<compile_context>
chip_gen: v7x
topology: tpu7x:2x2x1
jax: 0.10.0
libtpu: 0.0.40
codegen_flags: <defaults>
</compile_context>

<pallas_src>
import numpy as np
import jax
import jax.numpy as jnp
from jax.experimental import pallas as pl
from jax.experimental.pallas import tpu as pltpu

EPS = 1e-5


# ---------------------------------------------------------------------------
# The fused Pallas kernel — one grid step processes one batch tile of `nb` images
# ---------------------------------------------------------------------------
def _cnn_fused_kernel(l1_ref, t1_ref, sh1_ref, t2_ref, sh2_ref,
                      wfc1_ref, bfc1_ref, wfc2_ref, bfc2_ref,
                      wfc3_ref, bfc3_ref, wout_ref, bout_ref, o_ref):
    f32 = jnp.float32
    nb = o_ref.shape[0]                      # batch rows in this tile (multiple of 8)

    # ---- conv1: ONE K=512 matmul (5 kernel-H taps concatenated along K, BN scale
    #      pre-folded into t1).  Rows (di1, ki2, di2, ih2, n); cols (dj1, j1h, c1).
    a1 = jnp.dot(l1_ref[...], t1_ref[...], preferred_element_type=f32)   # (80*nb, 768)
    a1 = jnp.maximum(a1[:, :384], a1[:, 384:])             # 2x2 max-pool, W (dj1)
    a1 = jnp.maximum(a1[:40 * nb, :], a1[40 * nb:, :])     # 2x2 max-pool, H (di1)
    # shift + ReLU after the pool (exact: the BN scale is already inside the conv)
    h1 = jnp.maximum(a1 + sh1_ref[...], 0.0).astype(t2_ref.dtype)        # (40*nb, 384)

    # ---- conv2: accumulate the 5 kernel-H taps (rows (di2, ih2, n); cols (dj2, jh2, c2))
    blk = 8 * nb
    a2 = jnp.dot(h1[:blk, :], t2_ref[0], preferred_element_type=f32)
    for k in range(1, 5):
        a2 = a2 + jnp.dot(h1[k * blk:(k + 1) * blk, :], t2_ref[k],
                          preferred_element_type=f32)
    a2 = jnp.maximum(a2[:, :256], a2[:, 256:])              # pool W (dj2)
    a2 = jnp.maximum(a2[:4 * nb, :], a2[4 * nb:, :])        # pool H (di2)
    h2 = jnp.maximum(a2 + sh2_ref[...], 0.0).astype(wfc1_ref.dtype)      # (4*nb, 256)

    # ---- fc1 (torch flatten folded into 4 row-block partial weights over ih2)
    y = jnp.dot(h2[:nb, :], wfc1_ref[0], preferred_element_type=f32)
    for h in range(1, 4):
        y = y + jnp.dot(h2[h * nb:(h + 1) * nb, :], wfc1_ref[h],
                        preferred_element_type=f32)
    y = jnp.maximum(y + bfc1_ref[...], 0.0).astype(wfc2_ref.dtype)

    # ---- fc2 / fc3
    y = jnp.maximum(jnp.dot(y, wfc2_ref[...], preferred_element_type=f32)
                    + bfc2_ref[...], 0.0).astype(wfc3_ref.dtype)
    y = jnp.maximum(jnp.dot(y, wfc3_ref[...], preferred_element_type=f32)
                    + bfc3_ref[...], 0.0).astype(wout_ref.dtype)

    # ---- output layer + softmax (lanes 8..127 masked via a -1e30 bias)
    logits = jnp.dot(y, wout_ref[...], preferred_element_type=f32) + bout_ref[...]
    m = jnp.max(logits, axis=1, keepdims=True)
    e = jnp.exp(logits - m)
    # exact normalization: the approx EUP reciprocal was not accurate enough
    o_ref[...] = e / jnp.sum(e, axis=1, keepdims=True)


# ---------------------------------------------------------------------------
# Wrapper-side glue: build the batch-tiled conv1 input slabs
# ---------------------------------------------------------------------------
def _build_l1(x_nchw, np_batch, nb_tile):
    """(grid*80*nb, 512) conv1 input slabs.

    Per batch tile the rows are ordered (di1, ki2, di2, ih2, n_local); the lane
    axis packs the 5 kernel-H taps along K: col = ki1*84 + w*3 + ci (420 -> 512).
    Built from structured shifted H-slices + one constant single-axis take
    (no two-axis advanced-index gather).
    """
    n_in = x_nchw.shape[0]
    x = jnp.transpose(x_nchw, (0, 2, 3, 1)).astype(jnp.float32)      # NCHW -> NHWC
    x = jnp.pad(x, ((0, np_batch - n_in), (0, 0), (0, 0), (0, 0)))
    x = x.reshape(np_batch, 28, 28 * 3)                              # (n, h, w*3 + ci)
    # 5 H-shifted taps concatenated on the K axis (structured slices)
    xw = jnp.concatenate([x[:, k:k + 24, :] for k in range(5)], axis=2)   # (n, 24, 420)
    xw = jnp.pad(xw, ((0, 0), (0, 0), (0, 512 - 420)))                    # K: 420 -> 512
    # duplicate conv1 output rows per (di1, ki2, di2, ih2)
    di1, ki2, di2, ih2 = np.meshgrid(np.arange(2), np.arange(5), np.arange(2),
                                     np.arange(4), indexing="ij")
    h_out = (2 * (2 * ih2 + di2 + ki2) + di1).reshape(-1)            # (80,) in [0, 24)
    l1 = jnp.take(xw, jnp.asarray(h_out), axis=1)                    # (n, 80, 512)
    # per-tile, batch-innermost row order (keeps every in-kernel slice 8-aligned)
    g = np_batch // nb_tile
    l1 = l1.reshape(g, nb_tile, 80, 512).transpose(0, 2, 1, 3)
    return l1.reshape(g * 80 * nb_tile, 512)


def cnn_forward(x_nchw, kp, batch_tile=None):
    n_in = x_nchw.shape[0]
    n8 = max(8, ((n_in + 7) // 8) * 8)
    # Default tile keeps the per-tile VMEM footprint inside every generation's
    # default scoped limit.  TODO(synk): raise toward 64-128 rows per tile (with a
    # matching vmem_limit_bytes) for big batches to improve MXU row utilization.
    nb = batch_tile if batch_tile is not None else min(n8, 16)
    np_batch = ((n8 + nb - 1) // nb) * nb
    grid = (np_batch // nb,)

    l1 = _build_l1(x_nchw, np_batch, nb).astype(jnp.bfloat16)

    const2 = lambda shape: pl.BlockSpec(shape, lambda i: (0, 0))
    const3 = lambda shape: pl.BlockSpec(shape, lambda i: (0, 0, 0))

    out = pl.pallas_call(
        _cnn_fused_kernel,
        out_shape=jax.ShapeDtypeStruct((np_batch, 128), jnp.float32),
        grid=grid,
        in_specs=[
            pl.BlockSpec((80 * nb, 512), lambda i: (i, 0)),   # l1 (batch-tiled)
            const2((512, 768)),                               # t1   (conv1, BN scale folded)
            const2((1, 384)),                                 # sh1  (post-pool shift)
            const3((5, 384, 512)),                            # t2   (conv2, BN scale folded)
            const2((1, 256)),                                 # sh2
            const3((4, 256, 512)),                            # wfc1 (flatten folded)
            const2((1, 512)),                                 # bfc1
            const2((512, 256)),                               # wfc2
            const2((1, 256)),                                 # bfc2
            const2((256, 128)),                               # wfc3
            const2((1, 128)),                                 # bfc3
            const2((128, 128)),                               # wout (lane-padded)
            const2((1, 128)),                                 # bout (-1e30 mask lanes)
        ],
        out_specs=pl.BlockSpec((nb, 128), lambda i: (i, 0)),
        compiler_params=pltpu.CompilerParams(
            dimension_semantics=("parallel",),
            vmem_limit_bytes=(32 * 1024 * 1024 if nb > 8 else None)),
    )(l1, kp["t1"], kp["sh1"], kp["t2"], kp["sh2"],
      kp["wfc1"], kp["bfc1"], kp["wfc2"], kp["bfc2"],
      kp["wfc3"], kp["bfc3"], kp["wout"], kp["bout"])
    return out[:n_in, :8]


# ---------------------------------------------------------------------------
# Parameter packing: Toeplitz conv weights (BN scale folded), post-pool shifts,
# permuted fc1, lane-padded output layer
# ---------------------------------------------------------------------------
def pack_params(P):
    f32 = np.float32
    w1 = np.asarray(P["w1"], f32)                   # (32, 3, 5, 5)  OIHW
    w2 = np.asarray(P["w2"], f32)                   # (64, 32, 5, 5)

    # inference BatchNorm: y = (conv + b - mean) * s + beta, s = gamma / sqrt(var+eps)
    s1 = np.asarray(P["g1"], f32) / np.sqrt(np.asarray(P["v1"], f32) + EPS)
    sh1 = (np.asarray(P["be1"], f32) - np.asarray(P["m1"], f32) * s1
           + np.asarray(P["b1c"], f32) * s1)
    s2 = np.asarray(P["g2"], f32) / np.sqrt(np.asarray(P["v2"], f32) + EPS)
    sh2 = (np.asarray(P["be2"], f32) - np.asarray(P["m2"], f32) * s2
           + np.asarray(P["b2c"], f32) * s2)

    # conv1 block-Toeplitz: 5 kernel-H taps stacked on K (row = ki*84 + w*3 + ci,
    # padded 420 -> 512), BN scale folded per output channel:
    #   t1[ki*84 + w*3 + ci, dj1*384 + j1h*32 + c1] = w1[c1, ci, ki, w-(2*j1h+dj1)] * s1[c1]
    w1s = w1 * s1[:, None, None, None]
    t1 = np.zeros((512, 768), f32)
    for ki in range(5):
        for dj in range(2):
            for jh in range(12):
                for kj in range(5):
                    w = 2 * jh + dj + kj
                    c0 = dj * 384 + jh * 32
                    r0 = ki * 84 + w * 3
                    t1[r0:r0 + 3, c0:c0 + 32] = w1s[:, :, ki, kj].T

    # conv2 block-Toeplitz per kernel-H tap, BN scale folded:
    #   t2[ki][j1*32 + c1, dj2*256 + jh2*64 + c2] = w2[c2, c1, ki, j1-(2*jh2+dj2)] * s2[c2]
    w2s = w2 * s2[:, None, None, None]
    t2 = np.zeros((5, 384, 512), f32)
    for ki in range(5):
        for dj in range(2):
            for jh in range(4):
                for kj in range(5):
                    j1 = 2 * jh + dj + kj
                    c0 = dj * 256 + jh * 64
                    t2[ki, j1 * 32:(j1 + 1) * 32, c0:c0 + 64] = w2s[:, :, ki, kj].T

    # fc1: torch flatten index = c2*16 + h*4 + w  ->  blocks [h][w*64 + c2, f]
    wfc1 = np.asarray(P["wfc1"], f32).reshape(512, 64, 4, 4)          # (f, c, h, w)
    wfc1_p = np.transpose(wfc1, (2, 3, 1, 0)).reshape(4, 256, 512)    # (h, w*64+c, f)

    # output layer padded to 128 lanes; masked lanes carry a -1e30 bias
    wout_p = np.zeros((128, 128), f32)
    wout_p[:, :8] = np.asarray(P["wout"], f32).T
    bout_p = np.full((128,), -1e30, f32)
    bout_p[:8] = np.asarray(P["bout"], f32)

    bf16 = jnp.bfloat16
    return dict(
        t1=jnp.asarray(t1, bf16),
        sh1=jnp.asarray(np.tile(sh1, 12).reshape(1, 384), jnp.float32),
        t2=jnp.asarray(t2, bf16),
        sh2=jnp.asarray(np.tile(sh2, 4).reshape(1, 256), jnp.float32),
        wfc1=jnp.asarray(wfc1_p, bf16),
        bfc1=jnp.asarray(np.asarray(P["bfc1"], f32).reshape(1, 512), jnp.float32),
        wfc2=jnp.asarray(np.asarray(P["wfc2"], f32).T, bf16),
        bfc2=jnp.asarray(np.asarray(P["bfc2"], f32).reshape(1, 256), jnp.float32),
        wfc3=jnp.asarray(np.asarray(P["wfc3"], f32).T, bf16),
        bfc3=jnp.asarray(np.asarray(P["bfc3"], f32).reshape(1, 128), jnp.float32),
        wout=jnp.asarray(wout_p, bf16),
        bout=jnp.asarray(bout_p.reshape(1, 128), jnp.float32),
    )


# ---------------------------------------------------------------------------
# Canonical (PyTorch-layout) parameters + pure-JAX reference forward
# ---------------------------------------------------------------------------
def make_params(key):
    ks = jax.random.split(key, 20)

    def kn(k, shape, fan_in):
        return jax.random.normal(k, shape, jnp.float32) * np.sqrt(2.0 / fan_in)

    P = {}
    P["w1"] = kn(ks[0], (32, 3, 5, 5), 3 * 25)
    P["b1c"] = jnp.zeros((32,), jnp.float32)
    P["g1"] = 1.0 + 0.1 * jax.random.normal(ks[1], (32,), jnp.float32)
    P["be1"] = 0.1 * jax.random.normal(ks[2], (32,), jnp.float32)
    P["m1"] = 0.1 * jax.random.normal(ks[3], (32,), jnp.float32)
    P["v1"] = 1.0 + 0.05 * jax.random.uniform(ks[4], (32,), jnp.float32)
    P["w2"] = kn(ks[5], (64, 32, 5, 5), 32 * 25)
    P["b2c"] = jnp.zeros((64,), jnp.float32)
    P["g2"] = 1.0 + 0.1 * jax.random.normal(ks[6], (64,), jnp.float32)
    P["be2"] = 0.1 * jax.random.normal(ks[7], (64,), jnp.float32)
    P["m2"] = 0.1 * jax.random.normal(ks[8], (64,), jnp.float32)
    P["v2"] = 1.0 + 0.05 * jax.random.uniform(ks[9], (64,), jnp.float32)
    P["wfc1"] = kn(ks[10], (512, 1024), 1024)
    P["bfc1"] = 0.01 * jax.random.normal(ks[11], (512,), jnp.float32)
    P["wfc2"] = kn(ks[12], (256, 512), 512)
    P["bfc2"] = 0.01 * jax.random.normal(ks[13], (256,), jnp.float32)
    P["wfc3"] = kn(ks[14], (128, 256), 256)
    P["bfc3"] = 0.01 * jax.random.normal(ks[15], (128,), jnp.float32)
    P["wout"] = kn(ks[16], (8, 128), 128)
    P["bout"] = 0.01 * jax.random.normal(ks[17], (8,), jnp.float32)
    return P


def reference_forward(x, P):
    hp = jax.lax.Precision.HIGHEST

    def conv_bn_relu_pool(y, w, b, g, be, m, v):
        y = jax.lax.conv_general_dilated(y, w, (1, 1), "VALID",
                                         dimension_numbers=("NCHW", "OIHW", "NCHW"),
                                         precision=hp)
        y = y + b[None, :, None, None]
        s = g / jnp.sqrt(v + EPS)
        y = (y - m[None, :, None, None]) * s[None, :, None, None] + be[None, :, None, None]
        y = jnp.maximum(y, 0.0)
        return jax.lax.reduce_window(y, -jnp.inf, jax.lax.max,
                                     (1, 1, 2, 2), (1, 1, 2, 2), "VALID")

    y = conv_bn_relu_pool(x, P["w1"], P["b1c"], P["g1"], P["be1"], P["m1"], P["v1"])
    y = conv_bn_relu_pool(y, P["w2"], P["b2c"], P["g2"], P["be2"], P["m2"], P["v2"])
    y = y.reshape(y.shape[0], -1)                                    # (N, 1024) in (C,H,W)
    y = jnp.maximum(jnp.dot(y, P["wfc1"].T, precision=hp) + P["bfc1"], 0.0)
    y = jnp.maximum(jnp.dot(y, P["wfc2"].T, precision=hp) + P["bfc2"], 0.0)
    y = jnp.maximum(jnp.dot(y, P["wfc3"].T, precision=hp) + P["bfc3"], 0.0)
    logits = jnp.dot(y, P["wout"].T, precision=hp) + P["bout"]
    return jax.nn.softmax(logits, axis=1)


# ---------------------------------------------------------------------------
if __name__ == "__main__":
    key = jax.random.PRNGKey(0)
    k_x, k_p = jax.random.split(key)
    # spatial size 28 is what the module implies (64 * 4 * 4 flatten after 2x (5x5 conv + pool))
    x = jax.random.normal(k_x, (2, 3, 28, 28), jnp.float32)
    P = make_params(k_p)
    kp = pack_params(P)

    fwd = jax.jit(lambda xx: cnn_forward(xx, kp))
    out = jax.block_until_ready(fwd(x))

    assert out.shape == (2, 8)
    assert bool(jnp.all(jnp.isfinite(out)))
    assert bool(jnp.allclose(jnp.sum(out, axis=1), 1.0, atol=2e-3))

    ref = reference_forward(x, P)
    err = float(jnp.max(jnp.abs(out - ref)))
    assert err < 0.1, f"kernel/reference mismatch: max|dp| = {err}"

    print("KERNEL_OK")
</pallas_src>

<mosaic_0001>
module attributes {stable_mosaic.version = 11 : i64} {
  func.func @_cnn_fused_kernel(%arg0: i32, %arg1: memref<640x512xbf16, #tpu.memory_space<vmem>>, %arg2: memref<512x768xbf16, #tpu.memory_space<vmem>>, %arg3: memref<1x384xf32, #tpu.memory_space<vmem>>, %arg4: memref<5x384x512xbf16, #tpu.memory_space<vmem>>, %arg5: memref<1x256xf32, #tpu.memory_space<vmem>>, %arg6: memref<4x256x512xbf16, #tpu.memory_space<vmem>>, %arg7: memref<1x512xf32, #tpu.memory_space<vmem>>, %arg8: memref<512x256xbf16, #tpu.memory_space<vmem>>, %arg9: memref<1x256xf32, #tpu.memory_space<vmem>>, %arg10: memref<256x128xbf16, #tpu.memory_space<vmem>>, %arg11: memref<1x128xf32, #tpu.memory_space<vmem>>, %arg12: memref<128x128xbf16, #tpu.memory_space<vmem>>, %arg13: memref<1x128xf32, #tpu.memory_space<vmem>>, %arg14: memref<8x128xf32, #tpu.memory_space<vmem>>) attributes {dimension_semantics = [#tpu.dimension_semantics<parallel>], iteration_bounds = array<i64: 1>, scalar_prefetch = 0 : i64, scratch_operands = 0 : i64, tpu.core_type = #tpu.core_type<tc>, window_params = [{transform_indices = @transform_0, window_bounds = array<i64: 640, 512>}, {pipeline_mode = #tpu.pipeline_mode<synchronous>, transform_indices = @transform_1, window_bounds = array<i64: 512, 768>}, {pipeline_mode = #tpu.pipeline_mode<synchronous>, transform_indices = @transform_2, window_bounds = array<i64: 1, 384>}, {pipeline_mode = #tpu.pipeline_mode<synchronous>, transform_indices = @transform_3, window_bounds = array<i64: 5, 384, 512>}, {pipeline_mode = #tpu.pipeline_mode<synchronous>, transform_indices = @transform_4, window_bounds = array<i64: 1, 256>}, {pipeline_mode = #tpu.pipeline_mode<synchronous>, transform_indices = @transform_5, window_bounds = array<i64: 4, 256, 512>}, {pipeline_mode = #tpu.pipeline_mode<synchronous>, transform_indices = @transform_6, window_bounds = array<i64: 1, 512>}, {pipeline_mode = #tpu.pipeline_mode<synchronous>, transform_indices = @transform_7, window_bounds = array<i64: 512, 256>}, {pipeline_mode = #tpu.pipeline_mode<synchronous>, transform_indices = @transform_8, window_bounds = array<i64: 1, 256>}, {pipeline_mode = #tpu.pipeline_mode<synchronous>, transform_indices = @transform_9, window_bounds = array<i64: 256, 128>}, {pipeline_mode = #tpu.pipeline_mode<synchronous>, transform_indices = @transform_10, window_bounds = array<i64: 1, 128>}, {pipeline_mode = #tpu.pipeline_mode<synchronous>, transform_indices = @transform_11, window_bounds = array<i64: 128, 128>}, {pipeline_mode = #tpu.pipeline_mode<synchronous>, transform_indices = @transform_12, window_bounds = array<i64: 1, 128>}, {transform_indices = @transform_13, window_bounds = array<i64: 8, 128>}]} {
    %c0 = arith.constant 0 : index
    %c0_0 = arith.constant 0 : index
    %0 = vector.load %arg1[%c0, %c0_0] : memref<640x512xbf16, #tpu.memory_space<vmem>>, vector<640x512xbf16>
    %c0_1 = arith.constant 0 : index
    %c0_2 = arith.constant 0 : index
    %1 = vector.load %arg2[%c0_1, %c0_2] : memref<512x768xbf16, #tpu.memory_space<vmem>>, vector<512x768xbf16>
    %cst = arith.constant dense<0.000000e+00> : vector<640x768xf32>
    %2 = tpu.matmul %0, %1, %cst {dimension_numbers = #tpu.dot_dimension_numbers<[1], [0], [0], [1], [0, 0, 1, 1], [], []>} : vector<640x512xbf16>, vector<512x768xbf16>, vector<640x768xf32> -> vector<640x768xf32>
    %3 = vector.extract_strided_slice %2 {offsets = [0, 0], sizes = [640, 384], strides = [1, 1]} : vector<640x768xf32> to vector<640x384xf32>
    %4 = vector.extract_strided_slice %2 {offsets = [0, 384], sizes = [640, 384], strides = [1, 1]} : vector<640x768xf32> to vector<640x384xf32>
    %5 = arith.maximumf %3, %4 : vector<640x384xf32>
    %6 = vector.extract_strided_slice %5 {offsets = [0, 0], sizes = [320, 384], strides = [1, 1]} : vector<640x384xf32> to vector<320x384xf32>
    %7 = vector.extract_strided_slice %5 {offsets = [320, 0], sizes = [320, 384], strides = [1, 1]} : vector<640x384xf32> to vector<320x384xf32>
    %8 = arith.maximumf %6, %7 : vector<320x384xf32>
    %c0_3 = arith.constant 0 : index
    %c0_4 = arith.constant 0 : index
    %9 = vector.load %arg3[%c0_3, %c0_4] : memref<1x384xf32, #tpu.memory_space<vmem>>, vector<1x384xf32>
    %10 = vector.broadcast %9 : vector<1x384xf32> to vector<320x384xf32>
    %11 = arith.addf %8, %10 : vector<320x384xf32>
    %cst_5 = arith.constant 0.000000e+00 : f32
    %12 = vector.broadcast %cst_5 : f32 to vector<320x384xf32>
    %13 = arith.maximumf %11, %12 : vector<320x384xf32>
    %14 = arith.truncf %13 : vector<320x384xf32> to vector<320x384xbf16>
    %15 = vector.extract_strided_slice %14 {offsets = [0, 0], sizes = [64, 384], strides = [1, 1]} : vector<320x384xbf16> to vector<64x384xbf16>
    %c0_6 = arith.constant 0 : index
    %c0_7 = arith.constant 0 : index
    %c0_8 = arith.constant 0 : index
    %16 = vector.load %arg4[%c0_6, %c0_7, %c0_8] : memref<5x384x512xbf16, #tpu.memory_space<vmem>>, vector<1x384x512xbf16>
    %17 = vector.shape_cast %16 : vector<1x384x512xbf16> to vector<384x512xbf16>
    %cst_9 = arith.constant dense<0.000000e+00> : vector<64x512xf32>
    %18 = tpu.matmul %15, %17, %cst_9 {dimension_numbers = #tpu.dot_dimension_numbers<[1], [0], [0], [1], [0, 0, 1, 1], [], []>} : vector<64x384xbf16>, vector<384x512xbf16>, vector<64x512xf32> -> vector<64x512xf32>
    %19 = vector.extract_strided_slice %14 {offsets = [64, 0], sizes = [64, 384], strides = [1, 1]} : vector<320x384xbf16> to vector<64x384xbf16>
    %c1 = arith.constant 1 : index
    %c0_10 = arith.constant 0 : index
    %c0_11 = arith.constant 0 : index
    %20 = vector.load %arg4[%c1, %c0_10, %c0_11] : memref<5x384x512xbf16, #tpu.memory_space<vmem>>, vector<1x384x512xbf16>
    %21 = vector.shape_cast %20 : vector<1x384x512xbf16> to vector<384x512xbf16>
    %cst_12 = arith.constant dense<0.000000e+00> : vector<64x512xf32>
    %22 = tpu.matmul %19, %21, %cst_12 {dimension_numbers = #tpu.dot_dimension_numbers<[1], [0], [0], [1], [0, 0, 1, 1], [], []>} : vector<64x384xbf16>, vector<384x512xbf16>, vector<64x512xf32> -> vector<64x512xf32>
    %23 = arith.addf %18, %22 : vector<64x512xf32>
    %24 = vector.extract_strided_slice %14 {offsets = [128, 0], sizes = [64, 384], strides = [1, 1]} : vector<320x384xbf16> to vector<64x384xbf16>
    %c2 = arith.constant 2 : index
    %c0_13 = arith.constant 0 : index
    %c0_14 = arith.constant 0 : index
    %25 = vector.load %arg4[%c2, %c0_13, %c0_14] : memref<5x384x512xbf16, #tpu.memory_space<vmem>>, vector<1x384x512xbf16>
    %26 = vector.shape_cast %25 : vector<1x384x512xbf16> to vector<384x512xbf16>
    %cst_15 = arith.constant dense<0.000000e+00> : vector<64x512xf32>
    %27 = tpu.matmul %24, %26, %cst_15 {dimension_numbers = #tpu.dot_dimension_numbers<[1], [0], [0], [1], [0, 0, 1, 1], [], []>} : vector<64x384xbf16>, vector<384x512xbf16>, vector<64x512xf32> -> vector<64x512xf32>
    %28 = arith.addf %23, %27 : vector<64x512xf32>
    %29 = vector.extract_strided_slice %14 {offsets = [192, 0], sizes = [64, 384], strides = [1, 1]} : vector<320x384xbf16> to vector<64x384xbf16>
    %c3 = arith.constant 3 : index
    %c0_16 = arith.constant 0 : index
    %c0_17 = arith.constant 0 : index
    %30 = vector.load %arg4[%c3, %c0_16, %c0_17] : memref<5x384x512xbf16, #tpu.memory_space<vmem>>, vector<1x384x512xbf16>
    %31 = vector.shape_cast %30 : vector<1x384x512xbf16> to vector<384x512xbf16>
    %cst_18 = arith.constant dense<0.000000e+00> : vector<64x512xf32>
    %32 = tpu.matmul %29, %31, %cst_18 {dimension_numbers = #tpu.dot_dimension_numbers<[1], [0], [0], [1], [0, 0, 1, 1], [], []>} : vector<64x384xbf16>, vector<384x512xbf16>, vector<64x512xf32> -> vector<64x512xf32>
    %33 = arith.addf %28, %32 : vector<64x512xf32>
    %34 = vector.extract_strided_slice %14 {offsets = [256, 0], sizes = [64, 384], strides = [1, 1]} : vector<320x384xbf16> to vector<64x384xbf16>
    %c4 = arith.constant 4 : index
    %c0_19 = arith.constant 0 : index
    %c0_20 = arith.constant 0 : index
    %35 = vector.load %arg4[%c4, %c0_19, %c0_20] : memref<5x384x512xbf16, #tpu.memory_space<vmem>>, vector<1x384x512xbf16>
    %36 = vector.shape_cast %35 : vector<1x384x512xbf16> to vector<384x512xbf16>
    %cst_21 = arith.constant dense<0.000000e+00> : vector<64x512xf32>
    %37 = tpu.matmul %34, %36, %cst_21 {dimension_numbers = #tpu.dot_dimension_numbers<[1], [0], [0], [1], [0, 0, 1, 1], [], []>} : vector<64x384xbf16>, vector<384x512xbf16>, vector<64x512xf32> -> vector<64x512xf32>
    %38 = arith.addf %33, %37 : vector<64x512xf32>
    %39 = vector.extract_strided_slice %38 {offsets = [0, 0], sizes = [64, 256], strides = [1, 1]} : vector<64x512xf32> to vector<64x256xf32>
    %40 = vector.extract_strided_slice %38 {offsets = [0, 256], sizes = [64, 256], strides = [1, 1]} : vector<64x512xf32> to vector<64x256xf32>
    %41 = arith.maximumf %39, %40 : vector<64x256xf32>
    %42 = vector.extract_strided_slice %41 {offsets = [0, 0], sizes = [32, 256], strides = [1, 1]} : vector<64x256xf32> to vector<32x256xf32>
    %43 = vector.extract_strided_slice %41 {offsets = [32, 0], sizes = [32, 256], strides = [1, 1]} : vector<64x256xf32> to vector<32x256xf32>
    %44 = arith.maximumf %42, %43 : vector<32x256xf32>
    %c0_22 = arith.constant 0 : index
    %c0_23 = arith.constant 0 : index
    %45 = vector.load %arg5[%c0_22, %c0_23] : memref<1x256xf32, #tpu.memory_space<vmem>>, vector<1x256xf32>
    %46 = vector.broadcast %45 : vector<1x256xf32> to vector<32x256xf32>
    %47 = arith.addf %44, %46 : vector<32x256xf32>
    %cst_24 = arith.constant 0.000000e+00 : f32
    %48 = vector.broadcast %cst_24 : f32 to vector<32x256xf32>
    %49 = arith.maximumf %47, %48 : vector<32x256xf32>
    %50 = arith.truncf %49 : vector<32x256xf32> to vector<32x256xbf16>
    %51 = vector.extract_strided_slice %50 {offsets = [0, 0], sizes = [8, 256], strides = [1, 1]} : vector<32x256xbf16> to vector<8x256xbf16>
    %c0_25 = arith.constant 0 : index
    %c0_26 = arith.constant 0 : index
    %c0_27 = arith.constant 0 : index
    %52 = vector.load %arg6[%c0_25, %c0_26, %c0_27] : memref<4x256x512xbf16, #tpu.memory_space<vmem>>, vector<1x256x512xbf16>
    %53 = vector.shape_cast %52 : vector<1x256x512xbf16> to vector<256x512xbf16>
    %cst_28 = arith.constant dense<0.000000e+00> : vector<8x512xf32>
    %54 = tpu.matmul %51, %53, %cst_28 {dimension_numbers = #tpu.dot_dimension_numbers<[1], [0], [0], [1], [0, 0, 1, 1], [], []>} : vector<8x256xbf16>, vector<256x512xbf16>, vector<8x512xf32> -> vector<8x512xf32>
    %55 = vector.extract_strided_slice %50 {offsets = [8, 0], sizes = [8, 256], strides = [1, 1]} : vector<32x256xbf16> to vector<8x256xbf16>
    %c1_29 = arith.constant 1 : index
    %c0_30 = arith.constant 0 : index
    %c0_31 = arith.constant 0 : index
    %56 = vector.load %arg6[%c1_29, %c0_30, %c0_31] : memref<4x256x512xbf16, #tpu.memory_space<vmem>>, vector<1x256x512xbf16>
    %57 = vector.shape_cast %56 : vector<1x256x512xbf16> to vector<256x512xbf16>
    %cst_32 = arith.constant dense<0.000000e+00> : vector<8x512xf32>
    %58 = tpu.matmul %55, %57, %cst_32 {dimension_numbers = #tpu.dot_dimension_numbers<[1], [0], [0], [1], [0, 0, 1, 1], [], []>} : vector<8x256xbf16>, vector<256x512xbf16>, vector<8x512xf32> -> vector<8x512xf32>
    %59 = arith.addf %54, %58 : vector<8x512xf32>
    %60 = vector.extract_strided_slice %50 {offsets = [16, 0], sizes = [8, 256], strides = [1, 1]} : vector<32x256xbf16> to vector<8x256xbf16>
    %c2_33 = arith.constant 2 : index
    %c0_34 = arith.constant 0 : index
    %c0_35 = arith.constant 0 : index
    %61 = vector.load %arg6[%c2_33, %c0_34, %c0_35] : memref<4x256x512xbf16, #tpu.memory_space<vmem>>, vector<1x256x512xbf16>
    %62 = vector.shape_cast %61 : vector<1x256x512xbf16> to vector<256x512xbf16>
    %cst_36 = arith.constant dense<0.000000e+00> : vector<8x512xf32>
    %63 = tpu.matmul %60, %62, %cst_36 {dimension_numbers = #tpu.dot_dimension_numbers<[1], [0], [0], [1], [0, 0, 1, 1], [], []>} : vector<8x256xbf16>, vector<256x512xbf16>, vector<8x512xf32> -> vector<8x512xf32>
    %64 = arith.addf %59, %63 : vector<8x512xf32>
    %65 = vector.extract_strided_slice %50 {offsets = [24, 0], sizes = [8, 256], strides = [1, 1]} : vector<32x256xbf16> to vector<8x256xbf16>
    %c3_37 = arith.constant 3 : index
    %c0_38 = arith.constant 0 : index
    %c0_39 = arith.constant 0 : index
    %66 = vector.load %arg6[%c3_37, %c0_38, %c0_39] : memref<4x256x512xbf16, #tpu.memory_space<vmem>>, vector<1x256x512xbf16>
    %67 = vector.shape_cast %66 : vector<1x256x512xbf16> to vector<256x512xbf16>
    %cst_40 = arith.constant dense<0.000000e+00> : vector<8x512xf32>
    %68 = tpu.matmul %65, %67, %cst_40 {dimension_numbers = #tpu.dot_dimension_numbers<[1], [0], [0], [1], [0, 0, 1, 1], [], []>} : vector<8x256xbf16>, vector<256x512xbf16>, vector<8x512xf32> -> vector<8x512xf32>
    %69 = arith.addf %64, %68 : vector<8x512xf32>
    %c0_41 = arith.constant 0 : index
    %c0_42 = arith.constant 0 : index
    %70 = vector.load %arg7[%c0_41, %c0_42] : memref<1x512xf32, #tpu.memory_space<vmem>>, vector<1x512xf32>
    %71 = vector.broadcast %70 : vector<1x512xf32> to vector<8x512xf32>
    %72 = arith.addf %69, %71 : vector<8x512xf32>
    %cst_43 = arith.constant 0.000000e+00 : f32
    %73 = vector.broadcast %cst_43 : f32 to vector<8x512xf32>
    %74 = arith.maximumf %72, %73 : vector<8x512xf32>
    %75 = arith.truncf %74 : vector<8x512xf32> to vector<8x512xbf16>
    %c0_44 = arith.constant 0 : index
    %c0_45 = arith.constant 0 : index
    %76 = vector.load %arg8[%c0_44, %c0_45] : memref<512x256xbf16, #tpu.memory_space<vmem>>, vector<512x256xbf16>
    %cst_46 = arith.constant dense<0.000000e+00> : vector<8x256xf32>
    %77 = tpu.matmul %75, %76, %cst_46 {dimension_numbers = #tpu.dot_dimension_numbers<[1], [0], [0], [1], [0, 0, 1, 1], [], []>} : vector<8x512xbf16>, vector<512x256xbf16>, vector<8x256xf32> -> vector<8x256xf32>
    %c0_47 = arith.constant 0 : index
    %c0_48 = arith.constant 0 : index
    %78 = vector.load %arg9[%c0_47, %c0_48] : memref<1x256xf32, #tpu.memory_space<vmem>>, vector<1x256xf32>
    %79 = vector.broadcast %78 : vector<1x256xf32> to vector<8x256xf32>
    %80 = arith.addf %77, %79 : vector<8x256xf32>
    %cst_49 = arith.constant 0.000000e+00 : f32
    %81 = vector.broadcast %cst_49 : f32 to vector<8x256xf32>
    %82 = arith.maximumf %80, %81 : vector<8x256xf32>
    %83 = arith.truncf %82 : vector<8x256xf32> to vector<8x256xbf16>
    %c0_50 = arith.constant 0 : index
    %c0_51 = arith.constant 0 : index
    %84 = vector.load %arg10[%c0_50, %c0_51] : memref<256x128xbf16, #tpu.memory_space<vmem>>, vector<256x128xbf16>
    %cst_52 = arith.constant dense<0.000000e+00> : vector<8x128xf32>
    %85 = tpu.matmul %83, %84, %cst_52 {dimension_numbers = #tpu.dot_dimension_numbers<[1], [0], [0], [1], [0, 0, 1, 1], [], []>} : vector<8x256xbf16>, vector<256x128xbf16>, vector<8x128xf32> -> vector<8x128xf32>
    %c0_53 = arith.constant 0 : index
    %c0_54 = arith.constant 0 : index
    %86 = vector.load %arg11[%c0_53, %c0_54] : memref<1x128xf32, #tpu.memory_space<vmem>>, vector<1x128xf32>
    %87 = vector.broadcast %86 : vector<1x128xf32> to vector<8x128xf32>
    %88 = arith.addf %85, %87 : vector<8x128xf32>
    %cst_55 = arith.constant 0.000000e+00 : f32
    %89 = vector.broadcast %cst_55 : f32 to vector<8x128xf32>
    %90 = arith.maximumf %88, %89 : vector<8x128xf32>
    %91 = arith.truncf %90 : vector<8x128xf32> to vector<8x128xbf16>
    %c0_56 = arith.constant 0 : index
    %c0_57 = arith.constant 0 : index
    %92 = vector.load %arg12[%c0_56, %c0_57] : memref<128x128xbf16, #tpu.memory_space<vmem>>, vector<128x128xbf16>
    %cst_58 = arith.constant dense<0.000000e+00> : vector<8x128xf32>
    %93 = tpu.matmul %91, %92, %cst_58 {dimension_numbers = #tpu.dot_dimension_numbers<[1], [0], [0], [1], [0, 0, 1, 1], [], []>} : vector<8x128xbf16>, vector<128x128xbf16>, vector<8x128xf32> -> vector<8x128xf32>
    %c0_59 = arith.constant 0 : index
    %c0_60 = arith.constant 0 : index
    %94 = vector.load %arg13[%c0_59, %c0_60] : memref<1x128xf32, #tpu.memory_space<vmem>>, vector<1x128xf32>
    %95 = vector.broadcast %94 : vector<1x128xf32> to vector<8x128xf32>
    %96 = arith.addf %93, %95 : vector<8x128xf32>
    %cst_61 = arith.constant dense<0xFF800000> : vector<8xf32>
    %97 = vector.multi_reduction <maximumf>, %96, %cst_61 [1] : vector<8x128xf32> to vector<8xf32>
    %98 = vector.shape_cast %97 : vector<8xf32> to vector<8x1xf32>
    %99 = vector.broadcast %98 : vector<8x1xf32> to vector<8x128xf32>
    %100 = arith.subf %96, %99 : vector<8x128xf32>
    %101 = math.exp %100 : vector<8x128xf32>
    %cst_62 = arith.constant dense<0.000000e+00> : vector<8xf32>
    %102 = vector.multi_reduction <add>, %101, %cst_62 [1] : vector<8x128xf32> to vector<8xf32>
    %103 = vector.shape_cast %102 : vector<8xf32> to vector<8x1xf32>
    %104 = vector.broadcast %103 : vector<8x1xf32> to vector<8x128xf32>
    %105 = arith.divf %101, %104 : vector<8x128xf32>
    %c0_63 = arith.constant 0 : index
    %c0_64 = arith.constant 0 : index
    %106 = vector.load %arg14[%c0_63, %c0_64] : memref<8x128xf32, #tpu.memory_space<vmem>>, vector<8x128xf32>
    tpu.vector_store %arg14[%c0_63, %c0_64], %105 {strides = array<i32>} : memref<8x128xf32, #tpu.memory_space<vmem>>, vector<8x128xf32>,
    return
  }
  func.func @transform_0(%arg0: i32) -> (i32, i32) {
    %c0_i32 = arith.constant 0 : i32
    %c0_i32_0 = arith.constant 0 : i32
    return %arg0, %c0_i32 : i32, i32
  }
  func.func @transform_1(%arg0: i32) -> (i32, i32) {
    %c0_i32 = arith.constant 0 : i32
    %c0_i32_0 = arith.constant 0 : i32
    %c0_i32_1 = arith.constant 0 : i32
    return %c0_i32, %c0_i32_0 : i32, i32
  }
  func.func @transform_2(%arg0: i32) -> (i32, i32) {
    %c0_i32 = arith.constant 0 : i32
    %c0_i32_0 = arith.constant 0 : i32
    %c0_i32_1 = arith.constant 0 : i32
    return %c0_i32, %c0_i32_0 : i32, i32
  }
  func.func @transform_3(%arg0: i32) -> (i32, i32, i32) {
    %c0_i32 = arith.constant 0 : i32
    %c0_i32_0 = arith.constant 0 : i32
    %c0_i32_1 = arith.constant 0 : i32
    %c0_i32_2 = arith.constant 0 : i32
    return %c0_i32, %c0_i32_0, %c0_i32_1 : i32, i32, i32
  }
  func.func @transform_4(%arg0: i32) -> (i32, i32) {
    %c0_i32 = arith.constant 0 : i32
    %c0_i32_0 = arith.constant 0 : i32
    %c0_i32_1 = arith.constant 0 : i32
    return %c0_i32, %c0_i32_0 : i32, i32
  }
  func.func @transform_5(%arg0: i32) -> (i32, i32, i32) {
    %c0_i32 = arith.constant 0 : i32
    %c0_i32_0 = arith.constant 0 : i32
    %c0_i32_1 = arith.constant 0 : i32
    %c0_i32_2 = arith.constant 0 : i32
    return %c0_i32, %c0_i32_0, %c0_i32_1 : i32, i32, i32
  }
  func.func @transform_6(%arg0: i32) -> (i32, i32) {
    %c0_i32 = arith.constant 0 : i32
    %c0_i32_0 = arith.constant 0 : i32
    %c0_i32_1 = arith.constant 0 : i32
    return %c0_i32, %c0_i32_0 : i32, i32
  }
  func.func @transform_7(%arg0: i32) -> (i32, i32) {
    %c0_i32 = arith.constant 0 : i32
    %c0_i32_0 = arith.constant 0 : i32
    %c0_i32_1 = arith.constant 0 : i32
    return %c0_i32, %c0_i32_0 : i32, i32
  }
  func.func @transform_8(%arg0: i32) -> (i32, i32) {
    %c0_i32 = arith.constant 0 : i32
    %c0_i32_0 = arith.constant 0 : i32
    %c0_i32_1 = arith.constant 0 : i32
    return %c0_i32, %c0_i32_0 : i32, i32
  }
  func.func @transform_9(%arg0: i32) -> (i32, i32) {
    %c0_i32 = arith.constant 0 : i32
    %c0_i32_0 = arith.constant 0 : i32
    %c0_i32_1 = arith.constant 0 : i32
    return %c0_i32, %c0_i32_0 : i32, i32
  }
  func.func @transform_10(%arg0: i32) -> (i32, i32) {
    %c0_i32 = arith.constant 0 : i32
    %c0_i32_0 = arith.constant 0 : i32
    %c0_i32_1 = arith.constant 0 : i32
    return %c0_i32, %c0_i32_0 : i32, i32
  }
  func.func @transform_11(%arg0: i32) -> (i32, i32) {
    %c0_i32 = arith.constant 0 : i32
    %c0_i32_0 = arith.constant 0 : i32
    %c0_i32_1 = arith.constant 0 : i32
    return %c0_i32, %c0_i32_0 : i32, i32
  }
  func.func @transform_12(%arg0: i32) -> (i32, i32) {
    %c0_i32 = arith.constant 0 : i32
    %c0_i32_0 = arith.constant 0 : i32
    %c0_i32_1 = arith.constant 0 : i32
    return %c0_i32, %c0_i32_0 : i32, i32
  }
  func.func @transform_13(%arg0: i32) -> (i32, i32) {
    %c0_i32 = arith.constant 0 : i32
    %c0_i32_0 = arith.constant 0 : i32
    return %arg0, %c0_i32 : i32, i32
  }
}

</mosaic_0001>

<bundles_post_ra>
// kernel: _lambda_.1
= control target key start
LH: loop header
LB: loop body
LE: loop exit
PB: predicated region body
PF: predicated region fallthrough
CT: control target
= control target key end

     0   :  { %vm17134_vm0 = vmmov 0   ;;  %s23059_s1 = inlined_call_operand.vmem [shape: bf16[512,768], index: 1, kind: input, shape index: {}]   ;;  %s23060_s0 = inlined_call_operand.vmem [shape: bf16[640,512], index: 0, kind: input, shape index: {}]   ;;  %s23061_s2 = inlined_call_operand.vmem [shape: f32[1,384], index: 2, kind: input, shape index: {}]   ;;  %s23062_s3 = inlined_call_operand.vmem [shape: bf16[5,384,512], index: 3, kind: input, shape index: {}]   ;;  %s23063_s5 = inlined_call_operand.vmem [shape: bf16[4,256,512], index: 5, kind: input, shape index: {}]   ;;  %s23064_s4 = inlined_call_operand.vmem [shape: f32[1,256], index: 4, kind: input, shape index: {}]   ;;  %s23065_s7 = inlined_call_operand.vmem [shape: bf16[512,256], index: 7, kind: input, shape index: {}]   ;;  %s23066_s6 = inlined_call_operand.vmem [shape: f32[1,512], index: 6, kind: input, shape index: {}]   ;;  %s23067_s9 = inlined_call_operand.vmem [shape: bf16[256,128], index: 9, kind: input, shape index: {}]   ;;  %s23068_s11 = inlined_call_operand.vmem [shape: bf16[128,128], index: 11, kind: input, shape index: {}]   ;;  %s23069_s8 = inlined_call_operand.vmem [shape: f32[1,256], index: 8, kind: input, shape index: {}]   ;;  %s23070_s10 = inlined_call_operand.vmem [shape: f32[1,128], index: 10, kind: input, shape index: {}]   ;;  %s23071_s12 = inlined_call_operand.vmem [shape: f32[1,128], index: 12, kind: input, shape index: {}]   ;;  %s23072_s13 = inlined_call_operand.vmem [shape: f32[8,128], index: 13, kind: output, shape index: {}]  }
   0x1   :  { %v15215_v0 = vld [vmem:[%s23059_s1 + $0x4] ss:$24 sps:$4 sm:$0xff]   ;;  %v15219_v2 = vld [vmem:[%s23059_s1] ss:$24 sps:$4 sm:$0xff]   ;;  %v15221_v4 = vld [vmem:[%s23059_s1 + $0x34] ss:$24 sps:$4 sm:$0xff]  }
   0x2   :  { %v15217_v1 = vld [vmem:[%s23059_s1 + $0xc] ss:$24 sps:$4 sm:$0xff]   ;;  %2157 = vmatprep.subr.bf16.mxu0 %v15215_v0  ;;  %v15220_v3 = vld [vmem:[%s23059_s1 + $0x8] ss:$24 sps:$4 sm:$0xff]   ;;  %v15223_v5 = vld [vmem:[%s23059_s1 + $0x3c] ss:$24 sps:$4 sm:$0xff]  }
   0x3   :  { %3023 = vmatprep.subr.bf16.mxu1 %v15217_v1  ;;  %2158 = vmatpush1.bf16.msra.mxu0 %v15219_v2  ;;  %v15225_v6 = vld [vmem:[%s23059_s1 + $0x30] ss:$24 sps:$4 sm:$0xff]   ;;  %v15227_v8 = vld [vmem:[%s23059_s1 + $0x64] ss:$24 sps:$4 sm:$0xff]   ;;  %v15231_v10 = vld [vmem:[%s23059_s1 + $0x60] ss:$24 sps:$4 sm:$0xff]  }
   0x4   :  { %3024 = vmatpush1.bf16.msra.mxu1 %v15220_v3  ;;  %2159 = vmatprep.subr.bf16.mxu0 %v15221_v4  ;;  %v15226_v7 = vld [vmem:[%s23059_s1 + $0x38] ss:$24 sps:$4 sm:$0xff]   ;;  %v15229_v9 = vld [vmem:[%s23059_s1 + $0x6c] ss:$24 sps:$4 sm:$0xff]   ;;  %v15232_v11 = vld [vmem:[%s23059_s1 + $0x68] ss:$24 sps:$4 sm:$0xff]  }
   0x5   :  { %3025 = vmatprep.subr.bf16.mxu1 %v15223_v5  ;;  %v15233_v12 = vld [vmem:[%s23059_s1 + $0x94] ss:$24 sps:$4 sm:$0xff]   ;;  %v15237_v14 = vld [vmem:[%s23059_s1 + $0x90] ss:$24 sps:$4 sm:$0xff]   ;;  %v15239_v16 = vld [vmem:[%s23059_s1 + $0xc4] ss:$24 sps:$4 sm:$0xff]  }
   0x6   :  { %v15235_v13 = vld [vmem:[%s23059_s1 + $0x9c] ss:$24 sps:$4 sm:$0xff]   ;;  %v15238_v15 = vld [vmem:[%s23059_s1 + $0x98] ss:$24 sps:$4 sm:$0xff]   ;;  %v15241_v17 = vld [vmem:[%s23059_s1 + $0xcc] ss:$24 sps:$4 sm:$0xff]  }
   0x7   :  { %2160 = vmatpush1.bf16.msra.mxu0 %v15225_v6  ;;  %v15243_v18 = vld [vmem:[%s23059_s1 + $0xc0] ss:$24 sps:$4 sm:$0xff]   ;;  %v15245_v20 = vld [vmem:[%s23059_s1 + $0xf4] ss:$24 sps:$4 sm:$0xff]   ;;  %v15249_v22 = vld [vmem:[%s23059_s1 + $0xf0] ss:$24 sps:$4 sm:$0xff]  }
   0x8   :  { %3026 = vmatpush1.bf16.msra.mxu1 %v15226_v7  ;;  %2161 = vmatprep.subr.bf16.mxu0 %v15227_v8  ;;  %v15244_v19 = vld [vmem:[%s23059_s1 + $0xc8] ss:$24 sps:$4 sm:$0xff]   ;;  %v15247_v21 = vld [vmem:[%s23059_s1 + $0xfc] ss:$24 sps:$4 sm:$0xff]   ;;  %v15250_v23 = vld [vmem:[%s23059_s1 + $0xf8] ss:$24 sps:$4 sm:$0xff]  }
   0x9   :  { %3027 = vmatprep.subr.bf16.mxu1 %v15229_v9  ;;  %v15251_v24 = vld [vmem:[%s23059_s1 + $0x124] ss:$24 sps:$4 sm:$0xff]   ;;  %v15255_v26 = vld [vmem:[%s23059_s1 + $0x120] ss:$24 sps:$4 sm:$0xff]   ;;  %v15257_v28 = vld [vmem:[%s23059_s1 + $0x154] ss:$24 sps:$4 sm:$0xff]  }
   0xa   :  { %v15253_v25 = vld [vmem:[%s23059_s1 + $0x12c] ss:$24 sps:$4 sm:$0xff]   ;;  %v15256_v27 = vld [vmem:[%s23059_s1 + $0x128] ss:$24 sps:$4 sm:$0xff]   ;;  %v15259_v29 = vld [vmem:[%s23059_s1 + $0x15c] ss:$24 sps:$4 sm:$0xff]  }
   0xb   :  { %2162 = vmatpush1.bf16.msra.mxu0 %v15231_v10  ;;  %v15261_v30 = vld [vmem:[%s23059_s1 + $0x150] ss:$24 sps:$4 sm:$0xff]   ;;  %v15263_v32 = vld [vmem:[%s23059_s1 + $0x184] ss:$24 sps:$4 sm:$0xff]   ;;  %v15267_v34 = vld [vmem:[%s23059_s1 + $0x180] ss:$24 sps:$4 sm:$0xff]  }
   0xc   :  { %3028 = vmatpush1.bf16.msra.mxu1 %v15232_v11  ;;  %2163 = vmatprep.subr.bf16.mxu0 %v15233_v12  ;;  %v15262_v31 = vld [vmem:[%s23059_s1 + $0x158] ss:$24 sps:$4 sm:$0xff]   ;;  %v15265_v33 = vld [vmem:[%s23059_s1 + $0x18c] ss:$24 sps:$4 sm:$0xff]   ;;  %v15268_v35 = vld [vmem:[%s23059_s1 + $0x188] ss:$24 sps:$4 sm:$0xff]  }
   0xd   :  { %3029 = vmatprep.subr.bf16.mxu1 %v15235_v13  ;;  %v15269_v36 = vld [vmem:[%s23059_s1 + $0x1b4] ss:$24 sps:$4 sm:$0xff]   ;;  %v15273_v38 = vld [vmem:[%s23059_s1 + $0x1b0] ss:$24 sps:$4 sm:$0xff]   ;;  %v15275_v40 = vld [vmem:[%s23059_s1 + $0x1e4] ss:$24 sps:$4 sm:$0xff]  }
   0xe   :  { %v15271_v37 = vld [vmem:[%s23059_s1 + $0x1bc] ss:$24 sps:$4 sm:$0xff]   ;;  %v15274_v39 = vld [vmem:[%s23059_s1 + $0x1b8] ss:$24 sps:$4 sm:$0xff]   ;;  %v15277_v41 = vld [vmem:[%s23059_s1 + $0x1ec] ss:$24 sps:$4 sm:$0xff]  }
   0xf   :  { %2164 = vmatpush1.bf16.msra.mxu0 %v15237_v14  ;;  %v15279_v42 = vld [vmem:[%s23059_s1 + $0x1e0] ss:$24 sps:$4 sm:$0xff]   ;;  %v15281_v44 = vld [vmem:[%s23059_s1 + $0x214] ss:$24 sps:$4 sm:$0xff]   ;;  %v15285_v46 = vld [vmem:[%s23059_s1 + $0x210] ss:$24 sps:$4 sm:$0xff]  }
  0x10   :  { %3030 = vmatpush1.bf16.msra.mxu1 %v15238_v15  ;;  %2165 = vmatprep.subr.bf16.mxu0 %v15239_v16  ;;  %v15280_v43 = vld [vmem:[%s23059_s1 + $0x1e8] ss:$24 sps:$4 sm:$0xff]   ;;  %v15283_v45 = vld [vmem:[%s23059_s1 + $0x21c] ss:$24 sps:$4 sm:$0xff]   ;;  %v15286_v47 = vld [vmem:[%s23059_s1 + $0x218] ss:$24 sps:$4 sm:$0xff]  }
  0x11   :  { %3031 = vmatprep.subr.bf16.mxu1 %v15241_v17  ;;  %v15311_v48 = vld [vmem:[%s23060_s0 + $0x4] ss:$16 sps:$4 sm:$0xff]   ;;  %v15291_v51 = vld [vmem:[%s23059_s1 + $0x240] ss:$24 sps:$4 sm:$0xff]   ;;  %v15297_v55 = vld [vmem:[%s23059_s1 + $0x270] ss:$24 sps:$4 sm:$0xff]  }
  0x12   :  { %v15287_v49 = vld [vmem:[%s23059_s1 + $0x244] ss:$24 sps:$4 sm:$0xff]   ;;  %2189 = vmatprep.mubr.bf16.mxu0 %v15311_v48  ;;  %3055 = vmatprep.mubr.bf16.mxu1 %v15311_v48  ;;  %v15292_v52 = vld [vmem:[%s23059_s1 + $0x248] ss:$24 sps:$4 sm:$0xff]   ;;  %v15293_v53 = vld [vmem:[%s23059_s1 + $0x274] ss:$24 sps:$4 sm:$0xff]  }
  0x13   :  { %2166 = vmatpush1.bf16.msra.mxu0 %v15243_v18  ;;  %v15289_v50 = vld [vmem:[%s23059_s1 + $0x24c] ss:$24 sps:$4 sm:$0xff]   ;;  %v15295_v54 = vld [vmem:[%s23059_s1 + $0x27c] ss:$24 sps:$4 sm:$0xff]   ;;  %v15298_v56 = vld [vmem:[%s23059_s1 + $0x278] ss:$24 sps:$4 sm:$0xff]  }
  0x14   :  { %3032 = vmatpush1.bf16.msra.mxu1 %v15244_v19  ;;  %2167 = vmatprep.subr.bf16.mxu0 %v15245_v20  ;;  %v15299_v57 = vld [vmem:[%s23059_s1 + $0x2a4] ss:$24 sps:$4 sm:$0xff]   ;;  %v15303_v59 = vld [vmem:[%s23059_s1 + $0x2a0] ss:$24 sps:$4 sm:$0xff]   ;;  %v15305_v61 = vld [vmem:[%s23059_s1 + $0x2d4] ss:$24 sps:$4 sm:$0xff]  }
  0x15   :  { %3033 = vmatprep.subr.bf16.mxu1 %v15247_v21  ;;  %v15301_v58 = vld [vmem:[%s23059_s1 + $0x2ac] ss:$24 sps:$4 sm:$0xff]   ;;  %v15304_v60 = vld [vmem:[%s23059_s1 + $0x2a8] ss:$24 sps:$4 sm:$0xff]   ;;  %v15307_v62 = vld [vmem:[%s23059_s1 + $0x2dc] ss:$24 sps:$4 sm:$0xff]  }
  0x16   :  { %v15309_v63 = vld [vmem:[%s23059_s1 + $0x2d0] ss:$24 sps:$4 sm:$0xff]   ;;  %v15316_v1 = vld [vmem:[%s23059_s1 + $0x304] ss:$24 sps:$4 sm:$0xff]   ;;  %v15314_v3 = vld [vmem:[%s23059_s1 + $0x300] ss:$24 sps:$4 sm:$0xff]  }
  0x17   :  { %2168 = vmatpush1.bf16.msra.mxu0 %v15249_v22  ;;  %v15310_v0 = vld [vmem:[%s23059_s1 + $0x2d8] ss:$24 sps:$4 sm:$0xff]   ;;  %v15317_v4 = vld [vmem:[%s23060_s0 + $0x24] ss:$16 sps:$4 sm:$0xff]  }
  0x18   :  { %3034 = vmatpush1.bf16.msra.mxu1 %v15250_v23  ;;  %2169 = vmatprep.subr.bf16.mxu0 %v15251_v24  ;;  %v15313_v2 = vld [vmem:[%s23060_s0] ss:$16 sps:$4 sm:$0xff]   ;;  %v15325_v5 = vld [vmem:[%s23059_s1 + $0x334] ss:$24 sps:$4 sm:$0xff]   ;;  %v15337_v7 = vld [vmem:[%s23059_s1 + $0x364] ss:$24 sps:$4 sm:$0xff]  }
  0x19   :  { %3035 = vmatprep.subr.bf16.mxu1 %v15253_v25  ;;  %v15323_v6 = vld [vmem:[%s23059_s1 + $0x330] ss:$24 sps:$4 sm:$0xff]   ;;  %v15320_v9 = vld [vmem:[%s23060_s0 + $0x44] ss:$16 sps:$4 sm:$0xff]   ;;  %v15335_v10 = vld [vmem:[%s23059_s1 + $0x360] ss:$24 sps:$4 sm:$0xff]  }
  0x1a   :  { %v15319_v8 = vld [vmem:[%s23060_s0 + $0x20] ss:$16 sps:$4 sm:$0xff]   ;;  %v15346_v11 = vld [vmem:[%s23059_s1 + $0x394] ss:$24 sps:$4 sm:$0xff]   ;;  %v15358_v15 = vld [vmem:[%s23059_s1 + $0x3c4] ss:$24 sps:$4 sm:$0xff]  }
  0x1b   :  { %2170 = vmatpush1.bf16.msra.mxu0 %v15255_v26  ;;  %v15322_v12 = vld [vmem:[%s23060_s0 + $0x40] ss:$16 sps:$4 sm:$0xff]   ;;  %v15326_v14 = vld [vmem:[%s23060_s0 + $0x64] ss:$16 sps:$4 sm:$0xff]  }
  0x1c   :  { %3036 = vmatpush1.bf16.msra.mxu1 %v15256_v27  ;;  %2171 = vmatprep.subr.bf16.mxu0 %v15257_v28  ;;  %v15344_v13 = vld [vmem:[%s23059_s1 + $0x390] ss:$24 sps:$4 sm:$0xff]   ;;  %v15356_v16 = vld [vmem:[%s23059_s1 + $0x3c0] ss:$24 sps:$4 sm:$0xff]   ;;  %v15367_v17 = vld [vmem:[%s23059_s1 + $0x3f4] ss:$24 sps:$4 sm:$0xff]  }
  0x1d   :  { %3037 = vmatprep.subr.bf16.mxu1 %v15259_v29  ;;  %v15365_v18 = vld [vmem:[%s23059_s1 + $0x3f0] ss:$24 sps:$4 sm:$0xff]   ;;  %v15379_v19 = vld [vmem:[%s23059_s1 + $0x424] ss:$24 sps:$4 sm:$0xff]   ;;  %v15377_v22 = vld [vmem:[%s23059_s1 + $0x420] ss:$24 sps:$4 sm:$0xff]  }
  0x1e   :  { %v15328_v20 = vld [vmem:[%s23060_s0 + $0x60] ss:$16 sps:$4 sm:$0xff]   ;;  %v15329_v21 = vld [vmem:[%s23060_s0 + $0x84] ss:$16 sps:$4 sm:$0xff]  }
  0x1f   :  { %2172 = vmatpush1.bf16.msra.mxu0 %v15261_v30  ;;  %v15388_v23 = vld [vmem:[%s23059_s1 + $0x454] ss:$24 sps:$4 sm:$0xff]   ;;  %v15386_v24 = vld [vmem:[%s23059_s1 + $0x450] ss:$24 sps:$4 sm:$0xff]   ;;  %v15398_v27 = vld [vmem:[%s23059_s1 + $0x480] ss:$24 sps:$4 sm:$0xff]  }
  0x20   :  { %3038 = vmatpush1.bf16.msra.mxu1 %v15262_v31  ;;  %2173 = vmatprep.subr.bf16.mxu0 %v15263_v32  ;;  %v15331_v25 = vld [vmem:[%s23060_s0 + $0x80] ss:$16 sps:$4 sm:$0xff]   ;;  %v15332_v26 = vld [vmem:[%s23060_s0 + $0xa4] ss:$16 sps:$4 sm:$0xff]  }
  0x21   :  { %3039 = vmatprep.subr.bf16.mxu1 %v15265_v33  ;;  %v15400_v28 = vld [vmem:[%s23059_s1 + $0x484] ss:$24 sps:$4 sm:$0xff]   ;;  %v15334_v29 = vld [vmem:[%s23060_s0 + $0xa0] ss:$16 sps:$4 sm:$0xff]   ;;  %v15430_v48 = vld [vmem:[%s23059_s1 + $0x514] ss:$24 sps:$4 sm:$0xff]  }
  0x22   :  { %v15338_v30 = vld [vmem:[%s23060_s0 + $0xc4] ss:$16 sps:$4 sm:$0xff]   ;;  %v15340_v31 = vld [vmem:[%s23060_s0 + $0xc0] ss:$16 sps:$4 sm:$0xff]  }
  0x23   :  { %2174 = vmatpush1.bf16.msra.mxu0 %v15267_v34  ;;  %v15341_v32 = vld [vmem:[%s23060_s0 + $0xe4] ss:$16 sps:$4 sm:$0xff]   ;;  %v15407_v33 = vld [vmem:[%s23059_s1 + $0x4b0] ss:$24 sps:$4 sm:$0xff]  }
  0x24   :  { %3040 = vmatpush1.bf16.msra.mxu1 %v15268_v35  ;;  %2175 = vmatprep.subr.bf16.mxu0 %v15269_v36  ;;  %v15409_v34 = vld [vmem:[%s23059_s1 + $0x4b4] ss:$24 sps:$4 sm:$0xff]   ;;  %v15343_v35 = vld [vmem:[%s23060_s0 + $0xe0] ss:$16 sps:$4 sm:$0xff]  }
  0x25   :  { %3041 = vmatprep.subr.bf16.mxu1 %v15271_v37  ;;  %v15347_v36 = vld [vmem:[%s23060_s0 + $0x104] ss:$16 sps:$4 sm:$0xff]   ;;  %v15349_v37 = vld [vmem:[%s23060_s0 + $0x100] ss:$16 sps:$4 sm:$0xff]  }
  0x27   :  { %2176 = vmatpush1.bf16.msra.mxu0 %v15273_v38  ;;  %v15350_v38 = vld [vmem:[%s23060_s0 + $0x124] ss:$16 sps:$4 sm:$0xff]  }
  0x28   :  { %3042 = vmatpush1.bf16.msra.mxu1 %v15274_v39  ;;  %2177 = vmatprep.subr.bf16.mxu0 %v15275_v40  ;;  %v15352_v39 = vld [vmem:[%s23060_s0 + $0x120] ss:$16 sps:$4 sm:$0xff]   ;;  %v15353_v40 = vld [vmem:[%s23060_s0 + $0x144] ss:$16 sps:$4 sm:$0xff]  }
  0x29   :  { %3043 = vmatprep.subr.bf16.mxu1 %v15277_v41  ;;  %v15419_v41 = vld [vmem:[%s23059_s1 + $0x4e0] ss:$24 sps:$4 sm:$0xff]  }
  0x2b   :  { %2178 = vmatpush1.bf16.msra.mxu0 %v15279_v42  ;;  %v15421_v42 = vld [vmem:[%s23059_s1 + $0x4e4] ss:$24 sps:$4 sm:$0xff]  }
  0x2c   :  { %3044 = vmatpush1.bf16.msra.mxu1 %v15280_v43  ;;  %2179 = vmatprep.subr.bf16.mxu0 %v15281_v44  ;;  %v15355_v43 = vld [vmem:[%s23060_s0 + $0x140] ss:$16 sps:$4 sm:$0xff]   ;;  %v15359_v44 = vld [vmem:[%s23060_s0 + $0x164] ss:$16 sps:$4 sm:$0xff]  }
  0x2d   :  { %3045 = vmatprep.subr.bf16.mxu1 %v15283_v45  ;;  %v15361_v45 = vld [vmem:[%s23060_s0 + $0x160] ss:$16 sps:$4 sm:$0xff]  }
  0x2f   :  { %2180 = vmatpush1.bf16.msra.mxu0 %v15285_v46  ;;  %v15362_v46 = vld [vmem:[%s23060_s0 + $0x184] ss:$16 sps:$4 sm:$0xff]  }
  0x30   :  { %3046 = vmatpush1.bf16.msra.mxu1 %v15286_v47  ;;  %2181 = vmatprep.subr.bf16.mxu0 %v15287_v49  ;;  %v15428_v47 = vld [vmem:[%s23059_s1 + $0x510] ss:$24 sps:$4 sm:$0xff]  }
  0x31   :  { %3047 = vmatprep.subr.bf16.mxu1 %v15289_v50  ;;  %v15364_v49 = vld [vmem:[%s23060_s0 + $0x180] ss:$16 sps:$4 sm:$0xff]   ;;  %v15368_v50 = vld [vmem:[%s23060_s0 + $0x1a4] ss:$16 sps:$4 sm:$0xff]  }
  0x33   :  { %2182 = vmatpush1.bf16.msra.mxu0 %v15291_v51  ;;  %v15370_v51 = vld [vmem:[%s23060_s0 + $0x1a0] ss:$16 sps:$4 sm:$0xff]  }
  0x34   :  { %3048 = vmatpush1.bf16.msra.mxu1 %v15292_v52  ;;  %2183 = vmatprep.subr.bf16.mxu0 %v15293_v53  ;;  %v15371_v52 = vld [vmem:[%s23060_s0 + $0x1c4] ss:$16 sps:$4 sm:$0xff]   ;;  %v15373_v53 = vld [vmem:[%s23060_s0 + $0x1c0] ss:$16 sps:$4 sm:$0xff]  }
  0x35   :  { %3049 = vmatprep.subr.bf16.mxu1 %v15295_v54  ;;  %v15374_v54 = vld [vmem:[%s23060_s0 + $0x1e4] ss:$16 sps:$4 sm:$0xff]  }
  0x37   :  { %2184 = vmatpush1.bf16.msra.mxu0 %v15297_v55  ;;  %v15440_v55 = vld [vmem:[%s23059_s1 + $0x540] ss:$24 sps:$4 sm:$0xff]  }
  0x38   :  { %3050 = vmatpush1.bf16.msra.mxu1 %v15298_v56  ;;  %2185 = vmatprep.subr.bf16.mxu0 %v15299_v57  ;;  %v15442_v56 = vld [vmem:[%s23059_s1 + $0x544] ss:$24 sps:$4 sm:$0xff]   ;;  %v15376_v57 = vld [vmem:[%s23060_s0 + $0x1e0] ss:$16 sps:$4 sm:$0xff]  }
  0x39   :  { %3051 = vmatprep.subr.bf16.mxu1 %v15301_v58  ;;  %v15380_v58 = vld [vmem:[%s23060_s0 + $0x204] ss:$16 sps:$4 sm:$0xff]  }
  0x3b   :  { %2186 = vmatpush1.bf16.msra.mxu0 %v15303_v59  ;;  %v15382_v59 = vld [vmem:[%s23060_s0 + $0x200] ss:$16 sps:$4 sm:$0xff]  }
  0x3c   :  { %3052 = vmatpush1.bf16.msra.mxu1 %v15304_v60  ;;  %2187 = vmatprep.subr.bf16.mxu0 %v15305_v61  ;;  %v15383_v60 = vld [vmem:[%s23060_s0 + $0x224] ss:$16 sps:$4 sm:$0xff]  }
  0x3d   :  { %3053 = vmatprep.subr.bf16.mxu1 %v15307_v62  ;;  %v15451_v61 = vld [vmem:[%s23059_s1 + $0x30c] ss:$24 sps:$4 sm:$0xff]   ;;  %v15449_v62 = vld [vmem:[%s23059_s1 + $0x308] ss:$24 sps:$4 sm:$0xff]  }
  0x3f   :  { %2188 = vmatpush1.bf16.msra.mxu0 %v15309_v63  ;;  %v15452_v63 = vld [vmem:[%s23059_s1 + $0x570] ss:$24 sps:$4 sm:$0xff]  }
  0x40   :  { %3054 = vmatpush1.bf16.msra.mxu1 %v15310_v0  ;;  %2590 = vmatprep.subr.bf16.mxu0 %v15316_v1  ;;  %v15454_v0 = vld [vmem:[%s23059_s1 + $0x574] ss:$24 sps:$4 sm:$0xff]  }
  0x41   :  { %v15457_v1 = vld [vmem:[%s23059_s1 + $0x33c] ss:$24 sps:$4 sm:$0xff]   ;;  %3456 = vmatprep.subr.bf16.mxu1 %v15451_v61 }
  0x42   :  { %2190 = vmatmul.mubr.bf16.vlgmr.msra.gmra.mrb[0].mxu0 %v15313_v2  ;;  %v15437_v61 = vld [vmem:[%s23060_s0 + $0x3c4] ss:$16 sps:$4 sm:$0xff]  }
  0x43   :  { %3056 = vmatmul.mubr.bf16.vlgmr.msra.gmra.mrb[0].mxu1 %v15313_v2  ;;  %2591 = vmatpush1.bf16.msra.mxu0 %v15314_v3  ;;  %v15455_v2 = vld [vmem:[%s23059_s1 + $0x338] ss:$24 sps:$4 sm:$0xff]  }
  0x44   :  { %2199 = vmatprep.mubr.bf16.mxu0 %v15317_v4  ;;  %3065 = vmatprep.mubr.bf16.mxu1 %v15317_v4  ;;  %v15385_v3 = vld [vmem:[%s23060_s0 + $0x220] ss:$16 sps:$4 sm:$0xff]   ;;  %v15389_v4 = vld [vmem:[%s23060_s0 + $0x244] ss:$16 sps:$4 sm:$0xff]  }
  0x45   :  { %2592 = vmatprep.subr.bf16.mxu0 %v15325_v5  ;;  %3457 = vmatpush1.bf16.msra.mxu1 %v15449_v62  ;;  %v15463_v5 = vld [vmem:[%s23059_s1 + $0x36c] ss:$24 sps:$4 sm:$0xff]   ;;  %v15439_v62 = vld [vmem:[%s23060_s0 + $0x3c0] ss:$16 sps:$4 sm:$0xff]  }
  0x46   :  { %3458 = vmatprep.subr.bf16.mxu1 %v15457_v1  ;;  %v15446_v1 = vld [vmem:[%s23060_s0 + $0x404] ss:$16 sps:$4 sm:$0xff]  }
  0x47   :  { %2593 = vmatpush1.bf16.msra.mxu0 %v15323_v6  ;;  %v15461_v6 = vld [vmem:[%s23059_s1 + $0x368] ss:$24 sps:$4 sm:$0xff]  }
  0x48   :  { %2594 = vmatprep.subr.bf16.mxu0 %v15337_v7  ;;  %v15466_v7 = vld [vmem:[%s23059_s1 + $0x39c] ss:$24 sps:$4 sm:$0xff]  }
  0x49   :  { %3459 = vmatpush1.bf16.msra.mxu1 %v15455_v2  ;;  %v15448_v2 = vld [vmem:[%s23060_s0 + $0x400] ss:$16 sps:$4 sm:$0xff]  }
  0x4a   :  { %2200 = vmatmul.mubr.bf16.gmra.mrb[4].mxu0 %v15319_v8  ;;  %3460 = vmatprep.subr.bf16.mxu1 %v15463_v5  ;;  %v15467_v5 = vld [vmem:[%s23060_s0 + $0x444] ss:$16 sps:$4 sm:$0xff]  }
  0x4b   :  { %3066 = vmatmul.mubr.bf16.gmra.mrb[4].mxu1 %v15319_v8  ;;  %2209 = vmatprep.mubr.bf16.mxu0 %v15320_v9  ;;  %v15464_v8 = vld [vmem:[%s23059_s1 + $0x398] ss:$24 sps:$4 sm:$0xff]  }
  0x4c   :  { %3075 = vmatprep.mubr.bf16.mxu1 %v15320_v9  ;;  %2595 = vmatpush1.bf16.msra.mxu0 %v15335_v10  ;;  %v15391_v9 = vld [vmem:[%s23060_s0 + $0x240] ss:$16 sps:$4 sm:$0xff]   ;;  %v15392_v10 = vld [vmem:[%s23060_s0 + $0x264] ss:$16 sps:$4 sm:$0xff]  }
  0x4d   :  { %2596 = vmatprep.subr.bf16.mxu0 %v15346_v11  ;;  %3461 = vmatpush1.bf16.msra.mxu1 %v15461_v6  ;;  %v15472_v11 = vld [vmem:[%s23059_s1 + $0x3cc] ss:$24 sps:$4 sm:$0xff]   ;;  %v15469_v6 = vld [vmem:[%s23060_s0 + $0x440] ss:$16 sps:$4 sm:$0xff]  }
  0x4e   :  { %3462 = vmatprep.subr.bf16.mxu1 %v15466_v7  ;;  %v15476_v7 = vld [vmem:[%s23060_s0 + $0x464] ss:$16 sps:$4 sm:$0xff]  }
  0x50   :  { %2597 = vmatpush1.bf16.msra.mxu0 %v15344_v13  ;;  %v15475_v13 = vld [vmem:[%s23059_s1 + $0x3fc] ss:$24 sps:$4 sm:$0xff]  }
  0x51   :  { %2598 = vmatprep.subr.bf16.mxu0 %v15358_v15  ;;  %3463 = vmatpush1.bf16.msra.mxu1 %v15464_v8  ;;  %v15394_v15 = vld [vmem:[%s23060_s0 + $0x260] ss:$16 sps:$4 sm:$0xff]  }
  0x52   :  { %2210 = vmatmul.mubr.bf16.gmra.mrb[8].mxu0 %v15322_v12  ;;  %3464 = vmatprep.subr.bf16.mxu1 %v15472_v11  ;;  %v15478_v8 = vld [vmem:[%s23060_s0 + $0x460] ss:$16 sps:$4 sm:$0xff]   ;;  %v15497_v11 = vld [vmem:[%s23060_s0 + $0x4a4] ss:$16 sps:$4 sm:$0xff]  }
  0x53   :  { %3076 = vmatmul.mubr.bf16.gmra.mrb[8].mxu1 %v15322_v12  ;;  %2219 = vmatprep.mubr.bf16.mxu0 %v15326_v14  ;;  %v15470_v12 = vld [vmem:[%s23059_s1 + $0x3c8] ss:$24 sps:$4 sm:$0xff]  }
  0x54   :  { %3085 = vmatprep.mubr.bf16.mxu1 %v15326_v14  ;;  %2599 = vmatpush1.bf16.msra.mxu0 %v15356_v16  ;;  %v15473_v14 = vld [vmem:[%s23059_s1 + $0x3f8] ss:$24 sps:$4 sm:$0xff]   ;;  %v15395_v16 = vld [vmem:[%s23060_s0 + $0x284] ss:$16 sps:$4 sm:$0xff]  }
  0x55   :  { %2600 = vmatprep.subr.bf16.mxu0 %v15367_v17  ;;  %3465 = vmatpush1.bf16.msra.mxu1 %v15470_v12  ;;  %v15484_v17 = vld [vmem:[%s23059_s1 + $0x42c] ss:$24 sps:$4 sm:$0xff]   ;;  %v15499_v12 = vld [vmem:[%s23060_s0 + $0x4a0] ss:$16 sps:$4 sm:$0xff]  }
  0x56   :  { %3466 = vmatprep.subr.bf16.mxu1 %v15475_v13  ;;  %v15509_v13 = vld [vmem:[%s23060_s0 + $0x4c4] ss:$16 sps:$4 sm:$0xff]  }
  0x58   :  { %2601 = vmatpush1.bf16.msra.mxu0 %v15365_v18  ;;  %v15482_v18 = vld [vmem:[%s23059_s1 + $0x428] ss:$24 sps:$4 sm:$0xff]  }
  0x59   :  { %2602 = vmatprep.subr.bf16.mxu0 %v15379_v19  ;;  %3467 = vmatpush1.bf16.msra.mxu1 %v15473_v14  ;;  %v15479_v19 = vld [vmem:[%s23059_s1 + $0x5a0] ss:$24 sps:$4 sm:$0xff]  }
  0x5a   :  { %2220 = vmatmul.mubr.bf16.gmra.mrb[12].mxu0 %v15328_v20  ;;  %3468 = vmatprep.subr.bf16.mxu1 %v15484_v17  ;;  %v15511_v14 = vld [vmem:[%s23060_s0 + $0x4c0] ss:$16 sps:$4 sm:$0xff]   ;;  %v15529_v17 = vld [vmem:[%s23060_s0 + $0xc] ss:$16 sps:$4 sm:$0xff]  }
  0x5b   :  { %3086 = vmatmul.mubr.bf16.gmra.mrb[12].mxu1 %v15328_v20  ;;  %2229 = vmatprep.mubr.bf16.mxu0 %v15329_v21  ;;  %v15481_v20 = vld [vmem:[%s23059_s1 + $0x5a4] ss:$24 sps:$4 sm:$0xff]  }
  0x5c   :  { %3095 = vmatprep.mubr.bf16.mxu1 %v15329_v21  ;;  %2603 = vmatpush1.bf16.msra.mxu0 %v15377_v22  ;;  %v15487_v21 = vld [vmem:[%s23059_s1 + $0x45c] ss:$24 sps:$4 sm:$0xff]   ;;  %v15485_v22 = vld [vmem:[%s23059_s1 + $0x458] ss:$24 sps:$4 sm:$0xff]  }
  0x5d   :  { %2604 = vmatprep.subr.bf16.mxu0 %v15388_v23  ;;  %3469 = vmatpush1.bf16.msra.mxu1 %v15482_v18  ;;  %v15397_v23 = vld [vmem:[%s23060_s0 + $0x280] ss:$16 sps:$4 sm:$0xff]   ;;  %v15527_v18 = vld [vmem:[%s23060_s0 + $0x8] ss:$16 sps:$4 sm:$0xff]  }
  0x5e   :  { %3470 = vmatprep.subr.bf16.mxu1 %v15487_v21  ;;  %v15541_v21 = vld [vmem:[%s23059_s1 + $0x44] ss:$24 sps:$4 sm:$0xff]  }
  0x60   :  { %2605 = vmatpush1.bf16.msra.mxu0 %v15386_v24  ;;  %v15401_v24 = vld [vmem:[%s23060_s0 + $0x2a4] ss:$16 sps:$4 sm:$0xff]  }
  0x61   :  { %2606 = vmatprep.subr.bf16.mxu0 %v15400_v28  ;;  %3471 = vmatpush1.bf16.msra.mxu1 %v15485_v22  ;;  %v15494_v28 = vld [vmem:[%s23059_s1 + $0x4b8] ss:$24 sps:$4 sm:$0xff]  }
  0x62   :  { %2230 = vmatmul.mubr.bf16.gmra.mrb[16].mxu0 %v15331_v25  ;;  %v15539_v22 = vld [vmem:[%s23059_s1 + $0x40] ss:$24 sps:$4 sm:$0xff]  }
  0x63   :  { %3096 = vmatmul.mubr.bf16.gmra.mrb[16].mxu1 %v15331_v25  ;;  %2239 = vmatprep.mubr.bf16.mxu0 %v15332_v26  ;;  %v15493_v25 = vld [vmem:[%s23059_s1 + $0x48c] ss:$24 sps:$4 sm:$0xff]  }
  0x64   :  { %3105 = vmatprep.mubr.bf16.mxu1 %v15332_v26  ;;  %2607 = vmatpush1.bf16.msra.mxu0 %v15398_v27  ;;  %v15491_v26 = vld [vmem:[%s23059_s1 + $0x488] ss:$24 sps:$4 sm:$0xff]   ;;  %v15496_v27 = vld [vmem:[%s23059_s1 + $0x4bc] ss:$24 sps:$4 sm:$0xff]  }
  0x65   :  { %2608 = vmatprep.subr.bf16.mxu0 %v15409_v34  ;;  %3472 = vmatprep.subr.bf16.mxu1 %v15493_v25  ;;  %v15505_v34 = vld [vmem:[%s23059_s1 + $0x5d4] ss:$24 sps:$4 sm:$0xff]  }
  0x66   :  { %3473 = vmatpush1.bf16.msra.mxu1 %v15491_v26  ;;  %v15536_v25 = vld [vmem:[%s23060_s0 + $0x4c] ss:$16 sps:$4 sm:$0xff]   ;;  %v15551_v26 = vld [vmem:[%s23059_s1 + $0x70] ss:$24 sps:$4 sm:$0xff]  }
  0x67   :  { %3474 = vmatprep.subr.bf16.mxu1 %v15496_v27  ;;  %v15562_v27 = vld [vmem:[%s23059_s1 + $0xa4] ss:$24 sps:$4 sm:$0xff]  }
  0x68   :  { %2609 = vmatpush1.bf16.msra.mxu0 %v15407_v33  ;;  %v15503_v33 = vld [vmem:[%s23059_s1 + $0x5d0] ss:$24 sps:$4 sm:$0xff]  }
  0x69   :  { %2610 = vmatprep.subr.bf16.mxu0 %v15421_v42  ;;  %v15515_v42 = vld [vmem:[%s23059_s1 + $0x578] ss:$24 sps:$4 sm:$0xff]  }
  0x6a   :  { %2240 = vmatmul.mubr.bf16.gmra.mrb[20].mxu0 %v15334_v29  ;;  %3475 = vmatpush1.bf16.msra.mxu1 %v15494_v28  ;;  %v15560_v28 = vld [vmem:[%s23059_s1 + $0xa0] ss:$24 sps:$4 sm:$0xff]  }
  0x6b   :  { %3106 = vmatmul.mubr.bf16.gmra.mrb[20].mxu1 %v15334_v29  ;;  %2249 = vmatprep.mubr.bf16.mxu0 %v15338_v30  ;;  %v15403_v29 = vld [vmem:[%s23060_s0 + $0x2a0] ss:$16 sps:$4 sm:$0xff]  }
  0x6c   :  { %3115 = vmatprep.mubr.bf16.mxu1 %v15338_v30  ;;  %2611 = vmatpush1.bf16.msra.mxu0 %v15419_v41  ;;  %v15404_v30 = vld [vmem:[%s23060_s0 + $0x2c4] ss:$16 sps:$4 sm:$0xff]  }
  0x6d   :  { %2612 = vmatprep.subr.bf16.mxu0 %v15430_v48  ;;  %v15517_v41 = vld [vmem:[%s23059_s1 + $0x57c] ss:$24 sps:$4 sm:$0xff]   ;;  %v15524_v48 = vld [vmem:[%s23059_s1 + $0x5d8] ss:$24 sps:$4 sm:$0xff]  }
  0x70   :  { %2613 = vmatpush1.bf16.msra.mxu0 %v15428_v47  ;;  %v15526_v47 = vld [vmem:[%s23059_s1 + $0x5dc] ss:$24 sps:$4 sm:$0xff]  }
  0x71   :  { %2614 = vmatprep.subr.bf16.mxu0 %v15442_v56  ;;  %v15427_v56 = vld [vmem:[%s23060_s0 + $0x360] ss:$16 sps:$4 sm:$0xff]  }
  0x72   :  { %2250 = vmatmul.mubr.bf16.gmra.mrb[24].mxu0 %v15340_v31 }
  0x73   :  { %3116 = vmatmul.mubr.bf16.gmra.mrb[24].mxu1 %v15340_v31  ;;  %2259 = vmatprep.mubr.bf16.mxu0 %v15341_v32  ;;  %v15502_v31 = vld [vmem:[%s23059_s1 + $0x4ec] ss:$24 sps:$4 sm:$0xff]  }
  0x74   :  { %3125 = vmatprep.mubr.bf16.mxu1 %v15341_v32  ;;  %2615 = vmatpush1.bf16.msra.mxu0 %v15440_v55  ;;  %v15500_v32 = vld [vmem:[%s23059_s1 + $0x4e8] ss:$24 sps:$4 sm:$0xff]   ;;  %v15425_v55 = vld [vmem:[%s23060_s0 + $0x364] ss:$16 sps:$4 sm:$0xff]  }
  0x75   :  { %2616 = vmatprep.subr.bf16.mxu0 %v15454_v0  ;;  %3476 = vmatprep.subr.bf16.mxu1 %v15502_v31  ;;  %v15445_v0 = vld [vmem:[%s23060_s0 + $0x3e0] ss:$16 sps:$4 sm:$0xff]   ;;  %v15542_v31 = vld [vmem:[%s23060_s0 + $0x6c] ss:$16 sps:$4 sm:$0xff]  }
  0x76   :  { %3477 = vmatpush1.bf16.msra.mxu1 %v15500_v32  ;;  %v15572_v32 = vld [vmem:[%s23059_s1 + $0xd0] ss:$24 sps:$4 sm:$0xff]  }
  0x78   :  { %2617 = vmatpush1.bf16.msra.mxu0 %v15452_v63  ;;  %v15443_v63 = vld [vmem:[%s23060_s0 + $0x3e4] ss:$16 sps:$4 sm:$0xff]  }
  0x79   :  { %2618 = vmatprep.subr.bf16.mxu0 %v15481_v20  ;;  %v15533_v20 = vld [vmem:[%s23060_s0 + $0x2c] ss:$16 sps:$4 sm:$0xff]  }
  0x7a   :  { %2260 = vmatmul.mubr.bf16.gmra.mrb[28].mxu0 %v15343_v35 }
  0x7b   :  { %3126 = vmatmul.mubr.bf16.gmra.mrb[28].mxu1 %v15343_v35  ;;  %2269 = vmatprep.mubr.bf16.mxu0 %v15347_v36  ;;  %v15508_v35 = vld [vmem:[%s23059_s1 + $0x51c] ss:$24 sps:$4 sm:$0xff]  }
  0x7c   :  { %3135 = vmatprep.mubr.bf16.mxu1 %v15347_v36  ;;  %2619 = vmatpush1.bf16.msra.mxu0 %v15479_v19  ;;  %v15506_v36 = vld [vmem:[%s23059_s1 + $0x518] ss:$24 sps:$4 sm:$0xff]  }
  0x7d   :  { %2620 = vmatprep.subr.bf16.mxu0 %v15505_v34  ;;  %3478 = vmatprep.subr.bf16.mxu1 %v15508_v35  ;;  %v15530_v19 = vld [vmem:[%s23059_s1 + $0x10] ss:$24 sps:$4 sm:$0xff]   ;;  %v15581_v34 = vld [vmem:[%s23059_s1 + $0x100] ss:$24 sps:$4 sm:$0xff]   ;;  %v15595_v35 = vld [vmem:[%s23059_s1 + $0x134] ss:$24 sps:$4 sm:$0xff]  }
  0x7e   :  { %3479 = vmatpush1.bf16.msra.mxu1 %v15506_v36  ;;  %v15544_v36 = vld [vmem:[%s23060_s0 + $0x68] ss:$16 sps:$4 sm:$0xff]  }
  0x80   :  { %2621 = vmatpush1.bf16.msra.mxu0 %v15503_v33  ;;  %v15583_v33 = vld [vmem:[%s23059_s1 + $0x104] ss:$24 sps:$4 sm:$0xff]  }
  0x82   :  { %2270 = vmatmul.mubr.bf16.gmra.mrb[32].mxu0 %v15349_v37 }
  0x83   :  { %3136 = vmatmul.mubr.bf16.gmra.mrb[32].mxu1 %v15349_v37  ;;  %2279 = vmatprep.mubr.bf16.mxu0 %v15350_v38  ;;  %v15406_v37 = vld [vmem:[%s23060_s0 + $0x2c0] ss:$16 sps:$4 sm:$0xff]  }
  0x84   :  { %3145 = vmatprep.mubr.bf16.mxu1 %v15350_v38  ;;  %v15410_v38 = vld [vmem:[%s23060_s0 + $0x2e4] ss:$16 sps:$4 sm:$0xff]  }
  0x8a   :  { %2280 = vmatmul.mubr.bf16.gmra.mrb[36].mxu0 %v15352_v39 }
  0x8b   :  { %3146 = vmatmul.mubr.bf16.gmra.mrb[36].mxu1 %v15352_v39  ;;  %2289 = vmatprep.mubr.bf16.mxu0 %v15353_v40  ;;  %v15514_v39 = vld [vmem:[%s23059_s1 + $0x54c] ss:$24 sps:$4 sm:$0xff]  }
  0x8c   :  { %3155 = vmatprep.mubr.bf16.mxu1 %v15353_v40  ;;  %v15512_v40 = vld [vmem:[%s23059_s1 + $0x548] ss:$24 sps:$4 sm:$0xff]   ;;  %3480 = vmatprep.subr.bf16.mxu1 %v15514_v39  ;;  %v15604_v39 = vld [vmem:[%s23059_s1 + $0x164] ss:$24 sps:$4 sm:$0xff]  }
  0x8d   :  { %3481 = vmatpush1.bf16.msra.mxu1 %v15512_v40  ;;  %v15602_v40 = vld [vmem:[%s23059_s1 + $0x160] ss:$24 sps:$4 sm:$0xff]  }
  0x8e   :  { %3482 = vmatprep.subr.bf16.mxu1 %v15517_v41  ;;  %v15547_v41 = vld [vmem:[%s23060_s0 + $0x88] ss:$16 sps:$4 sm:$0xff]  }
  0x91   :  { %3483 = vmatpush1.bf16.msra.mxu1 %v15515_v42  ;;  %v15548_v42 = vld [vmem:[%s23060_s0 + $0xac] ss:$16 sps:$4 sm:$0xff]  }
  0x92   :  { %2290 = vmatmul.mubr.bf16.gmra.mrb[40].mxu0 %v15355_v43 }
  0x93   :  { %3156 = vmatmul.mubr.bf16.gmra.mrb[40].mxu1 %v15355_v43  ;;  %2299 = vmatprep.mubr.bf16.mxu0 %v15359_v44  ;;  %v15412_v43 = vld [vmem:[%s23060_s0 + $0x2e0] ss:$16 sps:$4 sm:$0xff]  }
  0x94   :  { %3165 = vmatprep.mubr.bf16.mxu1 %v15359_v44  ;;  %v15413_v44 = vld [vmem:[%s23060_s0 + $0x304] ss:$16 sps:$4 sm:$0xff]  }
  0x9a   :  { %2300 = vmatmul.mubr.bf16.gmra.mrb[44].mxu0 %v15361_v45 }
  0x9b   :  { %3166 = vmatmul.mubr.bf16.gmra.mrb[44].mxu1 %v15361_v45  ;;  %2309 = vmatprep.mubr.bf16.mxu0 %v15362_v46  ;;  %v15523_v45 = vld [vmem:[%s23059_s1 + $0x5ac] ss:$24 sps:$4 sm:$0xff]  }
  0x9c   :  { %3175 = vmatprep.mubr.bf16.mxu1 %v15362_v46  ;;  %v15521_v46 = vld [vmem:[%s23059_s1 + $0x5a8] ss:$24 sps:$4 sm:$0xff]   ;;  %3484 = vmatprep.subr.bf16.mxu1 %v15523_v45 }
  0x9d   :  { %3485 = vmatpush1.bf16.msra.mxu1 %v15521_v46  ;;  %v15550_v45 = vld [vmem:[%s23060_s0 + $0xa8] ss:$16 sps:$4 sm:$0xff]   ;;  %v15554_v46 = vld [vmem:[%s23060_s0 + $0xcc] ss:$16 sps:$4 sm:$0xff]  }
  0x9e   :  { %3486 = vmatprep.subr.bf16.mxu1 %v15526_v47  ;;  %v15556_v47 = vld [vmem:[%s23060_s0 + $0xc8] ss:$16 sps:$4 sm:$0xff]  }
  0xa1   :  { %3487 = vmatpush1.bf16.msra.mxu1 %v15524_v48  ;;  %v15557_v48 = vld [vmem:[%s23060_s0 + $0xec] ss:$16 sps:$4 sm:$0xff]  }
  0xa2   :  { %2310 = vmatmul.mubr.bf16.gmra.mrb[48].mxu0 %v15364_v49 }
  0xa3   :  { %3176 = vmatmul.mubr.bf16.gmra.mrb[48].mxu1 %v15364_v49  ;;  %2319 = vmatprep.mubr.bf16.mxu0 %v15368_v50  ;;  %v15415_v49 = vld [vmem:[%s23060_s0 + $0x300] ss:$16 sps:$4 sm:$0xff]  }
  0xa4   :  { %3185 = vmatprep.mubr.bf16.mxu1 %v15368_v50  ;;  %v15416_v50 = vld [vmem:[%s23060_s0 + $0x324] ss:$16 sps:$4 sm:$0xff]  }
  0xaa   :  { %2320 = vmatmul.mubr.bf16.gmra.mrb[52].mxu0 %v15370_v51 }
  0xab   :  { %3186 = vmatmul.mubr.bf16.gmra.mrb[52].mxu1 %v15370_v51  ;;  %2329 = vmatprep.mubr.bf16.mxu0 %v15371_v52  ;;  %v15532_v51 = vld [vmem:[%s23059_s1 + $0x14] ss:$24 sps:$4 sm:$0xff]  }
  0xac   :  { %3195 = vmatprep.mubr.bf16.mxu1 %v15371_v52  ;;  %3889 = vmatprep.subr.bf16.mxu0 %v15532_v51  ;;  %v15418_v52 = vld [vmem:[%s23060_s0 + $0x320] ss:$16 sps:$4 sm:$0xff]   ;;  %v15559_v51 = vld [vmem:[%s23060_s0 + $0xe8] ss:$16 sps:$4 sm:$0xff]  }
  0xb2   :  { %2330 = vmatmul.mubr.bf16.gmra.mrb[56].mxu0 %v15373_v53 }
  0xb3   :  { %3196 = vmatmul.mubr.bf16.gmra.mrb[56].mxu1 %v15373_v53  ;;  %2339 = vmatprep.mubr.bf16.mxu0 %v15374_v54  ;;  %v15422_v53 = vld [vmem:[%s23060_s0 + $0x344] ss:$16 sps:$4 sm:$0xff]  }
  0xb4   :  { %3205 = vmatprep.mubr.bf16.mxu1 %v15374_v54  ;;  %v15424_v54 = vld [vmem:[%s23060_s0 + $0x340] ss:$16 sps:$4 sm:$0xff]  }
  0xba   :  { %2340 = vmatmul.mubr.bf16.gmra.mrb[60].mxu0 %v15376_v57 }
  0xbb   :  { %3206 = vmatmul.mubr.bf16.gmra.mrb[60].mxu1 %v15376_v57  ;;  %2349 = vmatprep.mubr.bf16.mxu0 %v15380_v58  ;;  %v15431_v57 = vld [vmem:[%s23060_s0 + $0x384] ss:$16 sps:$4 sm:$0xff]  }
  0xbc   :  { %3215 = vmatprep.mubr.bf16.mxu1 %v15380_v58  ;;  %v15433_v58 = vld [vmem:[%s23060_s0 + $0x380] ss:$16 sps:$4 sm:$0xff]  }
  0xc2   :  { %2350 = vmatmul.mubr.bf16.gmra.mrb[64].mxu0 %v15382_v59 }
  0xc3   :  { %3216 = vmatmul.mubr.bf16.gmra.mrb[64].mxu1 %v15382_v59  ;;  %2359 = vmatprep.mubr.bf16.mxu0 %v15383_v60  ;;  %v15434_v59 = vld [vmem:[%s23060_s0 + $0x3a4] ss:$16 sps:$4 sm:$0xff]  }
  0xc4   :  { %3225 = vmatprep.mubr.bf16.mxu1 %v15383_v60  ;;  %v15436_v60 = vld [vmem:[%s23060_s0 + $0x3a0] ss:$16 sps:$4 sm:$0xff]  }
  0xca   :  { %2360 = vmatmul.mubr.bf16.gmra.mrb[68].mxu0 %v15385_v3 }
  0xcb   :  { %3226 = vmatmul.mubr.bf16.gmra.mrb[68].mxu1 %v15385_v3  ;;  %2369 = vmatprep.mubr.bf16.mxu0 %v15389_v4  ;;  %v15458_v3 = vld [vmem:[%s23060_s0 + $0x424] ss:$16 sps:$4 sm:$0xff]  }
  0xcc   :  { %3235 = vmatprep.mubr.bf16.mxu1 %v15389_v4  ;;  %v15460_v4 = vld [vmem:[%s23060_s0 + $0x420] ss:$16 sps:$4 sm:$0xff]  }
  0xd2   :  { %2370 = vmatmul.mubr.bf16.gmra.mrb[72].mxu0 %v15391_v9 }
  0xd3   :  { %3236 = vmatmul.mubr.bf16.gmra.mrb[72].mxu1 %v15391_v9  ;;  %2379 = vmatprep.mubr.bf16.mxu0 %v15392_v10  ;;  %v15488_v9 = vld [vmem:[%s23060_s0 + $0x484] ss:$16 sps:$4 sm:$0xff]  }
  0xd4   :  { %3245 = vmatprep.mubr.bf16.mxu1 %v15392_v10  ;;  %v15490_v10 = vld [vmem:[%s23060_s0 + $0x480] ss:$16 sps:$4 sm:$0xff]  }
  0xda   :  { %2380 = vmatmul.mubr.bf16.gmra.mrb[76].mxu0 %v15394_v15 }
  0xdb   :  { %3246 = vmatmul.mubr.bf16.gmra.mrb[76].mxu1 %v15394_v15  ;;  %2389 = vmatprep.mubr.bf16.mxu0 %v15395_v16  ;;  %v15518_v15 = vld [vmem:[%s23060_s0 + $0x4e4] ss:$16 sps:$4 sm:$0xff]  }
  0xdc   :  { %3255 = vmatprep.mubr.bf16.mxu1 %v15395_v16  ;;  %v15520_v16 = vld [vmem:[%s23060_s0 + $0x4e0] ss:$16 sps:$4 sm:$0xff]  }
  0xe2   :  { %2390 = vmatmul.mubr.bf16.gmra.mrb[80].mxu0 %v15397_v23 }
  0xe3   :  { %3256 = vmatmul.mubr.bf16.gmra.mrb[80].mxu1 %v15397_v23  ;;  %2399 = vmatprep.mubr.bf16.mxu0 %v15401_v24  ;;  %v15553_v23 = vld [vmem:[%s23059_s1 + $0x74] ss:$24 sps:$4 sm:$0xff]  }
  0xe4   :  { %3265 = vmatprep.mubr.bf16.mxu1 %v15401_v24  ;;  %v15535_v24 = vld [vmem:[%s23060_s0 + $0x28] ss:$16 sps:$4 sm:$0xff]  }
  0xea   :  { %2400 = vmatmul.mubr.bf16.gmra.mrb[84].mxu0 %v15403_v29 }
  0xeb   :  { %3266 = vmatmul.mubr.bf16.gmra.mrb[84].mxu1 %v15403_v29  ;;  %2409 = vmatprep.mubr.bf16.mxu0 %v15404_v30  ;;  %v15574_v29 = vld [vmem:[%s23059_s1 + $0xd4] ss:$24 sps:$4 sm:$0xff]  }
  0xec   :  { %3275 = vmatprep.mubr.bf16.mxu1 %v15404_v30  ;;  %v15538_v30 = vld [vmem:[%s23060_s0 + $0x48] ss:$16 sps:$4 sm:$0xff]  }
  0xf2   :  { %2410 = vmatmul.mubr.bf16.gmra.mrb[88].mxu0 %v15406_v37 }
  0xf3   :  { %3276 = vmatmul.mubr.bf16.gmra.mrb[88].mxu1 %v15406_v37  ;;  %2419 = vmatprep.mubr.bf16.mxu0 %v15410_v38  ;;  %v15545_v37 = vld [vmem:[%s23060_s0 + $0x8c] ss:$16 sps:$4 sm:$0xff]  }
  0xf4   :  { %3285 = vmatprep.mubr.bf16.mxu1 %v15410_v38  ;;  %v15593_v38 = vld [vmem:[%s23059_s1 + $0x130] ss:$24 sps:$4 sm:$0xff]  }
  0xfa   :  { %2420 = vmatmul.mubr.bf16.gmra.mrb[92].mxu0 %v15412_v43 }
  0xfb   :  { %3286 = vmatmul.mubr.bf16.gmra.mrb[92].mxu1 %v15412_v43  ;;  %2429 = vmatprep.mubr.bf16.mxu0 %v15413_v44  ;;  %v15614_v43 = vld [vmem:[%s23059_s1 + $0x190] ss:$24 sps:$4 sm:$0xff]  }
  0xfc   :  { %3295 = vmatprep.mubr.bf16.mxu1 %v15413_v44  ;;  %v15616_v44 = vld [vmem:[%s23059_s1 + $0x194] ss:$24 sps:$4 sm:$0xff]  }
 0x102   :  { %2430 = vmatmul.mubr.bf16.gmra.mrb[96].mxu0 %v15415_v49 }
 0x103   :  { %3296 = vmatmul.mubr.bf16.gmra.mrb[96].mxu1 %v15415_v49  ;;  %2439 = vmatprep.mubr.bf16.mxu0 %v15416_v50  ;;  %v15623_v49 = vld [vmem:[%s23059_s1 + $0x1c0] ss:$24 sps:$4 sm:$0xff]  }
 0x104   :  { %3305 = vmatprep.mubr.bf16.mxu1 %v15416_v50  ;;  %v15625_v50 = vld [vmem:[%s23059_s1 + $0x1c4] ss:$24 sps:$4 sm:$0xff]  }
 0x10a   :  { %2440 = vmatmul.mubr.bf16.gmra.mrb[100].mxu0 %v15418_v52 }
 0x10b   :  { %3306 = vmatmul.mubr.bf16.gmra.mrb[100].mxu1 %v15418_v52  ;;  %2449 = vmatprep.mubr.bf16.mxu0 %v15422_v53  ;;  %v15563_v52 = vld [vmem:[%s23060_s0 + $0x10c] ss:$16 sps:$4 sm:$0xff]  }
 0x10c   :  { %3315 = vmatprep.mubr.bf16.mxu1 %v15422_v53  ;;  %v15565_v53 = vld [vmem:[%s23060_s0 + $0x108] ss:$16 sps:$4 sm:$0xff]  }
 0x112   :  { %2450 = vmatmul.mubr.bf16.gmra.mrb[104].mxu0 %v15424_v54 }
 0x113   :  { %3316 = vmatmul.mubr.bf16.gmra.mrb[104].mxu1 %v15424_v54  ;;  %2459 = vmatprep.mubr.bf16.mxu0 %v15425_v55  ;;  %v15566_v54 = vld [vmem:[%s23060_s0 + $0x12c] ss:$16 sps:$4 sm:$0xff]  }
 0x114   :  { %3325 = vmatprep.mubr.bf16.mxu1 %v15425_v55  ;;  %v15568_v55 = vld [vmem:[%s23060_s0 + $0x128] ss:$16 sps:$4 sm:$0xff]  }
 0x11a   :  { %2460 = vmatmul.mubr.bf16.gmra.mrb[108].mxu0 %v15427_v56 }
 0x11b   :  { %3326 = vmatmul.mubr.bf16.gmra.mrb[108].mxu1 %v15427_v56  ;;  %2469 = vmatprep.mubr.bf16.mxu0 %v15431_v57  ;;  %v15569_v56 = vld [vmem:[%s23060_s0 + $0x14c] ss:$16 sps:$4 sm:$0xff]  }
 0x11c   :  { %3335 = vmatprep.mubr.bf16.mxu1 %v15431_v57  ;;  %v15635_v57 = vld [vmem:[%s23059_s1 + $0x1f0] ss:$24 sps:$4 sm:$0xff]  }
 0x122   :  { %2470 = vmatmul.mubr.bf16.gmra.mrb[112].mxu0 %v15433_v58 }
 0x123   :  { %3336 = vmatmul.mubr.bf16.gmra.mrb[112].mxu1 %v15433_v58  ;;  %2479 = vmatprep.mubr.bf16.mxu0 %v15434_v59  ;;  %v15637_v58 = vld [vmem:[%s23059_s1 + $0x1f4] ss:$24 sps:$4 sm:$0xff]  }
 0x124   :  { %3345 = vmatprep.mubr.bf16.mxu1 %v15434_v59  ;;  %v15571_v59 = vld [vmem:[%s23060_s0 + $0x148] ss:$16 sps:$4 sm:$0xff]  }
 0x12a   :  { %2480 = vmatmul.mubr.bf16.gmra.mrb[116].mxu0 %v15436_v60 }
 0x12b   :  { %3346 = vmatmul.mubr.bf16.gmra.mrb[116].mxu1 %v15436_v60  ;;  %2489 = vmatprep.mubr.bf16.mxu0 %v15437_v61  ;;  %v15575_v60 = vld [vmem:[%s23060_s0 + $0x16c] ss:$16 sps:$4 sm:$0xff]  }
 0x12c   :  { %3355 = vmatprep.mubr.bf16.mxu1 %v15437_v61  ;;  %v15577_v61 = vld [vmem:[%s23060_s0 + $0x168] ss:$16 sps:$4 sm:$0xff]  }
 0x132   :  { %2490 = vmatmul.mubr.bf16.gmra.mrb[120].mxu0 %v15439_v62 }
 0x133   :  { %3356 = vmatmul.mubr.bf16.gmra.mrb[120].mxu1 %v15439_v62  ;;  %2499 = vmatprep.mubr.bf16.mxu0 %v15443_v63  ;;  %v15578_v62 = vld [vmem:[%s23060_s0 + $0x18c] ss:$16 sps:$4 sm:$0xff]  }
 0x134   :  { %3365 = vmatprep.mubr.bf16.mxu1 %v15443_v63  ;;  %v15580_v63 = vld [vmem:[%s23060_s0 + $0x188] ss:$16 sps:$4 sm:$0xff]  }
 0x13a   :  { %2500 = vmatmul.mubr.bf16.gmra.mrb[124].mxu0 %v15445_v0 }
 0x13b   :  { %3366 = vmatmul.mubr.bf16.gmra.mrb[124].mxu1 %v15445_v0  ;;  %2509 = vmatprep.mubr.bf16.mxu0 %v15446_v1  ;;  %v15584_v0 = vld [vmem:[%s23060_s0 + $0x1ac] ss:$16 sps:$4 sm:$0xff]  }
 0x13c   :  { %3375 = vmatprep.mubr.bf16.mxu1 %v15446_v1  ;;  %v15646_v1 = vld [vmem:[%s23059_s1 + $0x224] ss:$24 sps:$4 sm:$0xff]  }
 0x142   :  { %2510 = vmatmul.mubr.bf16.gmra.mrb[128].mxu0 %v15448_v2 }
 0x143   :  { %3376 = vmatmul.mubr.bf16.gmra.mrb[128].mxu1 %v15448_v2  ;;  %2519 = vmatprep.mubr.bf16.mxu0 %v15458_v3  ;;  %v15644_v2 = vld [vmem:[%s23059_s1 + $0x220] ss:$24 sps:$4 sm:$0xff]  }
 0x144   :  { %3385 = vmatprep.mubr.bf16.mxu1 %v15458_v3  ;;  %v15586_v3 = vld [vmem:[%s23060_s0 + $0x1a8] ss:$16 sps:$4 sm:$0xff]  }
 0x14a   :  { %2520 = vmatmul.mubr.bf16.gmra.mrb[132].mxu0 %v15460_v4 }
 0x14b   :  { %3386 = vmatmul.mubr.bf16.gmra.mrb[132].mxu1 %v15460_v4  ;;  %2529 = vmatprep.mubr.bf16.mxu0 %v15467_v5  ;;  %v15587_v4 = vld [vmem:[%s23060_s0 + $0x1cc] ss:$16 sps:$4 sm:$0xff]  }
 0x14c   :  { %3395 = vmatprep.mubr.bf16.mxu1 %v15467_v5  ;;  %v15589_v5 = vld [vmem:[%s23060_s0 + $0x1c8] ss:$16 sps:$4 sm:$0xff]  }
 0x152   :  { %2530 = vmatmul.mubr.bf16.gmra.mrb[136].mxu0 %v15469_v6 }
 0x153   :  { %3396 = vmatmul.mubr.bf16.gmra.mrb[136].mxu1 %v15469_v6  ;;  %2539 = vmatprep.mubr.bf16.mxu0 %v15476_v7  ;;  %v15590_v6 = vld [vmem:[%s23060_s0 + $0x1ec] ss:$16 sps:$4 sm:$0xff]  }
 0x154   :  { %3405 = vmatprep.mubr.bf16.mxu1 %v15476_v7  ;;  %v15656_v7 = vld [vmem:[%s23059_s1 + $0x250] ss:$24 sps:$4 sm:$0xff]  }
 0x15a   :  { %2540 = vmatmul.mubr.bf16.gmra.mrb[140].mxu0 %v15478_v8 }
 0x15b   :  { %3406 = vmatmul.mubr.bf16.gmra.mrb[140].mxu1 %v15478_v8  ;;  %2549 = vmatprep.mubr.bf16.mxu0 %v15488_v9  ;;  %v15658_v8 = vld [vmem:[%s23059_s1 + $0x254] ss:$24 sps:$4 sm:$0xff]  }
 0x15c   :  { %3415 = vmatprep.mubr.bf16.mxu1 %v15488_v9  ;;  %v15592_v9 = vld [vmem:[%s23060_s0 + $0x1e8] ss:$16 sps:$4 sm:$0xff]  }
 0x162   :  { %2550 = vmatmul.mubr.bf16.gmra.mrb[144].mxu0 %v15490_v10 }
 0x163   :  { %3416 = vmatmul.mubr.bf16.gmra.mrb[144].mxu1 %v15490_v10  ;;  %2559 = vmatprep.mubr.bf16.mxu0 %v15497_v11  ;;  %v15596_v10 = vld [vmem:[%s23060_s0 + $0x20c] ss:$16 sps:$4 sm:$0xff]  }
 0x164   :  { %3425 = vmatprep.mubr.bf16.mxu1 %v15497_v11  ;;  %v15598_v11 = vld [vmem:[%s23060_s0 + $0x208] ss:$16 sps:$4 sm:$0xff]  }
 0x16a   :  { %2560 = vmatmul.mubr.bf16.gmra.mrb[148].mxu0 %v15499_v12 }
 0x16b   :  { %3426 = vmatmul.mubr.bf16.gmra.mrb[148].mxu1 %v15499_v12  ;;  %2569 = vmatprep.mubr.bf16.mxu0 %v15509_v13  ;;  %v15599_v12 = vld [vmem:[%s23060_s0 + $0x22c] ss:$16 sps:$4 sm:$0xff]  }
 0x16c   :  { %3435 = vmatprep.mubr.bf16.mxu1 %v15509_v13  ;;  %v15601_v13 = vld [vmem:[%s23060_s0 + $0x228] ss:$16 sps:$4 sm:$0xff]  }
 0x172   :  { %2570 = vmatmul.mubr.bf16.gmra.mrb[152].mxu0 %v15511_v14 }
 0x173   :  { %3436 = vmatmul.mubr.bf16.gmra.mrb[152].mxu1 %v15511_v14  ;;  %2579 = vmatprep.mubr.bf16.mxu0 %v15518_v15  ;;  %v15605_v14 = vld [vmem:[%s23060_s0 + $0x24c] ss:$16 sps:$4 sm:$0xff]  }
 0x174   :  { %3445 = vmatprep.mubr.bf16.mxu1 %v15518_v15  ;;  %v15667_v15 = vld [vmem:[%s23059_s1 + $0x284] ss:$24 sps:$4 sm:$0xff]  }
 0x17a   :  { %2580 = vmatmul.mubr.bf16.gmra.mrb[156].mxu0 %v15520_v16 }
 0x17b   :  { %3446 = vmatmul.mubr.bf16.gmra.mrb[156].mxu1 %v15520_v16  ;;  %2622 = vmatprep.mubr.bf16.mxu0 %v15529_v17  ;;  %v15665_v16 = vld [vmem:[%s23059_s1 + $0x280] ss:$24 sps:$4 sm:$0xff]  }
 0x17c   :  { %3488 = vmatprep.mubr.bf16.mxu1 %v15529_v17  ;;  %v15607_v17 = vld [vmem:[%s23060_s0 + $0x248] ss:$16 sps:$4 sm:$0xff]  }
 0x182   :  { %2623 = vmatmul.mubr.bf16.vlgmr.msra.gmra.mrb[0].mxu0 %v15527_v18 }
 0x183   :  { %3489 = vmatmul.mubr.bf16.vlgmr.msra.gmra.mrb[0].mxu1 %v15527_v18  ;;  %3890 = vmatpush1.bf16.msra.mxu0 %v15530_v19  ;;  %v15608_v18 = vld [vmem:[%s23060_s0 + $0x26c] ss:$16 sps:$4 sm:$0xff]   ;;  %v15610_v19 = vld [vmem:[%s23060_s0 + $0x268] ss:$16 sps:$4 sm:$0xff]  }
 0x184   :  { %2632 = vmatprep.mubr.bf16.mxu0 %v15533_v20  ;;  %3498 = vmatprep.mubr.bf16.mxu1 %v15533_v20  ;;  %v15611_v20 = vld [vmem:[%s23060_s0 + $0x28c] ss:$16 sps:$4 sm:$0xff]  }
 0x185   :  { %3891 = vmatprep.subr.bf16.mxu0 %v15541_v21  ;;  %v15677_v21 = vld [vmem:[%s23059_s1 + $0x2b0] ss:$24 sps:$4 sm:$0xff]  }
 0x187   :  { %3892 = vmatpush1.bf16.msra.mxu0 %v15539_v22  ;;  %v15679_v22 = vld [vmem:[%s23059_s1 + $0x2b4] ss:$24 sps:$4 sm:$0xff]  }
 0x188   :  { %3893 = vmatprep.subr.bf16.mxu0 %v15553_v23  ;;  %v15613_v23 = vld [vmem:[%s23060_s0 + $0x288] ss:$16 sps:$4 sm:$0xff]  }
 0x18a   :  { %2633 = vmatmul.mubr.bf16.gmra.mrb[4].mxu0 %v15535_v24 }
 0x18b   :  { %3499 = vmatmul.mubr.bf16.gmra.mrb[4].mxu1 %v15535_v24  ;;  %2642 = vmatprep.mubr.bf16.mxu0 %v15536_v25  ;;  %v15617_v24 = vld [vmem:[%s23060_s0 + $0x2ac] ss:$16 sps:$4 sm:$0xff]  }
 0x18c   :  { %3508 = vmatprep.mubr.bf16.mxu1 %v15536_v25  ;;  %3894 = vmatpush1.bf16.msra.mxu0 %v15551_v26  ;;  %v15619_v25 = vld [vmem:[%s23060_s0 + $0x2a8] ss:$16 sps:$4 sm:$0xff]   ;;  %v15620_v26 = vld [vmem:[%s23060_s0 + $0x2cc] ss:$16 sps:$4 sm:$0xff]  }
 0x18d   :  { %3895 = vmatprep.subr.bf16.mxu0 %v15562_v27  ;;  %v15622_v27 = vld [vmem:[%s23060_s0 + $0x2c8] ss:$16 sps:$4 sm:$0xff]  }
 0x190   :  { %3896 = vmatpush1.bf16.msra.mxu0 %v15560_v28  ;;  %v15626_v28 = vld [vmem:[%s23060_s0 + $0x2ec] ss:$16 sps:$4 sm:$0xff]  }
 0x191   :  { %3897 = vmatprep.subr.bf16.mxu0 %v15574_v29  ;;  %v15688_v29 = vld [vmem:[%s23059_s1 + $0x2e4] ss:$24 sps:$4 sm:$0xff]  }
 0x192   :  { %2643 = vmatmul.mubr.bf16.gmra.mrb[8].mxu0 %v15538_v30 }
 0x193   :  { %3509 = vmatmul.mubr.bf16.gmra.mrb[8].mxu1 %v15538_v30  ;;  %2652 = vmatprep.mubr.bf16.mxu0 %v15542_v31  ;;  %v15686_v30 = vld [vmem:[%s23059_s1 + $0x2e0] ss:$24 sps:$4 sm:$0xff]  }
 0x194   :  { %3518 = vmatprep.mubr.bf16.mxu1 %v15542_v31  ;;  %3898 = vmatpush1.bf16.msra.mxu0 %v15572_v32  ;;  %v15628_v31 = vld [vmem:[%s23060_s0 + $0x2e8] ss:$16 sps:$4 sm:$0xff]   ;;  %v15629_v32 = vld [vmem:[%s23060_s0 + $0x30c] ss:$16 sps:$4 sm:$0xff]  }
 0x195   :  { %3899 = vmatprep.subr.bf16.mxu0 %v15583_v33  ;;  %v15631_v33 = vld [vmem:[%s23060_s0 + $0x308] ss:$16 sps:$4 sm:$0xff]  }
 0x198   :  { %3900 = vmatpush1.bf16.msra.mxu0 %v15581_v34  ;;  %v15632_v34 = vld [vmem:[%s23060_s0 + $0x32c] ss:$16 sps:$4 sm:$0xff]  }
 0x199   :  { %3901 = vmatprep.subr.bf16.mxu0 %v15595_v35  ;;  %v15697_v35 = vld [vmem:[%s23059_s1 + $0x314] ss:$24 sps:$4 sm:$0xff]  }
 0x19a   :  { %2653 = vmatmul.mubr.bf16.gmra.mrb[12].mxu0 %v15544_v36 }
 0x19b   :  { %3519 = vmatmul.mubr.bf16.gmra.mrb[12].mxu1 %v15544_v36  ;;  %2662 = vmatprep.mubr.bf16.mxu0 %v15545_v37  ;;  %v15634_v36 = vld [vmem:[%s23060_s0 + $0x328] ss:$16 sps:$4 sm:$0xff]  }
 0x19c   :  { %3528 = vmatprep.mubr.bf16.mxu1 %v15545_v37  ;;  %3902 = vmatpush1.bf16.msra.mxu0 %v15593_v38  ;;  %v15638_v37 = vld [vmem:[%s23060_s0 + $0x34c] ss:$16 sps:$4 sm:$0xff]   ;;  %v15640_v38 = vld [vmem:[%s23060_s0 + $0x348] ss:$16 sps:$4 sm:$0xff]  }
 0x19d   :  { %3903 = vmatprep.subr.bf16.mxu0 %v15604_v39  ;;  %v15641_v39 = vld [vmem:[%s23060_s0 + $0x36c] ss:$16 sps:$4 sm:$0xff]  }
 0x1a0   :  { %3904 = vmatpush1.bf16.msra.mxu0 %v15602_v40 }
 0x1a1   :  { %3905 = vmatprep.subr.bf16.mxu0 %v15616_v44  ;;  %v15643_v44 = vld [vmem:[%s23060_s0 + $0x368] ss:$16 sps:$4 sm:$0xff]  }
 0x1a2   :  { %2663 = vmatmul.mubr.bf16.gmra.mrb[16].mxu0 %v15547_v41 }
 0x1a3   :  { %3529 = vmatmul.mubr.bf16.gmra.mrb[16].mxu1 %v15547_v41  ;;  %2672 = vmatprep.mubr.bf16.mxu0 %v15548_v42 }
 0x1a4   :  { %3538 = vmatprep.mubr.bf16.mxu1 %v15548_v42  ;;  %3906 = vmatpush1.bf16.msra.mxu0 %v15614_v43 }
 0x1a5   :  { %3907 = vmatprep.subr.bf16.mxu0 %v15625_v50 }
 0x1a8   :  { %3908 = vmatpush1.bf16.msra.mxu0 %v15623_v49 }
 0x1a9   :  { %3909 = vmatprep.subr.bf16.mxu0 %v15637_v58 }
 0x1aa   :  { %2673 = vmatmul.mubr.bf16.gmra.mrb[20].mxu0 %v15550_v45 }
 0x1ab   :  { %3539 = vmatmul.mubr.bf16.gmra.mrb[20].mxu1 %v15550_v45  ;;  %2682 = vmatprep.mubr.bf16.mxu0 %v15554_v46  ;;  %v15673_v45 = vld [vmem:[%s23060_s0 + $0x448] ss:$16 sps:$4 sm:$0xff]  }
 0x1ac   :  { %3548 = vmatprep.mubr.bf16.mxu1 %v15554_v46  ;;  %3910 = vmatpush1.bf16.msra.mxu0 %v15635_v57 }
 0x1ad   :  { %3911 = vmatprep.subr.bf16.mxu0 %v15646_v1 }
 0x1b0   :  { %3912 = vmatpush1.bf16.msra.mxu0 %v15644_v2 }
 0x1b1   :  { %3913 = vmatprep.subr.bf16.mxu0 %v15658_v8  ;;  %v15653_v8 = vld [vmem:[%s23060_s0 + $0x3cc] ss:$16 sps:$4 sm:$0xff]  }
 0x1b2   :  { %2683 = vmatmul.mubr.bf16.gmra.mrb[24].mxu0 %v15556_v47 }
 0x1b3   :  { %3549 = vmatmul.mubr.bf16.gmra.mrb[24].mxu1 %v15556_v47  ;;  %2692 = vmatprep.mubr.bf16.mxu0 %v15557_v48 }
 0x1b4   :  { %3558 = vmatprep.mubr.bf16.mxu1 %v15557_v48  ;;  %3914 = vmatpush1.bf16.msra.mxu0 %v15656_v7  ;;  %v15647_v48 = vld [vmem:[%s23060_s0 + $0x38c] ss:$16 sps:$4 sm:$0xff]  }
 0x1b5   :  { %3915 = vmatprep.subr.bf16.mxu0 %v15667_v15 }
 0x1b8   :  { %3916 = vmatpush1.bf16.msra.mxu0 %v15665_v16  ;;  %v15655_v16 = vld [vmem:[%s23060_s0 + $0x3c8] ss:$16 sps:$4 sm:$0xff]  }
 0x1b9   :  { %3917 = vmatprep.subr.bf16.mxu0 %v15679_v22 }
 0x1ba   :  { %2693 = vmatmul.mubr.bf16.gmra.mrb[28].mxu0 %v15559_v51 }
 0x1bb   :  { %3559 = vmatmul.mubr.bf16.gmra.mrb[28].mxu1 %v15559_v51  ;;  %2702 = vmatprep.mubr.bf16.mxu0 %v15563_v52 }
 0x1bc   :  { %3568 = vmatprep.mubr.bf16.mxu1 %v15563_v52  ;;  %3918 = vmatpush1.bf16.msra.mxu0 %v15677_v21 }
 0x1bd   :  { %3919 = vmatprep.subr.bf16.mxu0 %v15688_v29  ;;  %v15670_v29 = vld [vmem:[%s23060_s0 + $0x428] ss:$16 sps:$4 sm:$0xff]  }
 0x1c0   :  { %3920 = vmatpush1.bf16.msra.mxu0 %v15686_v30 }
 0x1c1   :  { %4322 = vmatprep.subr.bf16.mxu0 %v15697_v35 }
 0x1c2   :  { %2703 = vmatmul.mubr.bf16.gmra.mrb[32].mxu0 %v15565_v53 }
 0x1c3   :  { %3569 = vmatmul.mubr.bf16.gmra.mrb[32].mxu1 %v15565_v53  ;;  %2712 = vmatprep.mubr.bf16.mxu0 %v15566_v54 }
 0x1c4   :  { %3578 = vmatprep.mubr.bf16.mxu1 %v15566_v54 }
 0x1ca   :  { %2713 = vmatmul.mubr.bf16.gmra.mrb[36].mxu0 %v15568_v55 }
 0x1cb   :  { %3579 = vmatmul.mubr.bf16.gmra.mrb[36].mxu1 %v15568_v55  ;;  %2722 = vmatprep.mubr.bf16.mxu0 %v15569_v56 }
 0x1cc   :  { %3588 = vmatprep.mubr.bf16.mxu1 %v15569_v56  ;;  %v15649_v56 = vld [vmem:[%s23060_s0 + $0x388] ss:$16 sps:$4 sm:$0xff]  }
 0x1d2   :  { %2723 = vmatmul.mubr.bf16.gmra.mrb[40].mxu0 %v15571_v59 }
 0x1d3   :  { %3589 = vmatmul.mubr.bf16.gmra.mrb[40].mxu1 %v15571_v59  ;;  %2732 = vmatprep.mubr.bf16.mxu0 %v15575_v60 }
 0x1d4   :  { %3598 = vmatprep.mubr.bf16.mxu1 %v15575_v60  ;;  %v15650_v60 = vld [vmem:[%s23060_s0 + $0x3ac] ss:$16 sps:$4 sm:$0xff]  }
 0x1da   :  { %2733 = vmatmul.mubr.bf16.gmra.mrb[44].mxu0 %v15577_v61 }
 0x1db   :  { %3599 = vmatmul.mubr.bf16.gmra.mrb[44].mxu1 %v15577_v61  ;;  %2742 = vmatprep.mubr.bf16.mxu0 %v15578_v62 }
 0x1dc   :  { %3608 = vmatprep.mubr.bf16.mxu1 %v15578_v62 }
 0x1e2   :  { %2743 = vmatmul.mubr.bf16.gmra.mrb[48].mxu0 %v15580_v63 }
 0x1e3   :  { %3609 = vmatmul.mubr.bf16.gmra.mrb[48].mxu1 %v15580_v63  ;;  %2752 = vmatprep.mubr.bf16.mxu0 %v15584_v0 }
 0x1e4   :  { %3618 = vmatprep.mubr.bf16.mxu1 %v15584_v0 }
 0x1ea   :  { %2753 = vmatmul.mubr.bf16.gmra.mrb[52].mxu0 %v15586_v3 }
 0x1eb   :  { %3619 = vmatmul.mubr.bf16.gmra.mrb[52].mxu1 %v15586_v3  ;;  %2762 = vmatprep.mubr.bf16.mxu0 %v15587_v4 }
 0x1ec   :  { %3628 = vmatprep.mubr.bf16.mxu1 %v15587_v4  ;;  %v15652_v4 = vld [vmem:[%s23060_s0 + $0x3a8] ss:$16 sps:$4 sm:$0xff]  }
 0x1f2   :  { %2763 = vmatmul.mubr.bf16.gmra.mrb[56].mxu0 %v15589_v5 }
 0x1f3   :  { %3629 = vmatmul.mubr.bf16.gmra.mrb[56].mxu1 %v15589_v5  ;;  %2772 = vmatprep.mubr.bf16.mxu0 %v15590_v6 }
 0x1f4   :  { %3638 = vmatprep.mubr.bf16.mxu1 %v15590_v6 }
 0x1fa   :  { %2773 = vmatmul.mubr.bf16.gmra.mrb[60].mxu0 %v15592_v9 }
 0x1fb   :  { %3639 = vmatmul.mubr.bf16.gmra.mrb[60].mxu1 %v15592_v9  ;;  %2782 = vmatprep.mubr.bf16.mxu0 %v15596_v10 }
 0x1fc   :  { %3648 = vmatprep.mubr.bf16.mxu1 %v15596_v10 }
 0x202   :  { %2783 = vmatmul.mubr.bf16.gmra.mrb[64].mxu0 %v15598_v11 }
 0x203   :  { %3649 = vmatmul.mubr.bf16.gmra.mrb[64].mxu1 %v15598_v11  ;;  %2792 = vmatprep.mubr.bf16.mxu0 %v15599_v12 }
 0x204   :  { %3658 = vmatprep.mubr.bf16.mxu1 %v15599_v12 }
 0x20a   :  { %2793 = vmatmul.mubr.bf16.gmra.mrb[68].mxu0 %v15601_v13 }
 0x20b   :  { %3659 = vmatmul.mubr.bf16.gmra.mrb[68].mxu1 %v15601_v13  ;;  %2802 = vmatprep.mubr.bf16.mxu0 %v15605_v14 }
 0x20c   :  { %3668 = vmatprep.mubr.bf16.mxu1 %v15605_v14 }
 0x212   :  { %2803 = vmatmul.mubr.bf16.gmra.mrb[72].mxu0 %v15607_v17 }
 0x213   :  { %3669 = vmatmul.mubr.bf16.gmra.mrb[72].mxu1 %v15607_v17  ;;  %2812 = vmatprep.mubr.bf16.mxu0 %v15608_v18 }
 0x214   :  { %3678 = vmatprep.mubr.bf16.mxu1 %v15608_v18 }
 0x21a   :  { %2813 = vmatmul.mubr.bf16.gmra.mrb[76].mxu0 %v15610_v19 }
 0x21b   :  { %3679 = vmatmul.mubr.bf16.gmra.mrb[76].mxu1 %v15610_v19  ;;  %2822 = vmatprep.mubr.bf16.mxu0 %v15611_v20 }
 0x21c   :  { %3688 = vmatprep.mubr.bf16.mxu1 %v15611_v20  ;;  %v15659_v20 = vld [vmem:[%s23060_s0 + $0x3ec] ss:$16 sps:$4 sm:$0xff]  }
 0x222   :  { %2823 = vmatmul.mubr.bf16.gmra.mrb[80].mxu0 %v15613_v23 }
 0x223   :  { %3689 = vmatmul.mubr.bf16.gmra.mrb[80].mxu1 %v15613_v23  ;;  %2832 = vmatprep.mubr.bf16.mxu0 %v15617_v24 }
 0x224   :  { %3698 = vmatprep.mubr.bf16.mxu1 %v15617_v24 }
 0x22a   :  { %2833 = vmatmul.mubr.bf16.gmra.mrb[84].mxu0 %v15619_v25 }
 0x22b   :  { %3699 = vmatmul.mubr.bf16.gmra.mrb[84].mxu1 %v15619_v25  ;;  %2842 = vmatprep.mubr.bf16.mxu0 %v15620_v26 }
 0x22c   :  { %3708 = vmatprep.mubr.bf16.mxu1 %v15620_v26 }
 0x232   :  { %2843 = vmatmul.mubr.bf16.gmra.mrb[88].mxu0 %v15622_v27 }
 0x233   :  { %3709 = vmatmul.mubr.bf16.gmra.mrb[88].mxu1 %v15622_v27  ;;  %2852 = vmatprep.mubr.bf16.mxu0 %v15626_v28 }
 0x234   :  { %3718 = vmatprep.mubr.bf16.mxu1 %v15626_v28  ;;  %v15661_v28 = vld [vmem:[%s23060_s0 + $0x3e8] ss:$16 sps:$4 sm:$0xff]  }
 0x23a   :  { %2853 = vmatmul.mubr.bf16.gmra.mrb[92].mxu0 %v15628_v31 }
 0x23b   :  { %3719 = vmatmul.mubr.bf16.gmra.mrb[92].mxu1 %v15628_v31  ;;  %2862 = vmatprep.mubr.bf16.mxu0 %v15629_v32 }
 0x23c   :  { %3728 = vmatprep.mubr.bf16.mxu1 %v15629_v32  ;;  %v15662_v32 = vld [vmem:[%s23060_s0 + $0x40c] ss:$16 sps:$4 sm:$0xff]  }
 0x242   :  { %2863 = vmatmul.mubr.bf16.gmra.mrb[96].mxu0 %v15631_v33 }
 0x243   :  { %3729 = vmatmul.mubr.bf16.gmra.mrb[96].mxu1 %v15631_v33  ;;  %2872 = vmatprep.mubr.bf16.mxu0 %v15632_v34 }
 0x244   :  { %3738 = vmatprep.mubr.bf16.mxu1 %v15632_v34 }
 0x24a   :  { %2873 = vmatmul.mubr.bf16.gmra.mrb[100].mxu0 %v15634_v36 }
 0x24b   :  { %3739 = vmatmul.mubr.bf16.gmra.mrb[100].mxu1 %v15634_v36  ;;  %2882 = vmatprep.mubr.bf16.mxu0 %v15638_v37 }
 0x24c   :  { %3748 = vmatprep.mubr.bf16.mxu1 %v15638_v37 }
 0x252   :  { %2883 = vmatmul.mubr.bf16.gmra.mrb[104].mxu0 %v15640_v38 }
 0x253   :  { %3749 = vmatmul.mubr.bf16.gmra.mrb[104].mxu1 %v15640_v38  ;;  %2892 = vmatprep.mubr.bf16.mxu0 %v15641_v39 }
 0x254   :  { %3758 = vmatprep.mubr.bf16.mxu1 %v15641_v39 }
 0x255   :  { %v18093_v40 = vpop.f32.mrb[0].mxu0 }
 0x256   :  { %v18095_v41 = vpop.f32.mrb[0].mxu1  ;;  %v18097_v42 = vpop.f32.mrb[1].mxu0 }
 0x257   :  { %23275 = vst [vmem:[#allocation2_spill] sm:$0xff] %v18095_v41  ;;  %23276 = vst [vmem:[#allocation3_spill] sm:$0xff] %v18097_v42  ;;  %v18099_v43 = vpop.f32.mrb[1].mxu1  ;;  %v18106_v46 = vpop.f32.mrb[2].mxu0 }
 0x258   :  { %v18108_v47 = vpop.f32.mrb[2].mxu1  ;;  %v18113_v49 = vpop.f32.mrb[3].mxu0 }
 0x259   :  { %23277 = vst [vmem:[#allocation4_spill] sm:$0xff] %v18108_v47  ;;  %23278 = vst [vmem:[#allocation5_spill] sm:$0xff] %v18113_v49  ;;  %v18115_v50 = vpop.f32.mrb[3].mxu1 }
 0x25a   :  { %2893 = vmatmul.mubr.bf16.gmra.mrb[108].mxu0 %v15643_v44 }
 0x25b   :  { %3759 = vmatmul.mubr.bf16.gmra.mrb[108].mxu1 %v15643_v44  ;;  %2902 = vmatprep.mubr.bf16.mxu0 %v15647_v48  ;;  %v15664_v44 = vld [vmem:[%s23060_s0 + $0x408] ss:$16 sps:$4 sm:$0xff]  }
 0x25c   :  { %3768 = vmatprep.mubr.bf16.mxu1 %v15647_v48 }
 0x25d   :  { %v18119_v52 = vpop.f32.mrb[4].mxu0 }
 0x25e   :  { %v18121_v53 = vpop.f32.mrb[4].mxu1  ;;  %v18123_v54 = vpop.f32.mrb[5].mxu0 }
 0x25f   :  { %23279 = vst [vmem:[#allocation6_spill] sm:$0xff] %v18121_v53  ;;  %23280 = vst [vmem:[#allocation7_spill] sm:$0xff] %v18123_v54  ;;  %v18125_v55 = vpop.f32.mrb[5].mxu1  ;;  %v18132_v58 = vpop.f32.mrb[6].mxu0 }
 0x260   :  { %v18134_v59 = vpop.f32.mrb[6].mxu1  ;;  %v18139_v61 = vpop.f32.mrb[7].mxu0 }
 0x261   :  { %23281 = vst [vmem:[#allocation8_spill] sm:$0xff] %v18134_v59  ;;  %23282 = vst [vmem:[#allocation9_spill] sm:$0xff] %v18139_v61  ;;  %v18141_v62 = vpop.f32.mrb[7].mxu1 }
 0x262   :  { %2903 = vmatmul.mubr.bf16.gmra.mrb[112].mxu0 %v15649_v56 }
 0x263   :  { %3769 = vmatmul.mubr.bf16.gmra.mrb[112].mxu1 %v15649_v56  ;;  %2912 = vmatprep.mubr.bf16.mxu0 %v15650_v60 }
 0x264   :  { %3778 = vmatprep.mubr.bf16.mxu1 %v15650_v60 }
 0x265   :  { %v18145_v0 = vpop.f32.mrb[8].mxu0 }
 0x266   :  { %v18147_v1 = vpop.f32.mrb[8].mxu1  ;;  %v18149_v2 = vpop.f32.mrb[9].mxu0 }
 0x267   :  { %23283 = vst [vmem:[#allocation10_spill] sm:$0xff] %v18147_v1  ;;  %23284 = vst [vmem:[#allocation11_spill] sm:$0xff] %v18149_v2  ;;  %v18151_v3 = vpop.f32.mrb[9].mxu1  ;;  %v18158_v6 = vpop.f32.mrb[10].mxu0 }
 0x268   :  { %v18160_v7 = vpop.f32.mrb[10].mxu1  ;;  %v18165_v9 = vpop.f32.mrb[11].mxu0 }
 0x269   :  { %23285 = vst [vmem:[#allocation12_spill] sm:$0xff] %v18160_v7  ;;  %23286 = vst [vmem:[#allocation13_spill] sm:$0xff] %v18165_v9  ;;  %v18167_v10 = vpop.f32.mrb[11].mxu1 }
 0x26a   :  { %2913 = vmatmul.mubr.bf16.gmra.mrb[116].mxu0 %v15652_v4 }
 0x26b   :  { %3779 = vmatmul.mubr.bf16.gmra.mrb[116].mxu1 %v15652_v4  ;;  %2922 = vmatprep.mubr.bf16.mxu0 %v15653_v8  ;;  %v15668_v4 = vld [vmem:[%s23060_s0 + $0x42c] ss:$16 sps:$4 sm:$0xff]  }
 0x26c   :  { %3788 = vmatprep.mubr.bf16.mxu1 %v15653_v8 }
 0x26d   :  { %v18171_v12 = vpop.f32.mrb[12].mxu0 }
 0x26e   :  { %v18173_v13 = vpop.f32.mrb[12].mxu1  ;;  %v18175_v14 = vpop.f32.mrb[13].mxu0 }
 0x26f   :  { %23287 = vst [vmem:[#allocation14_spill] sm:$0xff] %v18173_v13  ;;  %23288 = vst [vmem:[#allocation15_spill] sm:$0xff] %v18175_v14  ;;  %v18177_v15 = vpop.f32.mrb[13].mxu1  ;;  %v18184_v18 = vpop.f32.mrb[14].mxu0 }
 0x270   :  { %v18186_v19 = vpop.f32.mrb[14].mxu1  ;;  %v18191_v21 = vpop.f32.mrb[15].mxu0 }
 0x271   :  { %23289 = vst [vmem:[#allocation16_spill] sm:$0xff] %v18186_v19  ;;  %23290 = vst [vmem:[#allocation17_spill] sm:$0xff] %v18191_v21  ;;  %v18193_v22 = vpop.f32.mrb[15].mxu1 }
 0x272   :  { %2923 = vmatmul.mubr.bf16.gmra.mrb[120].mxu0 %v15655_v16 }
 0x273   :  { %3789 = vmatmul.mubr.bf16.gmra.mrb[120].mxu1 %v15655_v16  ;;  %2932 = vmatprep.mubr.bf16.mxu0 %v15659_v20 }
 0x274   :  { %3798 = vmatprep.mubr.bf16.mxu1 %v15659_v20 }
 0x275   :  { %v18197_v24 = vpop.f32.mrb[16].mxu0 }
 0x276   :  { %v18199_v25 = vpop.f32.mrb[16].mxu1  ;;  %v18201_v26 = vpop.f32.mrb[17].mxu0 }
 0x277   :  { %23291 = vst [vmem:[#allocation18_spill] sm:$0xff] %v18199_v25  ;;  %23292 = vst [vmem:[#allocation19_spill] sm:$0xff] %v18201_v26  ;;  %v18203_v27 = vpop.f32.mrb[17].mxu1  ;;  %v18210_v30 = vpop.f32.mrb[18].mxu0 }
 0x278   :  { %v18212_v31 = vpop.f32.mrb[18].mxu1  ;;  %v18217_v33 = vpop.f32.mrb[19].mxu0 }
 0x279   :  { %23293 = vst [vmem:[#allocation20_spill] sm:$0xff] %v18212_v31  ;;  %23294 = vst [vmem:[#allocation21_spill] sm:$0xff] %v18217_v33  ;;  %v18219_v34 = vpop.f32.mrb[19].mxu1 }
 0x27a   :  { %2933 = vmatmul.mubr.bf16.gmra.mrb[124].mxu0 %v15661_v28 }
 0x27b   :  { %3799 = vmatmul.mubr.bf16.gmra.mrb[124].mxu1 %v15661_v28  ;;  %2942 = vmatprep.mubr.bf16.mxu0 %v15662_v32 }
 0x27c   :  { %3808 = vmatprep.mubr.bf16.mxu1 %v15662_v32 }
 0x27d   :  { %v18223_v36 = vpop.f32.mrb[20].mxu0 }
 0x27e   :  { %v18225_v37 = vpop.f32.mrb[20].mxu1  ;;  %v18227_v38 = vpop.f32.mrb[21].mxu0 }
 0x27f   :  { %23295 = vst [vmem:[#allocation22_spill] sm:$0xff] %v18225_v37  ;;  %23296 = vst [vmem:[#allocation23_spill] sm:$0xff] %v18227_v38  ;;  %v18229_v39 = vpop.f32.mrb[21].mxu1  ;;  %v18236_v56 = vpop.f32.mrb[22].mxu0 }
 0x280   :  { %v18238_v60 = vpop.f32.mrb[22].mxu1  ;;  %v18243_v8 = vpop.f32.mrb[23].mxu0 }
 0x281   :  { %23297 = vst [vmem:[#allocation24_spill] sm:$0xff] %v18238_v60  ;;  %23298 = vst [vmem:[#allocation25_spill] sm:$0xff] %v18243_v8  ;;  %v18245_v16 = vpop.f32.mrb[23].mxu1 }
 0x282   :  { %2943 = vmatmul.mubr.bf16.gmra.mrb[128].mxu0 %v15664_v44 }
 0x283   :  { %3809 = vmatmul.mubr.bf16.gmra.mrb[128].mxu1 %v15664_v44  ;;  %2952 = vmatprep.mubr.bf16.mxu0 %v15668_v4 }
 0x284   :  { %3818 = vmatprep.mubr.bf16.mxu1 %v15668_v4  ;;  %v15671_v4 = vld [vmem:[%s23060_s0 + $0x44c] ss:$16 sps:$4 sm:$0xff]  }
 0x285   :  { %v18249_v28 = vpop.f32.mrb[24].mxu0 }
 0x286   :  { %v18251_v32 = vpop.f32.mrb[24].mxu1  ;;  %v18253_v48 = vpop.f32.mrb[25].mxu0 }
 0x287   :  { %23299 = vst [vmem:[#allocation26_spill] sm:$0xff] %v18251_v32  ;;  %23300 = vst [vmem:[#allocation27_spill] sm:$0xff] %v18253_v48  ;;  %v18255_v35 = vpop.f32.mrb[25].mxu1  ;;  %v18262_v20 = vpop.f32.mrb[26].mxu0 }
 0x288   :  { %v18264_v44 = vpop.f32.mrb[26].mxu1  ;;  %v18269_v17 = vpop.f32.mrb[27].mxu0 }
 0x289   :  { %23301 = vst [vmem:[#allocation28_spill] sm:$0xff] %v18264_v44  ;;  %23302 = vst [vmem:[#allocation29_spill] sm:$0xff] %v18269_v17  ;;  %v18271_v11 = vpop.f32.mrb[27].mxu1 }
 0x28a   :  { %2953 = vmatmul.mubr.bf16.gmra.mrb[132].mxu0 %v15670_v29 }
 0x28b   :  { %3819 = vmatmul.mubr.bf16.gmra.mrb[132].mxu1 %v15670_v29  ;;  %2962 = vmatprep.mubr.bf16.mxu0 %v15671_v4 }
 0x28c   :  { %3828 = vmatprep.mubr.bf16.mxu1 %v15671_v4  ;;  %v15674_v4 = vld [vmem:[%s23060_s0 + $0x46c] ss:$16 sps:$4 sm:$0xff]  }
 0x28d   :  { %v18275_v23 = vpop.f32.mrb[28].mxu0 }
 0x28e   :  { %v18277_v63 = vpop.f32.mrb[28].mxu1  ;;  %v18279_v57 = vpop.f32.mrb[29].mxu0 }
 0x28f   :  { %23303 = vst [vmem:[#allocation30_spill] sm:$0xff] %v18277_v63  ;;  %23304 = vst [vmem:[#allocation31_spill] sm:$0xff] %v18279_v57  ;;  %v18281_v51 = vpop.f32.mrb[29].mxu1  ;;  %v18288_v5 = vpop.f32.mrb[30].mxu0 }
 0x290   :  { %v18290_v29 = vpop.f32.mrb[30].mxu1  ;;  %v18295_v63 = vpop.f32.mrb[31].mxu0 }
 0x291   :  { %23305 = vst [vmem:[#allocation32_spill] sm:$0xff] %v18290_v29  ;;  %23306 = vst [vmem:[#allocation33_spill] sm:$0xff] %v18295_v63  ;;  %v18297_v57 = vpop.f32.mrb[31].mxu1  ;;  %v15676_v63 = vld [vmem:[%s23060_s0 + $0x468] ss:$16 sps:$4 sm:$0xff]  }
 0x292   :  { %2963 = vmatmul.mubr.bf16.gmra.mrb[136].mxu0 %v15673_v45 }
 0x293   :  { %3829 = vmatmul.mubr.bf16.gmra.mrb[136].mxu1 %v15673_v45  ;;  %2972 = vmatprep.mubr.bf16.mxu0 %v15674_v4 }
 0x294   :  { %3838 = vmatprep.mubr.bf16.mxu1 %v15674_v4  ;;  %v15680_v4 = vld [vmem:[%s23060_s0 + $0x48c] ss:$16 sps:$4 sm:$0xff]  }
 0x295   :  { %v18301_v44 = vpop.f32.mrb[32].mxu0 }
 0x296   :  { %v18303_v32 = vpop.f32.mrb[32].mxu1  ;;  %v18305_v29 = vpop.f32.mrb[33].mxu0 }
 0x297   :  { %23307 = vst [vmem:[#allocation34_spill] sm:$0xff] %v18303_v32  ;;  %23308 = vst [vmem:[#allocation35_spill] sm:$0xff] %v18305_v29  ;;  %v18307_v48 = vpop.f32.mrb[33].mxu1  ;;  %v18314_v17 = vpop.f32.mrb[34].mxu0 }
 0x298   :  { %v18316_v45 = vpop.f32.mrb[34].mxu1  ;;  %v18321_v32 = vpop.f32.mrb[35].mxu0 }
 0x299   :  { %23309 = vst [vmem:[#allocation36_spill] sm:$0xff] %v18316_v45  ;;  %23310 = vst [vmem:[#allocation37_spill] sm:$0xff] %v18321_v32  ;;  %v18323_v29 = vpop.f32.mrb[35].mxu1  ;;  %v15682_v32 = vld [vmem:[%s23060_s0 + $0x488] ss:$16 sps:$4 sm:$0xff]  }
 0x29a   :  { %2973 = vmatmul.mubr.bf16.gmra.mrb[140].mxu0 %v15676_v63 }
 0x29b   :  { %3839 = vmatmul.mubr.bf16.gmra.mrb[140].mxu1 %v15676_v63  ;;  %2982 = vmatprep.mubr.bf16.mxu0 %v15680_v4 }
 0x29c   :  { %3848 = vmatprep.mubr.bf16.mxu1 %v15680_v4  ;;  %v15683_v4 = vld [vmem:[%s23060_s0 + $0x4ac] ss:$16 sps:$4 sm:$0xff]  }
 0x29d   :  { %v18327_v60 = vpop.f32.mrb[36].mxu0 }
 0x29e   :  { %v18329_v37 = vpop.f32.mrb[36].mxu1  ;;  %v18331_v45 = vpop.f32.mrb[37].mxu0 }
 0x29f   :  { %23311 = vst [vmem:[#allocation38_spill] sm:$0xff] %v18329_v37  ;;  %23312 = vst [vmem:[#allocation39_spill] sm:$0xff] %v18331_v45  ;;  %v18333_v38 = vpop.f32.mrb[37].mxu1  ;;  %v18340_v8 = vpop.f32.mrb[38].mxu0 }
 0x2a0   :  { %v18342_v63 = vpop.f32.mrb[38].mxu1  ;;  %v18347_v37 = vpop.f32.mrb[39].mxu0 }
 0x2a1   :  { %23313 = vst [vmem:[#allocation40_spill] sm:$0xff] %v18342_v63  ;;  %23314 = vst [vmem:[#allocation41_spill] sm:$0xff] %v18347_v37  ;;  %v18349_v45 = vpop.f32.mrb[39].mxu1  ;;  %v15685_v37 = vld [vmem:[%s23060_s0 + $0x4a8] ss:$16 sps:$4 sm:$0xff]  }
 0x2a2   :  { %2983 = vmatmul.mubr.bf16.gmra.mrb[144].mxu0 %v15682_v32 }
 0x2a3   :  { %3849 = vmatmul.mubr.bf16.gmra.mrb[144].mxu1 %v15682_v32  ;;  %2992 = vmatprep.mubr.bf16.mxu0 %v15683_v4 }
 0x2a4   :  { %3858 = vmatprep.mubr.bf16.mxu1 %v15683_v4  ;;  %v15689_v4 = vld [vmem:[%s23060_s0 + $0x4cc] ss:$16 sps:$4 sm:$0xff]  }
 0x2a5   :  { %v18353_v31 = vpop.f32.mrb[40].mxu0 }
 0x2a6   :  { %v18355_v25 = vpop.f32.mrb[40].mxu1  ;;  %v18357_v63 = vpop.f32.mrb[41].mxu0 }
 0x2a7   :  { %23315 = vst [vmem:[#allocation42_spill] sm:$0xff] %v18355_v25  ;;  %23316 = vst [vmem:[#allocation43_spill] sm:$0xff] %v18357_v63  ;;  %v18359_v26 = vpop.f32.mrb[41].mxu1  ;;  %v18366_v33 = vpop.f32.mrb[42].mxu0 }
 0x2a8   :  { %v18368_v32 = vpop.f32.mrb[42].mxu1  ;;  %v18373_v25 = vpop.f32.mrb[43].mxu0 }
 0x2a9   :  { %23317 = vst [vmem:[#allocation44_spill] sm:$0xff] %v18368_v32  ;;  %23318 = vst [vmem:[#allocation45_spill] sm:$0xff] %v18373_v25  ;;  %v18375_v63 = vpop.f32.mrb[43].mxu1  ;;  %v15691_v25 = vld [vmem:[%s23060_s0 + $0x4c8] ss:$16 sps:$4 sm:$0xff]  }
 0x2aa   :  { %2993 = vmatmul.mubr.bf16.gmra.mrb[148].mxu0 %v15685_v37 }
 0x2ab   :  { %3859 = vmatmul.mubr.bf16.gmra.mrb[148].mxu1 %v15685_v37  ;;  %3002 = vmatprep.mubr.bf16.mxu0 %v15689_v4 }
 0x2ac   :  { %3868 = vmatprep.mubr.bf16.mxu1 %v15689_v4  ;;  %v15692_v4 = vld [vmem:[%s23060_s0 + $0x4ec] ss:$16 sps:$4 sm:$0xff]  }
 0x2ad   :  { %v18379_v19 = vpop.f32.mrb[44].mxu0 }
 0x2ae   :  { %v18381_v13 = vpop.f32.mrb[44].mxu1  ;;  %v18383_v32 = vpop.f32.mrb[45].mxu0 }
 0x2af   :  { %23319 = vst [vmem:[#allocation46_spill] sm:$0xff] %v18381_v13  ;;  %23320 = vst [vmem:[#allocation47_spill] sm:$0xff] %v18383_v32  ;;  %v18385_v14 = vpop.f32.mrb[45].mxu1  ;;  %v18392_v21 = vpop.f32.mrb[46].mxu0 }
 0x2b0   :  { %v18394_v37 = vpop.f32.mrb[46].mxu1  ;;  %v18399_v13 = vpop.f32.mrb[47].mxu0 }
 0x2b1   :  { %23321 = vst [vmem:[#allocation48_spill] sm:$0xff] %v18394_v37  ;;  %23322 = vst [vmem:[#allocation49_spill] sm:$0xff] %v18399_v13  ;;  %v18401_v32 = vpop.f32.mrb[47].mxu1  ;;  %v15694_v13 = vld [vmem:[%s23060_s0 + $0x4e8] ss:$16 sps:$4 sm:$0xff]  }
 0x2b2   :  { %3003 = vmatmul.mubr.bf16.gmra.mrb[152].mxu0 %v15691_v25 }
 0x2b3   :  { %3869 = vmatmul.mubr.bf16.gmra.mrb[152].mxu1 %v15691_v25  ;;  %3012 = vmatprep.mubr.bf16.mxu0 %v15692_v4 }
 0x2b4   :  { %3878 = vmatprep.mubr.bf16.mxu1 %v15692_v4 }
 0x2b5   :  { %v18405_v7 = vpop.f32.mrb[48].mxu0 }
 0x2b6   :  { %v18407_v1 = vpop.f32.mrb[48].mxu1  ;;  %v18409_v37 = vpop.f32.mrb[49].mxu0 }
 0x2b7   :  { %23323 = vst [vmem:[#allocation50_spill] sm:$0xff] %v18407_v1  ;;  %23324 = vst [vmem:[#allocation51_spill] sm:$0xff] %v18409_v37  ;;  %v18411_v2 = vpop.f32.mrb[49].mxu1  ;;  %v18418_v9 = vpop.f32.mrb[50].mxu0  ;;  %v16971_v37 = vld [vmem:[%s23060_s0 + $0x4] ss:$16 sps:$4 sm:$0xff]  }
 0x2b8   :  { %23325 = vst [vmem:[#allocation52_spill] sm:$0xff] %v18411_v2  ;;  %23326 = vst [vmem:[#allocation53_spill] sm:$0xff] %v18418_v9  ;;  %v18420_v25 = vpop.f32.mrb[50].mxu1  ;;  %v18422_v4 = vpop.f32.mrb[51].mxu0 }
 0x2b9   :  { %23327 = vst [vmem:[#allocation54_spill] sm:$0xff] %v18420_v25  ;;  %23328 = vst [vmem:[#allocation55_spill] sm:$0xff] %v18422_v4  ;;  %v18424_v61 = vpop.f32.mrb[51].mxu1  ;;  %v16972_v4 = vld [vmem:[%s23060_s0] ss:$16 sps:$4 sm:$0xff]  }
 0x2ba   :  { %23329 = vst [vmem:[#allocation56_spill] sm:$0xff] %v18424_v61  ;;  %3013 = vmatmul.mubr.bf16.gmra.mrb[156].mxu0 %v15694_v13  ;;  %v23391_v61 = vmax.f32 %v18093_v40, %v18099_v43 }
 0x2bb   :  { %3879 = vmatmul.mubr.bf16.gmra.mrb[156].mxu1 %v15694_v13  ;;  %3921 = vmatprep.mubr.bf16.mxu0 %v16971_v37  ;;  %v15695_v13 = vld [vmem:[%s23059_s1 + $0x310] ss:$24 sps:$4 sm:$0xff]  }
 0x2bd   :  { %v18431_v53 = vpop.f32.mrb[52].mxu0 }
 0x2be   :  { %23330 = vst [vmem:[#allocation57_spill] sm:$0xff] %v18431_v53  ;;  %v18433_v59 = vpop.f32.mrb[52].mxu1  ;;  %v18435_v54 = vpop.f32.mrb[53].mxu0 }
 0x2bf   :  { %23331 = vst [vmem:[#allocation58_spill] sm:$0xff] %v18433_v59  ;;  %23332 = vst [vmem:[#allocation59_spill] sm:$0xff] %v18435_v54  ;;  %v18437_v25 = vpop.f32.mrb[53].mxu1  ;;  %v18441_v47 = vpop.f32.mrb[54].mxu0  ;;  %v15700_v59 = vld [vmem:[%s23059_s1 + $0x344] ss:$24 sps:$4 sm:$0xff]  }
 0x2c0   :  { %23333 = vst [vmem:[#allocation60_spill] sm:$0xff] %v18437_v25  ;;  %23334 = vst [vmem:[#allocation61_spill] sm:$0xff] %v18441_v47  ;;  %v18443_v1 = vpop.f32.mrb[54].mxu1  ;;  %v18448_v37 = vpop.f32.mrb[55].mxu0  ;;  %v15703_v54 = vld [vmem:[%s23059_s1 + $0x374] ss:$24 sps:$4 sm:$0xff]  }
 0x2c1   :  { %23335 = vst [vmem:[#allocation62_spill] sm:$0xff] %v18443_v1  ;;  %23336 = vst [vmem:[#allocation63_spill] sm:$0xff] %v18448_v37  ;;  %v18450_v49 = vpop.f32.mrb[55].mxu1  ;;  %v16973_v1 = vld [vmem:[%s23060_s0 + $0x24] ss:$16 sps:$4 sm:$0xff]  }
 0x2c2   :  { %23337 = vst [vmem:[#allocation64_spill] sm:$0xff] %v18450_v49  ;;  %3922 = vmatmul.mubr.bf16.vlgmr.msra.gmra.mrb[160].mxu0 %v16972_v4  ;;  %v15698_v37 = vld [vmem:[%s23059_s1 + $0x340] ss:$24 sps:$4 sm:$0xff]  }
 0x2c3   :  { %4323 = vmatpush1.bf16.msra.mxu0 %v15695_v13  ;;  %3931 = vmatprep.mubr.bf16.mxu0 %v16973_v1  ;;  %v15709_v1 = vld [vmem:[%s23059_s1 + $0x3d4] ss:$24 sps:$4 sm:$0xff]  }
 0x2c4   :  { %4324 = vmatprep.subr.bf16.mxu0 %v15700_v59  ;;  %v15701_v59 = vld [vmem:[%s23059_s1 + $0x370] ss:$24 sps:$4 sm:$0xff]  }
 0x2c5   :  { %v18469_v41 = vpop.f32.mrb[56].mxu0 }
 0x2c6   :  { %23338 = vst [vmem:[#allocation65_spill] sm:$0xff] %v18469_v41  ;;  %v18471_v42 = vpop.f32.mrb[56].mxu1  ;;  %v18473_v4 = vpop.f32.mrb[57].mxu0 }
 0x2c7   :  { %23339 = vst [vmem:[#allocation66_spill] sm:$0xff] %v18471_v42  ;;  %23340 = vst [vmem:[#allocation67_spill] sm:$0xff] %v18473_v4  ;;  %v18475_v13 = vpop.f32.mrb[57].mxu1  ;;  %v18479_v49 = vpop.f32.mrb[58].mxu0  ;;  %4325 = vmatpush1.bf16.msra.mxu0 %v15698_v37  ;;  %v15706_v42 = vld [vmem:[%s23059_s1 + $0x3a4] ss:$24 sps:$4 sm:$0xff]  }
 0x2c8   :  { %23341 = vst [vmem:[#allocation68_spill] sm:$0xff] %v18475_v13  ;;  %23342 = vst [vmem:[#allocation69_spill] sm:$0xff] %v18479_v49  ;;  %v18481_v47 = vpop.f32.mrb[58].mxu1  ;;  %v18486_v25 = vpop.f32.mrb[59].mxu0  ;;  %4326 = vmatprep.subr.bf16.mxu0 %v15703_v54  ;;  %v16974_v37 = vld [vmem:[%s23060_s0 + $0x20] ss:$16 sps:$4 sm:$0xff]  }
 0x2c9   :  { %23343 = vst [vmem:[#allocation70_spill] sm:$0xff] %v18481_v47  ;;  %23344 = vst [vmem:[#allocation71_spill] sm:$0xff] %v18486_v25  ;;  %v18488_v53 = vpop.f32.mrb[59].mxu1  ;;  %v16975_v47 = vld [vmem:[%s23060_s0 + $0x44] ss:$16 sps:$4 sm:$0xff]  }
 0x2ca   :  { %23345 = vst [vmem:[#allocation72_spill] sm:$0xff] %v18488_v53  ;;  %3932 = vmatmul.mubr.bf16.gmra.mrb[164].mxu0 %v16974_v37  ;;  %v15704_v54 = vld [vmem:[%s23059_s1 + $0x3a0] ss:$24 sps:$4 sm:$0xff]  }
 0x2cb   :  { %3941 = vmatprep.mubr.bf16.mxu0 %v16975_v47  ;;  %4327 = vmatpush1.bf16.msra.mxu0 %v15701_v59  ;;  %v15715_v47 = vld [vmem:[%s23059_s1 + $0x434] ss:$24 sps:$4 sm:$0xff]  }
 0x2cc   :  { %4328 = vmatprep.subr.bf16.mxu0 %v15706_v42  ;;  %v15707_v42 = vld [vmem:[%s23059_s1 + $0x3d0] ss:$24 sps:$4 sm:$0xff]  }
 0x2cd   :  { %v18507_v25 = vpop.f32.mrb[60].mxu0 }
 0x2ce   :  { %23346 = vst [vmem:[#allocation73_spill] sm:$0xff] %v18507_v25  ;;  %v18509_v4 = vpop.f32.mrb[60].mxu1  ;;  %v18511_v37 = vpop.f32.mrb[61].mxu0 }
 0x2cf   :  { %23347 = vst [vmem:[#allocation74_spill] sm:$0xff] %v18509_v4  ;;  %23348 = vst [vmem:[#allocation75_spill] sm:$0xff] %v18511_v37  ;;  %v18513_v53 = vpop.f32.mrb[61].mxu1  ;;  %v18517_v59 = vpop.f32.mrb[62].mxu0  ;;  %4329 = vmatpush1.bf16.msra.mxu0 %v15704_v54  ;;  %v15712_v4 = vld [vmem:[%s23059_s1 + $0x404] ss:$24 sps:$4 sm:$0xff]  }
 0x2d0   :  { %23349 = vst [vmem:[#allocation76_spill] sm:$0xff] %v18513_v53  ;;  %23350 = vst [vmem:[#allocation77_spill] sm:$0xff] %v18517_v59  ;;  %v18519_v49 = vpop.f32.mrb[62].mxu1  ;;  %v18524_v13 = vpop.f32.mrb[63].mxu0  ;;  %4330 = vmatprep.subr.bf16.mxu0 %v15709_v1  ;;  %v16976_v54 = vld [vmem:[%s23060_s0 + $0x40] ss:$16 sps:$4 sm:$0xff]  }
 0x2d1   :  { %23351 = vst [vmem:[#allocation78_spill] sm:$0xff] %v18519_v49  ;;  %23352 = vst [vmem:[#allocation79_spill] sm:$0xff] %v18524_v13  ;;  %v18526_v41 = vpop.f32.mrb[63].mxu1  ;;  %v16977_v49 = vld [vmem:[%s23060_s0 + $0x64] ss:$16 sps:$4 sm:$0xff]  }
 0x2d2   :  { %23353 = vst [vmem:[#allocation80_spill] sm:$0xff] %v18526_v41  ;;  %3942 = vmatmul.mubr.bf16.gmra.mrb[168].mxu0 %v16976_v54  ;;  %v15710_v1 = vld [vmem:[%s23059_s1 + $0x400] ss:$24 sps:$4 sm:$0xff]  }
 0x2d3   :  { %3951 = vmatprep.mubr.bf16.mxu0 %v16977_v49  ;;  %4331 = vmatpush1.bf16.msra.mxu0 %v15707_v42 }
 0x2d4   :  { %4332 = vmatprep.subr.bf16.mxu0 %v15712_v4  ;;  %v15713_v4 = vld [vmem:[%s23059_s1 + $0x430] ss:$24 sps:$4 sm:$0xff]  }
 0x2d5   :  { %v18545_v13 = vpop.f32.mrb[64].mxu0 }
 0x2d6   :  { %23354 = vst [vmem:[#allocation81_spill] sm:$0xff] %v18545_v13  ;;  %v18547_v37 = vpop.f32.mrb[64].mxu1  ;;  %v18549_v54 = vpop.f32.mrb[65].mxu0 }
 0x2d7   :  { %23355 = vst [vmem:[#allocation82_spill] sm:$0xff] %v18547_v37  ;;  %23356 = vst [vmem:[#allocation83_spill] sm:$0xff] %v18549_v54  ;;  %v18551_v41 = vpop.f32.mrb[65].mxu1  ;;  %v18555_v42 = vpop.f32.mrb[66].mxu0  ;;  %4333 = vmatpush1.bf16.msra.mxu0 %v15710_v1  ;;  %v15718_v37 = vld [vmem:[%s23059_s1 + $0x464] ss:$24 sps:$4 sm:$0xff]  }
 0x2d8   :  { %23357 = vst [vmem:[#allocation84_spill] sm:$0xff] %v18551_v41  ;;  %23358 = vst [vmem:[#allocation85_spill] sm:$0xff] %v18555_v42  ;;  %v18557_v59 = vpop.f32.mrb[66].mxu1  ;;  %v18562_v53 = vpop.f32.mrb[67].mxu0  ;;  %4334 = vmatprep.subr.bf16.mxu0 %v15715_v47  ;;  %v16978_v1 = vld [vmem:[%s23060_s0 + $0x60] ss:$16 sps:$4 sm:$0xff]  }
 0x2d9   :  { %23359 = vst [vmem:[#allocation86_spill] sm:$0xff] %v18557_v59  ;;  %23360 = vst [vmem:[#allocation87_spill] sm:$0xff] %v18562_v53  ;;  %v18564_v25 = vpop.f32.mrb[67].mxu1  ;;  %v16979_v59 = vld [vmem:[%s23060_s0 + $0x84] ss:$16 sps:$4 sm:$0xff]  }
 0x2da   :  { %23361 = vst [vmem:[#allocation88_spill] sm:$0xff] %v18564_v25  ;;  %3952 = vmatmul.mubr.bf16.gmra.mrb[172].mxu0 %v16978_v1  ;;  %v15716_v47 = vld [vmem:[%s23059_s1 + $0x460] ss:$24 sps:$4 sm:$0xff]   ;;  %v16981_v1 = vld [vmem:[%s23060_s0 + $0xa4] ss:$16 sps:$4 sm:$0xff]  }
 0x2db   :  { %3961 = vmatprep.mubr.bf16.mxu0 %v16979_v59  ;;  %4335 = vmatpush1.bf16.msra.mxu0 %v15713_v4 }
 0x2dc   :  { %4336 = vmatprep.subr.bf16.mxu0 %v15718_v37  ;;  %v16982_v37 = vld [vmem:[%s23060_s0 + $0xa0] ss:$16 sps:$4 sm:$0xff]  }
 0x2dd   :  { %v18580_v53 = vpop.f32.mrb[68].mxu0 }
 0x2de   :  { %23362 = vst [vmem:[#allocation89_spill] sm:$0xff] %v18580_v53  ;;  %v18582_v54 = vpop.f32.mrb[68].mxu1  ;;  %v18584_v49 = vpop.f32.mrb[69].mxu0 }
 0x2df   :  { %23363 = vst [vmem:[#allocation90_spill] sm:$0xff] %v18582_v54  ;;  %23364 = vst [vmem:[#allocation91_spill] sm:$0xff] %v18584_v49  ;;  %v18586_v25 = vpop.f32.mrb[69].mxu1  ;;  %v18590_v42 = vpop.f32.mrb[70].mxu0  ;;  %4337 = vmatpush1.bf16.msra.mxu0 %v15716_v47  ;;  %v16980_v54 = vld [vmem:[%s23060_s0 + $0x80] ss:$16 sps:$4 sm:$0xff]  }
 0x2e0   :  { %23365 = vst [vmem:[#allocation92_spill] sm:$0xff] %v18586_v25  ;;  %23366 = vst [vmem:[#allocation93_spill] sm:$0xff] %v18590_v42  ;;  %v18592_v59 = vpop.f32.mrb[70].mxu1  ;;  %v18594_v4 = vpop.f32.mrb[71].mxu0 }
 0x2e1   :  { %23367 = vst [vmem:[#allocation94_spill] sm:$0xff] %v18592_v59  ;;  %23368 = vst [vmem:[#allocation95_spill] sm:$0xff] %v18594_v4  ;;  %v18596_v41 = vpop.f32.mrb[71].mxu1 }
 0x2e2   :  { %23369 = vst [vmem:[#allocation96_spill] sm:$0xff] %v18596_v41  ;;  %3962 = vmatmul.mubr.bf16.gmra.mrb[176].mxu0 %v16980_v54  ;;  %v15719_v54 = vld [vmem:[%s23059_s1 + $0x490] ss:$24 sps:$4 sm:$0xff]  }
 0x2e3   :  { %3971 = vmatprep.mubr.bf16.mxu0 %v16981_v1  ;;  %v15721_v1 = vld [vmem:[%s23059_s1 + $0x494] ss:$24 sps:$4 sm:$0xff]  }
 0x2e4   :  { %4338 = vmatprep.subr.bf16.mxu0 %v15721_v1 }
 0x2e5   :  { %v18606_v49 = vpop.f32.mrb[72].mxu0  ;;  %4339 = vmatpush1.bf16.msra.mxu0 %v15719_v54 }
 0x2e6   :  { %23370 = vst [vmem:[#allocation97_spill] sm:$0xff] %v18606_v49  ;;  %v18608_v47 = vpop.f32.mrb[72].mxu1  ;;  %v18610_v59 = vpop.f32.mrb[73].mxu0 }
 0x2e7   :  { %23371 = vst [vmem:[#allocation98_spill] sm:$0xff] %v18608_v47  ;;  %23372 = vst [vmem:[#allocation99_spill] sm:$0xff] %v18610_v59  ;;  %v18612_v4 = vpop.f32.mrb[73].mxu1  ;;  %v18616_v41 = vpop.f32.mrb[74].mxu0 }
 0x2e8   :  { %23373 = vst [vmem:[#allocation100_spill] sm:$0xff] %v18612_v4  ;;  %23374 = vst [vmem:[#allocation101_spill] sm:$0xff] %v18616_v41  ;;  %v18618_v42 = vpop.f32.mrb[74].mxu1  ;;  %v18626_v47 = vpop.f32.mrb[75].mxu0  ;;  %v5117_v4 = vlaneseq }
 0x2e9   :  { %23375 = vst [vmem:[#allocation102_spill] sm:$0xff] %v18618_v42  ;;  %23376 = vst [vmem:[#allocation103_spill] sm:$0xff] %v18626_v47  ;;  %v18628_v59 = vpop.f32.mrb[75].mxu1  ;;  %v16983_v42 = vld [vmem:[%s23060_s0 + $0xc4] ss:$16 sps:$4 sm:$0xff]  }
 0x2ea   :  { %23377 = vst [vmem:[#allocation104_spill] sm:$0xff] %v18628_v59  ;;  %3972 = vmatmul.mubr.bf16.gmra.mrb[180].mxu0 %v16982_v37  ;;  %v18652_v41 = vshrl.u32 %v5117_v4, 7  ;;  %v16985_v4 = vld [vmem:[%s23060_s0 + $0xe4] ss:$16 sps:$4 sm:$0xff]  }
 0x2eb   :  { %3981 = vmatprep.mubr.bf16.mxu0 %v16983_v42 }
 0x2ec   :  { %23384 = vst [vmem:[#allocation111_spill] sm:$0xff] %v18652_v41  ;;  %v18664_v1 = vsub.s32 0, %v18652_v41 }
 0x2ed   :  { %v18638_v49 = vpop.f32.mrb[76].mxu0 }
 0x2ee   :  { %23378 = vst [vmem:[#allocation105_spill] sm:$0xff] %v18638_v49  ;;  %v18640_v47 = vpop.f32.mrb[76].mxu1  ;;  %v18642_v53 = vpop.f32.mrb[77].mxu0  ;;  %23387 = vst [vmem:[#allocation114_spill] sm:$0xff] %v18664_v1 }
 0x2ef   :  { %23379 = vst [vmem:[#allocation106_spill] sm:$0xff] %v18640_v47  ;;  %23380 = vst [vmem:[#allocation107_spill] sm:$0xff] %v18642_v53  ;;  %v18644_v25 = vpop.f32.mrb[77].mxu1  ;;  %v18648_v59 = vpop.f32.mrb[78].mxu0  ;;  %v16984_v53 = vld [vmem:[%s23060_s0 + $0xc0] ss:$16 sps:$4 sm:$0xff]  }
 0x2f0   :  { %23381 = vst [vmem:[#allocation108_spill] sm:$0xff] %v18644_v25  ;;  %23382 = vst [vmem:[#allocation109_spill] sm:$0xff] %v18648_v59  ;;  %v18650_v37 = vpop.f32.mrb[78].mxu1  ;;  %v18654_v42 = vpop.f32.mrb[79].mxu0 }
 0x2f1   :  { %23383 = vst [vmem:[#allocation110_spill] sm:$0xff] %v18650_v37  ;;  %23385 = vst [vmem:[#allocation112_spill] sm:$0xff] %v18654_v42  ;;  %v18656_v54 = vpop.f32.mrb[79].mxu1  ;;  %v5115_v37 = vld [vmem:[%s23061_s2] sm:$0x7] }
 0x2f2   :  { %23386 = vst [vmem:[#allocation113_spill] sm:$0xff] %v18656_v54  ;;  %3982 = vmatmul.mubr.bf16.gmra.mrb[184].mxu0 %v16984_v53  ;;  %v18677_v53 = vrot.slane %v5115_v37, %v18664_v1  ;;  %v23392_v37 = vmax.f32 %v18106_v46, %v18115_v50  ;;  %v16987_v1 = vld [vmem:[%s23060_s0 + $0x104] ss:$16 sps:$4 sm:$0xff]  }
 0x2f3   :  { %3991 = vmatprep.mubr.bf16.mxu0 %v16985_v4  ;;  %v15724_v46 = vld [vmem:[%s23059_s1 + $0x4c4] ss:$24 sps:$4 sm:$0xff]  }
 0x2f4   :  { %4340 = vmatprep.subr.bf16.mxu0 %v15724_v46  ;;  %v16989_v46 = vld [vmem:[%s23060_s0 + $0x124] ss:$16 sps:$4 sm:$0xff]  }
 0x2f5   :  { %v2824_v42 = vpop.f32.mrb[80].mxu0 }
 0x2f6   :  { %v18672_v25 = vpop.f32.mrb[80].mxu1  ;;  %v18674_v47 = vpop.f32.mrb[81].mxu0 }
 0x2f7   :  { %23388 = vst [vmem:[#allocation115_spill] sm:$0xff] %v18672_v25  ;;  %v3692_v54 = vpop.f32.mrb[81].mxu1  ;;  %v2828_v41 = vpop.f32.mrb[82].mxu0  ;;  %v16986_v25 = vld [vmem:[%s23060_s0 + $0xe0] ss:$16 sps:$4 sm:$0xff]  }
 0x2f8   :  { %v4875_v59 = vmax.f32 %v2824_v42, %v3692_v54  ;;  %v18679_v49 = vpop.f32.mrb[82].mxu1  ;;  %v18681_v13 = vpop.f32.mrb[83].mxu0 }
 0x2f9   :  { %23389 = vst [vmem:[#allocation116_spill] sm:$0xff] %v18679_v49  ;;  %23390 = vst [vmem:[#allocation117_spill] sm:$0xff] %v18681_v13  ;;  %v3696_v4 = vpop.f32.mrb[83].mxu1 }
 0x2fa   :  { %v4995_v9 = vmax.f32 %v23391_v61, %v4875_v59  ;;  %v4878_v2 = vmax.f32 %v2828_v41, %v3696_v4  ;;  %3992 = vmatmul.mubr.bf16.gmra.mrb[188].mxu0 %v16986_v25  ;;  %v15722_v61 = vld [vmem:[%s23059_s1 + $0x4c0] ss:$24 sps:$4 sm:$0xff]  }
 0x2fb   :  { %4001 = vmatprep.mubr.bf16.mxu0 %v16987_v1  ;;  %4341 = vmatpush1.bf16.msra.mxu0 %v15722_v61 }
 0x2fc   :  { %v5132_v42 = vadd.f32 %v18677_v53, %v4995_v9  ;;  %v4998_v54 = vmax.f32 %v23392_v37, %v4878_v2 }
 0x2fd   :  { %v2834_v43 = vpop.f32.mrb[84].mxu0 }
 0x2fe   :  { %v5135_v40 = vadd.f32 %v18677_v53, %v4998_v54  ;;  %v18697_v41 = vpop.f32.mrb[84].mxu1  ;;  %v18702_v25 = vpop.f32.mrb[85].mxu0  ;;  %v5252_v50 = vmax.f32 %v5132_v42, 0.0  ;;  %v16988_v42 = vld [vmem:[%s23060_s0 + $0x100] ss:$16 sps:$4 sm:$0xff]  }
 0x2ff   :  { %23393 = vst [vmem:[#allocation118_spill] sm:$0xff] %v18697_v41  ;;  %23394 = vst [vmem:[#allocation119_spill] sm:$0xff] %v18702_v25  ;;  %v3702_v9 = vpop.f32.mrb[85].mxu1  ;;  %v2838_v1 = vpop.f32.mrb[86].mxu0  ;;  %v23396_v25 = vmax.f32 %v18119_v52, %v18125_v55 }
 0x300   :  { %v5255_v2 = vmax.f32 %v5135_v40, 0.0  ;;  %v4881_v59 = vmax.f32 %v2834_v43, %v3702_v9  ;;  %v18707_v4 = vpop.f32.mrb[86].mxu1  ;;  %v18709_v37 = vpop.f32.mrb[87].mxu0  ;;  %v23397_v43 = vmax.f32 %v18132_v58, %v18141_v62 }
 0x301   :  { %v3706_v54 = vpop.f32.mrb[87].mxu1 }
 0x302   :  { %v18711_v41 = vpack.c.bf16 %v5255_v2, %v5252_v50  ;;  %v5001_v49 = vmax.f32 %v23396_v25, %v4881_v59  ;;  %v4884_v13 = vmax.f32 %v2838_v1, %v3706_v54  ;;  %4002 = vmatmul.mubr.bf16.gmra.mrb[192].mxu0 %v16988_v42 }
 0x303   :  { %4011 = vmatprep.mubr.bf16.mxu0 %v16989_v46  ;;  %v16990_v46 = vld [vmem:[%s23060_s0 + $0x120] ss:$16 sps:$4 sm:$0xff]  }
 0x304   :  { %23395 = vst [vmem:[#allocation120_spill] sm:$0xff] %v18711_v41  ;;  %v5138_v40 = vadd.f32 %v18677_v53, %v5001_v49  ;;  %v5004_v9 = vmax.f32 %v23397_v43, %v4884_v13  ;;  %v23398_v13 = vmax.f32 %v18145_v0, %v18151_v3 }
 0x305   :  { %v2844_v55 = vpop.f32.mrb[88].mxu0 }
 0x306   :  { %v5141_v52 = vadd.f32 %v18677_v53, %v5004_v9  ;;  %v18727_v61 = vpop.f32.mrb[88].mxu1  ;;  %v18729_v25 = vpop.f32.mrb[89].mxu0  ;;  %v5258_v2 = vmax.f32 %v5138_v40, 0.0 }
 0x307   :  { %v3712_v50 = vpop.f32.mrb[89].mxu1  ;;  %v2848_v1 = vpop.f32.mrb[90].mxu0 }
 0x308   :  { %v5261_v59 = vmax.f32 %v5141_v52, 0.0  ;;  %v4887_v49 = vmax.f32 %v2844_v55, %v3712_v50  ;;  %v18731_v54 = vpop.f32.mrb[90].mxu1  ;;  %v18733_v58 = vpop.f32.mrb[91].mxu0  ;;  %v23400_v52 = vmax.f32 %v18158_v6, %v18167_v10  ;;  %v16991_v50 = vld [vmem:[%s23060_s0 + $0x144] ss:$16 sps:$4 sm:$0xff]  }
 0x309   :  { %v3716_v62 = vpop.f32.mrb[91].mxu1  ;;  %v15725_v6 = vld [vmem:[%s23059_s1 + $0x4f0] ss:$24 sps:$4 sm:$0xff]  }
 0x30a   :  { %v5007_v42 = vmax.f32 %v23398_v13, %v4887_v49  ;;  %v4890_v43 = vmax.f32 %v2848_v1, %v3716_v62  ;;  %v18738_v9 = vpack.c.bf16 %v5261_v59, %v5258_v2  ;;  %4012 = vmatmul.mubr.bf16.gmra.mrb[196].mxu0 %v16990_v46 }
 0x30b   :  { %4021 = vmatprep.mubr.bf16.mxu0 %v16991_v50 }
 0x30c   :  { %23399 = vst [vmem:[#allocation121_spill] sm:$0xff] %v18738_v9  ;;  %v5144_v40 = vadd.f32 %v18677_v53, %v5007_v42  ;;  %v5010_v55 = vmax.f32 %v23400_v52, %v4890_v43  ;;  %v15727_v52 = vld [vmem:[%s23059_s1 + $0x4f4] ss:$24 sps:$4 sm:$0xff]   ;;  %v23403_v9 = vmax.f32 %v18184_v18, %v18193_v22 }
 0x30d   :  { %v2854_v3 = vpop.f32.mrb[92].mxu0  ;;  %4342 = vmatprep.subr.bf16.mxu0 %v15727_v52 }
 0x30e   :  { %v5147_v0 = vadd.f32 %v18677_v53, %v5010_v55  ;;  %v18751_v2 = vpop.f32.mrb[92].mxu1  ;;  %v18753_v59 = vpop.f32.mrb[93].mxu0  ;;  %v5264_v1 = vmax.f32 %v5144_v40, 0.0  ;;  %v23401_v55 = vmax.f32 %v18171_v12, %v18177_v15  ;;  %v16993_v12 = vld [vmem:[%s23060_s0 + $0x164] ss:$16 sps:$4 sm:$0xff]   ;;  %4343 = vmatpush1.bf16.msra.mxu0 %v15725_v6  ;;  %v23406_v6 = vmax.f32 %v18197_v24, %v18203_v27 }
 0x30f   :  { %v3722_v49 = vpop.f32.mrb[93].mxu1  ;;  %v2858_v42 = vpop.f32.mrb[94].mxu0  ;;  %v23408_v24 = vmax.f32 %v18210_v30, %v18219_v34 }
 0x310   :  { %v5267_v62 = vmax.f32 %v5147_v0, 0.0  ;;  %v4893_v13 = vmax.f32 %v2854_v3, %v3722_v49  ;;  %v18755_v46 = vpop.f32.mrb[94].mxu1  ;;  %v18760_v10 = vpop.f32.mrb[95].mxu0  ;;  %v16992_v3 = vld [vmem:[%s23060_s0 + $0x140] ss:$16 sps:$4 sm:$0xff]  }
 0x311   :  { %v3726_v43 = vpop.f32.mrb[95].mxu1 }
 0x312   :  { %v5013_v40 = vmax.f32 %v23401_v55, %v4893_v13  ;;  %v4896_v50 = vmax.f32 %v2858_v42, %v3726_v43  ;;  %v18768_v0 = vpack.c.bf16 %v5267_v62, %v5264_v1  ;;  %4022 = vmatmul.mubr.bf16.gmra.mrb[200].mxu0 %v16992_v3 }
 0x313   :  { %4031 = vmatprep.mubr.bf16.mxu0 %v16993_v12  ;;  %v16994_v12 = vld [vmem:[%s23060_s0 + $0x160] ss:$16 sps:$4 sm:$0xff]  }
 0x314   :  { %23402 = vst [vmem:[#allocation122_spill] sm:$0xff] %v18768_v0  ;;  %v5150_v49 = vadd.f32 %v18677_v53, %v5013_v40  ;;  %v5016_v41 = vmax.f32 %v23403_v9, %v4896_v50  ;;  %v16998_v0 = vld [vmem:[%s23060_s0 + $0x1a0] ss:$16 sps:$4 sm:$0xff]  }
 0x315   :  { %v2864_v1 = vpop.f32.mrb[96].mxu0 }
 0x316   :  { %v5153_v15 = vadd.f32 %v18677_v53, %v5016_v41  ;;  %v18781_v62 = vpop.f32.mrb[96].mxu1  ;;  %v18783_v13 = vpop.f32.mrb[97].mxu0  ;;  %v5270_v43 = vmax.f32 %v5150_v49, 0.0  ;;  %v15728_v49 = vld [vmem:[%s23059_s1 + $0x520] ss:$24 sps:$4 sm:$0xff]  }
 0x317   :  { %v3732_v42 = vpop.f32.mrb[97].mxu1  ;;  %v2868_v40 = vpop.f32.mrb[98].mxu0 }
 0x318   :  { %v5273_v52 = vmax.f32 %v5153_v15, 0.0  ;;  %v4899_v55 = vmax.f32 %v2864_v1, %v3732_v42  ;;  %v18785_v18 = vpop.f32.mrb[98].mxu1  ;;  %v18787_v22 = vpop.f32.mrb[99].mxu0  ;;  %v15730_v15 = vld [vmem:[%s23059_s1 + $0x524] ss:$24 sps:$4 sm:$0xff]  }
 0x319   :  { %23404 = vst [vmem:[#allocation123_spill] sm:$0xff] %v18785_v18  ;;  %23405 = vst [vmem:[#allocation124_spill] sm:$0xff] %v18787_v22  ;;  %v3736_v9 = vpop.f32.mrb[99].mxu1  ;;  %v16995_v42 = vld [vmem:[%s23060_s0 + $0x184] ss:$16 sps:$4 sm:$0xff]   ;;  %4344 = vmatprep.subr.bf16.mxu0 %v15730_v15  ;;  %v23414_v15 = vmax.f32 %v18223_v36, %v18229_v39 }
 0x31a   :  { %v5019_v50 = vmax.f32 %v23406_v6, %v4899_v55  ;;  %v4902_v41 = vmax.f32 %v2868_v40, %v3736_v9  ;;  %v18792_v3 = vpack.c.bf16 %v5273_v52, %v5270_v43  ;;  %4032 = vmatmul.mubr.bf16.gmra.mrb[204].mxu0 %v16994_v12  ;;  %v23696_v22 = vld [vmem:[#allocation116_spill] sm:$0xff] }
 0x31b   :  { %4041 = vmatprep.mubr.bf16.mxu0 %v16995_v42  ;;  %4345 = vmatpush1.bf16.msra.mxu0 %v15728_v49  ;;  %v16996_v49 = vld [vmem:[%s23060_s0 + $0x180] ss:$16 sps:$4 sm:$0xff]  }
 0x31c   :  { %23407 = vst [vmem:[#allocation125_spill] sm:$0xff] %v18792_v3  ;;  %v5156_v1 = vadd.f32 %v18677_v53, %v5019_v50  ;;  %v5022_v27 = vmax.f32 %v23408_v24, %v4902_v41 }
 0x31d   :  { %v2874_v52 = vpop.f32.mrb[100].mxu0 }
 0x31e   :  { %v5159_v43 = vadd.f32 %v18677_v53, %v5022_v27  ;;  %v18811_v55 = vpop.f32.mrb[100].mxu1  ;;  %v18813_v40 = vpop.f32.mrb[101].mxu0  ;;  %v5276_v6 = vmax.f32 %v5156_v1, 0.0 }
 0x31f   :  { %23409 = vst [vmem:[#allocation126_spill] sm:$0xff] %v18811_v55  ;;  %23410 = vst [vmem:[#allocation127_spill] sm:$0xff] %v18813_v40  ;;  %v3742_v9 = vpop.f32.mrb[101].mxu1  ;;  %v2878_v30 = vpop.f32.mrb[102].mxu0 }
 0x320   :  { %v5279_v50 = vmax.f32 %v5159_v43, 0.0  ;;  %v4905_v12 = vmax.f32 %v2874_v52, %v3742_v9  ;;  %v18815_v34 = vpop.f32.mrb[102].mxu1  ;;  %v18817_v41 = vpop.f32.mrb[103].mxu0  ;;  %v23415_v43 = vmax.f32 %v18236_v56, %v18245_v16  ;;  %v16997_v9 = vld [vmem:[%s23060_s0 + $0x1a4] ss:$16 sps:$4 sm:$0xff]  }
 0x321   :  { %23411 = vst [vmem:[#allocation128_spill] sm:$0xff] %v18815_v34  ;;  %23412 = vst [vmem:[#allocation129_spill] sm:$0xff] %v18817_v41  ;;  %v3746_v24 = vpop.f32.mrb[103].mxu1 }
 0x322   :  { %v18819_v42 = vpack.c.bf16 %v5279_v50, %v5276_v6  ;;  %v5025_v27 = vmax.f32 %v23414_v15, %v4905_v12  ;;  %v4908_v3 = vmax.f32 %v2878_v30, %v3746_v24  ;;  %4042 = vmatmul.mubr.bf16.gmra.mrb[208].mxu0 %v16996_v49 }
 0x323   :  { %4051 = vmatprep.mubr.bf16.mxu0 %v16997_v9 }
 0x324   :  { %23413 = vst [vmem:[#allocation130_spill] sm:$0xff] %v18819_v42  ;;  %v5162_v1 = vadd.f32 %v18677_v53, %v5025_v27  ;;  %v5028_v52 = vmax.f32 %v23415_v43, %v4908_v3  ;;  %v23420_v3 = vmax.f32 %v18249_v28, %v18255_v35  ;;  %v17114_v42 = vld [vmem:[%s23060_s0 + $0x3e8] ss:$16 sps:$4 sm:$0xff]  }
 0x325   :  { %v2884_v39 = vpop.f32.mrb[104].mxu0 }
 0x326   :  { %v5165_v36 = vadd.f32 %v18677_v53, %v5028_v52  ;;  %v18835_v6 = vpop.f32.mrb[104].mxu1  ;;  %v18837_v50 = vpop.f32.mrb[105].mxu0  ;;  %v5282_v30 = vmax.f32 %v5162_v1, 0.0 }
 0x327   :  { %23416 = vst [vmem:[#allocation131_spill] sm:$0xff] %v18835_v6  ;;  %23417 = vst [vmem:[#allocation132_spill] sm:$0xff] %v18837_v50  ;;  %v3752_v12 = vpop.f32.mrb[105].mxu1  ;;  %v2888_v27 = vpop.f32.mrb[106].mxu0 }
 0x328   :  { %v5285_v24 = vmax.f32 %v5165_v36, 0.0  ;;  %v4911_v15 = vmax.f32 %v2884_v39, %v3752_v12  ;;  %v18839_v49 = vpop.f32.mrb[106].mxu1  ;;  %v18841_v56 = vpop.f32.mrb[107].mxu0  ;;  %v23422_v36 = vmax.f32 %v18262_v20, %v18271_v11  ;;  %v16999_v12 = vld [vmem:[%s23060_s0 + $0x1c4] ss:$16 sps:$4 sm:$0xff]  }
 0x329   :  { %23418 = vst [vmem:[#allocation133_spill] sm:$0xff] %v18839_v49  ;;  %23419 = vst [vmem:[#allocation134_spill] sm:$0xff] %v18841_v56  ;;  %v3756_v16 = vpop.f32.mrb[107].mxu1  ;;  %v15785_v56 = vld [vmem:[%s23062_s3 + $0x4c0] ss:$16 sps:$4 sm:$0xff]  }
 0x32a   :  { %v5031_v43 = vmax.f32 %v23420_v3, %v4911_v15  ;;  %v4914_v52 = vmax.f32 %v2888_v27, %v3756_v16  ;;  %v18846_v9 = vpack.c.bf16 %v5285_v24, %v5282_v30  ;;  %4052 = vmatmul.mubr.bf16.gmra.mrb[212].mxu0 %v16998_v0 }
 0x32b   :  { %4061 = vmatprep.mubr.bf16.mxu0 %v16999_v12 }
 0x32c   :  { %23421 = vst [vmem:[#allocation135_spill] sm:$0xff] %v18846_v9  ;;  %v5168_v1 = vadd.f32 %v18677_v53, %v5031_v43  ;;  %v5034_v39 = vmax.f32 %v23422_v36, %v4914_v52  ;;  %v23427_v52 = vmax.f32 %v18275_v23, %v18281_v51  ;;  %v23429_v51 = vmax.f32 %v18288_v5, %v18297_v57 }
 0x32d   :  { %v2894_v28 = vpop.f32.mrb[108].mxu0 }
 0x32e   :  { %v5171_v35 = vadd.f32 %v18677_v53, %v5034_v39  ;;  %v18859_v30 = vpop.f32.mrb[108].mxu1  ;;  %v18861_v24 = vpop.f32.mrb[109].mxu0  ;;  %v5288_v0 = vmax.f32 %v5168_v1, 0.0  ;;  %v15731_v1 = vld [vmem:[%s23059_s1 + $0x550] ss:$24 sps:$4 sm:$0xff]  }
 0x32f   :  { %23423 = vst [vmem:[#allocation136_spill] sm:$0xff] %v18859_v30  ;;  %23424 = vst [vmem:[#allocation137_spill] sm:$0xff] %v18861_v24  ;;  %v3762_v15 = vpop.f32.mrb[109].mxu1  ;;  %v2898_v3 = vpop.f32.mrb[110].mxu0  ;;  %v17000_v30 = vld [vmem:[%s23060_s0 + $0x1c0] ss:$16 sps:$4 sm:$0xff]  }
 0x330   :  { %v5291_v27 = vmax.f32 %v5171_v35, 0.0  ;;  %v4917_v16 = vmax.f32 %v2894_v28, %v3762_v15  ;;  %v18863_v43 = vpop.f32.mrb[110].mxu1  ;;  %v18865_v11 = vpop.f32.mrb[111].mxu0  ;;  %v15733_v35 = vld [vmem:[%s23059_s1 + $0x554] ss:$24 sps:$4 sm:$0xff]  }
 0x331   :  { %23425 = vst [vmem:[#allocation138_spill] sm:$0xff] %v18863_v43  ;;  %23426 = vst [vmem:[#allocation139_spill] sm:$0xff] %v18865_v11  ;;  %v3766_v20 = vpop.f32.mrb[111].mxu1  ;;  %v17001_v15 = vld [vmem:[%s23060_s0 + $0x1e4] ss:$16 sps:$4 sm:$0xff]   ;;  %4346 = vmatprep.subr.bf16.mxu0 %v15733_v35  ;;  %v23434_v35 = vmax.f32 %v18301_v44, %v18307_v48  ;;  %v23563_v11 = vld [vmem:[#allocation19_spill] sm:$0xff] }
 0x332   :  { %v5037_v36 = vmax.f32 %v23427_v52, %v4917_v16  ;;  %v4920_v39 = vmax.f32 %v2898_v3, %v3766_v20  ;;  %v18870_v12 = vpack.c.bf16 %v5291_v27, %v5288_v0  ;;  %4062 = vmatmul.mubr.bf16.gmra.mrb[216].mxu0 %v17000_v30  ;;  %v17112_v43 = vld [vmem:[%s23060_s0 + $0x3c8] ss:$16 sps:$4 sm:$0xff]  }
 0x333   :  { %4071 = vmatprep.mubr.bf16.mxu0 %v17001_v15  ;;  %4347 = vmatpush1.bf16.msra.mxu0 %v15731_v1  ;;  %v17002_v1 = vld [vmem:[%s23060_s0 + $0x1e0] ss:$16 sps:$4 sm:$0xff]  }
 0x334   :  { %23428 = vst [vmem:[#allocation140_spill] sm:$0xff] %v18870_v12  ;;  %v5174_v28 = vadd.f32 %v18677_v53, %v5037_v36  ;;  %v5040_v23 = vmax.f32 %v23429_v51, %v4920_v39 }
 0x335   :  { %v2904_v0 = vpop.f32.mrb[112].mxu0 }
 0x336   :  { %v5177_v30 = vadd.f32 %v18677_v53, %v5040_v23  ;;  %v18889_v27 = vpop.f32.mrb[112].mxu1  ;;  %v18891_v16 = vpop.f32.mrb[113].mxu0  ;;  %v5294_v20 = vmax.f32 %v5174_v28, 0.0 }
 0x337   :  { %23430 = vst [vmem:[#allocation141_spill] sm:$0xff] %v18889_v27  ;;  %23431 = vst [vmem:[#allocation142_spill] sm:$0xff] %v18891_v16  ;;  %v3772_v3 = vpop.f32.mrb[113].mxu1  ;;  %v2908_v57 = vpop.f32.mrb[114].mxu0 }
 0x338   :  { %v5297_v52 = vmax.f32 %v5177_v30, 0.0  ;;  %v4923_v36 = vmax.f32 %v2904_v0, %v3772_v3  ;;  %v18893_v5 = vpop.f32.mrb[114].mxu1  ;;  %v18895_v39 = vpop.f32.mrb[115].mxu0  ;;  %v23436_v30 = vmax.f32 %v18314_v17, %v18323_v29  ;;  %v17003_v3 = vld [vmem:[%s23060_s0 + $0x204] ss:$16 sps:$4 sm:$0xff]  }
 0x339   :  { %23432 = vst [vmem:[#allocation143_spill] sm:$0xff] %v18893_v5  ;;  %23433 = vst [vmem:[#allocation144_spill] sm:$0xff] %v18895_v39  ;;  %v3776_v51 = vpop.f32.mrb[115].mxu1 }
 0x33a   :  { %v5043_v23 = vmax.f32 %v23434_v35, %v4923_v36  ;;  %v4926_v15 = vmax.f32 %v2908_v57, %v3776_v51  ;;  %v18900_v12 = vpack.c.bf16 %v5297_v52, %v5294_v20  ;;  %4072 = vmatmul.mubr.bf16.gmra.mrb[220].mxu0 %v17002_v1 }
 0x33b   :  { %4081 = vmatprep.mubr.bf16.mxu0 %v17003_v3 }
 0x33c   :  { %23435 = vst [vmem:[#allocation145_spill] sm:$0xff] %v18900_v12  ;;  %v5180_v28 = vadd.f32 %v18677_v53, %v5043_v23  ;;  %v5046_v0 = vmax.f32 %v23436_v30, %v4926_v15  ;;  %v23442_v30 = vmax.f32 %v18327_v60, %v18333_v38  ;;  %v23443_v38 = vmax.f32 %v18340_v8, %v18349_v45  ;;  %v17113_v12 = vld [vmem:[%s23060_s0 + $0x3ec] ss:$16 sps:$4 sm:$0xff]  }
 0x33d   :  { %v2914_v44 = vpop.f32.mrb[116].mxu0 }
 0x33e   :  { %v5183_v48 = vadd.f32 %v18677_v53, %v5046_v0  ;;  %v18913_v20 = vpop.f32.mrb[116].mxu1  ;;  %v18915_v52 = vpop.f32.mrb[117].mxu0  ;;  %v5300_v57 = vmax.f32 %v5180_v28, 0.0  ;;  %v15734_v28 = vld [vmem:[%s23059_s1 + $0x580] ss:$24 sps:$4 sm:$0xff]  }
 0x33f   :  { %23437 = vst [vmem:[#allocation146_spill] sm:$0xff] %v18913_v20  ;;  %23438 = vst [vmem:[#allocation147_spill] sm:$0xff] %v18915_v52  ;;  %v3782_v36 = vpop.f32.mrb[117].mxu1  ;;  %v2918_v23 = vpop.f32.mrb[118].mxu0  ;;  %v17004_v20 = vld [vmem:[%s23060_s0 + $0x200] ss:$16 sps:$4 sm:$0xff]  }
 0x340   :  { %v5303_v51 = vmax.f32 %v5183_v48, 0.0  ;;  %v4929_v35 = vmax.f32 %v2914_v44, %v3782_v36  ;;  %v18917_v1 = vpop.f32.mrb[118].mxu1  ;;  %v18919_v17 = vpop.f32.mrb[119].mxu0  ;;  %v15736_v48 = vld [vmem:[%s23059_s1 + $0x584] ss:$24 sps:$4 sm:$0xff]   ;;  %v23558_v52 = vld [vmem:[#allocation15_spill] sm:$0xff] }
 0x341   :  { %23439 = vst [vmem:[#allocation148_spill] sm:$0xff] %v18917_v1  ;;  %23440 = vst [vmem:[#allocation149_spill] sm:$0xff] %v18919_v17  ;;  %v3786_v29 = vpop.f32.mrb[119].mxu1  ;;  %v17005_v36 = vld [vmem:[%s23060_s0 + $0x224] ss:$16 sps:$4 sm:$0xff]   ;;  %4348 = vmatprep.subr.bf16.mxu0 %v15736_v48  ;;  %v23448_v48 = vmax.f32 %v18353_v31, %v18359_v26 }
 0x342   :  { %v18921_v15 = vpack.c.bf16 %v5303_v51, %v5300_v57  ;;  %v5049_v0 = vmax.f32 %v23442_v30, %v4929_v35  ;;  %v4932_v3 = vmax.f32 %v2918_v23, %v3786_v29  ;;  %4082 = vmatmul.mubr.bf16.gmra.mrb[224].mxu0 %v17004_v20  ;;  %v23559_v1 = vld [vmem:[#allocation14_spill] sm:$0xff] }
 0x343   :  { %4091 = vmatprep.mubr.bf16.mxu0 %v17005_v36  ;;  %4349 = vmatpush1.bf16.msra.mxu0 %v15734_v28  ;;  %v17006_v28 = vld [vmem:[%s23060_s0 + $0x220] ss:$16 sps:$4 sm:$0xff]  }
 0x344   :  { %23441 = vst [vmem:[#allocation150_spill] sm:$0xff] %v18921_v15  ;;  %v5186_v44 = vadd.f32 %v18677_v53, %v5049_v0  ;;  %v5052_v60 = vmax.f32 %v23443_v38, %v4932_v3 }
 0x345   :  { %v2924_v57 = vpop.f32.mrb[120].mxu0 }
 0x346   :  { %v5189_v20 = vadd.f32 %v18677_v53, %v5052_v60  ;;  %v18943_v51 = vpop.f32.mrb[120].mxu1  ;;  %v18945_v35 = vpop.f32.mrb[121].mxu0  ;;  %v5306_v29 = vmax.f32 %v5186_v44, 0.0 }
 0x347   :  { %23444 = vst [vmem:[#allocation151_spill] sm:$0xff] %v18943_v51  ;;  %23445 = vst [vmem:[#allocation152_spill] sm:$0xff] %v18945_v35  ;;  %v3792_v23 = vpop.f32.mrb[121].mxu1  ;;  %v2928_v8 = vpop.f32.mrb[122].mxu0  ;;  %v23557_v35 = vld [vmem:[#allocation12_spill] sm:$0xff] }
 0x348   :  { %v5309_v30 = vmax.f32 %v5189_v20, 0.0  ;;  %v4935_v0 = vmax.f32 %v2924_v57, %v3792_v23  ;;  %v18947_v45 = vpop.f32.mrb[122].mxu1  ;;  %v18949_v3 = vpop.f32.mrb[123].mxu0  ;;  %v23450_v20 = vmax.f32 %v18366_v33, %v18375_v63  ;;  %v17007_v23 = vld [vmem:[%s23060_s0 + $0x244] ss:$16 sps:$4 sm:$0xff]  }
 0x349   :  { %23446 = vst [vmem:[#allocation153_spill] sm:$0xff] %v18947_v45  ;;  %23447 = vst [vmem:[#allocation154_spill] sm:$0xff] %v18949_v3  ;;  %v3796_v38 = vpop.f32.mrb[123].mxu1  ;;  %v23556_v3 = vld [vmem:[#allocation13_spill] sm:$0xff] }
 0x34a   :  { %v5055_v60 = vmax.f32 %v23448_v48, %v4935_v0  ;;  %v4938_v36 = vmax.f32 %v2928_v8, %v3796_v38  ;;  %v18954_v15 = vpack.c.bf16 %v5309_v30, %v5306_v29  ;;  %4092 = vmatmul.mubr.bf16.gmra.mrb[228].mxu0 %v17006_v28 }
 0x34b   :  { %4101 = vmatprep.mubr.bf16.mxu0 %v17007_v23 }
 0x34c   :  { %23449 = vst [vmem:[#allocation155_spill] sm:$0xff] %v18954_v15  ;;  %v5192_v44 = vadd.f32 %v18677_v53, %v5055_v60  ;;  %v5058_v57 = vmax.f32 %v23450_v20, %v4938_v36  ;;  %v23455_v36 = vmax.f32 %v18379_v19, %v18385_v14  ;;  %v17008_v15 = vld [vmem:[%s23060_s0 + $0x240] ss:$16 sps:$4 sm:$0xff]  }
 0x34d   :  { %v2934_v31 = vpop.f32.mrb[124].mxu0 }
 0x34e   :  { %v5195_v26 = vadd.f32 %v18677_v53, %v5058_v57  ;;  %v18967_v29 = vpop.f32.mrb[124].mxu1  ;;  %v18969_v30 = vpop.f32.mrb[125].mxu0  ;;  %v5312_v8 = vmax.f32 %v5192_v44, 0.0 }
 0x34f   :  { %23451 = vst [vmem:[#allocation156_spill] sm:$0xff] %v18967_v29  ;;  %23452 = vst [vmem:[#allocation157_spill] sm:$0xff] %v18969_v30  ;;  %v3802_v0 = vpop.f32.mrb[125].mxu1  ;;  %v2938_v60 = vpop.f32.mrb[126].mxu0  ;;  %v23555_v30 = vld [vmem:[#allocation10_spill] sm:$0xff] }
 0x350   :  { %v5315_v38 = vmax.f32 %v5195_v26, 0.0  ;;  %v4941_v48 = vmax.f32 %v2934_v31, %v3802_v0  ;;  %v18971_v28 = vpop.f32.mrb[126].mxu1  ;;  %v18973_v33 = vpop.f32.mrb[127].mxu0  ;;  %v23457_v26 = vmax.f32 %v18392_v21, %v18401_v32  ;;  %v17009_v0 = vld [vmem:[%s23060_s0 + $0x264] ss:$16 sps:$4 sm:$0xff]  }
 0x351   :  { %23453 = vst [vmem:[#allocation158_spill] sm:$0xff] %v18971_v28  ;;  %23454 = vst [vmem:[#allocation159_spill] sm:$0xff] %v18973_v33  ;;  %v3806_v63 = vpop.f32.mrb[127].mxu1  ;;  %v23554_v33 = vld [vmem:[#allocation11_spill] sm:$0xff] }
 0x352   :  { %v5061_v20 = vmax.f32 %v23455_v36, %v4941_v48  ;;  %v4944_v57 = vmax.f32 %v2938_v60, %v3806_v63  ;;  %v18978_v23 = vpack.c.bf16 %v5315_v38, %v5312_v8  ;;  %4102 = vmatmul.mubr.bf16.gmra.mrb[232].mxu0 %v17008_v15 }
 0x353   :  { %4111 = vmatprep.mubr.bf16.mxu0 %v17009_v0 }
 0x354   :  { %23456 = vst [vmem:[#allocation160_spill] sm:$0xff] %v18978_v23  ;;  %v5198_v44 = vadd.f32 %v18677_v53, %v5061_v20  ;;  %v5064_v31 = vmax.f32 %v23457_v26, %v4944_v57  ;;  %v23462_v57 = vld [vmem:[#allocation52_spill] sm:$0xff] }
 0x355   :  { %v2944_v19 = vpop.f32.mrb[128].mxu0  ;;  %v23463_v26 = vmax.f32 %v18405_v7, %v23462_v57  ;;  %v23465_v7 = vld [vmem:[#allocation53_spill] sm:$0xff] }
 0x356   :  { %v5201_v14 = vadd.f32 %v18677_v53, %v5064_v31  ;;  %v18991_v8 = vpop.f32.mrb[128].mxu1  ;;  %v18993_v38 = vpop.f32.mrb[129].mxu0  ;;  %v5318_v15 = vmax.f32 %v5198_v44, 0.0  ;;  %v15737_v44 = vld [vmem:[%s23059_s1 + $0x5b0] ss:$24 sps:$4 sm:$0xff]  }
 0x357   :  { %23458 = vst [vmem:[#allocation161_spill] sm:$0xff] %v18991_v8  ;;  %23459 = vst [vmem:[#allocation162_spill] sm:$0xff] %v18993_v38  ;;  %v3812_v48 = vpop.f32.mrb[129].mxu1  ;;  %v2948_v36 = vpop.f32.mrb[130].mxu0  ;;  %v17010_v8 = vld [vmem:[%s23060_s0 + $0x260] ss:$16 sps:$4 sm:$0xff]  }
 0x358   :  { %v5321_v60 = vmax.f32 %v5201_v14, 0.0  ;;  %v4947_v63 = vmax.f32 %v2944_v19, %v3812_v48  ;;  %v18995_v20 = vpop.f32.mrb[130].mxu1  ;;  %v18997_v21 = vpop.f32.mrb[131].mxu0  ;;  %v15739_v14 = vld [vmem:[%s23059_s1 + $0x5b4] ss:$24 sps:$4 sm:$0xff]  }
 0x359   :  { %23460 = vst [vmem:[#allocation163_spill] sm:$0xff] %v18995_v20  ;;  %23461 = vst [vmem:[#allocation164_spill] sm:$0xff] %v18997_v21  ;;  %v3816_v32 = vpop.f32.mrb[131].mxu1  ;;  %v23466_v48 = vld [vmem:[#allocation56_spill] sm:$0xff]  ;;  %4350 = vmatprep.subr.bf16.mxu0 %v15739_v14  ;;  %v23473_v14 = vld [vmem:[#allocation57_spill] sm:$0xff] }
 0x35a   :  { %v5067_v0 = vmax.f32 %v23463_v26, %v4947_v63  ;;  %v4950_v31 = vmax.f32 %v2948_v36, %v3816_v32  ;;  %v19002_v23 = vpack.c.bf16 %v5321_v60, %v5318_v15  ;;  %4112 = vmatmul.mubr.bf16.gmra.mrb[236].mxu0 %v17010_v8  ;;  %v23467_v63 = vmax.f32 %v23465_v7, %v23466_v48  ;;  %v17011_v60 = vld [vmem:[%s23060_s0 + $0x284] ss:$16 sps:$4 sm:$0xff]  }
 0x35b   :  { %4121 = vmatprep.mubr.bf16.mxu0 %v17011_v60  ;;  %4351 = vmatpush1.bf16.msra.mxu0 %v15737_v44  ;;  %v17012_v44 = vld [vmem:[%s23060_s0 + $0x280] ss:$16 sps:$4 sm:$0xff]  }
 0x35c   :  { %23464 = vst [vmem:[#allocation52_spill] sm:$0xff] %v19002_v23  ;;  %v5204_v19 = vadd.f32 %v18677_v53, %v5067_v0  ;;  %v5070_v15 = vmax.f32 %v23467_v63, %v4950_v31 }
 0x35d   :  { %v2954_v36 = vpop.f32.mrb[132].mxu0 }
 0x35e   :  { %v5207_v8 = vadd.f32 %v18677_v53, %v5070_v15  ;;  %v19021_v32 = vpop.f32.mrb[132].mxu1  ;;  %v19023_v57 = vpop.f32.mrb[133].mxu0  ;;  %v5324_v0 = vmax.f32 %v5204_v19, 0.0  ;;  %v23474_v15 = vld [vmem:[#allocation60_spill] sm:$0xff] }
 0x35f   :  { %23468 = vst [vmem:[#allocation53_spill] sm:$0xff] %v19021_v32  ;;  %23469 = vst [vmem:[#allocation56_spill] sm:$0xff] %v19023_v57  ;;  %v3822_v26 = vpop.f32.mrb[133].mxu1  ;;  %v2958_v7 = vpop.f32.mrb[134].mxu0  ;;  %v23475_v21 = vmax.f32 %v23473_v14, %v23474_v15 }
 0x360   :  { %v5327_v23 = vmax.f32 %v5207_v8, 0.0  ;;  %v4953_v20 = vmax.f32 %v2954_v36, %v3822_v26  ;;  %v19025_v31 = vpop.f32.mrb[134].mxu1  ;;  %v19027_v48 = vpop.f32.mrb[135].mxu0  ;;  %v23476_v8 = vld [vmem:[#allocation61_spill] sm:$0xff]  ;;  %v23477_v36 = vld [vmem:[#allocation64_spill] sm:$0xff] }
 0x361   :  { %23470 = vst [vmem:[#allocation165_spill] sm:$0xff] %v19025_v31  ;;  %23471 = vst [vmem:[#allocation166_spill] sm:$0xff] %v19027_v48  ;;  %v3826_v63 = vpop.f32.mrb[135].mxu1  ;;  %v23478_v26 = vmax.f32 %v23476_v8, %v23477_v36  ;;  %v23483_v36 = vld [vmem:[#allocation65_spill] sm:$0xff] }
 0x362   :  { %v19029_v60 = vpack.c.bf16 %v5327_v23, %v5324_v0  ;;  %v5073_v38 = vmax.f32 %v23475_v21, %v4953_v20  ;;  %v4956_v32 = vmax.f32 %v2958_v7, %v3826_v63  ;;  %4122 = vmatmul.mubr.bf16.gmra.mrb[240].mxu0 %v17012_v44  ;;  %v17013_v23 = vld [vmem:[%s23060_s0 + $0x2a4] ss:$16 sps:$4 sm:$0xff]  }
 0x363   :  { %4131 = vmatprep.mubr.bf16.mxu0 %v17013_v23 }
 0x364   :  { %23472 = vst [vmem:[#allocation167_spill] sm:$0xff] %v19029_v60  ;;  %v5210_v19 = vadd.f32 %v18677_v53, %v5073_v38  ;;  %v5076_v31 = vmax.f32 %v23478_v26, %v4956_v32  ;;  %v23484_v26 = vld [vmem:[#allocation68_spill] sm:$0xff] }
 0x365   :  { %v2964_v20 = vpop.f32.mrb[136].mxu0  ;;  %v23485_v23 = vmax.f32 %v23483_v36, %v23484_v26 }
 0x366   :  { %v5213_v0 = vadd.f32 %v18677_v53, %v5076_v31  ;;  %v19045_v21 = vpop.f32.mrb[136].mxu1  ;;  %v19047_v7 = vpop.f32.mrb[137].mxu0  ;;  %v5330_v14 = vmax.f32 %v5210_v19, 0.0  ;;  %v15740_v19 = vld [vmem:[%s23059_s1 + $0x5e0] ss:$24 sps:$4 sm:$0xff]  }
 0x367   :  { %23479 = vst [vmem:[#allocation57_spill] sm:$0xff] %v19045_v21  ;;  %23480 = vst [vmem:[#allocation60_spill] sm:$0xff] %v19047_v7  ;;  %v3832_v63 = vpop.f32.mrb[137].mxu1  ;;  %v2968_v44 = vpop.f32.mrb[138].mxu0  ;;  %v17014_v21 = vld [vmem:[%s23060_s0 + $0x2a0] ss:$16 sps:$4 sm:$0xff]  }
 0x368   :  { %v5333_v15 = vmax.f32 %v5213_v0, 0.0  ;;  %v4959_v38 = vmax.f32 %v2964_v20, %v3832_v63  ;;  %v19049_v60 = vpop.f32.mrb[138].mxu1  ;;  %v19051_v32 = vpop.f32.mrb[139].mxu0  ;;  %v15742_v0 = vld [vmem:[%s23059_s1 + $0x5e4] ss:$24 sps:$4 sm:$0xff]  }
 0x369   :  { %23481 = vst [vmem:[#allocation61_spill] sm:$0xff] %v19049_v60  ;;  %23482 = vst [vmem:[#allocation64_spill] sm:$0xff] %v19051_v32  ;;  %v3836_v8 = vpop.f32.mrb[139].mxu1  ;;  %v23487_v63 = vld [vmem:[#allocation69_spill] sm:$0xff]  ;;  %4352 = vmatprep.subr.bf16.mxu0 %v15742_v0  ;;  %v23495_v0 = vld [vmem:[#allocation76_spill] sm:$0xff] }
 0x36a   :  { %v5079_v48 = vmax.f32 %v23485_v23, %v4959_v38  ;;  %v4962_v31 = vmax.f32 %v2968_v44, %v3836_v8  ;;  %v19056_v57 = vpack.c.bf16 %v5333_v15, %v5330_v14  ;;  %4132 = vmatmul.mubr.bf16.gmra.mrb[244].mxu0 %v17014_v21  ;;  %v23488_v38 = vld [vmem:[#allocation72_spill] sm:$0xff] }
 0x36b   :  { %v23489_v44 = vmax.f32 %v23487_v63, %v23488_v38  ;;  %v17015_v15 = vld [vmem:[%s23060_s0 + $0x2c4] ss:$16 sps:$4 sm:$0xff]   ;;  %4353 = vmatpush1.bf16.msra.mxu0 %v15740_v19  ;;  %v17016_v19 = vld [vmem:[%s23060_s0 + $0x2c0] ss:$16 sps:$4 sm:$0xff]  }
 0x36c   :  { %23486 = vst [vmem:[#allocation65_spill] sm:$0xff] %v19056_v57  ;;  %v5216_v20 = vadd.f32 %v18677_v53, %v5079_v48  ;;  %4141 = vmatprep.mubr.bf16.mxu0 %v17015_v15  ;;  %v23494_v15 = vld [vmem:[#allocation73_spill] sm:$0xff] }
 0x36d   :  { %v5082_v14 = vmax.f32 %v23489_v44, %v4962_v31  ;;  %v2974_v8 = vpop.f32.mrb[140].mxu0  ;;  %v23496_v32 = vmax.f32 %v23494_v15, %v23495_v0 }
 0x36e   :  { %v19075_v36 = vpop.f32.mrb[140].mxu1  ;;  %v19077_v26 = vpop.f32.mrb[141].mxu0  ;;  %v5336_v48 = vmax.f32 %v5216_v20, 0.0 }
 0x36f   :  { %v5219_v21 = vadd.f32 %v18677_v53, %v5082_v14  ;;  %23490 = vst [vmem:[#allocation68_spill] sm:$0xff] %v19075_v36  ;;  %23491 = vst [vmem:[#allocation69_spill] sm:$0xff] %v19077_v26  ;;  %v3842_v23 = vpop.f32.mrb[141].mxu1  ;;  %v2978_v63 = vpop.f32.mrb[142].mxu0  ;;  %v17108_v26 = vld [vmem:[%s23060_s0 + $0x388] ss:$16 sps:$4 sm:$0xff]  }
 0x370   :  { %v4965_v60 = vmax.f32 %v2974_v8, %v3842_v23  ;;  %v19079_v31 = vpop.f32.mrb[142].mxu1  ;;  %v19081_v38 = vpop.f32.mrb[143].mxu0  ;;  %v23499_v8 = vld [vmem:[#allocation80_spill] sm:$0xff] }
 0x371   :  { %v5339_v57 = vmax.f32 %v5219_v21, 0.0  ;;  %23492 = vst [vmem:[#allocation72_spill] sm:$0xff] %v19079_v31  ;;  %23493 = vst [vmem:[#allocation168_spill] sm:$0xff] %v19081_v38  ;;  %v3846_v44 = vpop.f32.mrb[143].mxu1  ;;  %v23498_v21 = vld [vmem:[#allocation77_spill] sm:$0xff] }
 0x372   :  { %v5085_v14 = vmax.f32 %v23496_v32, %v4965_v60  ;;  %v4968_v7 = vmax.f32 %v2978_v63, %v3846_v44  ;;  %4142 = vmatmul.mubr.bf16.gmra.mrb[248].mxu0 %v17016_v19  ;;  %v23500_v23 = vmax.f32 %v23498_v21, %v23499_v8  ;;  %v17017_v38 = vld [vmem:[%s23060_s0 + $0x2e4] ss:$16 sps:$4 sm:$0xff]   ;;  %v23505_v8 = vld [vmem:[#allocation81_spill] sm:$0xff] }
 0x373   :  { %v19086_v28 = vpack.c.bf16 %v5339_v57, %v5336_v48  ;;  %4151 = vmatprep.mubr.bf16.mxu0 %v17017_v38 }
 0x374   :  { %v5222_v20 = vadd.f32 %v18677_v53, %v5085_v14  ;;  %v5088_v31 = vmax.f32 %v23500_v23, %v4968_v7  ;;  %v23506_v23 = vld [vmem:[#allocation84_spill] sm:$0xff] }
 0x375   :  { %23497 = vst [vmem:[#allocation73_spill] sm:$0xff] %v19086_v28  ;;  %v2984_v57 = vpop.f32.mrb[144].mxu0  ;;  %v23507_v38 = vmax.f32 %v23505_v8, %v23506_v23 }
 0x376   :  { %v5225_v60 = vadd.f32 %v18677_v53, %v5088_v31  ;;  %v19099_v32 = vpop.f32.mrb[144].mxu1  ;;  %v19101_v48 = vpop.f32.mrb[145].mxu0  ;;  %v5342_v44 = vmax.f32 %v5222_v20, 0.0 }
 0x377   :  { %23501 = vst [vmem:[#allocation76_spill] sm:$0xff] %v19099_v32  ;;  %23502 = vst [vmem:[#allocation77_spill] sm:$0xff] %v19101_v48  ;;  %v3852_v63 = vpop.f32.mrb[145].mxu1  ;;  %v2988_v14 = vpop.f32.mrb[146].mxu0  ;;  %v17018_v32 = vld [vmem:[%s23060_s0 + $0x2e0] ss:$16 sps:$4 sm:$0xff]  }
 0x378   :  { %v5345_v15 = vmax.f32 %v5225_v60, 0.0  ;;  %v4971_v0 = vmax.f32 %v2984_v57, %v3852_v63  ;;  %v19103_v19 = vpop.f32.mrb[146].mxu1  ;;  %v19105_v7 = vpop.f32.mrb[147].mxu0  ;;  %v23509_v60 = vld [vmem:[#allocation85_spill] sm:$0xff]  ;;  %v23510_v57 = vld [vmem:[#allocation88_spill] sm:$0xff] }
 0x379   :  { %23503 = vst [vmem:[#allocation80_spill] sm:$0xff] %v19103_v19  ;;  %23504 = vst [vmem:[#allocation169_spill] sm:$0xff] %v19105_v7  ;;  %v3856_v21 = vpop.f32.mrb[147].mxu1  ;;  %v23511_v63 = vmax.f32 %v23509_v60, %v23510_v57  ;;  %v17019_v7 = vld [vmem:[%s23060_s0 + $0x304] ss:$16 sps:$4 sm:$0xff]  }
 0x37a   :  { %v5091_v28 = vmax.f32 %v23507_v38, %v4971_v0  ;;  %v4974_v31 = vmax.f32 %v2988_v14, %v3856_v21  ;;  %v19110_v36 = vpack.c.bf16 %v5345_v15, %v5342_v44  ;;  %4152 = vmatmul.mubr.bf16.gmra.mrb[252].mxu0 %v17018_v32 }
 0x37b   :  { %4161 = vmatprep.mubr.bf16.mxu0 %v17019_v7  ;;  %v23517_v7 = vld [vmem:[#allocation89_spill] sm:$0xff] }
 0x37c   :  { %23508 = vst [vmem:[#allocation81_spill] sm:$0xff] %v19110_v36  ;;  %v5228_v20 = vadd.f32 %v18677_v53, %v5091_v28  ;;  %v5094_v19 = vmax.f32 %v23511_v63, %v4974_v31  ;;  %v23518_v63 = vld [vmem:[#allocation92_spill] sm:$0xff] }
 0x37d   :  { %v2994_v44 = vpop.f32.mrb[148].mxu0 }
 0x37e   :  { %v5231_v0 = vadd.f32 %v18677_v53, %v5094_v19  ;;  %v19123_v15 = vpop.f32.mrb[148].mxu1  ;;  %v19125_v14 = vpop.f32.mrb[149].mxu0  ;;  %v5348_v32 = vmax.f32 %v5228_v20, 0.0  ;;  %v23519_v19 = vmax.f32 %v23517_v7, %v23518_v63 }
 0x37f   :  { %23512 = vst [vmem:[#allocation84_spill] sm:$0xff] %v19123_v15  ;;  %23513 = vst [vmem:[#allocation85_spill] sm:$0xff] %v19125_v14  ;;  %v3862_v21 = vpop.f32.mrb[149].mxu1  ;;  %v2998_v23 = vpop.f32.mrb[150].mxu0  ;;  %v17020_v15 = vld [vmem:[%s23060_s0 + $0x300] ss:$16 sps:$4 sm:$0xff]  }
 0x380   :  { %v5351_v8 = vmax.f32 %v5231_v0, 0.0  ;;  %v4977_v28 = vmax.f32 %v2994_v44, %v3862_v21  ;;  %v19127_v38 = vpop.f32.mrb[150].mxu1  ;;  %v19129_v31 = vpop.f32.mrb[151].mxu0  ;;  %v23520_v0 = vld [vmem:[#allocation93_spill] sm:$0xff]  ;;  %v23521_v44 = vld [vmem:[#allocation96_spill] sm:$0xff] }
 0x381   :  { %23514 = vst [vmem:[#allocation88_spill] sm:$0xff] %v19127_v38  ;;  %23515 = vst [vmem:[#allocation170_spill] sm:$0xff] %v19129_v31  ;;  %v3866_v60 = vpop.f32.mrb[151].mxu1  ;;  %v23522_v21 = vmax.f32 %v23520_v0, %v23521_v44  ;;  %v23527_v44 = vld [vmem:[#allocation97_spill] sm:$0xff] }
 0x382   :  { %v19131_v57 = vpack.c.bf16 %v5351_v8, %v5348_v32  ;;  %v5097_v36 = vmax.f32 %v23519_v19, %v4977_v28  ;;  %v4980_v48 = vmax.f32 %v2998_v23, %v3866_v60  ;;  %4162 = vmatmul.mubr.bf16.gmra.mrb[0].mxu0 %v17020_v15  ;;  %v17021_v32 = vld [vmem:[%s23060_s0 + $0x324] ss:$16 sps:$4 sm:$0xff]  }
 0x383   :  { %4171 = vmatprep.mubr.bf16.mxu0 %v17021_v32 }
 0x384   :  { %23516 = vst [vmem:[#allocation171_spill] sm:$0xff] %v19131_v57  ;;  %v5234_v20 = vadd.f32 %v18677_v53, %v5097_v36  ;;  %v5100_v38 = vmax.f32 %v23522_v21, %v4980_v48  ;;  %v23528_v21 = vld [vmem:[#allocation100_spill] sm:$0xff] }
 0x385   :  { %v3004_v28 = vpop.f32.mrb[152].mxu0  ;;  %v23529_v32 = vmax.f32 %v23527_v44, %v23528_v21 }
 0x386   :  { %v5237_v8 = vadd.f32 %v18677_v53, %v5100_v38  ;;  %v19147_v23 = vpop.f32.mrb[152].mxu1  ;;  %v19149_v60 = vpop.f32.mrb[153].mxu0  ;;  %v5354_v15 = vmax.f32 %v5234_v20, 0.0 }
 0x387   :  { %23523 = vst [vmem:[#allocation89_spill] sm:$0xff] %v19147_v23  ;;  %23524 = vst [vmem:[#allocation92_spill] sm:$0xff] %v19149_v60  ;;  %v3872_v7 = vpop.f32.mrb[153].mxu1  ;;  %v3008_v19 = vpop.f32.mrb[154].mxu0  ;;  %v17022_v23 = vld [vmem:[%s23060_s0 + $0x320] ss:$16 sps:$4 sm:$0xff]  }
 0x388   :  { %v5357_v63 = vmax.f32 %v5237_v8, 0.0  ;;  %v4983_v36 = vmax.f32 %v3004_v28, %v3872_v7  ;;  %v19151_v57 = vpop.f32.mrb[154].mxu1  ;;  %v19153_v48 = vpop.f32.mrb[155].mxu0  ;;  %v23531_v8 = vld [vmem:[#allocation101_spill] sm:$0xff]  ;;  %v23532_v28 = vld [vmem:[#allocation104_spill] sm:$0xff] }
 0x389   :  { %23525 = vst [vmem:[#allocation93_spill] sm:$0xff] %v19151_v57  ;;  %23526 = vst [vmem:[#allocation96_spill] sm:$0xff] %v19153_v48  ;;  %v3876_v0 = vpop.f32.mrb[155].mxu1  ;;  %v23533_v7 = vmax.f32 %v23531_v8, %v23532_v28  ;;  %v17023_v48 = vld [vmem:[%s23060_s0 + $0x344] ss:$16 sps:$4 sm:$0xff]   ;;  %v23538_v28 = vld [vmem:[#allocation105_spill] sm:$0xff] }
 0x38a   :  { %v5103_v31 = vmax.f32 %v23529_v32, %v4983_v36  ;;  %v4986_v38 = vmax.f32 %v3008_v19, %v3876_v0  ;;  %v19158_v14 = vpack.c.bf16 %v5357_v63, %v5354_v15  ;;  %4172 = vmatmul.mubr.bf16.gmra.mrb[4].mxu0 %v17022_v23 }
 0x38b   :  { %4181 = vmatprep.mubr.bf16.mxu0 %v17023_v48 }
 0x38c   :  { %23530 = vst [vmem:[#allocation97_spill] sm:$0xff] %v19158_v14  ;;  %v5240_v20 = vadd.f32 %v18677_v53, %v5103_v31  ;;  %v5106_v57 = vmax.f32 %v23533_v7, %v4986_v38  ;;  %v23539_v7 = vld [vmem:[#allocation108_spill] sm:$0xff] }
 0x38d   :  { %v3014_v15 = vpop.f32.mrb[156].mxu0  ;;  %v23540_v48 = vmax.f32 %v23538_v28, %v23539_v7  ;;  %v17032_v28 = vld [vmem:[%s23060_s0 + $0x3c0] ss:$16 sps:$4 sm:$0xff]   ;;  %v17033_v7 = vld [vmem:[%s23060_s0 + $0x3e4] ss:$16 sps:$4 sm:$0xff]  }
 0x38e   :  { %v5243_v36 = vadd.f32 %v18677_v53, %v5106_v57  ;;  %v19171_v63 = vpop.f32.mrb[156].mxu1  ;;  %v19173_v19 = vpop.f32.mrb[157].mxu0  ;;  %v5360_v23 = vmax.f32 %v5240_v20, 0.0 }
 0x38f   :  { %23534 = vst [vmem:[#allocation100_spill] sm:$0xff] %v19171_v63  ;;  %23535 = vst [vmem:[#allocation101_spill] sm:$0xff] %v19173_v19  ;;  %v3882_v0 = vpop.f32.mrb[157].mxu1  ;;  %v3018_v21 = vpop.f32.mrb[158].mxu0  ;;  %v17024_v63 = vld [vmem:[%s23060_s0 + $0x340] ss:$16 sps:$4 sm:$0xff]  }
 0x390   :  { %v5363_v44 = vmax.f32 %v5243_v36, 0.0  ;;  %v4989_v31 = vmax.f32 %v3014_v15, %v3882_v0  ;;  %v19175_v32 = vpop.f32.mrb[158].mxu1  ;;  %v19177_v38 = vpop.f32.mrb[159].mxu0  ;;  %v23542_v36 = vld [vmem:[#allocation109_spill] sm:$0xff]  ;;  %v23553_v19 = vld [vmem:[#allocation8_spill] sm:$0xff] }
 0x391   :  { %23536 = vst [vmem:[#allocation104_spill] sm:$0xff] %v19175_v32  ;;  %23537 = vst [vmem:[#allocation172_spill] sm:$0xff] %v19177_v38  ;;  %v3886_v8 = vpop.f32.mrb[159].mxu1  ;;  %v23543_v15 = vld [vmem:[#allocation113_spill] sm:$0xff]  ;;  %v17025_v38 = vld [vmem:[%s23060_s0 + $0x364] ss:$16 sps:$4 sm:$0xff]  }
 0x392   :  { %v5109_v14 = vmax.f32 %v23540_v48, %v4989_v31  ;;  %v4992_v57 = vmax.f32 %v3018_v21, %v3886_v8  ;;  %v19182_v60 = vpack.c.bf16 %v5363_v44, %v5360_v23  ;;  %4182 = vmatmul.mubr.bf16.gmra.mrb[8].mxu0 %v17024_v63  ;;  %v23544_v0 = vmax.f32 %v23542_v36, %v23543_v15  ;;  %v17026_v63 = vld [vmem:[%s23060_s0 + $0x360] ss:$16 sps:$4 sm:$0xff]   ;;  %v17031_v8 = vld [vmem:[%s23060_s0 + $0x3c4] ss:$16 sps:$4 sm:$0xff]  }
 0x393   :  { %4191 = vmatprep.mubr.bf16.mxu0 %v17025_v38  ;;  %v17028_v38 = vld [vmem:[%s23060_s0 + $0x380] ss:$16 sps:$4 sm:$0xff]   ;;  %v17037_v36 = vld [vmem:[%s23060_s0 + $0x424] ss:$16 sps:$4 sm:$0xff]  }
 0x394   :  { %23541 = vst [vmem:[#allocation105_spill] sm:$0xff] %v19182_v60  ;;  %v5246_v20 = vadd.f32 %v18677_v53, %v5109_v14  ;;  %v5112_v32 = vmax.f32 %v23544_v0, %v4992_v57  ;;  %v17027_v14 = vld [vmem:[%s23060_s0 + $0x384] ss:$16 sps:$4 sm:$0xff]   ;;  %v17034_v48 = vld [vmem:[%s23060_s0 + $0x3e0] ss:$16 sps:$4 sm:$0xff]  }
 0x395   :  { %v17035_v57 = vld [vmem:[%s23060_s0 + $0x404] ss:$16 sps:$4 sm:$0xff]   ;;  %v17038_v15 = vld [vmem:[%s23060_s0 + $0x420] ss:$16 sps:$4 sm:$0xff]  }
 0x396   :  { %v5249_v31 = vadd.f32 %v18677_v53, %v5112_v32  ;;  %v5366_v23 = vmax.f32 %v5246_v20, 0.0  ;;  %v17029_v53 = vld [vmem:[%s23060_s0 + $0x3a4] ss:$16 sps:$4 sm:$0xff]   ;;  %v17030_v32 = vld [vmem:[%s23060_s0 + $0x3a0] ss:$16 sps:$4 sm:$0xff]  }
 0x397   :  { %v17036_v20 = vld [vmem:[%s23060_s0 + $0x400] ss:$16 sps:$4 sm:$0xff]   ;;  %v17039_v0 = vld [vmem:[%s23060_s0 + $0x444] ss:$16 sps:$4 sm:$0xff]  }
 0x398   :  { %v5369_v44 = vmax.f32 %v5249_v31, 0.0  ;;  %v17040_v31 = vld [vmem:[%s23060_s0 + $0x440] ss:$16 sps:$4 sm:$0xff]  }
 0x39a   :  { %v19195_v21 = vpack.c.bf16 %v5369_v44, %v5366_v23  ;;  %4192 = vmatmul.mubr.bf16.gmra.mrb[12].mxu0 %v17026_v63  ;;  %v17041_v23 = vld [vmem:[%s23060_s0 + $0x464] ss:$16 sps:$4 sm:$0xff]   ;;  %v17042_v44 = vld [vmem:[%s23060_s0 + $0x460] ss:$16 sps:$4 sm:$0xff]  }
 0x39b   :  { %4201 = vmatprep.mubr.bf16.mxu0 %v17027_v14  ;;  %v17043_v63 = vld [vmem:[%s23060_s0 + $0x484] ss:$16 sps:$4 sm:$0xff]   ;;  %v17044_v14 = vld [vmem:[%s23060_s0 + $0x480] ss:$16 sps:$4 sm:$0xff]  }
 0x39c   :  { %23545 = vst [vmem:[#allocation108_spill] sm:$0xff] %v19195_v21  ;;  %v23552_v21 = vld [vmem:[#allocation9_spill] sm:$0xff] }
 0x3a2   :  { %4202 = vmatmul.mubr.bf16.gmra.mrb[16].mxu0 %v17028_v38  ;;  %v17045_v38 = vld [vmem:[%s23060_s0 + $0x4a4] ss:$16 sps:$4 sm:$0xff]  }
 0x3a3   :  { %4211 = vmatprep.mubr.bf16.mxu0 %v17029_v53  ;;  %v15743_v53 = vld [vmem:[%s23062_s3 + $0x300] ss:$16 sps:$4 sm:$0xff]  }
 0x3aa   :  { %4212 = vmatmul.mubr.bf16.gmra.mrb[20].mxu0 %v17030_v32  ;;  %v15745_v32 = vld [vmem:[%s23062_s3 + $0x304] ss:$16 sps:$4 sm:$0xff]  }
 0x3ab   :  { %4221 = vmatprep.mubr.bf16.mxu0 %v17031_v8  ;;  %6105 = vmatprep.subr.bf16.mxu1 %v15745_v32  ;;  %v17046_v8 = vld [vmem:[%s23060_s0 + $0x4a0] ss:$16 sps:$4 sm:$0xff]   ;;  %v17058_v32 = vld [vmem:[%s23060_s0 + $0x68] ss:$16 sps:$4 sm:$0xff]  }
 0x3ac   :  { %6106 = vmatpush1.bf16.msra.mxu1 %v15743_v53  ;;  %v17057_v53 = vld [vmem:[%s23060_s0 + $0x6c] ss:$16 sps:$4 sm:$0xff]  }
 0x3b2   :  { %4222 = vmatmul.mubr.bf16.gmra.mrb[24].mxu0 %v17032_v28  ;;  %v17047_v28 = vld [vmem:[%s23060_s0 + $0x4c4] ss:$16 sps:$4 sm:$0xff]  }
 0x3b3   :  { %4231 = vmatprep.mubr.bf16.mxu0 %v17033_v7  ;;  %v17048_v7 = vld [vmem:[%s23060_s0 + $0x4c0] ss:$16 sps:$4 sm:$0xff]  }
 0x3ba   :  { %4232 = vmatmul.mubr.bf16.gmra.mrb[28].mxu0 %v17034_v48  ;;  %v15746_v48 = vld [vmem:[%s23062_s3 + $0x320] ss:$16 sps:$4 sm:$0xff]  }
 0x3bb   :  { %4241 = vmatprep.mubr.bf16.mxu0 %v17035_v57  ;;  %v15748_v57 = vld [vmem:[%s23062_s3 + $0x324] ss:$16 sps:$4 sm:$0xff]  }
 0x3bc   :  { %6107 = vmatprep.subr.bf16.mxu1 %v15748_v57  ;;  %v17061_v57 = vld [vmem:[%s23060_s0 + $0xac] ss:$16 sps:$4 sm:$0xff]  }
 0x3bd   :  { %6108 = vmatpush1.bf16.msra.mxu1 %v15746_v48  ;;  %v17060_v48 = vld [vmem:[%s23060_s0 + $0x88] ss:$16 sps:$4 sm:$0xff]  }
 0x3c2   :  { %4242 = vmatmul.mubr.bf16.gmra.mrb[32].mxu0 %v17036_v20  ;;  %v17049_v20 = vld [vmem:[%s23060_s0 + $0x4e4] ss:$16 sps:$4 sm:$0xff]  }
 0x3c3   :  { %4251 = vmatprep.mubr.bf16.mxu0 %v17037_v36  ;;  %v17050_v36 = vld [vmem:[%s23060_s0 + $0x4e0] ss:$16 sps:$4 sm:$0xff]  }
 0x3ca   :  { %4252 = vmatmul.mubr.bf16.gmra.mrb[36].mxu0 %v17038_v15  ;;  %v17051_v15 = vld [vmem:[%s23060_s0 + $0xc] ss:$16 sps:$4 sm:$0xff]  }
 0x3cb   :  { %4261 = vmatprep.mubr.bf16.mxu0 %v17039_v0  ;;  %v17052_v0 = vld [vmem:[%s23060_s0 + $0x8] ss:$16 sps:$4 sm:$0xff]  }
 0x3d2   :  { %4262 = vmatmul.mubr.bf16.gmra.mrb[40].mxu0 %v17040_v31  ;;  %v17053_v31 = vld [vmem:[%s23060_s0 + $0x2c] ss:$16 sps:$4 sm:$0xff]  }
 0x3d3   :  { %4271 = vmatprep.mubr.bf16.mxu0 %v17041_v23  ;;  %v17054_v23 = vld [vmem:[%s23060_s0 + $0x28] ss:$16 sps:$4 sm:$0xff]  }
 0x3da   :  { %4272 = vmatmul.mubr.bf16.gmra.mrb[44].mxu0 %v17042_v44  ;;  %v15749_v44 = vld [vmem:[%s23062_s3 + $0x340] ss:$16 sps:$4 sm:$0xff]  }
 0x3db   :  { %4281 = vmatprep.mubr.bf16.mxu0 %v17043_v63  ;;  %v15751_v63 = vld [vmem:[%s23062_s3 + $0x344] ss:$16 sps:$4 sm:$0xff]  }
 0x3dc   :  { %6109 = vmatprep.subr.bf16.mxu1 %v15751_v63  ;;  %v17067_v63 = vld [vmem:[%s23060_s0 + $0x10c] ss:$16 sps:$4 sm:$0xff]  }
 0x3dd   :  { %6110 = vmatpush1.bf16.msra.mxu1 %v15749_v44  ;;  %v17066_v44 = vld [vmem:[%s23060_s0 + $0xe8] ss:$16 sps:$4 sm:$0xff]  }
 0x3e2   :  { %4282 = vmatmul.mubr.bf16.gmra.mrb[48].mxu0 %v17044_v14  ;;  %v17055_v14 = vld [vmem:[%s23060_s0 + $0x4c] ss:$16 sps:$4 sm:$0xff]  }
 0x3e3   :  { %4291 = vmatprep.mubr.bf16.mxu0 %v17045_v38  ;;  %v17056_v38 = vld [vmem:[%s23060_s0 + $0x48] ss:$16 sps:$4 sm:$0xff]  }
 0x3ea   :  { %4292 = vmatmul.mubr.bf16.gmra.mrb[52].mxu0 %v17046_v8  ;;  %v15752_v8 = vld [vmem:[%s23062_s3 + $0x360] ss:$16 sps:$4 sm:$0xff]  }
 0x3eb   :  { %4301 = vmatprep.mubr.bf16.mxu0 %v17047_v28  ;;  %v15754_v28 = vld [vmem:[%s23062_s3 + $0x364] ss:$16 sps:$4 sm:$0xff]  }
 0x3ec   :  { %6111 = vmatprep.subr.bf16.mxu1 %v15754_v28  ;;  %v17071_v28 = vld [vmem:[%s23060_s0 + $0x14c] ss:$16 sps:$4 sm:$0xff]  }
 0x3ed   :  { %6112 = vmatpush1.bf16.msra.mxu1 %v15752_v8  ;;  %v17070_v8 = vld [vmem:[%s23060_s0 + $0x128] ss:$16 sps:$4 sm:$0xff]  }
 0x3f2   :  { %4302 = vmatmul.mubr.bf16.gmra.mrb[56].mxu0 %v17048_v7  ;;  %v17059_v7 = vld [vmem:[%s23060_s0 + $0x8c] ss:$16 sps:$4 sm:$0xff]  }
 0x3f3   :  { %4311 = vmatprep.mubr.bf16.mxu0 %v17049_v20  ;;  %v17062_v20 = vld [vmem:[%s23060_s0 + $0xa8] ss:$16 sps:$4 sm:$0xff]  }
 0x3fa   :  { %4312 = vmatmul.mubr.bf16.gmra.mrb[60].mxu0 %v17050_v36  ;;  %v17063_v36 = vld [vmem:[%s23060_s0 + $0xcc] ss:$16 sps:$4 sm:$0xff]  }
 0x3fb   :  { %4354 = vmatprep.mubr.bf16.mxu0 %v17051_v15  ;;  %v17064_v15 = vld [vmem:[%s23060_s0 + $0xc8] ss:$16 sps:$4 sm:$0xff]  }
 0x402   :  { %4355 = vmatmul.mubr.bf16.vlgmr.msra.gmra.mrb[160].mxu0 %v17052_v0  ;;  %v15755_v0 = vld [vmem:[%s23062_s3 + $0x380] ss:$16 sps:$4 sm:$0xff]  }
 0x403   :  { %4364 = vmatprep.mubr.bf16.mxu0 %v17053_v31  ;;  %v15757_v31 = vld [vmem:[%s23062_s3 + $0x384] ss:$16 sps:$4 sm:$0xff]  }
 0x404   :  { %6113 = vmatprep.subr.bf16.mxu1 %v15757_v31  ;;  %v17077_v31 = vld [vmem:[%s23060_s0 + $0x1ac] ss:$16 sps:$4 sm:$0xff]  }
 0x405   :  { %6114 = vmatpush1.bf16.msra.mxu1 %v15755_v0  ;;  %v17076_v0 = vld [vmem:[%s23060_s0 + $0x188] ss:$16 sps:$4 sm:$0xff]  }
 0x40a   :  { %4365 = vmatmul.mubr.bf16.gmra.mrb[164].mxu0 %v17054_v23  ;;  %v17065_v23 = vld [vmem:[%s23060_s0 + $0xec] ss:$16 sps:$4 sm:$0xff]  }
 0x40b   :  { %4374 = vmatprep.mubr.bf16.mxu0 %v17055_v14  ;;  %v17068_v14 = vld [vmem:[%s23060_s0 + $0x108] ss:$16 sps:$4 sm:$0xff]  }
 0x412   :  { %4375 = vmatmul.mubr.bf16.gmra.mrb[168].mxu0 %v17056_v38  ;;  %v15758_v38 = vld [vmem:[%s23062_s3 + $0x3a0] ss:$16 sps:$4 sm:$0xff]  }
 0x413   :  { %4384 = vmatprep.mubr.bf16.mxu0 %v17057_v53  ;;  %v15760_v53 = vld [vmem:[%s23062_s3 + $0x3a4] ss:$16 sps:$4 sm:$0xff]  }
 0x414   :  { %6115 = vmatprep.subr.bf16.mxu1 %v15760_v53  ;;  %v17081_v53 = vld [vmem:[%s23060_s0 + $0x1ec] ss:$16 sps:$4 sm:$0xff]  }
 0x415   :  { %6116 = vmatpush1.bf16.msra.mxu1 %v15758_v38  ;;  %v17080_v38 = vld [vmem:[%s23060_s0 + $0x1c8] ss:$16 sps:$4 sm:$0xff]  }
 0x41a   :  { %4385 = vmatmul.mubr.bf16.gmra.mrb[172].mxu0 %v17058_v32  ;;  %v17069_v32 = vld [vmem:[%s23060_s0 + $0x12c] ss:$16 sps:$4 sm:$0xff]  }
 0x41b   :  { %4394 = vmatprep.mubr.bf16.mxu0 %v17059_v7  ;;  %v17072_v7 = vld [vmem:[%s23060_s0 + $0x148] ss:$16 sps:$4 sm:$0xff]  }
 0x422   :  { %4395 = vmatmul.mubr.bf16.gmra.mrb[176].mxu0 %v17060_v48  ;;  %v17073_v48 = vld [vmem:[%s23060_s0 + $0x16c] ss:$16 sps:$4 sm:$0xff]  }
 0x423   :  { %4404 = vmatprep.mubr.bf16.mxu0 %v17061_v57  ;;  %v17074_v57 = vld [vmem:[%s23060_s0 + $0x168] ss:$16 sps:$4 sm:$0xff]  }
 0x42a   :  { %4405 = vmatmul.mubr.bf16.gmra.mrb[180].mxu0 %v17062_v20  ;;  %v15761_v20 = vld [vmem:[%s23062_s3 + $0x3c0] ss:$16 sps:$4 sm:$0xff]  }
 0x42b   :  { %4414 = vmatprep.mubr.bf16.mxu0 %v17063_v36  ;;  %v15763_v36 = vld [vmem:[%s23062_s3 + $0x3c4] ss:$16 sps:$4 sm:$0xff]  }
 0x42c   :  { %6117 = vmatprep.subr.bf16.mxu1 %v15763_v36  ;;  %v17087_v36 = vld [vmem:[%s23060_s0 + $0x24c] ss:$16 sps:$4 sm:$0xff]  }
 0x42d   :  { %6118 = vmatpush1.bf16.msra.mxu1 %v15761_v20  ;;  %v17086_v20 = vld [vmem:[%s23060_s0 + $0x228] ss:$16 sps:$4 sm:$0xff]  }
 0x432   :  { %4415 = vmatmul.mubr.bf16.gmra.mrb[184].mxu0 %v17064_v15  ;;  %v17075_v15 = vld [vmem:[%s23060_s0 + $0x18c] ss:$16 sps:$4 sm:$0xff]  }
 0x433   :  { %4424 = vmatprep.mubr.bf16.mxu0 %v17065_v23  ;;  %v17078_v23 = vld [vmem:[%s23060_s0 + $0x1a8] ss:$16 sps:$4 sm:$0xff]  }
 0x43a   :  { %4425 = vmatmul.mubr.bf16.gmra.mrb[188].mxu0 %v17066_v44  ;;  %v17079_v44 = vld [vmem:[%s23060_s0 + $0x1cc] ss:$16 sps:$4 sm:$0xff]  }
 0x43b   :  { %4434 = vmatprep.mubr.bf16.mxu0 %v17067_v63  ;;  %v15764_v63 = vld [vmem:[%s23062_s3 + $0x3e0] ss:$16 sps:$4 sm:$0xff]  }
 0x442   :  { %4435 = vmatmul.mubr.bf16.gmra.mrb[192].mxu0 %v17068_v14  ;;  %v15766_v14 = vld [vmem:[%s23062_s3 + $0x3e4] ss:$16 sps:$4 sm:$0xff]  }
 0x443   :  { %4444 = vmatprep.mubr.bf16.mxu0 %v17069_v32  ;;  %6119 = vmatprep.subr.bf16.mxu1 %v15766_v14  ;;  %v17082_v32 = vld [vmem:[%s23060_s0 + $0x1e8] ss:$16 sps:$4 sm:$0xff]  }
 0x444   :  { %6120 = vmatpush1.bf16.msra.mxu1 %v15764_v63  ;;  %v17091_v63 = vld [vmem:[%s23060_s0 + $0x28c] ss:$16 sps:$4 sm:$0xff]   ;;  %v17092_v14 = vld [vmem:[%s23060_s0 + $0x288] ss:$16 sps:$4 sm:$0xff]  }
 0x44a   :  { %4445 = vmatmul.mubr.bf16.gmra.mrb[196].mxu0 %v17070_v8  ;;  %v17083_v8 = vld [vmem:[%s23060_s0 + $0x20c] ss:$16 sps:$4 sm:$0xff]  }
 0x44b   :  { %4454 = vmatprep.mubr.bf16.mxu0 %v17071_v28  ;;  %v17084_v28 = vld [vmem:[%s23060_s0 + $0x208] ss:$16 sps:$4 sm:$0xff]  }
 0x452   :  { %4455 = vmatmul.mubr.bf16.gmra.mrb[200].mxu0 %v17072_v7  ;;  %v15767_v7 = vld [vmem:[%s23062_s3 + $0x400] ss:$16 sps:$4 sm:$0xff]  }
 0x453   :  { %4464 = vmatprep.mubr.bf16.mxu0 %v17073_v48  ;;  %v15769_v48 = vld [vmem:[%s23062_s3 + $0x404] ss:$16 sps:$4 sm:$0xff]  }
 0x454   :  { %6121 = vmatprep.subr.bf16.mxu1 %v15769_v48  ;;  %v17097_v48 = vld [vmem:[%s23060_s0 + $0x2ec] ss:$16 sps:$4 sm:$0xff]  }
 0x455   :  { %6122 = vmatpush1.bf16.msra.mxu1 %v15767_v7  ;;  %v17096_v7 = vld [vmem:[%s23060_s0 + $0x2c8] ss:$16 sps:$4 sm:$0xff]  }
 0x45a   :  { %4465 = vmatmul.mubr.bf16.gmra.mrb[204].mxu0 %v17074_v57  ;;  %v17085_v57 = vld [vmem:[%s23060_s0 + $0x22c] ss:$16 sps:$4 sm:$0xff]  }
 0x45b   :  { %4474 = vmatprep.mubr.bf16.mxu0 %v17075_v15  ;;  %v17088_v15 = vld [vmem:[%s23060_s0 + $0x248] ss:$16 sps:$4 sm:$0xff]  }
 0x462   :  { %4475 = vmatmul.mubr.bf16.gmra.mrb[208].mxu0 %v17076_v0  ;;  %v17089_v0 = vld [vmem:[%s23060_s0 + $0x26c] ss:$16 sps:$4 sm:$0xff]  }
 0x463   :  { %4484 = vmatprep.mubr.bf16.mxu0 %v17077_v31  ;;  %v15770_v31 = vld [vmem:[%s23062_s3 + $0x420] ss:$16 sps:$4 sm:$0xff]  }
 0x46a   :  { %4485 = vmatmul.mubr.bf16.gmra.mrb[212].mxu0 %v17078_v23  ;;  %v15772_v23 = vld [vmem:[%s23062_s3 + $0x424] ss:$16 sps:$4 sm:$0xff]  }
 0x46b   :  { %4494 = vmatprep.mubr.bf16.mxu0 %v17079_v44  ;;  %v17090_v44 = vld [vmem:[%s23060_s0 + $0x268] ss:$16 sps:$4 sm:$0xff]   ;;  %6123 = vmatprep.subr.bf16.mxu1 %v15772_v23 }
 0x46c   :  { %6124 = vmatpush1.bf16.msra.mxu1 %v15770_v31  ;;  %v17101_v31 = vld [vmem:[%s23060_s0 + $0x32c] ss:$16 sps:$4 sm:$0xff]   ;;  %v17102_v23 = vld [vmem:[%s23060_s0 + $0x328] ss:$16 sps:$4 sm:$0xff]  }
 0x472   :  { %4495 = vmatmul.mubr.bf16.gmra.mrb[216].mxu0 %v17080_v38  ;;  %v17093_v38 = vld [vmem:[%s23060_s0 + $0x2ac] ss:$16 sps:$4 sm:$0xff]  }
 0x473   :  { %4504 = vmatprep.mubr.bf16.mxu0 %v17081_v53  ;;  %v17094_v53 = vld [vmem:[%s23060_s0 + $0x2a8] ss:$16 sps:$4 sm:$0xff]  }
 0x47a   :  { %4505 = vmatmul.mubr.bf16.gmra.mrb[220].mxu0 %v17082_v32  ;;  %v15773_v32 = vld [vmem:[%s23062_s3 + $0x440] ss:$16 sps:$4 sm:$0xff]  }
 0x47b   :  { %4514 = vmatprep.mubr.bf16.mxu0 %v17083_v8  ;;  %v15775_v8 = vld [vmem:[%s23062_s3 + $0x444] ss:$16 sps:$4 sm:$0xff]  }
 0x47c   :  { %6125 = vmatprep.subr.bf16.mxu1 %v15775_v8  ;;  %v23546_v8 = vld [vmem:[#allocation3_spill] sm:$0xff] }
 0x47d   :  { %6126 = vmatpush1.bf16.msra.mxu1 %v15773_v32 }
 0x482   :  { %4515 = vmatmul.mubr.bf16.gmra.mrb[224].mxu0 %v17084_v28  ;;  %v17095_v28 = vld [vmem:[%s23060_s0 + $0x2cc] ss:$16 sps:$4 sm:$0xff]  }
 0x483   :  { %4524 = vmatprep.mubr.bf16.mxu0 %v17085_v57  ;;  %v17098_v57 = vld [vmem:[%s23060_s0 + $0x2e8] ss:$16 sps:$4 sm:$0xff]  }
 0x48a   :  { %4525 = vmatmul.mubr.bf16.gmra.mrb[228].mxu0 %v17086_v20  ;;  %v17099_v20 = vld [vmem:[%s23060_s0 + $0x30c] ss:$16 sps:$4 sm:$0xff]  }
 0x48b   :  { %4534 = vmatprep.mubr.bf16.mxu0 %v17087_v36  ;;  %v15776_v36 = vld [vmem:[%s23062_s3 + $0x460] ss:$16 sps:$4 sm:$0xff]  }
 0x492   :  { %4535 = vmatmul.mubr.bf16.gmra.mrb[232].mxu0 %v17088_v15  ;;  %v15778_v15 = vld [vmem:[%s23062_s3 + $0x464] ss:$16 sps:$4 sm:$0xff]  }
 0x493   :  { %4544 = vmatprep.mubr.bf16.mxu0 %v17089_v0  ;;  %v17100_v0 = vld [vmem:[%s23060_s0 + $0x308] ss:$16 sps:$4 sm:$0xff]   ;;  %6127 = vmatprep.subr.bf16.mxu1 %v15778_v15 }
 0x494   :  { %6128 = vmatpush1.bf16.msra.mxu1 %v15776_v36  ;;  %v23548_v36 = vld [vmem:[#allocation5_spill] sm:$0xff] }
 0x49a   :  { %4545 = vmatmul.mubr.bf16.gmra.mrb[236].mxu0 %v17090_v44  ;;  %v17103_v44 = vld [vmem:[%s23060_s0 + $0x34c] ss:$16 sps:$4 sm:$0xff]  }
 0x49b   :  { %4554 = vmatprep.mubr.bf16.mxu0 %v17091_v63  ;;  %v15779_v63 = vld [vmem:[%s23062_s3 + $0x480] ss:$16 sps:$4 sm:$0xff]  }
 0x4a2   :  { %4555 = vmatmul.mubr.bf16.gmra.mrb[240].mxu0 %v17092_v14  ;;  %v15781_v14 = vld [vmem:[%s23062_s3 + $0x484] ss:$16 sps:$4 sm:$0xff]  }
 0x4a3   :  { %4564 = vmatprep.mubr.bf16.mxu0 %v17093_v38  ;;  %v17104_v38 = vld [vmem:[%s23060_s0 + $0x348] ss:$16 sps:$4 sm:$0xff]   ;;  %6129 = vmatprep.subr.bf16.mxu1 %v15781_v14 }
 0x4a4   :  { %6130 = vmatpush1.bf16.msra.mxu1 %v15779_v63  ;;  %v17107_v63 = vld [vmem:[%s23060_s0 + $0x38c] ss:$16 sps:$4 sm:$0xff]  }
 0x4aa   :  { %4565 = vmatmul.mubr.bf16.gmra.mrb[244].mxu0 %v17094_v53  ;;  %v17105_v53 = vld [vmem:[%s23060_s0 + $0x36c] ss:$16 sps:$4 sm:$0xff]  }
 0x4ab   :  { %4574 = vmatprep.mubr.bf16.mxu0 %v17095_v28 }
 0x4b2   :  { %4575 = vmatmul.mubr.bf16.gmra.mrb[248].mxu0 %v17096_v7 }
 0x4b3   :  { %4584 = vmatprep.mubr.bf16.mxu0 %v17097_v48  ;;  %v23547_v48 = vld [vmem:[#allocation2_spill] sm:$0xff] }
 0x4ba   :  { %4585 = vmatmul.mubr.bf16.gmra.mrb[252].mxu0 %v17098_v57  ;;  %v23551_v57 = vld [vmem:[#allocation6_spill] sm:$0xff] }
 0x4bb   :  { %4594 = vmatprep.mubr.bf16.mxu0 %v17099_v20 }
 0x4c2   :  { %4595 = vmatmul.mubr.bf16.gmra.mrb[0].mxu0 %v17100_v0 }
 0x4c3   :  { %4604 = vmatprep.mubr.bf16.mxu0 %v17101_v31  ;;  %v23549_v31 = vld [vmem:[#allocation4_spill] sm:$0xff] }
 0x4ca   :  { %4605 = vmatmul.mubr.bf16.gmra.mrb[4].mxu0 %v17102_v23 }
 0x4cb   :  { %4614 = vmatprep.mubr.bf16.mxu0 %v17103_v44  ;;  %v17106_v44 = vld [vmem:[%s23060_s0 + $0x368] ss:$16 sps:$4 sm:$0xff]  }
 0x4d2   :  { %4615 = vmatmul.mubr.bf16.gmra.mrb[8].mxu0 %v17104_v38  ;;  %v23550_v38 = vld [vmem:[#allocation7_spill] sm:$0xff] }
 0x4d3   :  { %4624 = vmatprep.mubr.bf16.mxu0 %v17105_v53  ;;  %v17109_v53 = vld [vmem:[%s23060_s0 + $0x3ac] ss:$16 sps:$4 sm:$0xff]  }
 0x4d5   :  { %v19515_v32 = vpop.f32.mrb[160].mxu0 }
 0x4d6   :  { %v19519_v7 = vpop.f32.mrb[161].mxu0 }
 0x4d7   :  { %v19523_v20 = vpop.f32.mrb[162].mxu0  ;;  %v23695_v9 = vmax.f32 %v23547_v48, %v19519_v7 }
 0x4d8   :  { %v19527_v0 = vpop.f32.mrb[163].mxu0 }
 0x4da   :  { %4625 = vmatmul.mubr.bf16.gmra.mrb[12].mxu0 %v17106_v44  ;;  %v15784_v44 = vld [vmem:[%s23062_s3 + $0x4a4] ss:$16 sps:$4 sm:$0xff]  }
 0x4db   :  { %4634 = vmatprep.mubr.bf16.mxu0 %v17107_v63  ;;  %v17110_v63 = vld [vmem:[%s23060_s0 + $0x3a8] ss:$16 sps:$4 sm:$0xff]   ;;  %6131 = vmatprep.subr.bf16.mxu1 %v15784_v44 }
 0x4dc   :  { %v23560_v44 = vld [vmem:[#allocation17_spill] sm:$0xff] }
 0x4dd   :  { %v19537_v14 = vpop.f32.mrb[164].mxu0 }
 0x4de   :  { %v19541_v15 = vpop.f32.mrb[165].mxu0 }
 0x4df   :  { %v19545_v28 = vpop.f32.mrb[166].mxu0 }
 0x4e0   :  { %v19549_v60 = vpop.f32.mrb[167].mxu0 }
 0x4e2   :  { %4635 = vmatmul.mubr.bf16.gmra.mrb[16].mxu0 %v17108_v26  ;;  %v17111_v26 = vld [vmem:[%s23060_s0 + $0x3cc] ss:$16 sps:$4 sm:$0xff]  }
 0x4e3   :  { %4644 = vmatprep.mubr.bf16.mxu0 %v17109_v53  ;;  %v15782_v53 = vld [vmem:[%s23062_s3 + $0x4a0] ss:$16 sps:$4 sm:$0xff]  }
 0x4e4   :  { %6132 = vmatpush1.bf16.msra.mxu1 %v15782_v53 }
 0x4e5   :  { %v19559_v23 = vpop.f32.mrb[168].mxu0 }
 0x4e6   :  { %v19563_v29 = vpop.f32.mrb[169].mxu0 }
 0x4e7   :  { %v19567_v45 = vpop.f32.mrb[170].mxu0 }
 0x4e8   :  { %v19571_v51 = vpop.f32.mrb[171].mxu0 }
 0x4ea   :  { %4645 = vmatmul.mubr.bf16.gmra.mrb[20].mxu0 %v17110_v63  ;;  %v17115_v63 = vld [vmem:[%s23060_s0 + $0x40c] ss:$16 sps:$4 sm:$0xff]  }
 0x4eb   :  { %4654 = vmatprep.mubr.bf16.mxu0 %v17111_v26  ;;  %v23561_v26 = vld [vmem:[#allocation16_spill] sm:$0xff] }
 0x4ed   :  { %v19587_v17 = vpop.f32.mrb[172].mxu0 }
 0x4ee   :  { %v19591_v5 = vpop.f32.mrb[173].mxu0 }
 0x4ef   :  { %v19595_v27 = vpop.f32.mrb[174].mxu0 }
 0x4f0   :  { %v19599_v16 = vpop.f32.mrb[175].mxu0 }
 0x4f2   :  { %4655 = vmatmul.mubr.bf16.gmra.mrb[24].mxu0 %v17112_v43  ;;  %v15787_v43 = vld [vmem:[%s23062_s3 + $0x4c4] ss:$16 sps:$4 sm:$0xff]  }
 0x4f3   :  { %4664 = vmatprep.mubr.bf16.mxu0 %v17113_v12  ;;  %v17116_v12 = vld [vmem:[%s23060_s0 + $0x408] ss:$16 sps:$4 sm:$0xff]   ;;  %6133 = vmatprep.subr.bf16.mxu1 %v15787_v43 }
 0x4f4   :  { %6134 = vmatpush1.bf16.msra.mxu1 %v15785_v56 }
 0x4f5   :  { %v19609_v39 = vpop.f32.mrb[176].mxu0 }
 0x4f6   :  { %23562 = vst [vmem:[#allocation109_spill] sm:$0xff] %v19609_v39  ;;  %v19613_v24 = vpop.f32.mrb[177].mxu0 }
 0x4f7   :  { %23564 = vst [vmem:[#allocation113_spill] sm:$0xff] %v19613_v24  ;;  %v19617_v49 = vpop.f32.mrb[178].mxu0 }
 0x4f8   :  { %23566 = vst [vmem:[#allocation3_spill] sm:$0xff] %v19617_v49  ;;  %v19621_v6 = vpop.f32.mrb[179].mxu0  ;;  %v17119_v49 = vld [vmem:[%s23060_s0 + $0x44c] ss:$16 sps:$4 sm:$0xff]  }
 0x4f9   :  { %23568 = vst [vmem:[#allocation2_spill] sm:$0xff] %v19621_v6 }
 0x4fa   :  { %4665 = vmatmul.mubr.bf16.gmra.mrb[28].mxu0 %v17114_v42  ;;  %v17117_v42 = vld [vmem:[%s23060_s0 + $0x42c] ss:$16 sps:$4 sm:$0xff]  }
 0x4fb   :  { %4674 = vmatprep.mubr.bf16.mxu0 %v17115_v63 }
 0x4fd   :  { %v19631_v53 = vpop.f32.mrb[180].mxu0 }
 0x4fe   :  { %23570 = vst [vmem:[#allocation5_spill] sm:$0xff] %v19631_v53  ;;  %v19635_v41 = vpop.f32.mrb[181].mxu0  ;;  %v17121_v53 = vld [vmem:[%s23060_s0 + $0x46c] ss:$16 sps:$4 sm:$0xff]  }
 0x4ff   :  { %23572 = vst [vmem:[#allocation4_spill] sm:$0xff] %v19635_v41  ;;  %v19639_v40 = vpop.f32.mrb[182].mxu0 }
 0x500   :  { %23574 = vst [vmem:[#allocation7_spill] sm:$0xff] %v19639_v40  ;;  %v19643_v50 = vpop.f32.mrb[183].mxu0 }
 0x501   :  { %23576 = vst [vmem:[#allocation6_spill] sm:$0xff] %v19643_v50  ;;  %v17120_v50 = vld [vmem:[%s23060_s0 + $0x448] ss:$16 sps:$4 sm:$0xff]  }
 0x502   :  { %4675 = vmatmul.mubr.bf16.gmra.mrb[32].mxu0 %v17116_v12  ;;  %v17126_v12 = vld [vmem:[%s23060_s0 + $0x4a8] ss:$16 sps:$4 sm:$0xff]  }
 0x503   :  { %4684 = vmatprep.mubr.bf16.mxu0 %v17117_v42  ;;  %v17118_v42 = vld [vmem:[%s23060_s0 + $0x428] ss:$16 sps:$4 sm:$0xff]  }
 0x505   :  { %v19659_v63 = vpop.f32.mrb[184].mxu0 }
 0x506   :  { %23578 = vst [vmem:[#allocation9_spill] sm:$0xff] %v19659_v63  ;;  %v19663_v40 = vpop.f32.mrb[185].mxu0  ;;  %v17123_v63 = vld [vmem:[%s23060_s0 + $0x48c] ss:$16 sps:$4 sm:$0xff]  }
 0x507   :  { %23580 = vst [vmem:[#allocation8_spill] sm:$0xff] %v19663_v40  ;;  %v19667_v55 = vpop.f32.mrb[186].mxu0 }
 0x508   :  { %23582 = vst [vmem:[#allocation11_spill] sm:$0xff] %v19667_v55  ;;  %v19671_v34 = vpop.f32.mrb[187].mxu0 }
 0x509   :  { %23584 = vst [vmem:[#allocation10_spill] sm:$0xff] %v19671_v34 }
 0x50a   :  { %4685 = vmatmul.mubr.bf16.gmra.mrb[36].mxu0 %v17118_v42  ;;  %v17127_v42 = vld [vmem:[%s23060_s0 + $0x4cc] ss:$16 sps:$4 sm:$0xff]  }
 0x50b   :  { %4694 = vmatprep.mubr.bf16.mxu0 %v17119_v49  ;;  %v15788_v49 = vld [vmem:[%s23062_s3 + $0x4e0] ss:$16 sps:$4 sm:$0xff]  }
 0x50d   :  { %v19681_v41 = vpop.f32.mrb[188].mxu0 }
 0x50e   :  { %23586 = vst [vmem:[#allocation13_spill] sm:$0xff] %v19681_v41  ;;  %v19685_v55 = vpop.f32.mrb[189].mxu0 }
 0x50f   :  { %23588 = vst [vmem:[#allocation12_spill] sm:$0xff] %v19685_v55  ;;  %v19689_v34 = vpop.f32.mrb[190].mxu0  ;;  %v17122_v55 = vld [vmem:[%s23060_s0 + $0x468] ss:$16 sps:$4 sm:$0xff]  }
 0x510   :  { %23590 = vst [vmem:[#allocation15_spill] sm:$0xff] %v19689_v34  ;;  %v19693_v6 = vpop.f32.mrb[191].mxu0 }
 0x511   :  { %23592 = vst [vmem:[#allocation14_spill] sm:$0xff] %v19693_v6 }
 0x512   :  { %4695 = vmatmul.mubr.bf16.gmra.mrb[40].mxu0 %v17120_v50  ;;  %v15790_v50 = vld [vmem:[%s23062_s3 + $0x4e4] ss:$16 sps:$4 sm:$0xff]  }
 0x513   :  { %4704 = vmatprep.mubr.bf16.mxu0 %v17121_v53  ;;  %6135 = vmatprep.subr.bf16.mxu1 %v15790_v50 }
 0x514   :  { %6136 = vmatpush1.bf16.msra.mxu1 %v15788_v49  ;;  %v17125_v49 = vld [vmem:[%s23060_s0 + $0x4ac] ss:$16 sps:$4 sm:$0xff]  }
 0x515   :  { %v19703_v56 = vpop.f32.mrb[192].mxu0 }
 0x516   :  { %23594 = vst [vmem:[#allocation17_spill] sm:$0xff] %v19703_v56  ;;  %v19707_v34 = vpop.f32.mrb[193].mxu0 }
 0x517   :  { %23596 = vst [vmem:[#allocation16_spill] sm:$0xff] %v19707_v34  ;;  %v19717_v43 = vpop.f32.mrb[194].mxu0 }
 0x518   :  { %23598 = vst [vmem:[#allocation19_spill] sm:$0xff] %v19717_v43  ;;  %v19721_v41 = vpop.f32.mrb[195].mxu0  ;;  %v17124_v43 = vld [vmem:[%s23060_s0 + $0x488] ss:$16 sps:$4 sm:$0xff]  }
 0x519   :  { %23600 = vst [vmem:[#allocation173_spill] sm:$0xff] %v19721_v41 }
 0x51a   :  { %4705 = vmatmul.mubr.bf16.gmra.mrb[44].mxu0 %v17122_v55 }
 0x51b   :  { %4714 = vmatprep.mubr.bf16.mxu0 %v17123_v63  ;;  %v15793_v63 = vld [vmem:[%s23062_s3 + $0x504] ss:$16 sps:$4 sm:$0xff]  }
 0x51c   :  { %6178 = vmatprep.subr.bf16.mxu1 %v15793_v63  ;;  %v17129_v63 = vld [vmem:[%s23060_s0 + $0x4ec] ss:$16 sps:$4 sm:$0xff]  }
 0x51d   :  { %v19731_v34 = vpop.f32.mrb[196].mxu0 }
 0x51e   :  { %23602 = vst [vmem:[#allocation174_spill] sm:$0xff] %v19731_v34  ;;  %v19735_v50 = vpop.f32.mrb[197].mxu0 }
 0x51f   :  { %23604 = vst [vmem:[#allocation175_spill] sm:$0xff] %v19735_v50  ;;  %v19739_v41 = vpop.f32.mrb[198].mxu0 }
 0x520   :  { %23606 = vst [vmem:[#allocation176_spill] sm:$0xff] %v19739_v41  ;;  %v19743_v53 = vpop.f32.mrb[199].mxu0  ;;  %v17128_v41 = vld [vmem:[%s23060_s0 + $0x4c8] ss:$16 sps:$4 sm:$0xff]  }
 0x521   :  { %23608 = vst [vmem:[#allocation177_spill] sm:$0xff] %v19743_v53 }
 0x522   :  { %4715 = vmatmul.mubr.bf16.gmra.mrb[48].mxu0 %v17124_v43 }
 0x523   :  { %4724 = vmatprep.mubr.bf16.mxu0 %v17125_v49 }
 0x525   :  { %v19756_v55 = vpop.f32.mrb[200].mxu0 }
 0x526   :  { %23610 = vst [vmem:[#allocation178_spill] sm:$0xff] %v19756_v55  ;;  %v19760_v50 = vpop.f32.mrb[201].mxu0  ;;  %v23693_v55 = vmax.f32 %v23546_v8, %v19515_v32 }
 0x527   :  { %23612 = vst [vmem:[#allocation179_spill] sm:$0xff] %v19760_v50  ;;  %v19764_v6 = vpop.f32.mrb[202].mxu0  ;;  %v17130_v50 = vld [vmem:[%s23060_s0 + $0x4e8] ss:$16 sps:$4 sm:$0xff]  }
 0x528   :  { %23614 = vst [vmem:[#allocation180_spill] sm:$0xff] %v19764_v6  ;;  %v19768_v56 = vpop.f32.mrb[203].mxu0 }
 0x529   :  { %23616 = vst [vmem:[#allocation181_spill] sm:$0xff] %v19768_v56 }
 0x52a   :  { %4725 = vmatmul.mubr.bf16.gmra.mrb[52].mxu0 %v17126_v12 }
 0x52b   :  { %4734 = vmatprep.mubr.bf16.mxu0 %v17127_v42 }
 0x52d   :  { %v19778_v53 = vpop.f32.mrb[204].mxu0 }
 0x52e   :  { %23618 = vst [vmem:[#allocation182_spill] sm:$0xff] %v19778_v53  ;;  %v19782_v6 = vpop.f32.mrb[205].mxu0 }
 0x52f   :  { %23620 = vst [vmem:[#allocation183_spill] sm:$0xff] %v19782_v6  ;;  %v19786_v56 = vpop.f32.mrb[206].mxu0 }
 0x530   :  { %23622 = vst [vmem:[#allocation184_spill] sm:$0xff] %v19786_v56  ;;  %v19790_v40 = vpop.f32.mrb[207].mxu0 }
 0x531   :  { %23624 = vst [vmem:[#allocation185_spill] sm:$0xff] %v19790_v40 }
 0x532   :  { %4735 = vmatmul.mubr.bf16.gmra.mrb[56].mxu0 %v17128_v41  ;;  %v17131_v41 = vld [vmem:[%s23061_s2] sm:$0x7] }
 0x533   :  { %4744 = vmatprep.mubr.bf16.mxu0 %v17129_v63 }
 0x535   :  { %v19800_v49 = vpop.f32.mrb[208].mxu0 }
 0x536   :  { %23626 = vst [vmem:[#allocation186_spill] sm:$0xff] %v19800_v49  ;;  %v19804_v56 = vpop.f32.mrb[209].mxu0 }
 0x537   :  { %23628 = vst [vmem:[#allocation187_spill] sm:$0xff] %v19804_v56  ;;  %v19808_v40 = vpop.f32.mrb[210].mxu0 }
 0x538   :  { %23630 = vst [vmem:[#allocation188_spill] sm:$0xff] %v19808_v40  ;;  %v19812_v43 = vpop.f32.mrb[211].mxu0 }
 0x539   :  { %23632 = vst [vmem:[#allocation189_spill] sm:$0xff] %v19812_v43 }
 0x53a   :  { %4745 = vmatmul.mubr.bf16.gmra.mrb[60].mxu0 %v17130_v50 }
 0x53d   :  { %v19819_v12 = vpop.f32.mrb[212].mxu0 }
 0x53e   :  { %23634 = vst [vmem:[#allocation190_spill] sm:$0xff] %v19819_v12  ;;  %v19823_v56 = vpop.f32.mrb[213].mxu0 }
 0x53f   :  { %23636 = vst [vmem:[#allocation191_spill] sm:$0xff] %v19823_v56  ;;  %v19827_v40 = vpop.f32.mrb[214].mxu0 }
 0x540   :  { %23638 = vst [vmem:[#allocation192_spill] sm:$0xff] %v19827_v40  ;;  %v19831_v43 = vpop.f32.mrb[215].mxu0 }
 0x541   :  { %23640 = vst [vmem:[#allocation193_spill] sm:$0xff] %v19831_v43 }
 0x545   :  { %v19835_v6 = vpop.f32.mrb[216].mxu0 }
 0x546   :  { %23642 = vst [vmem:[#allocation194_spill] sm:$0xff] %v19835_v6  ;;  %v19839_v12 = vpop.f32.mrb[217].mxu0 }
 0x547   :  { %23644 = vst [vmem:[#allocation195_spill] sm:$0xff] %v19839_v12  ;;  %v19843_v56 = vpop.f32.mrb[218].mxu0 }
 0x548   :  { %23646 = vst [vmem:[#allocation196_spill] sm:$0xff] %v19843_v56  ;;  %v19847_v40 = vpop.f32.mrb[219].mxu0 }
 0x549   :  { %23648 = vst [vmem:[#allocation197_spill] sm:$0xff] %v19847_v40 }
 0x54d   :  { %v19851_v43 = vpop.f32.mrb[220].mxu0 }
 0x54e   :  { %23650 = vst [vmem:[#allocation198_spill] sm:$0xff] %v19851_v43  ;;  %v19855_v6 = vpop.f32.mrb[221].mxu0 }
 0x54f   :  { %23652 = vst [vmem:[#allocation199_spill] sm:$0xff] %v19855_v6  ;;  %v19859_v12 = vpop.f32.mrb[222].mxu0 }
 0x550   :  { %23654 = vst [vmem:[#allocation200_spill] sm:$0xff] %v19859_v12  ;;  %v19863_v56 = vpop.f32.mrb[223].mxu0 }
 0x551   :  { %23656 = vst [vmem:[#allocation201_spill] sm:$0xff] %v19863_v56 }
 0x555   :  { %v19867_v40 = vpop.f32.mrb[224].mxu0 }
 0x556   :  { %23658 = vst [vmem:[#allocation202_spill] sm:$0xff] %v19867_v40  ;;  %v19871_v43 = vpop.f32.mrb[225].mxu0 }
 0x557   :  { %23660 = vst [vmem:[#allocation203_spill] sm:$0xff] %v19871_v43  ;;  %v19875_v6 = vpop.f32.mrb[226].mxu0 }
 0x558   :  { %23662 = vst [vmem:[#allocation204_spill] sm:$0xff] %v19875_v6  ;;  %v19879_v12 = vpop.f32.mrb[227].mxu0 }
 0x559   :  { %23664 = vst [vmem:[#allocation205_spill] sm:$0xff] %v19879_v12 }
 0x55d   :  { %v19883_v56 = vpop.f32.mrb[228].mxu0 }
 0x55e   :  { %23666 = vst [vmem:[#allocation206_spill] sm:$0xff] %v19883_v56  ;;  %v19887_v40 = vpop.f32.mrb[229].mxu0 }
 0x55f   :  { %23668 = vst [vmem:[#allocation207_spill] sm:$0xff] %v19887_v40  ;;  %v19891_v43 = vpop.f32.mrb[230].mxu0 }
 0x560   :  { %23670 = vst [vmem:[#allocation208_spill] sm:$0xff] %v19891_v43  ;;  %v19895_v6 = vpop.f32.mrb[231].mxu0 }
 0x561   :  { %23672 = vst [vmem:[#allocation209_spill] sm:$0xff] %v19895_v6 }
 0x565   :  { %v19899_v12 = vpop.f32.mrb[232].mxu0 }
 0x566   :  { %23674 = vst [vmem:[#allocation210_spill] sm:$0xff] %v19899_v12  ;;  %v19903_v56 = vpop.f32.mrb[233].mxu0 }
 0x567   :  { %23676 = vst [vmem:[#allocation211_spill] sm:$0xff] %v19903_v56  ;;  %v19907_v40 = vpop.f32.mrb[234].mxu0 }
 0x568   :  { %23678 = vst [vmem:[#allocation212_spill] sm:$0xff] %v19907_v40  ;;  %v19911_v43 = vpop.f32.mrb[235].mxu0 }
 0x569   :  { %23680 = vst [vmem:[#allocation213_spill] sm:$0xff] %v19911_v43  ;;  %v23690_v43 = vld [vmem:[#allocation111_spill] sm:$0xff] }
 0x56a   :  { %v19932_v53 = vsub.s32 1, %v23690_v43  ;;  %v23274_v42 = vsub.s32 2, %v23690_v43 }
 0x56c   :  { %23691 = vst [vmem:[#allocation111_spill] sm:$0xff] %v19932_v53  ;;  %v19945_v50 = vrot.slane %v17131_v41, %v23274_v42 }
 0x56d   :  { %v19915_v6 = vpop.f32.mrb[236].mxu0 }
 0x56e   :  { %23682 = vst [vmem:[#allocation214_spill] sm:$0xff] %v19915_v6  ;;  %v19919_v12 = vpop.f32.mrb[237].mxu0 }
 0x56f   :  { %23684 = vst [vmem:[#allocation215_spill] sm:$0xff] %v19919_v12  ;;  %v19923_v56 = vpop.f32.mrb[238].mxu0  ;;  %v19940_v12 = vrot.slane %v17131_v41, %v19932_v53  ;;  %v23697_v41 = vmax.f32 %v23548_v36, %v19523_v20  ;;  %v23700_v20 = vld [vmem:[#allocation118_spill] sm:$0xff] }
 0x570   :  { %23686 = vst [vmem:[#allocation216_spill] sm:$0xff] %v19923_v56  ;;  %v19927_v40 = vpop.f32.mrb[239].mxu0  ;;  %v23692_v56 = vld [vmem:[#allocation115_spill] sm:$0xff] }
 0x571   :  { %23688 = vst [vmem:[#allocation217_spill] sm:$0xff] %v19927_v40 }
 0x575   :  { %v4556_v6 = vpop.f32.mrb[240].mxu0 }
 0x576   :  { %v4876_v18 = vmax.f32 %v18674_v47, %v4556_v6  ;;  %v4558_v63 = vpop.f32.mrb[241].mxu0  ;;  %v23694_v47 = vld [vmem:[#allocation117_spill] sm:$0xff] }
 0x577   :  { %v4877_v34 = vmax.f32 %v23692_v56, %v4558_v63  ;;  %v4560_v40 = vpop.f32.mrb[242].mxu0 }
 0x578   :  { %v4996_v49 = vmax.f32 %v23693_v55, %v4876_v18  ;;  %v4879_v6 = vmax.f32 %v23694_v47, %v4560_v40  ;;  %v4562_v24 = vpop.f32.mrb[243].mxu0  ;;  %v23698_v18 = vmax.f32 %v23549_v31, %v19527_v0 }
 0x579   :  { %v4997_v53 = vmax.f32 %v23695_v9, %v4877_v34  ;;  %v4880_v39 = vmax.f32 %v23696_v22, %v4562_v24  ;;  %v23699_v22 = vld [vmem:[#allocation119_spill] sm:$0xff] }
 0x57a   :  { %v5133_v56 = vadd.f32 %v19940_v12, %v4996_v49  ;;  %v4999_v63 = vmax.f32 %v23697_v41, %v4879_v6 }
 0x57b   :  { %v5134_v42 = vadd.f32 %v19945_v50, %v4997_v53  ;;  %v5000_v32 = vmax.f32 %v23698_v18, %v4880_v39  ;;  %v23701_v53 = vmax.f32 %v23550_v38, %v19537_v14 }
 0x57c   :  { %v5136_v40 = vadd.f32 %v19940_v12, %v4999_v63  ;;  %v5253_v34 = vmax.f32 %v5133_v56, 0.0  ;;  %v23702_v56 = vmax.f32 %v23551_v57, %v19541_v15 }
 0x57d   :  { %v5137_v8 = vadd.f32 %v19945_v50, %v5000_v32  ;;  %v4566_v7 = vpop.f32.mrb[244].mxu0  ;;  %v5254_v55 = vmax.f32 %v5134_v42, 0.0  ;;  %v23703_v32 = vmax.f32 %v23552_v21, %v19545_v28 }
 0x57e   :  { %v5256_v9 = vmax.f32 %v5136_v40, 0.0  ;;  %v4882_v24 = vmax.f32 %v23699_v22, %v4566_v7  ;;  %v4568_v48 = vpop.f32.mrb[245].mxu0 }
 0x57f   :  { %v5257_v49 = vmax.f32 %v5137_v8, 0.0  ;;  %v4883_v36 = vmax.f32 %v23700_v20, %v4568_v48  ;;  %v4570_v47 = vpop.f32.mrb[246].mxu0  ;;  %v23705_v48 = vmax.f32 %v23554_v33, %v19559_v23  ;;  %v23706_v20 = vmax.f32 %v23555_v30, %v19563_v29 }
 0x580   :  { %v5002_v0 = vmax.f32 %v23701_v53, %v4882_v24  ;;  %v4885_v39 = vmax.f32 %v18709_v37, %v4570_v47  ;;  %v4572_v31 = vpop.f32.mrb[247].mxu0  ;;  %v19971_v6 = vpack.c.bf16 %v5256_v9, %v5253_v34  ;;  %v23704_v37 = vmax.f32 %v23553_v19, %v19549_v60 }
 0x581   :  { %v19973_v41 = vpack.c.bf16 %v5257_v49, %v5254_v55  ;;  %v5003_v63 = vmax.f32 %v23702_v56, %v4883_v36  ;;  %v4886_v42 = vmax.f32 %v18707_v4, %v4572_v31  ;;  %v23707_v53 = vmax.f32 %v23556_v3, %v19567_v45 }
 0x582   :  { %v5139_v18 = vadd.f32 %v19940_v12, %v5002_v0  ;;  %v5005_v14 = vmax.f32 %v23703_v32, %v4885_v39  ;;  %v23709_v32 = vmax.f32 %v23558_v52, %v19587_v17 }
 0x583   :  { %v5140_v38 = vadd.f32 %v19945_v50, %v5003_v63  ;;  %v5006_v40 = vmax.f32 %v23704_v37, %v4886_v42  ;;  %v23710_v37 = vmax.f32 %v23559_v1, %v19591_v5 }
 0x584   :  { %v5142_v8 = vadd.f32 %v19940_v12, %v5005_v14  ;;  %v5259_v15 = vmax.f32 %v5139_v18, 0.0 }
 0x585   :  { %v5143_v7 = vadd.f32 %v19945_v50, %v5006_v40  ;;  %v4576_v57 = vpop.f32.mrb[248].mxu0  ;;  %v5260_v22 = vmax.f32 %v5140_v38, 0.0 }
 0x586   :  { %v5262_v34 = vmax.f32 %v5142_v8, 0.0  ;;  %v4888_v4 = vmax.f32 %v18729_v25, %v4576_v57  ;;  %v4578_v9 = vpop.f32.mrb[249].mxu0 }
 0x587   :  { %v5263_v24 = vmax.f32 %v5143_v7, 0.0  ;;  %v4889_v21 = vmax.f32 %v18727_v61, %v4578_v9  ;;  %v4580_v28 = vpop.f32.mrb[250].mxu0  ;;  %v23711_v7 = vmax.f32 %v23560_v44, %v19595_v27 }
 0x588   :  { %v5008_v60 = vmax.f32 %v23705_v48, %v4888_v4  ;;  %v4891_v19 = vmax.f32 %v18733_v58, %v4580_v28  ;;  %v4582_v55 = vpop.f32.mrb[251].mxu0  ;;  %v19995_v49 = vpack.c.bf16 %v5262_v34, %v5259_v15  ;;  %v23708_v58 = vmax.f32 %v23557_v35, %v19571_v51 }
 0x589   :  { %v5009_v36 = vmax.f32 %v23706_v20, %v4889_v21  ;;  %v4892_v25 = vmax.f32 %v18731_v54, %v4582_v55  ;;  %v20001_v47 = vpack.c.bf16 %v5263_v24, %v5260_v22  ;;  %v23713_v21 = vld [vmem:[#allocation109_spill] sm:$0xff]  ;;  %v23716_v55 = vld [vmem:[#allocation18_spill] sm:$0xff] }
 0x58a   :  { %v5145_v61 = vadd.f32 %v19940_v12, %v5008_v60  ;;  %v5011_v33 = vmax.f32 %v23707_v53, %v4891_v19  ;;  %v23714_v28 = vmax.f32 %v23563_v11, %v23713_v21  ;;  %v23717_v20 = vld [vmem:[#allocation113_spill] sm:$0xff] }
 0x58b   :  { %v5146_v23 = vadd.f32 %v19945_v50, %v5009_v36  ;;  %v5012_v0 = vmax.f32 %v23708_v58, %v4892_v25  ;;  %v23718_v36 = vmax.f32 %v23716_v55, %v23717_v20  ;;  %v23736_v21 = vld [vmem:[#allocation25_spill] sm:$0xff]  ;;  %v23740_v55 = vld [vmem:[#allocation6_spill] sm:$0xff] }
 0x58c   :  { %v5148_v39 = vadd.f32 %v19940_v12, %v5011_v33  ;;  %v5265_v54 = vmax.f32 %v5145_v61, 0.0  ;;  %v23720_v33 = vld [vmem:[#allocation21_spill] sm:$0xff] }
 0x58d   :  { %v5149_v29 = vadd.f32 %v19945_v50, %v5012_v0  ;;  %v4586_v30 = vpop.f32.mrb[252].mxu0  ;;  %v5266_v42 = vmax.f32 %v5146_v23, 0.0  ;;  %v23721_v23 = vld [vmem:[#allocation3_spill] sm:$0xff] }
 0x58e   :  { %v5268_v31 = vmax.f32 %v5148_v39, 0.0  ;;  %v4894_v56 = vmax.f32 %v18753_v59, %v4586_v30  ;;  %v4588_v63 = vpop.f32.mrb[253].mxu0  ;;  %v23722_v58 = vmax.f32 %v23720_v33, %v23721_v23  ;;  %v23723_v39 = vld [vmem:[#allocation20_spill] sm:$0xff] }
 0x58f   :  { %v5269_v18 = vmax.f32 %v5149_v29, 0.0  ;;  %v4895_v45 = vmax.f32 %v18751_v2, %v4588_v63  ;;  %v4590_v3 = vpop.f32.mrb[254].mxu0  ;;  %v23724_v29 = vld [vmem:[#allocation2_spill] sm:$0xff] }
 0x590   :  { %v5014_v51 = vmax.f32 %v23709_v32, %v4894_v56  ;;  %v4897_v35 = vmax.f32 %v18760_v10, %v4590_v3  ;;  %v4592_v14 = vpop.f32.mrb[255].mxu0  ;;  %v20019_v38 = vpack.c.bf16 %v5268_v31, %v5265_v54  ;;  %v23712_v10 = vmax.f32 %v23561_v26, %v19599_v16  ;;  %v23715_v26 = vld [vmem:[#allocation124_spill] sm:$0xff] }
 0x591   :  { %v5015_v40 = vmax.f32 %v23710_v37, %v4895_v45  ;;  %v4898_v59 = vmax.f32 %v18755_v46, %v4592_v14  ;;  %v20025_v8 = vpack.c.bf16 %v5269_v18, %v5266_v42  ;;  %v23725_v30 = vmax.f32 %v23723_v39, %v23724_v29  ;;  %v23726_v45 = vld [vmem:[#allocation127_spill] sm:$0xff]  ;;  %v23727_v14 = vld [vmem:[#allocation126_spill] sm:$0xff] }
 0x592   :  { %v5151_v2 = vadd.f32 %v19940_v12, %v5014_v51  ;;  %v5017_v52 = vmax.f32 %v23711_v7, %v4897_v35  ;;  %v15799_v23 = vld [vmem:[%s23062_s3 + $0x544] ss:$16 sps:$4 sm:$0xff]  }
 0x593   :  { %v5152_v17 = vadd.f32 %v19945_v50, %v5015_v40  ;;  %v5018_v57 = vmax.f32 %v23712_v10, %v4898_v59  ;;  %v23728_v59 = vld [vmem:[#allocation23_spill] sm:$0xff] }
 0x594   :  { %v5154_v15 = vadd.f32 %v19940_v12, %v5017_v52  ;;  %v5271_v46 = vmax.f32 %v5151_v2, 0.0  ;;  %v23729_v2 = vld [vmem:[#allocation5_spill] sm:$0xff] }
 0x595   :  { %v5155_v5 = vadd.f32 %v19945_v50, %v5018_v57  ;;  %v4596_v1 = vpop.f32.mrb[0].mxu0  ;;  %v5272_v22 = vmax.f32 %v5152_v17, 0.0  ;;  %v23730_v7 = vmax.f32 %v23728_v59, %v23729_v2  ;;  %v23731_v17 = vld [vmem:[#allocation129_spill] sm:$0xff]  ;;  %v23750_v59 = vld [vmem:[#allocation8_spill] sm:$0xff] }
 0x596   :  { %v5274_v34 = vmax.f32 %v5154_v15, 0.0  ;;  %v4900_v4 = vmax.f32 %v18783_v13, %v4596_v1  ;;  %v4598_v9 = vpop.f32.mrb[1].mxu0  ;;  %v23719_v13 = vld [vmem:[#allocation123_spill] sm:$0xff] }
 0x597   :  { %v5275_v24 = vmax.f32 %v5155_v5, 0.0  ;;  %v4901_v27 = vmax.f32 %v18781_v62, %v4598_v9  ;;  %v4600_v44 = vpop.f32.mrb[2].mxu0  ;;  %v15791_v5 = vld [vmem:[%s23062_s3 + $0x500] ss:$16 sps:$4 sm:$0xff]  }
 0x598   :  { %v5020_v16 = vmax.f32 %v23714_v28, %v4900_v4  ;;  %v4903_v48 = vmax.f32 %v23715_v26, %v4600_v44  ;;  %v4602_v60 = vpop.f32.mrb[3].mxu0  ;;  %v20043_v19 = vpack.c.bf16 %v5274_v34, %v5271_v46  ;;  %v23732_v46 = vld [vmem:[#allocation22_spill] sm:$0xff]  ;;  %v23733_v34 = vld [vmem:[#allocation4_spill] sm:$0xff]  ;;  %v23737_v28 = vld [vmem:[#allocation7_spill] sm:$0xff] }
 0x599   :  { %v5021_v25 = vmax.f32 %v23718_v36, %v4901_v27  ;;  %v4904_v61 = vmax.f32 %v23719_v13, %v4602_v60  ;;  %v20049_v53 = vpack.c.bf16 %v5275_v24, %v5272_v22  ;;  %v23734_v4 = vmax.f32 %v23732_v46, %v23733_v34  ;;  %v23735_v22 = vld [vmem:[#allocation128_spill] sm:$0xff]  ;;  %v23753_v46 = vld [vmem:[#allocation29_spill] sm:$0xff]  ;;  %v23754_v34 = vld [vmem:[#allocation11_spill] sm:$0xff] }
 0x59a   :  { %v5157_v62 = vadd.f32 %v19940_v12, %v5020_v16  ;;  %v5023_v11 = vmax.f32 %v23722_v58, %v4903_v48  ;;  %v15796_v27 = vld [vmem:[%s23062_s3 + $0x524] ss:$16 sps:$4 sm:$0xff]   ;;  %v23738_v16 = vmax.f32 %v23736_v21, %v23737_v28  ;;  %v23759_v28 = vld [vmem:[#allocation135_spill] sm:$0xff] }
 0x59b   :  { %v5158_v0 = vadd.f32 %v19945_v50, %v5021_v25  ;;  %v5024_v54 = vmax.f32 %v23725_v30, %v4904_v61  ;;  %v23739_v60 = vld [vmem:[#allocation24_spill] sm:$0xff]  ;;  %v23742_v25 = vld [vmem:[#allocation130_spill] sm:$0xff] }
 0x59c   :  { %v5160_v31 = vadd.f32 %v19940_v12, %v5023_v11  ;;  %v5277_v42 = vmax.f32 %v5157_v62, 0.0  ;;  %v23741_v20 = vmax.f32 %v23739_v60, %v23740_v55  ;;  %v15794_v61 = vld [vmem:[%s23062_s3 + $0x520] ss:$16 sps:$4 sm:$0xff]   ;;  %v15805_v55 = vld [vmem:[%s23062_s3 + $0x584] ss:$16 sps:$4 sm:$0xff]  }
 0x59d   :  { %v5161_v56 = vadd.f32 %v19945_v50, %v5024_v54  ;;  %v4606_v63 = vpop.f32.mrb[4].mxu0  ;;  %v5278_v51 = vmax.f32 %v5158_v0, 0.0  ;;  %v23743_v0 = vld [vmem:[#allocation132_spill] sm:$0xff] }
 0x59e   :  { %v5280_v18 = vmax.f32 %v5160_v31, 0.0  ;;  %v4906_v3 = vmax.f32 %v23726_v45, %v4606_v63  ;;  %v4608_v32 = vpop.f32.mrb[5].mxu0  ;;  %v23744_v31 = vld [vmem:[#allocation131_spill] sm:$0xff] }
 0x59f   :  { %v5281_v35 = vmax.f32 %v5161_v56, 0.0  ;;  %v4907_v37 = vmax.f32 %v23727_v14, %v4608_v32  ;;  %v4610_v40 = vpop.f32.mrb[6].mxu0  ;;  %v23748_v32 = vld [vmem:[#allocation134_spill] sm:$0xff] }
 0x5a0   :  { %v5026_v52 = vmax.f32 %v23730_v7, %v4906_v3  ;;  %v4909_v10 = vmax.f32 %v23731_v17, %v4610_v40  ;;  %v4612_v57 = vpop.f32.mrb[7].mxu0  ;;  %v20067_v15 = vpack.c.bf16 %v5280_v18, %v5277_v42  ;;  %v23745_v42 = vld [vmem:[#allocation27_spill] sm:$0xff]  ;;  %v23746_v18 = vld [vmem:[#allocation9_spill] sm:$0xff]  ;;  %v23749_v40 = vld [vmem:[#allocation26_spill] sm:$0xff] }
 0x5a1   :  { %v20072_v1 = vpack.c.bf16 %v5281_v35, %v5278_v51  ;;  %v5027_v9 = vmax.f32 %v23734_v4, %v4907_v37  ;;  %v4910_v24 = vmax.f32 %v23735_v22, %v4612_v57  ;;  %v23747_v45 = vmax.f32 %v23745_v42, %v23746_v18  ;;  %v15797_v37 = vld [vmem:[%s23062_s3 + $0x540] ss:$16 sps:$4 sm:$0xff]  }
 0x5a2   :  { %v5163_v44 = vadd.f32 %v19940_v12, %v5026_v52  ;;  %v5029_v26 = vmax.f32 %v23738_v16, %v4909_v10  ;;  %6137 = vmatprep.mubr.bf16.mxu1 %v20067_v15  ;;  %v23751_v2 = vmax.f32 %v23749_v40, %v23750_v59  ;;  %v23752_v52 = vld [vmem:[#allocation133_spill] sm:$0xff]  ;;  %v15802_v10 = vld [vmem:[%s23062_s3 + $0x564] ss:$16 sps:$4 sm:$0xff]   ;;  %v23755_v4 = vmax.f32 %v23753_v46, %v23754_v34  ;;  %v15803_v18 = vld [vmem:[%s23062_s3 + $0x580] ss:$16 sps:$4 sm:$0xff]  }
 0x5a3   :  { %v5164_v48 = vadd.f32 %v19945_v50, %v5027_v9  ;;  %v5030_v36 = vmax.f32 %v23741_v20, %v4910_v24  ;;  %6138 = vmatmul.mubr.bf16.vlgmr.msra.gmra.mrb[160].mxu1 %v23742_v25  ;;  %v23756_v24 = vld [vmem:[#allocation28_spill] sm:$0xff]  ;;  %v23774_v34 = vld [vmem:[#allocation14_spill] sm:$0xff] }
 0x5a4   :  { %v5166_v13 = vadd.f32 %v19940_v12, %v5029_v26  ;;  %6179 = vmatpush1.bf16.msra.mxu1 %v15791_v5  ;;  %v5283_v58 = vmax.f32 %v5163_v44, 0.0  ;;  %v15800_v26 = vld [vmem:[%s23062_s3 + $0x560] ss:$16 sps:$4 sm:$0xff]   ;;  %v15808_v40 = vld [vmem:[%s23062_s3 + $0x5a4] ss:$16 sps:$4 sm:$0xff]  }
 0x5a5   :  { %v5167_v62 = vadd.f32 %v19945_v50, %v5030_v36  ;;  %v4616_v33 = vpop.f32.mrb[8].mxu0  ;;  %6180 = vmatprep.subr.bf16.mxu1 %v15796_v27  ;;  %v5284_v30 = vmax.f32 %v5164_v48, 0.0  ;;  %v23757_v27 = vld [vmem:[#allocation10_spill] sm:$0xff]  ;;  %v23773_v46 = vld [vmem:[#allocation32_spill] sm:$0xff] }
 0x5a6   :  { %v5286_v11 = vmax.f32 %v5166_v13, 0.0  ;;  %v4912_v39 = vmax.f32 %v23743_v0, %v4616_v33  ;;  %v4618_v29 = vpop.f32.mrb[9].mxu0  ;;  %v23758_v44 = vmax.f32 %v23756_v24, %v23757_v27  ;;  %v23760_v13 = vld [vmem:[#allocation137_spill] sm:$0xff]  ;;  %v15806_v27 = vld [vmem:[%s23062_s3 + $0x5a0] ss:$16 sps:$4 sm:$0xff]  }
 0x5a7   :  { %v5287_v54 = vmax.f32 %v5167_v62, 0.0  ;;  %v4913_v56 = vmax.f32 %v23744_v31, %v4618_v29  ;;  %v4620_v63 = vpop.f32.mrb[10].mxu0  ;;  %v23763_v29 = vld [vmem:[#allocation13_spill] sm:$0xff]  ;;  %v23765_v31 = vld [vmem:[#allocation139_spill] sm:$0xff] }
 0x5a8   :  { %v5032_v3 = vmax.f32 %v23747_v45, %v4912_v39  ;;  %v4915_v51 = vmax.f32 %v23748_v32, %v4620_v63  ;;  %6181 = vmatpush1.bf16.msra.mxu1 %v15794_v61  ;;  %v4622_v35 = vpop.f32.mrb[11].mxu0  ;;  %v20105_v14 = vpack.c.bf16 %v5286_v11, %v5283_v58  ;;  %v23761_v58 = vld [vmem:[#allocation136_spill] sm:$0xff]  ;;  %v23762_v39 = vld [vmem:[#allocation31_spill] sm:$0xff]  ;;  %v23766_v45 = vld [vmem:[#allocation30_spill] sm:$0xff] }
 0x5a9   :  { %v5033_v7 = vmax.f32 %v23751_v2, %v4913_v56  ;;  %v4916_v17 = vmax.f32 %v23752_v52, %v4622_v35  ;;  %6182 = vmatprep.subr.bf16.mxu1 %v15799_v23  ;;  %v20117_v57 = vpack.c.bf16 %v5287_v54, %v5284_v30  ;;  %v23764_v30 = vmax.f32 %v23762_v39, %v23763_v29  ;;  %v23769_v35 = vld [vmem:[#allocation138_spill] sm:$0xff]  ;;  %v23771_v52 = vld [vmem:[#allocation15_spill] sm:$0xff]  ;;  %v23782_v39 = vld [vmem:[#allocation144_spill] sm:$0xff] }
 0x5aa   :  { %v5169_v5 = vadd.f32 %v19940_v12, %v5032_v3  ;;  %v5035_v9 = vmax.f32 %v23755_v4, %v4915_v51  ;;  %6147 = vmatprep.mubr.bf16.mxu1 %v20105_v14  ;;  %v23767_v3 = vld [vmem:[#allocation12_spill] sm:$0xff]  ;;  %v23775_v4 = vmax.f32 %v23773_v46, %v23774_v34 }
 0x5ab   :  { %v5170_v22 = vadd.f32 %v19945_v50, %v5033_v7  ;;  %v5036_v21 = vmax.f32 %v23758_v44, %v4916_v17  ;;  %6148 = vmatmul.mubr.bf16.gmra.mrb[164].mxu1 %v23759_v28  ;;  %v23768_v32 = vmax.f32 %v23766_v45, %v23767_v3  ;;  %v23770_v7 = vld [vmem:[#allocation33_spill] sm:$0xff]  ;;  %v23786_v3 = vld [vmem:[#allocation143_spill] sm:$0xff] }
 0x5ac   :  { %v5172_v16 = vadd.f32 %v19940_v12, %v5035_v9  ;;  %6183 = vmatpush1.bf16.msra.mxu1 %v15797_v37  ;;  %v5289_v20 = vmax.f32 %v5169_v5, 0.0  ;;  %v23772_v17 = vmax.f32 %v23770_v7, %v23771_v52 }
 0x5ad   :  { %v5173_v48 = vadd.f32 %v19945_v50, %v5036_v21  ;;  %v4626_v60 = vpop.f32.mrb[12].mxu0  ;;  %6184 = vmatprep.subr.bf16.mxu1 %v15802_v10  ;;  %v5290_v33 = vmax.f32 %v5170_v22, 0.0  ;;  %v23776_v22 = vld [vmem:[#allocation140_spill] sm:$0xff] }
 0x5ae   :  { %v5292_v36 = vmax.f32 %v5172_v16, 0.0  ;;  %v4918_v61 = vmax.f32 %v23760_v13, %v4626_v60  ;;  %v4628_v62 = vpop.f32.mrb[13].mxu0  ;;  %v15811_v16 = vld [vmem:[%s23062_s3 + $0x5c4] ss:$16 sps:$4 sm:$0xff]  }
 0x5af   :  { %v5293_v23 = vmax.f32 %v5173_v48, 0.0  ;;  %v4919_v11 = vmax.f32 %v23761_v58, %v4628_v62  ;;  %v4630_v0 = vpop.f32.mrb[14].mxu0  ;;  %v23777_v60 = vld [vmem:[#allocation142_spill] sm:$0xff]  ;;  %v23780_v58 = vld [vmem:[#allocation17_spill] sm:$0xff] }
 0x5b0   :  { %v5038_v54 = vmax.f32 %v23764_v30, %v4918_v61  ;;  %v4921_v56 = vmax.f32 %v23765_v31, %v4630_v0  ;;  %6185 = vmatpush1.bf16.msra.mxu1 %v15800_v26  ;;  %v4632_v63 = vpop.f32.mrb[15].mxu0  ;;  %v20143_v42 = vpack.c.bf16 %v5292_v36, %v5289_v20  ;;  %v23778_v61 = vld [vmem:[#allocation141_spill] sm:$0xff]  ;;  %v15809_v31 = vld [vmem:[%s23062_s3 + $0x5c0] ss:$16 sps:$4 sm:$0xff]  }
 0x5b1   :  { %v5039_v51 = vmax.f32 %v23768_v32, %v4919_v11  ;;  %v4922_v37 = vmax.f32 %v23769_v35, %v4632_v63  ;;  %6186 = vmatprep.subr.bf16.mxu1 %v15805_v55  ;;  %v20155_v59 = vpack.c.bf16 %v5293_v23, %v5290_v33  ;;  %v23779_v23 = vld [vmem:[#allocation35_spill] sm:$0xff]  ;;  %v23784_v63 = vld [vmem:[#allocation16_spill] sm:$0xff] }
 0x5b2   :  { %v5175_v2 = vadd.f32 %v19940_v12, %v5038_v54  ;;  %v5041_v10 = vmax.f32 %v23772_v17, %v4921_v56  ;;  %6157 = vmatprep.mubr.bf16.mxu1 %v20143_v42  ;;  %v23781_v11 = vmax.f32 %v23779_v23, %v23780_v58  ;;  %v23783_v56 = vld [vmem:[#allocation34_spill] sm:$0xff]  ;;  %v23796_v23 = vld [vmem:[#allocation39_spill] sm:$0xff] }
 0x5b3   :  { %v5176_v5 = vadd.f32 %v19945_v50, %v5039_v51  ;;  %v5042_v9 = vmax.f32 %v23775_v4, %v4922_v37  ;;  %6158 = vmatmul.mubr.bf16.gmra.mrb[168].mxu1 %v23776_v22  ;;  %v15814_v51 = vld [vmem:[%s23062_s3 + $0x5e4] ss:$16 sps:$4 sm:$0xff]   ;;  %v23793_v4 = vld [vmem:[#allocation145_spill] sm:$0xff] }
 0x5b4   :  { %v5178_v24 = vadd.f32 %v19940_v12, %v5041_v10  ;;  %6187 = vmatpush1.bf16.msra.mxu1 %v15803_v18  ;;  %v5295_v26 = vmax.f32 %v5175_v2, 0.0  ;;  %v23785_v18 = vmax.f32 %v23783_v56, %v23784_v63  ;;  %v23788_v2 = vld [vmem:[#allocation19_spill] sm:$0xff]  ;;  %v23790_v10 = vld [vmem:[#allocation36_spill] sm:$0xff]  ;;  %v23797_v58 = vld [vmem:[#allocation174_spill] sm:$0xff] }
 0x5b5   :  { %v5179_v44 = vadd.f32 %v19945_v50, %v5042_v9  ;;  %v4636_v21 = vpop.f32.mrb[16].mxu0  ;;  %6188 = vmatprep.subr.bf16.mxu1 %v15808_v40  ;;  %v5296_v36 = vmax.f32 %v5176_v5, 0.0  ;;  %v23787_v40 = vld [vmem:[#allocation37_spill] sm:$0xff] }
 0x5b6   :  { %v5298_v48 = vmax.f32 %v5178_v24, 0.0  ;;  %v4924_v55 = vmax.f32 %v23777_v60, %v4636_v21  ;;  %v4638_v20 = vpop.f32.mrb[17].mxu0  ;;  %v23789_v7 = vmax.f32 %v23787_v40, %v23788_v2  ;;  %v23791_v5 = vld [vmem:[#allocation173_spill] sm:$0xff]  ;;  %v15812_v24 = vld [vmem:[%s23062_s3 + $0x5e0] ss:$16 sps:$4 sm:$0xff]   ;;  %v23794_v60 = vld [vmem:[#allocation147_spill] sm:$0xff] }
 0x5b7   :  { %v5299_v13 = vmax.f32 %v5179_v44, 0.0  ;;  %v4925_v62 = vmax.f32 %v23778_v61, %v4638_v20  ;;  %v4640_v33 = vpop.f32.mrb[18].mxu0  ;;  %v23792_v46 = vmax.f32 %v23790_v10, %v23791_v5  ;;  %v23795_v61 = vld [vmem:[#allocation146_spill] sm:$0xff]  ;;  %v15820_v40 = vld [vmem:[%s23062_s3 + $0x32c] ss:$16 sps:$4 sm:$0xff]  }
 0x5b8   :  { %v5044_v0 = vmax.f32 %v23781_v11, %v4924_v55  ;;  %v4927_v29 = vmax.f32 %v23782_v39, %v4640_v33  ;;  %6189 = vmatpush1.bf16.msra.mxu1 %v15806_v27  ;;  %v4642_v30 = vpop.f32.mrb[19].mxu0  ;;  %v20181_v54 = vpack.c.bf16 %v5298_v48, %v5295_v26  ;;  %v17132_v27 = vmov 0   ;;  %v23799_v39 = vld [vmem:[#allocation149_spill] sm:$0xff] }
 0x5b9   :  { %v5045_v45 = vmax.f32 %v23785_v18, %v4925_v62  ;;  %v4928_v32 = vmax.f32 %v23786_v3, %v4642_v30  ;;  %6190 = vmatprep.subr.bf16.mxu1 %v15811_v16  ;;  %v20193_v35 = vpack.c.bf16 %v5299_v13, %v5296_v36  ;;  %v15817_v16 = vld [vmem:[%s23062_s3 + $0x30c] ss:$16 sps:$4 sm:$0xff]   ;;  %v23798_v11 = vmax.f32 %v23796_v23, %v23797_v58  ;;  %v23800_v18 = vld [vmem:[#allocation38_spill] sm:$0xff] }
 0x5ba   :  { %v5181_v37 = vadd.f32 %v19940_v12, %v5044_v0  ;;  %v5047_v52 = vmax.f32 %v23789_v7, %v4927_v29  ;;  %6167 = vmatprep.mubr.bf16.mxu1 %v20181_v54  ;;  %v23804_v7 = vld [vmem:[#allocation41_spill] sm:$0xff] }
 0x5bb   :  { %v5182_v17 = vadd.f32 %v19945_v50, %v5045_v45  ;;  %v5048_v34 = vmax.f32 %v23792_v46, %v4928_v32  ;;  %6168 = vmatmul.mubr.bf16.gmra.mrb[172].mxu1 %v23793_v4  ;;  %v23801_v45 = vld [vmem:[#allocation175_spill] sm:$0xff]  ;;  %v23807_v46 = vld [vmem:[#allocation40_spill] sm:$0xff] }
 0x5bc   :  { %v5184_v9 = vadd.f32 %v19940_v12, %v5047_v52  ;;  %6191 = vmatpush1.bf16.msra.mxu1 %v15809_v31  ;;  %6210 = vmatprep.mubr.bf16.mxu1 %v17132_v27  ;;  %v5301_v26 = vmax.f32 %v5181_v37, 0.0  ;;  %v15815_v31 = vld [vmem:[%s23062_s3 + $0x308] ss:$16 sps:$4 sm:$0xff]   ;;  %v23802_v3 = vmax.f32 %v23800_v18, %v23801_v45  ;;  %v23805_v52 = vld [vmem:[#allocation176_spill] sm:$0xff] }
 0x5bd   :  { %v5185_v44 = vadd.f32 %v19945_v50, %v5048_v34  ;;  %v4646_v21 = vpop.f32.mrb[20].mxu0  ;;  %6192 = vmatprep.subr.bf16.mxu1 %v15814_v51  ;;  %v5302_v36 = vmax.f32 %v5182_v17, 0.0  ;;  %v23803_v51 = vld [vmem:[#allocation148_spill] sm:$0xff]  ;;  %v23806_v17 = vmax.f32 %v23804_v7, %v23805_v52  ;;  %v23808_v34 = vld [vmem:[#allocation177_spill] sm:$0xff] }
 0x5be   :  { %v5304_v48 = vmax.f32 %v5184_v9, 0.0  ;;  %v4930_v55 = vmax.f32 %v23794_v60, %v4646_v21  ;;  %v4648_v20 = vpop.f32.mrb[21].mxu0  ;;  %v23809_v9 = vmax.f32 %v23807_v46, %v23808_v34  ;;  %v15818_v21 = vld [vmem:[%s23062_s3 + $0x328] ss:$16 sps:$4 sm:$0xff]   ;;  %v15826_v52 = vld [vmem:[%s23062_s3 + $0x36c] ss:$16 sps:$4 sm:$0xff]  }
 0x5bf   :  { %v5305_v13 = vmax.f32 %v5185_v44, 0.0  ;;  %v4931_v62 = vmax.f32 %v23795_v61, %v4648_v20  ;;  %v4650_v33 = vpop.f32.mrb[22].mxu0  ;;  %v23810_v20 = vld [vmem:[#allocation152_spill] sm:$0xff]  ;;  %v15821_v45 = vld [vmem:[%s23062_s3 + $0x348] ss:$16 sps:$4 sm:$0xff]  }
 0x5c0   :  { %v5050_v0 = vmax.f32 %v23798_v11, %v4930_v55  ;;  %v4933_v29 = vmax.f32 %v23799_v39, %v4650_v33  ;;  %6193 = vmatpush1.bf16.msra.mxu1 %v15812_v24  ;;  %v4652_v30 = vpop.f32.mrb[23].mxu0  ;;  %v20223_v56 = vpack.c.bf16 %v5304_v48, %v5301_v26  ;;  %v15823_v48 = vld [vmem:[%s23062_s3 + $0x34c] ss:$16 sps:$4 sm:$0xff]   ;;  %v23821_v46 = vld [vmem:[#allocation180_spill] sm:$0xff] }
 0x5c1   :  { %v20225_v63 = vpack.c.bf16 %v5305_v13, %v5302_v36  ;;  %v5051_v32 = vmax.f32 %v23802_v3, %v4931_v62  ;;  %v4934_v37 = vmax.f32 %v23803_v51, %v4652_v30  ;;  %6251 = vmatprep.subr.bf16.mxu1 %v15817_v16  ;;  %v23811_v33 = vld [vmem:[#allocation151_spill] sm:$0xff]  ;;  %v23815_v30 = vld [vmem:[#allocation154_spill] sm:$0xff] }
 0x5c2   :  { %v5187_v2 = vadd.f32 %v19940_v12, %v5050_v0  ;;  %v5053_v10 = vmax.f32 %v23806_v17, %v4933_v29  ;;  %v23812_v11 = vld [vmem:[#allocation43_spill] sm:$0xff]  ;;  %v23813_v0 = vld [vmem:[#allocation178_spill] sm:$0xff] }
 0x5c3   :  { %v5188_v5 = vadd.f32 %v19945_v50, %v5051_v32  ;;  %v5054_v24 = vmax.f32 %v23809_v9, %v4934_v37  ;;  %6211 = vmatmul.mubr.bf16.vlgmr.msra.gmra.mrb[160].mxu1 %v20072_v1  ;;  %v23814_v39 = vmax.f32 %v23812_v11, %v23813_v0  ;;  %v23816_v32 = vld [vmem:[#allocation42_spill] sm:$0xff]  ;;  %v23817_v51 = vld [vmem:[#allocation179_spill] sm:$0xff]  ;;  %v23827_v0 = vld [vmem:[#allocation156_spill] sm:$0xff] }
 0x5c4   :  { %v5190_v44 = vadd.f32 %v19940_v12, %v5053_v10  ;;  %6252 = vmatpush1.bf16.msra.mxu1 %v15815_v31  ;;  %6220 = vmatprep.mubr.bf16.mxu1 %v17132_v27  ;;  %v5307_v60 = vmax.f32 %v5187_v2, 0.0  ;;  %v23818_v37 = vmax.f32 %v23816_v32, %v23817_v51  ;;  %v23819_v2 = vld [vmem:[#allocation153_spill] sm:$0xff]  ;;  %v23831_v32 = vld [vmem:[#allocation159_spill] sm:$0xff] }
 0x5c5   :  { %v5191_v16 = vadd.f32 %v19945_v50, %v5054_v24  ;;  %v4656_v26 = vpop.f32.mrb[24].mxu0  ;;  %6253 = vmatprep.subr.bf16.mxu1 %v15820_v40  ;;  %v5308_v61 = vmax.f32 %v5188_v5, 0.0  ;;  %v23820_v5 = vld [vmem:[#allocation45_spill] sm:$0xff] }
 0x5c6   :  { %v5310_v55 = vmax.f32 %v5190_v44, 0.0  ;;  %v4936_v36 = vmax.f32 %v23810_v20, %v4656_v26  ;;  %v4658_v13 = vpop.f32.mrb[25].mxu0  ;;  %v23822_v34 = vmax.f32 %v23820_v5, %v23821_v46  ;;  %v23823_v44 = vld [vmem:[#allocation44_spill] sm:$0xff]  ;;  %v23835_v46 = vld [vmem:[#allocation158_spill] sm:$0xff] }
 0x5c7   :  { %v5311_v62 = vmax.f32 %v5191_v16, 0.0  ;;  %v4937_v23 = vmax.f32 %v23811_v33, %v4658_v13  ;;  %v4660_v58 = vpop.f32.mrb[26].mxu0 }
 0x5c8   :  { %v5056_v29 = vmax.f32 %v23814_v39, %v4936_v36  ;;  %v4939_v31 = vmax.f32 %v23815_v30, %v4660_v58  ;;  %6254 = vmatpush1.bf16.msra.mxu1 %v15818_v21  ;;  %v4662_v18 = vpop.f32.mrb[27].mxu0  ;;  %v20261_v3 = vpack.c.bf16 %v5310_v55, %v5307_v60  ;;  %v23824_v21 = vld [vmem:[#allocation181_spill] sm:$0xff]  ;;  %v23828_v30 = vld [vmem:[#allocation47_spill] sm:$0xff] }
 0x5c9   :  { %v5057_v40 = vmax.f32 %v23818_v37, %v4937_v23  ;;  %v4940_v7 = vmax.f32 %v23819_v2, %v4662_v18  ;;  %6255 = vmatprep.subr.bf16.mxu1 %v15823_v48  ;;  %v20270_v17 = vpack.c.bf16 %v5311_v62, %v5308_v61  ;;  %v23825_v16 = vmax.f32 %v23823_v44, %v23824_v21  ;;  %v15824_v60 = vld [vmem:[%s23062_s3 + $0x368] ss:$16 sps:$4 sm:$0xff]   ;;  %v15829_v36 = vld [vmem:[%s23062_s3 + $0x38c] ss:$16 sps:$4 sm:$0xff]  }
 0x5ca   :  { %v5193_v10 = vadd.f32 %v19940_v12, %v5056_v29  ;;  %v5059_v9 = vmax.f32 %v23822_v34, %v4939_v31  ;;  %v23826_v62 = vld [vmem:[#allocation157_spill] sm:$0xff]  ;;  %v23829_v31 = vld [vmem:[#allocation182_spill] sm:$0xff] }
 0x5cb   :  { %v5194_v24 = vadd.f32 %v19945_v50, %v5057_v40  ;;  %v5060_v26 = vmax.f32 %v23825_v16, %v4940_v7  ;;  %6221 = vmatmul.mubr.bf16.gmra.mrb[164].mxu1 %v20117_v57  ;;  %v23830_v18 = vmax.f32 %v23828_v30, %v23829_v31  ;;  %v15827_v40 = vld [vmem:[%s23062_s3 + $0x388] ss:$16 sps:$4 sm:$0xff]   ;;  %v23832_v7 = vld [vmem:[#allocation46_spill] sm:$0xff]  ;;  %v23837_v16 = vld [vmem:[#allocation184_spill] sm:$0xff] }
 0x5cc   :  { %v5196_v48 = vadd.f32 %v19940_v12, %v5059_v9  ;;  %6256 = vmatpush1.bf16.msra.mxu1 %v15821_v45  ;;  %6230 = vmatprep.mubr.bf16.mxu1 %v17132_v27  ;;  %v5313_v13 = vmax.f32 %v5193_v10, 0.0  ;;  %v15832_v9 = vld [vmem:[%s23062_s3 + $0x3ac] ss:$16 sps:$4 sm:$0xff]  }
 0x5cd   :  { %v5197_v55 = vadd.f32 %v19945_v50, %v5060_v26  ;;  %v4666_v20 = vpop.f32.mrb[28].mxu0  ;;  %6257 = vmatprep.subr.bf16.mxu1 %v15826_v52  ;;  %v5314_v58 = vmax.f32 %v5194_v24, 0.0  ;;  %v23833_v52 = vld [vmem:[#allocation183_spill] sm:$0xff]  ;;  %v23836_v21 = vld [vmem:[#allocation49_spill] sm:$0xff] }
 0x5ce   :  { %v5316_v61 = vmax.f32 %v5196_v48, 0.0  ;;  %v4942_v33 = vmax.f32 %v23826_v62, %v4666_v20  ;;  %v4668_v23 = vpop.f32.mrb[29].mxu0  ;;  %v23834_v10 = vmax.f32 %v23832_v7, %v23833_v52  ;;  %v23838_v26 = vmax.f32 %v23836_v21, %v23837_v16  ;;  %v23840_v20 = vld [vmem:[#allocation185_spill] sm:$0xff]  ;;  %v23849_v21 = vld [vmem:[#allocation187_spill] sm:$0xff] }
 0x5cf   :  { %v5317_v11 = vmax.f32 %v5197_v55, 0.0  ;;  %v4943_v39 = vmax.f32 %v23827_v0, %v4668_v23  ;;  %v4670_v29 = vpop.f32.mrb[30].mxu0  ;;  %v23839_v55 = vld [vmem:[#allocation48_spill] sm:$0xff]  ;;  %v15830_v62 = vld [vmem:[%s23062_s3 + $0x3a8] ss:$16 sps:$4 sm:$0xff]  }
 0x5d0   :  { %v5062_v45 = vmax.f32 %v23830_v18, %v4942_v33  ;;  %v4945_v51 = vmax.f32 %v23831_v32, %v4670_v29  ;;  %6258 = vmatpush1.bf16.msra.mxu1 %v15824_v60  ;;  %v4672_v37 = vpop.f32.mrb[31].mxu0  ;;  %v20299_v2 = vpack.c.bf16 %v5316_v61, %v5313_v13  ;;  %v23841_v13 = vmax.f32 %v23839_v55, %v23840_v20  ;;  %v15838_v55 = vld [vmem:[%s23062_s3 + $0x3ec] ss:$16 sps:$4 sm:$0xff]  }
 0x5d1   :  { %v5063_v5 = vmax.f32 %v23834_v10, %v4943_v39  ;;  %v4946_v34 = vmax.f32 %v23835_v46, %v4672_v37  ;;  %6259 = vmatprep.subr.bf16.mxu1 %v15829_v36  ;;  %v20308_v24 = vpack.c.bf16 %v5317_v11, %v5314_v58  ;;  %v15835_v58 = vld [vmem:[%s23062_s3 + $0x3cc] ss:$16 sps:$4 sm:$0xff]   ;;  %v23842_v39 = vld [vmem:[#allocation162_spill] sm:$0xff]  ;;  %v23847_v10 = vld [vmem:[#allocation164_spill] sm:$0xff] }
 0x5d2   :  { %v5199_v44 = vadd.f32 %v19940_v12, %v5062_v45  ;;  %v5065_v48 = vmax.f32 %v23838_v26, %v4945_v51  ;;  %v23843_v45 = vld [vmem:[#allocation161_spill] sm:$0xff]  ;;  %v23844_v37 = vld [vmem:[#allocation51_spill] sm:$0xff] }
 0x5d3   :  { %v5200_v60 = vadd.f32 %v19945_v50, %v5063_v5  ;;  %v5066_v61 = vmax.f32 %v23841_v13, %v4946_v34  ;;  %6231 = vmatmul.mubr.bf16.gmra.mrb[168].mxu1 %v20155_v59  ;;  %v15833_v34 = vld [vmem:[%s23062_s3 + $0x3c8] ss:$16 sps:$4 sm:$0xff]  }
 0x5d4   :  { %v5202_v36 = vadd.f32 %v19940_v12, %v5065_v48  ;;  %6260 = vmatpush1.bf16.msra.mxu1 %v15827_v40  ;;  %6240 = vmatprep.mubr.bf16.mxu1 %v17132_v27  ;;  %v5319_v11 = vmax.f32 %v5199_v44, 0.0  ;;  %v23845_v40 = vld [vmem:[#allocation186_spill] sm:$0xff]  ;;  %v23851_v48 = vld [vmem:[#allocation163_spill] sm:$0xff] }
 0x5d5   :  { %v5203_v33 = vadd.f32 %v19945_v50, %v5066_v61  ;;  %v4676_v23 = vpop.f32.mrb[32].mxu0  ;;  %6261 = vmatprep.subr.bf16.mxu1 %v15832_v9  ;;  %v5320_v31 = vmax.f32 %v5200_v60, 0.0  ;;  %v23846_v7 = vmax.f32 %v23844_v37, %v23845_v40  ;;  %v23848_v44 = vld [vmem:[#allocation50_spill] sm:$0xff]  ;;  %v23852_v61 = vld [vmem:[#allocation55_spill] sm:$0xff]  ;;  %v23858_v37 = vld [vmem:[#allocation56_spill] sm:$0xff] }
 0x5d6   :  { %v5322_v0 = vmax.f32 %v5202_v36, 0.0  ;;  %v4948_v29 = vmax.f32 %v23842_v39, %v4676_v23  ;;  %v4678_v30 = vpop.f32.mrb[33].mxu0  ;;  %v23850_v16 = vmax.f32 %v23848_v44, %v23849_v21  ;;  %v23853_v36 = vld [vmem:[#allocation188_spill] sm:$0xff]  ;;  %v23861_v44 = vld [vmem:[#allocation190_spill] sm:$0xff] }
 0x5d7   :  { %v5323_v18 = vmax.f32 %v5203_v33, 0.0  ;;  %v4949_v32 = vmax.f32 %v23843_v45, %v4678_v30  ;;  %v4680_v51 = vpop.f32.mrb[34].mxu0  ;;  %v15836_v30 = vld [vmem:[%s23062_s3 + $0x3e8] ss:$16 sps:$4 sm:$0xff]   ;;  %v15841_v45 = vld [vmem:[%s23062_s3 + $0x40c] ss:$16 sps:$4 sm:$0xff]  }
 0x5d8   :  { %v5068_v52 = vmax.f32 %v23846_v7, %v4948_v29  ;;  %v4951_v5 = vmax.f32 %v23847_v10, %v4680_v51  ;;  %6262 = vmatpush1.bf16.msra.mxu1 %v15830_v62  ;;  %v4682_v46 = vpop.f32.mrb[35].mxu0  ;;  %v20337_v9 = vpack.c.bf16 %v5322_v0, %v5319_v11  ;;  %v23854_v62 = vmax.f32 %v23852_v61, %v23853_v36  ;;  %v23855_v11 = vld [vmem:[#allocation54_spill] sm:$0xff]  ;;  %v23856_v0 = vld [vmem:[#allocation189_spill] sm:$0xff] }
 0x5d9   :  { %v5069_v26 = vmax.f32 %v23850_v16, %v4949_v32  ;;  %v4952_v60 = vmax.f32 %v23851_v48, %v4682_v46  ;;  %6263 = vmatprep.subr.bf16.mxu1 %v15835_v58  ;;  %v20346_v20 = vpack.c.bf16 %v5323_v18, %v5320_v31  ;;  %v23857_v39 = vmax.f32 %v23855_v11, %v23856_v0  ;;  %v23864_v36 = vld [vmem:[#allocation58_spill] sm:$0xff]  ;;  %v23867_v11 = vld [vmem:[#allocation165_spill] sm:$0xff] }
 0x5da   :  { %v5205_v13 = vadd.f32 %v19940_v12, %v5068_v52  ;;  %v5071_v33 = vmax.f32 %v23854_v62, %v4951_v5  ;;  %v23865_v62 = vld [vmem:[#allocation191_spill] sm:$0xff] }
 0x5db   :  { %v5206_v23 = vadd.f32 %v19945_v50, %v5069_v26  ;;  %v5072_v29 = vmax.f32 %v23857_v39, %v4952_v60  ;;  %6241 = vmatmul.mubr.bf16.gmra.mrb[172].mxu1 %v20193_v35  ;;  %v23863_v26 = vld [vmem:[#allocation166_spill] sm:$0xff]  ;;  %v15844_v39 = vld [vmem:[%s23062_s3 + $0x42c] ss:$16 sps:$4 sm:$0xff]  }
 0x5dc   :  { %v5208_v58 = vadd.f32 %v19940_v12, %v5071_v33  ;;  %6264 = vmatpush1.bf16.msra.mxu1 %v15833_v34  ;;  %6283 = vmatprep.mubr.bf16.mxu1 %v20067_v15  ;;  %v5325_v32 = vmax.f32 %v5205_v13, 0.0  ;;  %v23859_v15 = vld [vmem:[#allocation53_spill] sm:$0xff]  ;;  %v23860_v34 = vld [vmem:[#allocation59_spill] sm:$0xff]  ;;  %v23866_v33 = vmax.f32 %v23864_v36, %v23865_v62 }
 0x5dd   :  { %v5209_v31 = vadd.f32 %v19945_v50, %v5072_v29  ;;  %v4686_v18 = vpop.f32.mrb[36].mxu0  ;;  %6265 = vmatprep.subr.bf16.mxu1 %v15838_v55  ;;  %v5326_v52 = vmax.f32 %v5206_v23, 0.0  ;;  %v23862_v21 = vmax.f32 %v23860_v34, %v23861_v44  ;;  %v15839_v55 = vld [vmem:[%s23062_s3 + $0x408] ss:$16 sps:$4 sm:$0xff]   ;;  %v23874_v44 = vld [vmem:[#allocation60_spill] sm:$0xff] }
 0x5de   :  { %v5328_v51 = vmax.f32 %v5208_v58, 0.0  ;;  %v4954_v40 = vmax.f32 %v23858_v37, %v4686_v18  ;;  %v4688_v7 = vpop.f32.mrb[37].mxu0  ;;  %v23868_v58 = vld [vmem:[#allocation63_spill] sm:$0xff]  ;;  %v23872_v37 = vld [vmem:[#allocation193_spill] sm:$0xff] }
 0x5df   :  { %v5329_v10 = vmax.f32 %v5209_v31, 0.0  ;;  %v4955_v5 = vmax.f32 %v23859_v15, %v4688_v7  ;;  %v4690_v46 = vpop.f32.mrb[38].mxu0  ;;  %v23876_v62 = vld [vmem:[#allocation67_spill] sm:$0xff] }
 0x5e0   :  { %v5074_v16 = vmax.f32 %v23862_v21, %v4954_v40  ;;  %v4957_v48 = vmax.f32 %v23863_v26, %v4690_v46  ;;  %6266 = vmatpush1.bf16.msra.mxu1 %v15836_v30  ;;  %v4692_v60 = vpop.f32.mrb[39].mxu0  ;;  %v20375_v13 = vpack.c.bf16 %v5328_v51, %v5325_v32  ;;  %v23869_v30 = vld [vmem:[#allocation192_spill] sm:$0xff]  ;;  %v23871_v51 = vld [vmem:[#allocation62_spill] sm:$0xff] }
 0x5e1   :  { %v20377_v61 = vpack.c.bf16 %v5329_v10, %v5326_v52  ;;  %v5075_v23 = vmax.f32 %v23866_v33, %v4955_v5  ;;  %v4958_v0 = vmax.f32 %v23867_v11, %v4692_v60  ;;  %6267 = vmatprep.subr.bf16.mxu1 %v15841_v45  ;;  %v23870_v31 = vmax.f32 %v23868_v58, %v23869_v30  ;;  %v15842_v45 = vld [vmem:[%s23062_s3 + $0x428] ss:$16 sps:$4 sm:$0xff]   ;;  %v15847_v5 = vld [vmem:[%s23062_s3 + $0x44c] ss:$16 sps:$4 sm:$0xff]   ;;  %v23877_v33 = vld [vmem:[#allocation194_spill] sm:$0xff] }
 0x5e2   :  { %v5211_v29 = vadd.f32 %v19940_v12, %v5074_v16  ;;  %v23873_v40 = vmax.f32 %v23871_v51, %v23872_v37  ;;  %v23875_v60 = vld [vmem:[#allocation57_spill] sm:$0xff] }
 0x5e3   :  { %v5077_v18 = vmax.f32 %v23870_v31, %v4957_v48  ;;  %v5212_v32 = vadd.f32 %v19945_v50, %v5075_v23  ;;  %v23878_v23 = vmax.f32 %v23876_v62, %v23877_v33  ;;  %v23880_v31 = vld [vmem:[#allocation66_spill] sm:$0xff]  ;;  %v23883_v37 = vld [vmem:[#allocation61_spill] sm:$0xff] }
 0x5e4   :  { %v5078_v7 = vmax.f32 %v23873_v40, %v4958_v0  ;;  %6268 = vmatpush1.bf16.msra.mxu1 %v15839_v55  ;;  %v5331_v46 = vmax.f32 %v5211_v29, 0.0  ;;  %v23879_v0 = vld [vmem:[#allocation64_spill] sm:$0xff]  ;;  %v15845_v29 = vld [vmem:[%s23062_s3 + $0x448] ss:$16 sps:$4 sm:$0xff]   ;;  %v15853_v62 = vld [vmem:[%s23062_s3 + $0x48c] ss:$16 sps:$4 sm:$0xff]  }
 0x5e5   :  { %v5214_v52 = vadd.f32 %v19940_v12, %v5077_v18  ;;  %v4696_v15 = vpop.f32.mrb[40].mxu0  ;;  %6269 = vmatprep.subr.bf16.mxu1 %v15844_v39  ;;  %v5332_v26 = vmax.f32 %v5212_v32, 0.0  ;;  %v23881_v18 = vld [vmem:[#allocation195_spill] sm:$0xff] }
 0x5e6   :  { %v5215_v10 = vadd.f32 %v19945_v50, %v5078_v7  ;;  %v4960_v21 = vmax.f32 %v23874_v44, %v4696_v15  ;;  %v4698_v16 = vpop.f32.mrb[41].mxu0  ;;  %v23882_v32 = vmax.f32 %v23880_v31, %v23881_v18  ;;  %v15850_v7 = vld [vmem:[%s23062_s3 + $0x46c] ss:$16 sps:$4 sm:$0xff]   ;;  %v23885_v15 = vld [vmem:[#allocation196_spill] sm:$0xff] }
 0x5e7   :  { %v5334_v34 = vmax.f32 %v5214_v52, 0.0  ;;  %v4961_v55 = vmax.f32 %v23875_v60, %v4698_v16  ;;  %v4700_v36 = vpop.f32.mrb[42].mxu0  ;;  %v23888_v16 = vld [vmem:[#allocation197_spill] sm:$0xff] }
 0x5e8   :  { %v5335_v48 = vmax.f32 %v5215_v10, 0.0  ;;  %v5080_v11 = vmax.f32 %v23878_v23, %v4960_v21  ;;  %v4963_v39 = vmax.f32 %v23879_v0, %v4700_v36  ;;  %6270 = vmatpush1.bf16.msra.mxu1 %v15842_v45  ;;  %v4702_v58 = vpop.f32.mrb[43].mxu0  ;;  %v23884_v10 = vld [vmem:[#allocation71_spill] sm:$0xff]  ;;  %v23887_v21 = vld [vmem:[#allocation70_spill] sm:$0xff] }
 0x5e9   :  { %v20411_v30 = vpack.c.bf16 %v5334_v34, %v5331_v46  ;;  %v5081_v51 = vmax.f32 %v23882_v32, %v4961_v55  ;;  %v4964_v40 = vmax.f32 %v23883_v37, %v4702_v58  ;;  %6271 = vmatprep.subr.bf16.mxu1 %v15847_v5  ;;  %v23886_v44 = vmax.f32 %v23884_v10, %v23885_v15  ;;  %v23893_v37 = vld [vmem:[#allocation198_spill] sm:$0xff]  ;;  %v23895_v15 = vld [vmem:[#allocation168_spill] sm:$0xff] }
 0x5ea   :  { %v20420_v52 = vpack.c.bf16 %v5335_v48, %v5332_v26  ;;  %v5217_v45 = vadd.f32 %v19940_v12, %v5080_v11  ;;  %v23889_v60 = vmax.f32 %v23887_v21, %v23888_v16  ;;  %v15848_v26 = vld [vmem:[%s23062_s3 + $0x468] ss:$16 sps:$4 sm:$0xff]   ;;  %v23896_v21 = vld [vmem:[#allocation74_spill] sm:$0xff] }
 0x5eb   :  { %v5083_v46 = vmax.f32 %v23886_v44, %v4963_v39  ;;  %v5218_v34 = vadd.f32 %v19945_v50, %v5081_v51  ;;  %v23890_v11 = vld [vmem:[#allocation69_spill] sm:$0xff]  ;;  %v23892_v51 = vld [vmem:[#allocation75_spill] sm:$0xff] }
 0x5ec   :  { %v5084_v55 = vmax.f32 %v23889_v60, %v4964_v40  ;;  %6272 = vmatpush1.bf16.msra.mxu1 %v15845_v29  ;;  %v5337_v33 = vmax.f32 %v5217_v45, 0.0  ;;  %v23891_v29 = vld [vmem:[#allocation68_spill] sm:$0xff]  ;;  %v23894_v40 = vmax.f32 %v23892_v51, %v23893_v37  ;;  %v15851_v45 = vld [vmem:[%s23062_s3 + $0x488] ss:$16 sps:$4 sm:$0xff]  }
 0x5ed   :  { %v5220_v5 = vadd.f32 %v19940_v12, %v5083_v46  ;;  %v4706_v36 = vpop.f32.mrb[44].mxu0  ;;  %6273 = vmatprep.subr.bf16.mxu1 %v15850_v7  ;;  %v5338_v58 = vmax.f32 %v5218_v34, 0.0  ;;  %v23897_v34 = vld [vmem:[#allocation199_spill] sm:$0xff] }
 0x5ee   :  { %v5221_v48 = vadd.f32 %v19945_v50, %v5084_v55  ;;  %v4966_v0 = vmax.f32 %v23890_v11, %v4706_v36  ;;  %v4708_v39 = vpop.f32.mrb[45].mxu0  ;;  %v23898_v16 = vmax.f32 %v23896_v21, %v23897_v34  ;;  %v23899_v55 = vld [vmem:[#allocation72_spill] sm:$0xff]  ;;  %v23900_v11 = vld [vmem:[#allocation79_spill] sm:$0xff] }
 0x5ef   :  { %v5340_v23 = vmax.f32 %v5220_v5, 0.0  ;;  %v4967_v18 = vmax.f32 %v23891_v29, %v4708_v39  ;;  %v4710_v32 = vpop.f32.mrb[46].mxu0  ;;  %v23903_v29 = vld [vmem:[#allocation78_spill] sm:$0xff] }
 0x5f0   :  { %v5341_v31 = vmax.f32 %v5221_v48, 0.0  ;;  %v5086_v10 = vmax.f32 %v23894_v40, %v4966_v0  ;;  %v4969_v7 = vmax.f32 %v23895_v15, %v4710_v32  ;;  %6274 = vmatpush1.bf16.msra.mxu1 %v15848_v26  ;;  %v4712_v44 = vpop.f32.mrb[47].mxu0  ;;  %v15856_v48 = vld [vmem:[%s23062_s3 + $0x4ac] ss:$16 sps:$4 sm:$0xff]   ;;  %v23901_v0 = vld [vmem:[#allocation200_spill] sm:$0xff] }
 0x5f1   :  { %v20447_v46 = vpack.c.bf16 %v5340_v23, %v5337_v33  ;;  %v5087_v60 = vmax.f32 %v23898_v16, %v4967_v18  ;;  %v4970_v5 = vmax.f32 %v23899_v55, %v4712_v44  ;;  %6275 = vmatprep.subr.bf16.mxu1 %v15853_v62  ;;  %v23902_v39 = vmax.f32 %v23900_v11, %v23901_v0  ;;  %v23904_v32 = vld [vmem:[#allocation201_spill] sm:$0xff]  ;;  %v23909_v11 = vld [vmem:[#allocation202_spill] sm:$0xff] }
 0x5f2   :  { %v20456_v36 = vpack.c.bf16 %v5341_v31, %v5338_v58  ;;  %v5223_v26 = vadd.f32 %v19940_v12, %v5086_v10  ;;  %v23905_v18 = vmax.f32 %v23903_v29, %v23904_v32  ;;  %v15854_v58 = vld [vmem:[%s23062_s3 + $0x4a8] ss:$16 sps:$4 sm:$0xff]   ;;  %v15859_v40 = vld [vmem:[%s23062_s3 + $0x4cc] ss:$16 sps:$4 sm:$0xff]  }
 0x5f3   :  { %v5089_v33 = vmax.f32 %v23902_v39, %v4969_v7  ;;  %v5224_v23 = vadd.f32 %v19945_v50, %v5087_v60  ;;  %v23906_v7 = vld [vmem:[#allocation77_spill] sm:$0xff] }
 0x5f4   :  { %v5090_v51 = vmax.f32 %v23905_v18, %v4970_v5  ;;  %6276 = vmatpush1.bf16.msra.mxu1 %v15851_v45  ;;  %v5343_v10 = vmax.f32 %v5223_v26, 0.0  ;;  %v23907_v45 = vld [vmem:[#allocation76_spill] sm:$0xff]  ;;  %v23908_v5 = vld [vmem:[#allocation83_spill] sm:$0xff]  ;;  %v23912_v18 = vld [vmem:[#allocation82_spill] sm:$0xff] }
 0x5f5   :  { %v5226_v62 = vadd.f32 %v19940_v12, %v5089_v33  ;;  %v4716_v37 = vpop.f32.mrb[48].mxu0  ;;  %6277 = vmatprep.subr.bf16.mxu1 %v15856_v48  ;;  %v5344_v34 = vmax.f32 %v5224_v23, 0.0  ;;  %v23910_v0 = vmax.f32 %v23908_v5, %v23909_v11  ;;  %v23911_v33 = vld [vmem:[#allocation169_spill] sm:$0xff]  ;;  %v23913_v23 = vld [vmem:[#allocation203_spill] sm:$0xff]  ;;  %v23919_v5 = vld [vmem:[#allocation86_spill] sm:$0xff] }
 0x5f6   :  { %v5227_v31 = vadd.f32 %v19945_v50, %v5090_v51  ;;  %v4972_v44 = vmax.f32 %v23906_v7, %v4716_v37  ;;  %v4718_v21 = vpop.f32.mrb[49].mxu0  ;;  %v15857_v26 = vld [vmem:[%s23062_s3 + $0x4c8] ss:$16 sps:$4 sm:$0xff]   ;;  %v23914_v51 = vmax.f32 %v23912_v18, %v23913_v23  ;;  %v15862_v7 = vld [vmem:[%s23062_s3 + $0x4ec] ss:$16 sps:$4 sm:$0xff]  }
 0x5f7   :  { %v5346_v15 = vmax.f32 %v5226_v62, 0.0  ;;  %v4973_v60 = vmax.f32 %v23907_v45, %v4718_v21  ;;  %v4720_v55 = vpop.f32.mrb[50].mxu0  ;;  %v23916_v21 = vld [vmem:[#allocation87_spill] sm:$0xff]  ;;  %v23917_v45 = vld [vmem:[#allocation204_spill] sm:$0xff]  ;;  %v23920_v11 = vld [vmem:[#allocation205_spill] sm:$0xff] }
 0x5f8   :  { %v5347_v16 = vmax.f32 %v5227_v31, 0.0  ;;  %v5092_v39 = vmax.f32 %v23910_v0, %v4972_v44  ;;  %v4975_v48 = vmax.f32 %v23911_v33, %v4720_v55  ;;  %6278 = vmatpush1.bf16.msra.mxu1 %v15854_v58  ;;  %v4722_v29 = vpop.f32.mrb[51].mxu0  ;;  %v23915_v31 = vld [vmem:[#allocation80_spill] sm:$0xff]  ;;  %v23918_v55 = vmax.f32 %v23916_v21, %v23917_v45  ;;  %v15865_v33 = vld [vmem:[%s23062_s3 + $0x50c] ss:$16 sps:$4 sm:$0xff]  }
 0x5f9   :  { %v20483_v32 = vpack.c.bf16 %v5346_v15, %v5343_v10  ;;  %v5093_v62 = vmax.f32 %v23914_v51, %v4973_v60  ;;  %v4976_v37 = vmax.f32 %v23915_v31, %v4722_v29  ;;  %6279 = vmatprep.subr.bf16.mxu1 %v15859_v40  ;;  %v23921_v60 = vmax.f32 %v23919_v5, %v23920_v11  ;;  %v23922_v18 = vld [vmem:[#allocation85_spill] sm:$0xff]  ;;  %v23924_v45 = vld [vmem:[#allocation91_spill] sm:$0xff]  ;;  %v23927_v11 = vld [vmem:[#allocation170_spill] sm:$0xff] }
 0x5fa   :  { %v20492_v44 = vpack.c.bf16 %v5347_v16, %v5344_v34  ;;  %v5229_v58 = vadd.f32 %v19940_v12, %v5092_v39  ;;  %v5095_v10 = vmax.f32 %v23918_v55, %v4975_v48  ;;  %v15860_v34 = vld [vmem:[%s23062_s3 + $0x4e8] ss:$16 sps:$4 sm:$0xff]   ;;  %v23925_v55 = vld [vmem:[#allocation206_spill] sm:$0xff] }
 0x5fb   :  { %v5230_v15 = vadd.f32 %v19945_v50, %v5093_v62  ;;  %v5096_v0 = vmax.f32 %v23921_v60, %v4976_v37 }
 0x5fc   :  { %v5232_v40 = vadd.f32 %v19940_v12, %v5095_v10  ;;  %6280 = vmatpush1.bf16.msra.mxu1 %v15857_v26  ;;  %v5349_v48 = vmax.f32 %v5229_v58, 0.0  ;;  %v23923_v26 = vld [vmem:[#allocation84_spill] sm:$0xff]  ;;  %v23926_v10 = vmax.f32 %v23924_v45, %v23925_v55  ;;  %v15863_v58 = vld [vmem:[%s23062_s3 + $0x508] ss:$16 sps:$4 sm:$0xff]  }
 0x5fd   :  { %v5233_v16 = vadd.f32 %v19945_v50, %v5096_v0  ;;  %v4726_v39 = vpop.f32.mrb[52].mxu0  ;;  %6281 = vmatprep.subr.bf16.mxu1 %v15862_v7  ;;  %v5350_v62 = vmax.f32 %v5230_v15, 0.0  ;;  %v23928_v15 = vld [vmem:[#allocation90_spill] sm:$0xff]  ;;  %v23933_v45 = vld [vmem:[#allocation208_spill] sm:$0xff] }
 0x5fe   :  { %v5352_v29 = vmax.f32 %v5232_v40, 0.0  ;;  %v4978_v23 = vmax.f32 %v23922_v18, %v4726_v39  ;;  %v4728_v51 = vpop.f32.mrb[53].mxu0 }
 0x5ff   :  { %v5353_v31 = vmax.f32 %v5233_v16, 0.0  ;;  %v4979_v37 = vmax.f32 %v23923_v26, %v4728_v51  ;;  %v4730_v21 = vpop.f32.mrb[54].mxu0  ;;  %v23929_v16 = vld [vmem:[#allocation207_spill] sm:$0xff]  ;;  %v23931_v51 = vld [vmem:[#allocation88_spill] sm:$0xff] }
 0x600   :  { %v5098_v5 = vmax.f32 %v23926_v10, %v4978_v23  ;;  %v4981_v7 = vmax.f32 %v23927_v11, %v4730_v21  ;;  %6282 = vmatpush1.bf16.msra.mxu1 %v15860_v34  ;;  %v4732_v60 = vpop.f32.mrb[55].mxu0  ;;  %v20519_v0 = vpack.c.bf16 %v5352_v29, %v5349_v48  ;;  %v23930_v39 = vmax.f32 %v23928_v15, %v23929_v16  ;;  %v15868_v34 = vld [vmem:[%s23062_s3 + $0x52c] ss:$16 sps:$4 sm:$0xff]  }
 0x601   :  { %v20521_v40 = vpack.c.bf16 %v5353_v31, %v5350_v62  ;;  %v4982_v26 = vmax.f32 %v23931_v51, %v4732_v60  ;;  %6324 = vmatprep.subr.bf16.mxu1 %v15865_v33  ;;  %v23932_v21 = vld [vmem:[#allocation95_spill] sm:$0xff]  ;;  %v23935_v62 = vld [vmem:[#allocation94_spill] sm:$0xff]  ;;  %v23936_v31 = vld [vmem:[#allocation209_spill] sm:$0xff] }
 0x602   :  { %v5099_v18 = vmax.f32 %v23930_v39, %v4979_v37  ;;  %v5235_v23 = vadd.f32 %v19940_v12, %v5098_v5  ;;  %v23934_v55 = vmax.f32 %v23932_v21, %v23933_v45  ;;  %v23937_v10 = vmax.f32 %v23935_v62, %v23936_v31  ;;  %v15866_v37 = vld [vmem:[%s23062_s3 + $0x528] ss:$16 sps:$4 sm:$0xff]   ;;  %v15871_v60 = vld [vmem:[%s23062_s3 + $0x54c] ss:$16 sps:$4 sm:$0xff]   ;;  %v23943_v31 = vld [vmem:[#allocation96_spill] sm:$0xff] }
 0x603   :  { %6284 = vmatmul.mubr.bf16.vlgmr.msra.gmra.mrb[176].mxu1 %v23742_v25  ;;  %v23938_v25 = vld [vmem:[#allocation92_spill] sm:$0xff]  ;;  %v23940_v45 = vld [vmem:[#allocation99_spill] sm:$0xff] }
 0x604   :  { %v5101_v48 = vmax.f32 %v23934_v55, %v4981_v7  ;;  %v5236_v29 = vadd.f32 %v19945_v50, %v5099_v18  ;;  %v5102_v11 = vmax.f32 %v23937_v10, %v4982_v26  ;;  %6293 = vmatprep.mubr.bf16.mxu1 %v20105_v14  ;;  %6325 = vmatpush1.bf16.msra.mxu1 %v15863_v58  ;;  %v5355_v15 = vmax.f32 %v5235_v23, 0.0  ;;  %v23939_v58 = vld [vmem:[#allocation89_spill] sm:$0xff]  ;;  %v23941_v55 = vld [vmem:[#allocation210_spill] sm:$0xff] }
 0x605   :  { %v4736_v7 = vpop.f32.mrb[56].mxu0  ;;  %6326 = vmatprep.subr.bf16.mxu1 %v15868_v34  ;;  %v15869_v23 = vld [vmem:[%s23062_s3 + $0x548] ss:$16 sps:$4 sm:$0xff]  }
 0x606   :  { %v5238_v33 = vadd.f32 %v19940_v12, %v5101_v48  ;;  %v5239_v5 = vadd.f32 %v19945_v50, %v5102_v11  ;;  %v4984_v39 = vmax.f32 %v23938_v25, %v4736_v7  ;;  %v4738_v18 = vpop.f32.mrb[57].mxu0  ;;  %v5356_v51 = vmax.f32 %v5236_v29, 0.0  ;;  %v23945_v29 = vld [vmem:[#allocation211_spill] sm:$0xff]  ;;  %v23947_v25 = vld [vmem:[#allocation93_spill] sm:$0xff] }
 0x607   :  { %v4985_v26 = vmax.f32 %v23939_v58, %v4738_v18  ;;  %v4740_v21 = vpop.f32.mrb[58].mxu0  ;;  %v23942_v48 = vmax.f32 %v23940_v45, %v23941_v55  ;;  %v23949_v45 = vld [vmem:[#allocation212_spill] sm:$0xff] }
 0x608   :  { %v5358_v16 = vmax.f32 %v5238_v33, 0.0  ;;  %v5359_v14 = vmax.f32 %v5239_v5, 0.0  ;;  %v4987_v34 = vmax.f32 %v23943_v31, %v4740_v21  ;;  %6327 = vmatpush1.bf16.msra.mxu1 %v15866_v37  ;;  %v4742_v10 = vpop.f32.mrb[59].mxu0  ;;  %v23944_v33 = vld [vmem:[#allocation98_spill] sm:$0xff]  ;;  %v23948_v21 = vld [vmem:[#allocation103_spill] sm:$0xff]  ;;  %v23952_v31 = vld [vmem:[#allocation213_spill] sm:$0xff] }
 0x609   :  { %v5104_v62 = vmax.f32 %v23942_v48, %v4984_v39  ;;  %v23946_v5 = vmax.f32 %v23944_v33, %v23945_v29  ;;  %v4988_v18 = vmax.f32 %v23947_v25, %v4742_v10  ;;  %6328 = vmatprep.subr.bf16.mxu1 %v15871_v60  ;;  %v15874_v39 = vld [vmem:[%s23062_s3 + $0x56c] ss:$16 sps:$4 sm:$0xff]   ;;  %v23950_v55 = vmax.f32 %v23948_v21, %v23949_v45  ;;  %v23951_v48 = vld [vmem:[#allocation102_spill] sm:$0xff] }
 0x60a   :  { %v20557_v11 = vpack.c.bf16 %v5358_v16, %v5355_v15  ;;  %v20566_v58 = vpack.c.bf16 %v5359_v14, %v5356_v51  ;;  %v15872_v51 = vld [vmem:[%s23062_s3 + $0x568] ss:$16 sps:$4 sm:$0xff]  }
 0x60b   :  { %v5105_v7 = vmax.f32 %v23946_v5, %v4985_v26  ;;  %v5241_v37 = vadd.f32 %v19940_v12, %v5104_v62  ;;  %v5107_v15 = vmax.f32 %v23950_v55, %v4987_v34  ;;  %v23953_v26 = vmax.f32 %v23951_v48, %v23952_v31  ;;  %6294 = vmatmul.mubr.bf16.gmra.mrb[180].mxu1 %v23759_v28  ;;  %v15877_v34 = vld [vmem:[%s23062_s3 + $0x58c] ss:$16 sps:$4 sm:$0xff]   ;;  %v23957_v55 = vld [vmem:[#allocation214_spill] sm:$0xff]  ;;  %v23959_v31 = vld [vmem:[#allocation172_spill] sm:$0xff] }
 0x60c   :  { %6303 = vmatprep.mubr.bf16.mxu1 %v20143_v42  ;;  %6329 = vmatpush1.bf16.msra.mxu1 %v15869_v23  ;;  %v23954_v28 = vld [vmem:[#allocation101_spill] sm:$0xff]  ;;  %v23955_v23 = vld [vmem:[#allocation100_spill] sm:$0xff]  ;;  %v23956_v45 = vld [vmem:[#allocation107_spill] sm:$0xff] }
 0x60d   :  { %v5242_v16 = vadd.f32 %v19945_v50, %v5105_v7  ;;  %v5108_v33 = vmax.f32 %v23953_v26, %v4988_v18  ;;  %v5244_v60 = vadd.f32 %v19940_v12, %v5107_v15  ;;  %v4746_v62 = vpop.f32.mrb[60].mxu0  ;;  %6330 = vmatprep.subr.bf16.mxu1 %v15874_v39  ;;  %v5361_v10 = vmax.f32 %v5241_v37, 0.0  ;;  %v15875_v37 = vld [vmem:[%s23062_s3 + $0x588] ss:$16 sps:$4 sm:$0xff]  }
 0x60e   :  { %v4990_v5 = vmax.f32 %v23954_v28, %v4746_v62  ;;  %v4748_v7 = vpop.f32.mrb[61].mxu0  ;;  %v23958_v15 = vmax.f32 %v23956_v45, %v23957_v55  ;;  %v23963_v28 = vld [vmem:[#allocation104_spill] sm:$0xff] }
 0x60f   :  { %v5245_v14 = vadd.f32 %v19945_v50, %v5108_v33  ;;  %v5364_v29 = vmax.f32 %v5244_v60, 0.0  ;;  %v5362_v25 = vmax.f32 %v5242_v16, 0.0  ;;  %v4991_v18 = vmax.f32 %v23955_v23, %v4748_v7  ;;  %v4750_v21 = vpop.f32.mrb[62].mxu0  ;;  %v23960_v60 = vld [vmem:[#allocation106_spill] sm:$0xff]  ;;  %v23961_v16 = vld [vmem:[#allocation215_spill] sm:$0xff]  ;;  %v23965_v45 = vld [vmem:[#allocation216_spill] sm:$0xff] }
 0x610   :  { %v5110_v48 = vmax.f32 %v23958_v15, %v4990_v5  ;;  %v4993_v39 = vmax.f32 %v23959_v31, %v4750_v21  ;;  %6331 = vmatpush1.bf16.msra.mxu1 %v15872_v51  ;;  %v4752_v26 = vpop.f32.mrb[63].mxu0  ;;  %v15880_v5 = vld [vmem:[%s23062_s3 + $0x5ac] ss:$16 sps:$4 sm:$0xff]   ;;  %v23964_v21 = vld [vmem:[#allocation112_spill] sm:$0xff]  ;;  %v23967_v15 = vld [vmem:[#allocation110_spill] sm:$0xff] }
 0x611   :  { %v5365_v42 = vmax.f32 %v5245_v14, 0.0  ;;  %v20595_v33 = vpack.c.bf16 %v5364_v29, %v5361_v10  ;;  %v23962_v14 = vmax.f32 %v23960_v60, %v23961_v16  ;;  %v4994_v7 = vmax.f32 %v23963_v28, %v4752_v26  ;;  %6332 = vmatprep.subr.bf16.mxu1 %v15877_v34  ;;  %v23968_v31 = vld [vmem:[#allocation217_spill] sm:$0xff]  ;;  %v15887_v28 = vld [vmem:[%s23062_s3] ss:$16 sps:$4 sm:$0xff]  }
 0x612   :  { %v5247_v51 = vadd.f32 %v19940_v12, %v5110_v48  ;;  %v23966_v55 = vmax.f32 %v23964_v21, %v23965_v45  ;;  %v15883_v48 = vld [vmem:[%s23062_s3 + $0x5cc] ss:$16 sps:$4 sm:$0xff]   ;;  %v15896_v21 = vld [vmem:[%s23062_s3 + $0x60] ss:$16 sps:$4 sm:$0xff]   ;;  %v15901_v45 = vld [vmem:[%s23062_s3 + $0x84] ss:$16 sps:$4 sm:$0xff]  }
 0x613   :  { %v5111_v62 = vmax.f32 %v23962_v14, %v4991_v18  ;;  %v20604_v23 = vpack.c.bf16 %v5365_v42, %v5362_v25  ;;  %v23969_v18 = vmax.f32 %v23967_v15, %v23968_v31  ;;  %6304 = vmatmul.mubr.bf16.gmra.mrb[184].mxu1 %v23776_v22  ;;  %v15878_v25 = vld [vmem:[%s23062_s3 + $0x5a8] ss:$16 sps:$4 sm:$0xff]   ;;  %v15905_v15 = vld [vmem:[%s23062_s3 + $0xc0] ss:$16 sps:$4 sm:$0xff]  }
 0x614   :  { %v5113_v10 = vmax.f32 %v23966_v55, %v4993_v39  ;;  %6313 = vmatprep.mubr.bf16.mxu1 %v20181_v54  ;;  %6333 = vmatpush1.bf16.msra.mxu1 %v15875_v37  ;;  %v5367_v39 = vmax.f32 %v5247_v51, 0.0  ;;  %v15884_v14 = vld [vmem:[%s23062_s3 + $0x5e8] ss:$16 sps:$4 sm:$0xff]   ;;  %v15893_v51 = vld [vmem:[%s23062_s3 + $0x40] ss:$16 sps:$4 sm:$0xff]  }
 0x615   :  { %v5248_v29 = vadd.f32 %v19945_v50, %v5111_v62  ;;  %v5114_v60 = vmax.f32 %v23969_v18, %v4994_v7  ;;  %6334 = vmatprep.subr.bf16.mxu1 %v15880_v5  ;;  %v15889_v62 = vld [vmem:[%s23062_s3 + $0x4] ss:$16 sps:$4 sm:$0xff]   ;;  %v15890_v7 = vld [vmem:[%s23062_s3 + $0x20] ss:$16 sps:$4 sm:$0xff]  }
 0x616   :  { %v5250_v34 = vadd.f32 %v19940_v12, %v5113_v10  ;;  %v15881_v12 = vld [vmem:[%s23062_s3 + $0x5c8] ss:$16 sps:$4 sm:$0xff]   ;;  %v15895_v5 = vld [vmem:[%s23062_s3 + $0x44] ss:$16 sps:$4 sm:$0xff]   ;;  %v15899_v55 = vld [vmem:[%s23062_s3 + $0x80] ss:$16 sps:$4 sm:$0xff]  }
 0x617   :  { %v5251_v42 = vadd.f32 %v19945_v50, %v5114_v60  ;;  %v5368_v16 = vmax.f32 %v5248_v29, 0.0  ;;  %v15886_v50 = vld [vmem:[%s23062_s3 + $0x5ec] ss:$16 sps:$4 sm:$0xff]   ;;  %v15902_v10 = vld [vmem:[%s23062_s3 + $0xa0] ss:$16 sps:$4 sm:$0xff]  }
 0x618   :  { %v5370_v26 = vmax.f32 %v5250_v34, 0.0  ;;  %6335 = vmatpush1.bf16.msra.mxu1 %v15878_v25  ;;  %v15907_v29 = vld [vmem:[%s23062_s3 + $0xc4] ss:$16 sps:$4 sm:$0xff]   ;;  %v15908_v31 = vld [vmem:[%s23062_s3 + $0xe0] ss:$16 sps:$4 sm:$0xff]  }
 0x619   :  { %v5371_v22 = vmax.f32 %v5251_v42, 0.0  ;;  %6336 = vmatprep.subr.bf16.mxu1 %v15883_v48  ;;  %v15913_v18 = vld [vmem:[%s23062_s3 + $0x104] ss:$16 sps:$4 sm:$0xff]   ;;  %v15911_v60 = vld [vmem:[%s23062_s3 + $0x100] ss:$16 sps:$4 sm:$0xff]  }
 0x61a   :  { %v20627_v54 = vpack.c.bf16 %v5370_v26, %v5367_v39  ;;  %v15914_v34 = vld [vmem:[%s23062_s3 + $0x120] ss:$16 sps:$4 sm:$0xff]   ;;  %v15919_v25 = vld [vmem:[%s23062_s3 + $0x144] ss:$16 sps:$4 sm:$0xff]  }
 0x61b   :  { %v20632_v37 = vpack.c.bf16 %v5371_v22, %v5368_v16  ;;  %6314 = vmatmul.mubr.bf16.gmra.mrb[188].mxu1 %v23793_v4  ;;  %v15892_v4 = vld [vmem:[%s23062_s3 + $0x24] ss:$16 sps:$4 sm:$0xff]   ;;  %v15917_v42 = vld [vmem:[%s23062_s3 + $0x140] ss:$16 sps:$4 sm:$0xff]  }
 0x61c   :  { %6337 = vmatpush1.bf16.msra.mxu1 %v15881_v12  ;;  %6356 = vmatprep.mubr.bf16.mxu1 %v17132_v27  ;;  %v15922_v48 = vld [vmem:[%s23062_s3 + $0x164] ss:$16 sps:$4 sm:$0xff]   ;;  %v15920_v39 = vld [vmem:[%s23062_s3 + $0x160] ss:$16 sps:$4 sm:$0xff]  }
 0x61d   :  { %6338 = vmatprep.subr.bf16.mxu1 %v15886_v50  ;;  %v15925_v26 = vld [vmem:[%s23062_s3 + $0x184] ss:$16 sps:$4 sm:$0xff]   ;;  %v15923_v16 = vld [vmem:[%s23062_s3 + $0x180] ss:$16 sps:$4 sm:$0xff]  }
 0x61e   :  { %v15928_v22 = vld [vmem:[%s23062_s3 + $0x1a4] ss:$16 sps:$4 sm:$0xff]   ;;  %v15926_v12 = vld [vmem:[%s23062_s3 + $0x1a0] ss:$16 sps:$4 sm:$0xff]  }
 0x61f   :  { %v15931_v50 = vld [vmem:[%s23062_s3 + $0x1c4] ss:$16 sps:$4 sm:$0xff]  }
 0x620   :  { %6339 = vmatpush1.bf16.msra.mxu1 %v15884_v14  ;;  %v15929_v14 = vld [vmem:[%s23062_s3 + $0x1c0] ss:$16 sps:$4 sm:$0xff]  }
 0x621   :  { %6877 = vmatprep.subr.bf16.mxu1 %v15889_v62  ;;  %v15934_v62 = vld [vmem:[%s23062_s3 + $0x1e4] ss:$16 sps:$4 sm:$0xff]  }
 0x623   :  { %6357 = vmatmul.mubr.bf16.vlgmr.msra.gmra.mrb[176].mxu1 %v20072_v1  ;;  %v15898_v1 = vld [vmem:[%s23062_s3 + $0x64] ss:$16 sps:$4 sm:$0xff]  }
 0x624   :  { %6878 = vmatpush1.bf16.msra.mxu1 %v15887_v28  ;;  %6366 = vmatprep.mubr.bf16.mxu1 %v17132_v27  ;;  %v15932_v28 = vld [vmem:[%s23062_s3 + $0x1e0] ss:$16 sps:$4 sm:$0xff]  }
 0x625   :  { %6879 = vmatprep.subr.bf16.mxu1 %v15892_v4  ;;  %v15937_v4 = vld [vmem:[%s23062_s3 + $0x204] ss:$16 sps:$4 sm:$0xff]  }
 0x628   :  { %6880 = vmatpush1.bf16.msra.mxu1 %v15890_v7  ;;  %v15935_v7 = vld [vmem:[%s23062_s3 + $0x200] ss:$16 sps:$4 sm:$0xff]  }
 0x629   :  { %6881 = vmatprep.subr.bf16.mxu1 %v15895_v5  ;;  %v15940_v5 = vld [vmem:[%s23062_s3 + $0x224] ss:$16 sps:$4 sm:$0xff]  }
 0x62b   :  { %6367 = vmatmul.mubr.bf16.gmra.mrb[180].mxu1 %v20117_v57  ;;  %v15904_v57 = vld [vmem:[%s23062_s3 + $0xa4] ss:$16 sps:$4 sm:$0xff]  }
 0x62c   :  { %6882 = vmatpush1.bf16.msra.mxu1 %v15893_v51  ;;  %6376 = vmatprep.mubr.bf16.mxu1 %v17132_v27  ;;  %v23970_v51 = vld [vmem:[#allocation120_spill] sm:$0xff] }
 0x62d   :  { %6883 = vmatprep.subr.bf16.mxu1 %v15898_v1  ;;  %v15938_v1 = vld [vmem:[%s23062_s3 + $0x220] ss:$16 sps:$4 sm:$0xff]  }
 0x630   :  { %6884 = vmatpush1.bf16.msra.mxu1 %v15896_v21  ;;  %v15943_v21 = vld [vmem:[%s23062_s3 + $0x244] ss:$16 sps:$4 sm:$0xff]  }
 0x631   :  { %6885 = vmatprep.subr.bf16.mxu1 %v15901_v45  ;;  %v15941_v45 = vld [vmem:[%s23062_s3 + $0x240] ss:$16 sps:$4 sm:$0xff]  }
 0x633   :  { %6377 = vmatmul.mubr.bf16.gmra.mrb[184].mxu1 %v20155_v59  ;;  %v15910_v59 = vld [vmem:[%s23062_s3 + $0xe4] ss:$16 sps:$4 sm:$0xff]  }
 0x634   :  { %6886 = vmatpush1.bf16.msra.mxu1 %v15899_v55  ;;  %6386 = vmatprep.mubr.bf16.mxu1 %v17132_v27  ;;  %v15946_v55 = vld [vmem:[%s23062_s3 + $0x264] ss:$16 sps:$4 sm:$0xff]  }
 0x635   :  { %6887 = vmatprep.subr.bf16.mxu1 %v15904_v57  ;;  %v23971_v57 = vld [vmem:[#allocation121_spill] sm:$0xff] }
 0x638   :  { %6888 = vmatpush1.bf16.msra.mxu1 %v15902_v10  ;;  %v15944_v10 = vld [vmem:[%s23062_s3 + $0x260] ss:$16 sps:$4 sm:$0xff]  }
 0x639   :  { %6889 = vmatprep.subr.bf16.mxu1 %v15907_v29  ;;  %v15949_v29 = vld [vmem:[%s23062_s3 + $0x284] ss:$16 sps:$4 sm:$0xff]  }
 0x63b   :  { %6387 = vmatmul.mubr.bf16.gmra.mrb[188].mxu1 %v20193_v35  ;;  %v15916_v35 = vld [vmem:[%s23062_s3 + $0x124] ss:$16 sps:$4 sm:$0xff]  }
 0x63c   :  { %6890 = vmatpush1.bf16.msra.mxu1 %v15905_v15  ;;  %6909 = vmatprep.mubr.bf16.mxu1 %v19971_v6  ;;  %v15947_v15 = vld [vmem:[%s23062_s3 + $0x280] ss:$16 sps:$4 sm:$0xff]  }
 0x63d   :  { %6891 = vmatprep.subr.bf16.mxu1 %v15910_v59  ;;  %v15952_v59 = vld [vmem:[%s23062_s3 + $0x2a4] ss:$16 sps:$4 sm:$0xff]  }
 0x640   :  { %6892 = vmatpush1.bf16.msra.mxu1 %v15908_v31  ;;  %v23972_v31 = vld [vmem:[#allocation122_spill] sm:$0xff] }
 0x641   :  { %6893 = vmatprep.subr.bf16.mxu1 %v15913_v18  ;;  %v15950_v18 = vld [vmem:[%s23062_s3 + $0x2a0] ss:$16 sps:$4 sm:$0xff]  }
 0x644   :  { %6894 = vmatpush1.bf16.msra.mxu1 %v15911_v60  ;;  %v15955_v60 = vld [vmem:[%s23062_s3 + $0x2c4] ss:$16 sps:$4 sm:$0xff]  }
 0x645   :  { %6895 = vmatprep.subr.bf16.mxu1 %v15916_v35  ;;  %v15953_v35 = vld [vmem:[%s23062_s3 + $0x2c0] ss:$16 sps:$4 sm:$0xff]  }
 0x648   :  { %6896 = vmatpush1.bf16.msra.mxu1 %v15914_v34  ;;  %v15958_v34 = vld [vmem:[%s23062_s3 + $0x2e4] ss:$16 sps:$4 sm:$0xff]  }
 0x649   :  { %6897 = vmatprep.subr.bf16.mxu1 %v15919_v25  ;;  %v23973_v25 = vld [vmem:[#allocation125_spill] sm:$0xff] }
 0x64c   :  { %6898 = vmatpush1.bf16.msra.mxu1 %v15917_v42  ;;  %v15956_v42 = vld [vmem:[%s23062_s3 + $0x2e0] ss:$16 sps:$4 sm:$0xff]  }
 0x64d   :  { %6899 = vmatprep.subr.bf16.mxu1 %v15922_v48  ;;  %v15961_v48 = vld [vmem:[%s23062_s3 + $0xc] ss:$16 sps:$4 sm:$0xff]  }
 0x650   :  { %6900 = vmatpush1.bf16.msra.mxu1 %v15920_v39  ;;  %v15959_v39 = vld [vmem:[%s23062_s3 + $0x8] ss:$16 sps:$4 sm:$0xff]  }
 0x651   :  { %6901 = vmatprep.subr.bf16.mxu1 %v15925_v26  ;;  %v15964_v26 = vld [vmem:[%s23062_s3 + $0x2c] ss:$16 sps:$4 sm:$0xff]  }
 0x654   :  { %6902 = vmatpush1.bf16.msra.mxu1 %v15923_v16  ;;  %v15962_v16 = vld [vmem:[%s23062_s3 + $0x28] ss:$16 sps:$4 sm:$0xff]  }
 0x655   :  { %6903 = vmatprep.subr.bf16.mxu1 %v15928_v22  ;;  %v15967_v22 = vld [vmem:[%s23062_s3 + $0x4c] ss:$16 sps:$4 sm:$0xff]  }
 0x658   :  { %6904 = vmatpush1.bf16.msra.mxu1 %v15926_v12  ;;  %v15965_v12 = vld [vmem:[%s23062_s3 + $0x48] ss:$16 sps:$4 sm:$0xff]  }
 0x659   :  { %6905 = vmatprep.subr.bf16.mxu1 %v15931_v50  ;;  %v15970_v50 = vld [vmem:[%s23062_s3 + $0x6c] ss:$16 sps:$4 sm:$0xff]  }
 0x65c   :  { %6906 = vmatpush1.bf16.msra.mxu1 %v15929_v14  ;;  %v15968_v14 = vld [vmem:[%s23062_s3 + $0x68] ss:$16 sps:$4 sm:$0xff]  }
 0x65d   :  { %6907 = vmatprep.subr.bf16.mxu1 %v15934_v62  ;;  %v15973_v62 = vld [vmem:[%s23062_s3 + $0x8c] ss:$16 sps:$4 sm:$0xff]  }
 0x660   :  { %6908 = vmatpush1.bf16.msra.mxu1 %v15932_v28  ;;  %v15971_v28 = vld [vmem:[%s23062_s3 + $0x88] ss:$16 sps:$4 sm:$0xff]  }
 0x661   :  { %6950 = vmatprep.subr.bf16.mxu1 %v15937_v4  ;;  %v15976_v4 = vld [vmem:[%s23062_s3 + $0xac] ss:$16 sps:$4 sm:$0xff]  }
 0x663   :  { %6910 = vmatmul.mubr.bf16.vlgmr.msra.gmra.mrb[160].mxu1 %v23970_v51 }
 0x664   :  { %6919 = vmatprep.mubr.bf16.mxu1 %v19995_v49  ;;  %6951 = vmatpush1.bf16.msra.mxu1 %v15935_v7  ;;  %v15974_v7 = vld [vmem:[%s23062_s3 + $0xa8] ss:$16 sps:$4 sm:$0xff]  }
 0x665   :  { %6952 = vmatprep.subr.bf16.mxu1 %v15940_v5  ;;  %v15979_v5 = vld [vmem:[%s23062_s3 + $0xcc] ss:$16 sps:$4 sm:$0xff]  }
 0x668   :  { %6953 = vmatpush1.bf16.msra.mxu1 %v15938_v1  ;;  %v15977_v1 = vld [vmem:[%s23062_s3 + $0xc8] ss:$16 sps:$4 sm:$0xff]  }
 0x669   :  { %6954 = vmatprep.subr.bf16.mxu1 %v15943_v21  ;;  %v15982_v21 = vld [vmem:[%s23062_s3 + $0xec] ss:$16 sps:$4 sm:$0xff]  }
 0x66b   :  { %6920 = vmatmul.mubr.bf16.gmra.mrb[164].mxu1 %v23971_v57 }
 0x66c   :  { %6929 = vmatprep.mubr.bf16.mxu1 %v20019_v38  ;;  %6955 = vmatpush1.bf16.msra.mxu1 %v15941_v45  ;;  %v15980_v45 = vld [vmem:[%s23062_s3 + $0xe8] ss:$16 sps:$4 sm:$0xff]  }
 0x66d   :  { %6956 = vmatprep.subr.bf16.mxu1 %v15946_v55  ;;  %v15985_v55 = vld [vmem:[%s23062_s3 + $0x10c] ss:$16 sps:$4 sm:$0xff]  }
 0x670   :  { %6957 = vmatpush1.bf16.msra.mxu1 %v15944_v10  ;;  %v15983_v10 = vld [vmem:[%s23062_s3 + $0x108] ss:$16 sps:$4 sm:$0xff]  }
 0x671   :  { %6958 = vmatprep.subr.bf16.mxu1 %v15949_v29  ;;  %v15988_v29 = vld [vmem:[%s23062_s3 + $0x12c] ss:$16 sps:$4 sm:$0xff]  }
 0x673   :  { %6930 = vmatmul.mubr.bf16.gmra.mrb[168].mxu1 %v23972_v31 }
 0x674   :  { %6939 = vmatprep.mubr.bf16.mxu1 %v20043_v19  ;;  %6959 = vmatpush1.bf16.msra.mxu1 %v15947_v15  ;;  %v15991_v15 = vld [vmem:[%s23062_s3 + $0x14c] ss:$16 sps:$4 sm:$0xff]  }
 0x675   :  { %6960 = vmatprep.subr.bf16.mxu1 %v15952_v59  ;;  %v15989_v59 = vld [vmem:[%s23062_s3 + $0x148] ss:$16 sps:$4 sm:$0xff]  }
 0x678   :  { %6961 = vmatpush1.bf16.msra.mxu1 %v15950_v18  ;;  %v15994_v18 = vld [vmem:[%s23062_s3 + $0x16c] ss:$16 sps:$4 sm:$0xff]  }
 0x679   :  { %6962 = vmatprep.subr.bf16.mxu1 %v15955_v60  ;;  %v15992_v60 = vld [vmem:[%s23062_s3 + $0x168] ss:$16 sps:$4 sm:$0xff]  }
 0x67b   :  { %6940 = vmatmul.mubr.bf16.gmra.mrb[172].mxu1 %v23973_v25 }
 0x67c   :  { %6963 = vmatpush1.bf16.msra.mxu1 %v15953_v35  ;;  %6982 = vmatprep.mubr.bf16.mxu1 %v17132_v27  ;;  %v15997_v35 = vld [vmem:[%s23062_s3 + $0x18c] ss:$16 sps:$4 sm:$0xff]  }
 0x67d   :  { %6964 = vmatprep.subr.bf16.mxu1 %v15958_v34  ;;  %v15995_v34 = vld [vmem:[%s23062_s3 + $0x188] ss:$16 sps:$4 sm:$0xff]  }
 0x680   :  { %6965 = vmatpush1.bf16.msra.mxu1 %v15956_v42  ;;  %v16000_v42 = vld [vmem:[%s23062_s3 + $0x1ac] ss:$16 sps:$4 sm:$0xff]  }
 0x681   :  { %7023 = vmatprep.subr.bf16.mxu1 %v15961_v48  ;;  %v15998_v48 = vld [vmem:[%s23062_s3 + $0x1a8] ss:$16 sps:$4 sm:$0xff]  }
 0x683   :  { %6983 = vmatmul.mubr.bf16.vlgmr.msra.gmra.mrb[160].mxu1 %v19973_v41 }
 0x684   :  { %7024 = vmatpush1.bf16.msra.mxu1 %v15959_v39  ;;  %6992 = vmatprep.mubr.bf16.mxu1 %v17132_v27  ;;  %v16003_v39 = vld [vmem:[%s23062_s3 + $0x1cc] ss:$16 sps:$4 sm:$0xff]  }
 0x685   :  { %7025 = vmatprep.subr.bf16.mxu1 %v15964_v26  ;;  %v16001_v26 = vld [vmem:[%s23062_s3 + $0x1c8] ss:$16 sps:$4 sm:$0xff]  }
 0x688   :  { %7026 = vmatpush1.bf16.msra.mxu1 %v15962_v16  ;;  %v16006_v16 = vld [vmem:[%s23062_s3 + $0x1ec] ss:$16 sps:$4 sm:$0xff]  }
 0x689   :  { %7027 = vmatprep.subr.bf16.mxu1 %v15967_v22  ;;  %v16004_v22 = vld [vmem:[%s23062_s3 + $0x1e8] ss:$16 sps:$4 sm:$0xff]  }
 0x68b   :  { %6993 = vmatmul.mubr.bf16.gmra.mrb[164].mxu1 %v20001_v47 }
 0x68c   :  { %7028 = vmatpush1.bf16.msra.mxu1 %v15965_v12  ;;  %7002 = vmatprep.mubr.bf16.mxu1 %v17132_v27  ;;  %v16009_v12 = vld [vmem:[%s23062_s3 + $0x20c] ss:$16 sps:$4 sm:$0xff]  }
 0x68d   :  { %7029 = vmatprep.subr.bf16.mxu1 %v15970_v50  ;;  %v16007_v50 = vld [vmem:[%s23062_s3 + $0x208] ss:$16 sps:$4 sm:$0xff]  }
 0x690   :  { %7030 = vmatpush1.bf16.msra.mxu1 %v15968_v14  ;;  %v16012_v14 = vld [vmem:[%s23062_s3 + $0x22c] ss:$16 sps:$4 sm:$0xff]  }
 0x691   :  { %7031 = vmatprep.subr.bf16.mxu1 %v15973_v62  ;;  %v16010_v62 = vld [vmem:[%s23062_s3 + $0x228] ss:$16 sps:$4 sm:$0xff]  }
 0x693   :  { %7003 = vmatmul.mubr.bf16.gmra.mrb[168].mxu1 %v20025_v8 }
 0x694   :  { %7032 = vmatpush1.bf16.msra.mxu1 %v15971_v28  ;;  %7012 = vmatprep.mubr.bf16.mxu1 %v17132_v27  ;;  %v16015_v28 = vld [vmem:[%s23062_s3 + $0x24c] ss:$16 sps:$4 sm:$0xff]  }
 0x695   :  { %7033 = vmatprep.subr.bf16.mxu1 %v15976_v4  ;;  %v16013_v4 = vld [vmem:[%s23062_s3 + $0x248] ss:$16 sps:$4 sm:$0xff]  }
 0x698   :  { %7034 = vmatpush1.bf16.msra.mxu1 %v15974_v7  ;;  %v16021_v7 = vld [vmem:[%s23062_s3 + $0x28c] ss:$16 sps:$4 sm:$0xff]  }
 0x699   :  { %7035 = vmatprep.subr.bf16.mxu1 %v15979_v5  ;;  %v16019_v5 = vld [vmem:[%s23062_s3 + $0x288] ss:$16 sps:$4 sm:$0xff]  }
 0x69b   :  { %7013 = vmatmul.mubr.bf16.gmra.mrb[172].mxu1 %v20049_v53 }
 0x69c   :  { %7036 = vmatpush1.bf16.msra.mxu1 %v15977_v1  ;;  %7055 = vmatprep.mubr.bf16.mxu1 %v19971_v6  ;;  %v15986_v6 = vld [vmem:[%s23062_s3 + $0x128] ss:$16 sps:$4 sm:$0xff]   ;;  %v16027_v1 = vld [vmem:[%s23062_s3 + $0x2cc] ss:$16 sps:$4 sm:$0xff]  }
 0x69d   :  { %7037 = vmatprep.subr.bf16.mxu1 %v15982_v21  ;;  %v16025_v21 = vld [vmem:[%s23062_s3 + $0x2c8] ss:$16 sps:$4 sm:$0xff]  }
 0x6a0   :  { %7038 = vmatpush1.bf16.msra.mxu1 %v15980_v45  ;;  %v16033_v45 = vld [vmem:[%s23062_s3 + $0x604] ss:$16 sps:$4 sm:$0xff]  }
 0x6a1   :  { %7039 = vmatprep.subr.bf16.mxu1 %v15985_v55  ;;  %v16031_v55 = vld [vmem:[%s23062_s3 + $0x600] ss:$16 sps:$4 sm:$0xff]  }
 0x6a4   :  { %7040 = vmatpush1.bf16.msra.mxu1 %v15983_v10  ;;  %v16034_v10 = vld [vmem:[%s23062_s3 + $0x620] ss:$16 sps:$4 sm:$0xff]  }
 0x6a5   :  { %7041 = vmatprep.subr.bf16.mxu1 %v15988_v29  ;;  %v16039_v29 = vld [vmem:[%s23062_s3 + $0x644] ss:$16 sps:$4 sm:$0xff]  }
 0x6a8   :  { %7042 = vmatpush1.bf16.msra.mxu1 %v15986_v6  ;;  %v16037_v6 = vld [vmem:[%s23062_s3 + $0x640] ss:$16 sps:$4 sm:$0xff]  }
 0x6a9   :  { %7043 = vmatprep.subr.bf16.mxu1 %v15991_v15  ;;  %v16040_v15 = vld [vmem:[%s23062_s3 + $0x660] ss:$16 sps:$4 sm:$0xff]  }
 0x6ac   :  { %7044 = vmatpush1.bf16.msra.mxu1 %v15989_v59  ;;  %v16045_v59 = vld [vmem:[%s23062_s3 + $0x684] ss:$16 sps:$4 sm:$0xff]  }
 0x6ad   :  { %7045 = vmatprep.subr.bf16.mxu1 %v15994_v18  ;;  %v16043_v18 = vld [vmem:[%s23062_s3 + $0x680] ss:$16 sps:$4 sm:$0xff]  }
 0x6b0   :  { %7046 = vmatpush1.bf16.msra.mxu1 %v15992_v60  ;;  %v16046_v60 = vld [vmem:[%s23062_s3 + $0x6a0] ss:$16 sps:$4 sm:$0xff]  }
 0x6b1   :  { %7047 = vmatprep.subr.bf16.mxu1 %v15997_v35  ;;  %v16051_v35 = vld [vmem:[%s23062_s3 + $0x6c4] ss:$16 sps:$4 sm:$0xff]  }
 0x6b4   :  { %7048 = vmatpush1.bf16.msra.mxu1 %v15995_v34  ;;  %v16049_v34 = vld [vmem:[%s23062_s3 + $0x6c0] ss:$16 sps:$4 sm:$0xff]  }
 0x6b5   :  { %7049 = vmatprep.subr.bf16.mxu1 %v16000_v42  ;;  %v16052_v42 = vld [vmem:[%s23062_s3 + $0x6e0] ss:$16 sps:$4 sm:$0xff]  }
 0x6b8   :  { %7050 = vmatpush1.bf16.msra.mxu1 %v15998_v48  ;;  %v16057_v48 = vld [vmem:[%s23062_s3 + $0x704] ss:$16 sps:$4 sm:$0xff]  }
 0x6b9   :  { %7051 = vmatprep.subr.bf16.mxu1 %v16003_v39  ;;  %v16055_v39 = vld [vmem:[%s23062_s3 + $0x700] ss:$16 sps:$4 sm:$0xff]  }
 0x6bc   :  { %7052 = vmatpush1.bf16.msra.mxu1 %v16001_v26  ;;  %v16058_v26 = vld [vmem:[%s23062_s3 + $0x720] ss:$16 sps:$4 sm:$0xff]  }
 0x6bd   :  { %7053 = vmatprep.subr.bf16.mxu1 %v16006_v16  ;;  %v16063_v16 = vld [vmem:[%s23062_s3 + $0x744] ss:$16 sps:$4 sm:$0xff]  }
 0x6c0   :  { %7054 = vmatpush1.bf16.msra.mxu1 %v16004_v22  ;;  %v16061_v22 = vld [vmem:[%s23062_s3 + $0x740] ss:$16 sps:$4 sm:$0xff]  }
 0x6c1   :  { %7096 = vmatprep.subr.bf16.mxu1 %v16009_v12  ;;  %v16066_v12 = vld [vmem:[%s23062_s3 + $0x764] ss:$16 sps:$4 sm:$0xff]  }
 0x6c3   :  { %7056 = vmatmul.mubr.bf16.vlgmr.msra.gmra.mrb[176].mxu1 %v23970_v51  ;;  %v16016_v51 = vld [vmem:[%s23062_s3 + $0x268] ss:$16 sps:$4 sm:$0xff]  }
 0x6c4   :  { %7065 = vmatprep.mubr.bf16.mxu1 %v19995_v49  ;;  %7097 = vmatpush1.bf16.msra.mxu1 %v16007_v50  ;;  %v16018_v49 = vld [vmem:[%s23062_s3 + $0x26c] ss:$16 sps:$4 sm:$0xff]   ;;  %v16064_v50 = vld [vmem:[%s23062_s3 + $0x760] ss:$16 sps:$4 sm:$0xff]  }
 0x6c5   :  { %7098 = vmatprep.subr.bf16.mxu1 %v16012_v14  ;;  %v16069_v14 = vld [vmem:[%s23062_s3 + $0x784] ss:$16 sps:$4 sm:$0xff]  }
 0x6c8   :  { %7099 = vmatpush1.bf16.msra.mxu1 %v16010_v62  ;;  %v16067_v62 = vld [vmem:[%s23062_s3 + $0x780] ss:$16 sps:$4 sm:$0xff]  }
 0x6c9   :  { %7100 = vmatprep.subr.bf16.mxu1 %v16015_v28  ;;  %v16072_v28 = vld [vmem:[%s23062_s3 + $0x7a4] ss:$16 sps:$4 sm:$0xff]  }
 0x6cb   :  { %7066 = vmatmul.mubr.bf16.gmra.mrb[180].mxu1 %v23971_v57  ;;  %v16022_v57 = vld [vmem:[%s23062_s3 + $0x2a8] ss:$16 sps:$4 sm:$0xff]  }
 0x6cc   :  { %7075 = vmatprep.mubr.bf16.mxu1 %v20019_v38  ;;  %7101 = vmatpush1.bf16.msra.mxu1 %v16013_v4  ;;  %v16024_v38 = vld [vmem:[%s23062_s3 + $0x2ac] ss:$16 sps:$4 sm:$0xff]   ;;  %v16070_v4 = vld [vmem:[%s23062_s3 + $0x7a0] ss:$16 sps:$4 sm:$0xff]  }
 0x6cd   :  { %7102 = vmatprep.subr.bf16.mxu1 %v16018_v49  ;;  %v16075_v49 = vld [vmem:[%s23062_s3 + $0x7c4] ss:$16 sps:$4 sm:$0xff]  }
 0x6d0   :  { %7103 = vmatpush1.bf16.msra.mxu1 %v16016_v51  ;;  %v16073_v51 = vld [vmem:[%s23062_s3 + $0x7c0] ss:$16 sps:$4 sm:$0xff]  }
 0x6d1   :  { %7104 = vmatprep.subr.bf16.mxu1 %v16021_v7  ;;  %v16078_v7 = vld [vmem:[%s23062_s3 + $0x7e4] ss:$16 sps:$4 sm:$0xff]  }
 0x6d3   :  { %7076 = vmatmul.mubr.bf16.gmra.mrb[184].mxu1 %v23972_v31  ;;  %v16028_v31 = vld [vmem:[%s23062_s3 + $0x2e8] ss:$16 sps:$4 sm:$0xff]  }
 0x6d4   :  { %7085 = vmatprep.mubr.bf16.mxu1 %v20043_v19  ;;  %7105 = vmatpush1.bf16.msra.mxu1 %v16019_v5  ;;  %v16030_v19 = vld [vmem:[%s23062_s3 + $0x2ec] ss:$16 sps:$4 sm:$0xff]   ;;  %v16076_v5 = vld [vmem:[%s23062_s3 + $0x7e0] ss:$16 sps:$4 sm:$0xff]  }
 0x6d5   :  { %7106 = vmatprep.subr.bf16.mxu1 %v16024_v38  ;;  %v16081_v38 = vld [vmem:[%s23062_s3 + $0x804] ss:$16 sps:$4 sm:$0xff]  }
 0x6d8   :  { %7107 = vmatpush1.bf16.msra.mxu1 %v16022_v57  ;;  %v16079_v57 = vld [vmem:[%s23062_s3 + $0x800] ss:$16 sps:$4 sm:$0xff]  }
 0x6d9   :  { %7108 = vmatprep.subr.bf16.mxu1 %v16027_v1  ;;  %v16084_v1 = vld [vmem:[%s23062_s3 + $0x824] ss:$16 sps:$4 sm:$0xff]  }
 0x6db   :  { %7086 = vmatmul.mubr.bf16.gmra.mrb[188].mxu1 %v23973_v25  ;;  %v16036_v25 = vld [vmem:[%s23062_s3 + $0x624] ss:$16 sps:$4 sm:$0xff]  }
 0x6dc   :  { %7109 = vmatpush1.bf16.msra.mxu1 %v16025_v21  ;;  %7128 = vmatprep.mubr.bf16.mxu1 %v17132_v27  ;;  %v23974_v21 = vld [vmem:[#allocation150_spill] sm:$0xff] }
 0x6dd   :  { %7110 = vmatprep.subr.bf16.mxu1 %v16030_v19  ;;  %v16082_v19 = vld [vmem:[%s23062_s3 + $0x820] ss:$16 sps:$4 sm:$0xff]  }
 0x6e0   :  { %7111 = vmatpush1.bf16.msra.mxu1 %v16028_v31  ;;  %v16087_v31 = vld [vmem:[%s23062_s3 + $0x844] ss:$16 sps:$4 sm:$0xff]  }
 0x6e1   :  { %7746 = vmatprep.subr.bf16.mxu1 %v16033_v45  ;;  %v16085_v45 = vld [vmem:[%s23062_s3 + $0x840] ss:$16 sps:$4 sm:$0xff]  }
 0x6e3   :  { %7129 = vmatmul.mubr.bf16.vlgmr.msra.gmra.mrb[176].mxu1 %v19973_v41  ;;  %v16042_v41 = vld [vmem:[%s23062_s3 + $0x664] ss:$16 sps:$4 sm:$0xff]  }
 0x6e4   :  { %7747 = vmatpush1.bf16.msra.mxu1 %v16031_v55  ;;  %7138 = vmatprep.mubr.bf16.mxu1 %v17132_v27  ;;  %v16090_v55 = vld [vmem:[%s23062_s3 + $0x864] ss:$16 sps:$4 sm:$0xff]  }
 0x6e5   :  { %7748 = vmatprep.subr.bf16.mxu1 %v16036_v25  ;;  %v23975_v25 = vld [vmem:[#allocation155_spill] sm:$0xff] }
 0x6e8   :  { %7749 = vmatpush1.bf16.msra.mxu1 %v16034_v10  ;;  %v16088_v10 = vld [vmem:[%s23062_s3 + $0x860] ss:$16 sps:$4 sm:$0xff]  }
 0x6e9   :  { %7750 = vmatprep.subr.bf16.mxu1 %v16039_v29  ;;  %v16093_v29 = vld [vmem:[%s23062_s3 + $0x884] ss:$16 sps:$4 sm:$0xff]  }
 0x6eb   :  { %7139 = vmatmul.mubr.bf16.gmra.mrb[180].mxu1 %v20001_v47  ;;  %v16048_v47 = vld [vmem:[%s23062_s3 + $0x6a4] ss:$16 sps:$4 sm:$0xff]  }
 0x6ec   :  { %7751 = vmatpush1.bf16.msra.mxu1 %v16037_v6  ;;  %7148 = vmatprep.mubr.bf16.mxu1 %v17132_v27  ;;  %v16091_v6 = vld [vmem:[%s23062_s3 + $0x880] ss:$16 sps:$4 sm:$0xff]  }
 0x6ed   :  { %7752 = vmatprep.subr.bf16.mxu1 %v16042_v41  ;;  %v16096_v41 = vld [vmem:[%s23062_s3 + $0x8a4] ss:$16 sps:$4 sm:$0xff]  }
 0x6f0   :  { %7753 = vmatpush1.bf16.msra.mxu1 %v16040_v15  ;;  %v23976_v15 = vld [vmem:[#allocation160_spill] sm:$0xff] }
 0x6f1   :  { %7754 = vmatprep.subr.bf16.mxu1 %v16045_v59  ;;  %v16094_v59 = vld [vmem:[%s23062_s3 + $0x8a0] ss:$16 sps:$4 sm:$0xff]  }
 0x6f3   :  { %7149 = vmatmul.mubr.bf16.gmra.mrb[184].mxu1 %v20025_v8  ;;  %v16054_v8 = vld [vmem:[%s23062_s3 + $0x6e4] ss:$16 sps:$4 sm:$0xff]  }
 0x6f4   :  { %7755 = vmatpush1.bf16.msra.mxu1 %v16043_v18  ;;  %7158 = vmatprep.mubr.bf16.mxu1 %v17132_v27  ;;  %v16099_v18 = vld [vmem:[%s23062_s3 + $0x8c4] ss:$16 sps:$4 sm:$0xff]  }
 0x6f5   :  { %7756 = vmatprep.subr.bf16.mxu1 %v16048_v47  ;;  %v16097_v47 = vld [vmem:[%s23062_s3 + $0x8c0] ss:$16 sps:$4 sm:$0xff]  }
 0x6f8   :  { %7757 = vmatpush1.bf16.msra.mxu1 %v16046_v60  ;;  %v16102_v60 = vld [vmem:[%s23062_s3 + $0x8e4] ss:$16 sps:$4 sm:$0xff]  }
 0x6f9   :  { %7758 = vmatprep.subr.bf16.mxu1 %v16051_v35  ;;  %v23977_v35 = vld [vmem:[#allocation52_spill] sm:$0xff] }
 0x6fb   :  { %7159 = vmatmul.mubr.bf16.gmra.mrb[188].mxu1 %v20049_v53  ;;  %v16060_v53 = vld [vmem:[%s23062_s3 + $0x724] ss:$16 sps:$4 sm:$0xff]  }
 0x6fc   :  { %7759 = vmatpush1.bf16.msra.mxu1 %v16049_v34  ;;  %7778 = vmatprep.mubr.bf16.mxu1 %v20223_v56  ;;  %v16100_v34 = vld [vmem:[%s23062_s3 + $0x8e0] ss:$16 sps:$4 sm:$0xff]  }
 0x6fd   :  { %7760 = vmatprep.subr.bf16.mxu1 %v16054_v8  ;;  %v16105_v8 = vld [vmem:[%s23062_s3 + $0x60c] ss:$16 sps:$4 sm:$0xff]  }
 0x700   :  { %7761 = vmatpush1.bf16.msra.mxu1 %v16052_v42  ;;  %v16103_v42 = vld [vmem:[%s23062_s3 + $0x608] ss:$16 sps:$4 sm:$0xff]  }
 0x701   :  { %7762 = vmatprep.subr.bf16.mxu1 %v16057_v48  ;;  %v16108_v48 = vld [vmem:[%s23062_s3 + $0x62c] ss:$16 sps:$4 sm:$0xff]  }
 0x704   :  { %7763 = vmatpush1.bf16.msra.mxu1 %v16055_v39  ;;  %v16106_v39 = vld [vmem:[%s23062_s3 + $0x628] ss:$16 sps:$4 sm:$0xff]  }
 0x705   :  { %7764 = vmatprep.subr.bf16.mxu1 %v16060_v53  ;;  %v16111_v53 = vld [vmem:[%s23062_s3 + $0x64c] ss:$16 sps:$4 sm:$0xff]  }
 0x708   :  { %7765 = vmatpush1.bf16.msra.mxu1 %v16058_v26  ;;  %v16109_v26 = vld [vmem:[%s23062_s3 + $0x648] ss:$16 sps:$4 sm:$0xff]  }
 0x709   :  { %7766 = vmatprep.subr.bf16.mxu1 %v16063_v16  ;;  %v16114_v16 = vld [vmem:[%s23062_s3 + $0x66c] ss:$16 sps:$4 sm:$0xff]  }
 0x70c   :  { %7767 = vmatpush1.bf16.msra.mxu1 %v16061_v22  ;;  %v16112_v22 = vld [vmem:[%s23062_s3 + $0x668] ss:$16 sps:$4 sm:$0xff]  }
 0x70d   :  { %7768 = vmatprep.subr.bf16.mxu1 %v16066_v12  ;;  %v16117_v12 = vld [vmem:[%s23062_s3 + $0x68c] ss:$16 sps:$4 sm:$0xff]  }
 0x710   :  { %7769 = vmatpush1.bf16.msra.mxu1 %v16064_v50  ;;  %v16115_v50 = vld [vmem:[%s23062_s3 + $0x688] ss:$16 sps:$4 sm:$0xff]  }
 0x711   :  { %7770 = vmatprep.subr.bf16.mxu1 %v16069_v14  ;;  %v16120_v14 = vld [vmem:[%s23062_s3 + $0x6ac] ss:$16 sps:$4 sm:$0xff]  }
 0x714   :  { %7771 = vmatpush1.bf16.msra.mxu1 %v16067_v62  ;;  %v16118_v62 = vld [vmem:[%s23062_s3 + $0x6a8] ss:$16 sps:$4 sm:$0xff]  }
 0x715   :  { %7772 = vmatprep.subr.bf16.mxu1 %v16072_v28  ;;  %v16123_v28 = vld [vmem:[%s23062_s3 + $0x6cc] ss:$16 sps:$4 sm:$0xff]  }
 0x718   :  { %7773 = vmatpush1.bf16.msra.mxu1 %v16070_v4  ;;  %v16121_v4 = vld [vmem:[%s23062_s3 + $0x6c8] ss:$16 sps:$4 sm:$0xff]  }
 0x719   :  { %7774 = vmatprep.subr.bf16.mxu1 %v16075_v49  ;;  %v16126_v49 = vld [vmem:[%s23062_s3 + $0x6ec] ss:$16 sps:$4 sm:$0xff]  }
 0x71c   :  { %7775 = vmatpush1.bf16.msra.mxu1 %v16073_v51  ;;  %v16124_v51 = vld [vmem:[%s23062_s3 + $0x6e8] ss:$16 sps:$4 sm:$0xff]  }
 0x71d   :  { %7776 = vmatprep.subr.bf16.mxu1 %v16078_v7  ;;  %v16129_v7 = vld [vmem:[%s23062_s3 + $0x70c] ss:$16 sps:$4 sm:$0xff]  }
 0x720   :  { %7777 = vmatpush1.bf16.msra.mxu1 %v16076_v5  ;;  %v16127_v5 = vld [vmem:[%s23062_s3 + $0x708] ss:$16 sps:$4 sm:$0xff]  }
 0x721   :  { %7819 = vmatprep.subr.bf16.mxu1 %v16081_v38  ;;  %v16132_v38 = vld [vmem:[%s23062_s3 + $0x72c] ss:$16 sps:$4 sm:$0xff]  }
 0x723   :  { %7779 = vmatmul.mubr.bf16.vlgmr.msra.gmra.mrb[160].mxu1 %v23974_v21 }
 0x724   :  { %7788 = vmatprep.mubr.bf16.mxu1 %v20261_v3  ;;  %7820 = vmatpush1.bf16.msra.mxu1 %v16079_v57  ;;  %v16135_v57 = vld [vmem:[%s23062_s3 + $0x74c] ss:$16 sps:$4 sm:$0xff]  }
 0x725   :  { %7821 = vmatprep.subr.bf16.mxu1 %v16084_v1  ;;  %v16133_v1 = vld [vmem:[%s23062_s3 + $0x748] ss:$16 sps:$4 sm:$0xff]  }
 0x728   :  { %7822 = vmatpush1.bf16.msra.mxu1 %v16082_v19  ;;  %v16138_v19 = vld [vmem:[%s23062_s3 + $0x76c] ss:$16 sps:$4 sm:$0xff]  }
 0x729   :  { %7823 = vmatprep.subr.bf16.mxu1 %v16087_v31  ;;  %v16136_v31 = vld [vmem:[%s23062_s3 + $0x768] ss:$16 sps:$4 sm:$0xff]  }
 0x72b   :  { %7789 = vmatmul.mubr.bf16.gmra.mrb[164].mxu1 %v23975_v25 }
 0x72c   :  { %7798 = vmatprep.mubr.bf16.mxu1 %v20299_v2  ;;  %7824 = vmatpush1.bf16.msra.mxu1 %v16085_v45  ;;  %v16141_v45 = vld [vmem:[%s23062_s3 + $0x78c] ss:$16 sps:$4 sm:$0xff]  }
 0x72d   :  { %7825 = vmatprep.subr.bf16.mxu1 %v16090_v55  ;;  %v16139_v55 = vld [vmem:[%s23062_s3 + $0x788] ss:$16 sps:$4 sm:$0xff]  }
 0x730   :  { %7826 = vmatpush1.bf16.msra.mxu1 %v16088_v10  ;;  %v16144_v10 = vld [vmem:[%s23062_s3 + $0x7ac] ss:$16 sps:$4 sm:$0xff]  }
 0x731   :  { %7827 = vmatprep.subr.bf16.mxu1 %v16093_v29  ;;  %v16142_v29 = vld [vmem:[%s23062_s3 + $0x7a8] ss:$16 sps:$4 sm:$0xff]  }
 0x733   :  { %7799 = vmatmul.mubr.bf16.gmra.mrb[168].mxu1 %v23976_v15 }
 0x734   :  { %7808 = vmatprep.mubr.bf16.mxu1 %v20337_v9  ;;  %7828 = vmatpush1.bf16.msra.mxu1 %v16091_v6  ;;  %v16147_v6 = vld [vmem:[%s23062_s3 + $0x7cc] ss:$16 sps:$4 sm:$0xff]  }
 0x735   :  { %7829 = vmatprep.subr.bf16.mxu1 %v16096_v41  ;;  %v16145_v41 = vld [vmem:[%s23062_s3 + $0x7c8] ss:$16 sps:$4 sm:$0xff]  }
 0x738   :  { %7830 = vmatpush1.bf16.msra.mxu1 %v16094_v59  ;;  %v16150_v59 = vld [vmem:[%s23062_s3 + $0x7ec] ss:$16 sps:$4 sm:$0xff]  }
 0x739   :  { %7831 = vmatprep.subr.bf16.mxu1 %v16099_v18  ;;  %v16148_v18 = vld [vmem:[%s23062_s3 + $0x7e8] ss:$16 sps:$4 sm:$0xff]  }
 0x73b   :  { %7809 = vmatmul.mubr.bf16.gmra.mrb[172].mxu1 %v23977_v35 }
 0x73c   :  { %7832 = vmatpush1.bf16.msra.mxu1 %v16097_v47  ;;  %7851 = vmatprep.mubr.bf16.mxu1 %v17132_v27  ;;  %v16153_v47 = vld [vmem:[%s23062_s3 + $0x80c] ss:$16 sps:$4 sm:$0xff]  }
 0x73d   :  { %7833 = vmatprep.subr.bf16.mxu1 %v16102_v60  ;;  %v16151_v60 = vld [vmem:[%s23062_s3 + $0x808] ss:$16 sps:$4 sm:$0xff]  }
 0x740   :  { %7834 = vmatpush1.bf16.msra.mxu1 %v16100_v34  ;;  %v16156_v34 = vld [vmem:[%s23062_s3 + $0x82c] ss:$16 sps:$4 sm:$0xff]  }
 0x741   :  { %7892 = vmatprep.subr.bf16.mxu1 %v16105_v8  ;;  %v16154_v8 = vld [vmem:[%s23062_s3 + $0x828] ss:$16 sps:$4 sm:$0xff]  }
 0x743   :  { %7852 = vmatmul.mubr.bf16.vlgmr.msra.gmra.mrb[160].mxu1 %v20225_v63 }
 0x744   :  { %7893 = vmatpush1.bf16.msra.mxu1 %v16103_v42  ;;  %7861 = vmatprep.mubr.bf16.mxu1 %v17132_v27  ;;  %v16159_v42 = vld [vmem:[%s23062_s3 + $0x84c] ss:$16 sps:$4 sm:$0xff]  }
 0x745   :  { %7894 = vmatprep.subr.bf16.mxu1 %v16108_v48  ;;  %v16157_v48 = vld [vmem:[%s23062_s3 + $0x848] ss:$16 sps:$4 sm:$0xff]  }
 0x748   :  { %7895 = vmatpush1.bf16.msra.mxu1 %v16106_v39  ;;  %v16165_v39 = vld [vmem:[%s23062_s3 + $0x88c] ss:$16 sps:$4 sm:$0xff]  }
 0x749   :  { %7896 = vmatprep.subr.bf16.mxu1 %v16111_v53  ;;  %v16163_v53 = vld [vmem:[%s23062_s3 + $0x888] ss:$16 sps:$4 sm:$0xff]  }
 0x74b   :  { %7862 = vmatmul.mubr.bf16.gmra.mrb[164].mxu1 %v20270_v17 }
 0x74c   :  { %7897 = vmatpush1.bf16.msra.mxu1 %v16109_v26  ;;  %7871 = vmatprep.mubr.bf16.mxu1 %v17132_v27  ;;  %v16171_v26 = vld [vmem:[%s23062_s3 + $0x8cc] ss:$16 sps:$4 sm:$0xff]  }
 0x74d   :  { %7898 = vmatprep.subr.bf16.mxu1 %v16114_v16  ;;  %v16169_v16 = vld [vmem:[%s23062_s3 + $0x8c8] ss:$16 sps:$4 sm:$0xff]  }
 0x750   :  { %7899 = vmatpush1.bf16.msra.mxu1 %v16112_v22  ;;  %v16177_v22 = vld [vmem:[%s23062_s3 + $0x904] ss:$16 sps:$4 sm:$0xff]  }
 0x751   :  { %7900 = vmatprep.subr.bf16.mxu1 %v16117_v12  ;;  %v16175_v12 = vld [vmem:[%s23062_s3 + $0x900] ss:$16 sps:$4 sm:$0xff]  }
 0x753   :  { %7872 = vmatmul.mubr.bf16.gmra.mrb[168].mxu1 %v20308_v24 }
 0x754   :  { %7901 = vmatpush1.bf16.msra.mxu1 %v16115_v50  ;;  %7881 = vmatprep.mubr.bf16.mxu1 %v17132_v27  ;;  %v16178_v50 = vld [vmem:[%s23062_s3 + $0x920] ss:$16 sps:$4 sm:$0xff]  }
 0x755   :  { %7902 = vmatprep.subr.bf16.mxu1 %v16120_v14  ;;  %v16183_v14 = vld [vmem:[%s23062_s3 + $0x944] ss:$16 sps:$4 sm:$0xff]  }
 0x758   :  { %7903 = vmatpush1.bf16.msra.mxu1 %v16118_v62  ;;  %v16181_v62 = vld [vmem:[%s23062_s3 + $0x940] ss:$16 sps:$4 sm:$0xff]  }
 0x759   :  { %7904 = vmatprep.subr.bf16.mxu1 %v16123_v28  ;;  %v16184_v28 = vld [vmem:[%s23062_s3 + $0x960] ss:$16 sps:$4 sm:$0xff]  }
 0x75b   :  { %7882 = vmatmul.mubr.bf16.gmra.mrb[172].mxu1 %v20346_v20 }
 0x75c   :  { %7905 = vmatpush1.bf16.msra.mxu1 %v16121_v4  ;;  %7924 = vmatprep.mubr.bf16.mxu1 %v20223_v56  ;;  %v16130_v56 = vld [vmem:[%s23062_s3 + $0x728] ss:$16 sps:$4 sm:$0xff]   ;;  %v16189_v4 = vld [vmem:[%s23062_s3 + $0x984] ss:$16 sps:$4 sm:$0xff]  }
 0x75d   :  { %7906 = vmatprep.subr.bf16.mxu1 %v16126_v49  ;;  %v16187_v49 = vld [vmem:[%s23062_s3 + $0x980] ss:$16 sps:$4 sm:$0xff]  }
 0x760   :  { %7907 = vmatpush1.bf16.msra.mxu1 %v16124_v51  ;;  %v16190_v51 = vld [vmem:[%s23062_s3 + $0x9a0] ss:$16 sps:$4 sm:$0xff]  }
 0x761   :  { %7908 = vmatprep.subr.bf16.mxu1 %v16129_v7  ;;  %v16195_v7 = vld [vmem:[%s23062_s3 + $0x9c4] ss:$16 sps:$4 sm:$0xff]  }
 0x764   :  { %7909 = vmatpush1.bf16.msra.mxu1 %v16127_v5  ;;  %v16193_v5 = vld [vmem:[%s23062_s3 + $0x9c0] ss:$16 sps:$4 sm:$0xff]  }
 0x765   :  { %7910 = vmatprep.subr.bf16.mxu1 %v16132_v38  ;;  %v16196_v38 = vld [vmem:[%s23062_s3 + $0x9e0] ss:$16 sps:$4 sm:$0xff]  }
 0x768   :  { %7911 = vmatpush1.bf16.msra.mxu1 %v16130_v56  ;;  %v16201_v56 = vld [vmem:[%s23062_s3 + $0xa04] ss:$16 sps:$4 sm:$0xff]  }
 0x769   :  { %7912 = vmatprep.subr.bf16.mxu1 %v16135_v57  ;;  %v16199_v57 = vld [vmem:[%s23062_s3 + $0xa00] ss:$16 sps:$4 sm:$0xff]  }
 0x76c   :  { %7913 = vmatpush1.bf16.msra.mxu1 %v16133_v1  ;;  %v16202_v1 = vld [vmem:[%s23062_s3 + $0xa20] ss:$16 sps:$4 sm:$0xff]  }
 0x76d   :  { %7914 = vmatprep.subr.bf16.mxu1 %v16138_v19  ;;  %v16207_v19 = vld [vmem:[%s23062_s3 + $0xa44] ss:$16 sps:$4 sm:$0xff]  }
 0x770   :  { %7915 = vmatpush1.bf16.msra.mxu1 %v16136_v31  ;;  %v16205_v31 = vld [vmem:[%s23062_s3 + $0xa40] ss:$16 sps:$4 sm:$0xff]  }
 0x771   :  { %7916 = vmatprep.subr.bf16.mxu1 %v16141_v45  ;;  %v16210_v45 = vld [vmem:[%s23062_s3 + $0xa64] ss:$16 sps:$4 sm:$0xff]  }
 0x774   :  { %7917 = vmatpush1.bf16.msra.mxu1 %v16139_v55  ;;  %v16208_v55 = vld [vmem:[%s23062_s3 + $0xa60] ss:$16 sps:$4 sm:$0xff]  }
 0x775   :  { %7918 = vmatprep.subr.bf16.mxu1 %v16144_v10  ;;  %v16213_v10 = vld [vmem:[%s23062_s3 + $0xa84] ss:$16 sps:$4 sm:$0xff]  }
 0x778   :  { %7919 = vmatpush1.bf16.msra.mxu1 %v16142_v29  ;;  %v16211_v29 = vld [vmem:[%s23062_s3 + $0xa80] ss:$16 sps:$4 sm:$0xff]  }
 0x779   :  { %7920 = vmatprep.subr.bf16.mxu1 %v16147_v6  ;;  %v16216_v6 = vld [vmem:[%s23062_s3 + $0xaa4] ss:$16 sps:$4 sm:$0xff]  }
 0x77c   :  { %7921 = vmatpush1.bf16.msra.mxu1 %v16145_v41  ;;  %v16214_v41 = vld [vmem:[%s23062_s3 + $0xaa0] ss:$16 sps:$4 sm:$0xff]  }
 0x77d   :  { %7922 = vmatprep.subr.bf16.mxu1 %v16150_v59  ;;  %v16219_v59 = vld [vmem:[%s23062_s3 + $0xac4] ss:$16 sps:$4 sm:$0xff]  }
 0x780   :  { %7923 = vmatpush1.bf16.msra.mxu1 %v16148_v18  ;;  %v16217_v18 = vld [vmem:[%s23062_s3 + $0xac0] ss:$16 sps:$4 sm:$0xff]  }
 0x781   :  { %7965 = vmatprep.subr.bf16.mxu1 %v16153_v47  ;;  %v16222_v47 = vld [vmem:[%s23062_s3 + $0xae4] ss:$16 sps:$4 sm:$0xff]  }
 0x783   :  { %7925 = vmatmul.mubr.bf16.vlgmr.msra.gmra.mrb[176].mxu1 %v23974_v21  ;;  %v16160_v21 = vld [vmem:[%s23062_s3 + $0x868] ss:$16 sps:$4 sm:$0xff]  }
 0x784   :  { %7934 = vmatprep.mubr.bf16.mxu1 %v20261_v3  ;;  %7966 = vmatpush1.bf16.msra.mxu1 %v16151_v60  ;;  %v16162_v3 = vld [vmem:[%s23062_s3 + $0x86c] ss:$16 sps:$4 sm:$0xff]   ;;  %v16220_v60 = vld [vmem:[%s23062_s3 + $0xae0] ss:$16 sps:$4 sm:$0xff]  }
 0x785   :  { %7967 = vmatprep.subr.bf16.mxu1 %v16156_v34  ;;  %v16225_v34 = vld [vmem:[%s23062_s3 + $0xb04] ss:$16 sps:$4 sm:$0xff]  }
 0x788   :  { %7968 = vmatpush1.bf16.msra.mxu1 %v16154_v8  ;;  %v16223_v8 = vld [vmem:[%s23062_s3 + $0xb00] ss:$16 sps:$4 sm:$0xff]  }
 0x789   :  { %7969 = vmatprep.subr.bf16.mxu1 %v16159_v42  ;;  %v16228_v42 = vld [vmem:[%s23062_s3 + $0xb24] ss:$16 sps:$4 sm:$0xff]  }
 0x78b   :  { %7935 = vmatmul.mubr.bf16.gmra.mrb[180].mxu1 %v23975_v25  ;;  %v16166_v25 = vld [vmem:[%s23062_s3 + $0x8a8] ss:$16 sps:$4 sm:$0xff]  }
 0x78c   :  { %7944 = vmatprep.mubr.bf16.mxu1 %v20299_v2  ;;  %7970 = vmatpush1.bf16.msra.mxu1 %v16157_v48  ;;  %v16168_v2 = vld [vmem:[%s23062_s3 + $0x8ac] ss:$16 sps:$4 sm:$0xff]  }
 0x78d   :  { %7971 = vmatprep.subr.bf16.mxu1 %v16162_v3  ;;  %v23978_v48 = vld [vmem:[#allocation167_spill] sm:$0xff]  ;;  %v16226_v3 = vld [vmem:[%s23062_s3 + $0xb20] ss:$16 sps:$4 sm:$0xff]  }
 0x790   :  { %7972 = vmatpush1.bf16.msra.mxu1 %v16160_v21  ;;  %v16231_v21 = vld [vmem:[%s23062_s3 + $0xb44] ss:$16 sps:$4 sm:$0xff]  }
 0x791   :  { %7973 = vmatprep.subr.bf16.mxu1 %v16165_v39  ;;  %v16229_v39 = vld [vmem:[%s23062_s3 + $0xb40] ss:$16 sps:$4 sm:$0xff]  }
 0x793   :  { %7945 = vmatmul.mubr.bf16.gmra.mrb[184].mxu1 %v23976_v15  ;;  %v16172_v15 = vld [vmem:[%s23062_s3 + $0x8e8] ss:$16 sps:$4 sm:$0xff]  }
 0x794   :  { %7954 = vmatprep.mubr.bf16.mxu1 %v20337_v9  ;;  %7974 = vmatpush1.bf16.msra.mxu1 %v16163_v53  ;;  %v16174_v9 = vld [vmem:[%s23062_s3 + $0x8ec] ss:$16 sps:$4 sm:$0xff]   ;;  %v16234_v53 = vld [vmem:[%s23062_s3 + $0xb64] ss:$16 sps:$4 sm:$0xff]  }
 0x795   :  { %7975 = vmatprep.subr.bf16.mxu1 %v16168_v2  ;;  %v23979_v2 = vld [vmem:[#allocation65_spill] sm:$0xff] }
 0x798   :  { %7976 = vmatpush1.bf16.msra.mxu1 %v16166_v25  ;;  %v16232_v25 = vld [vmem:[%s23062_s3 + $0xb60] ss:$16 sps:$4 sm:$0xff]  }
 0x799   :  { %7977 = vmatprep.subr.bf16.mxu1 %v16171_v26  ;;  %v16237_v26 = vld [vmem:[%s23062_s3 + $0xb84] ss:$16 sps:$4 sm:$0xff]  }
 0x79b   :  { %7955 = vmatmul.mubr.bf16.gmra.mrb[188].mxu1 %v23977_v35  ;;  %v16180_v35 = vld [vmem:[%s23062_s3 + $0x924] ss:$16 sps:$4 sm:$0xff]  }
 0x79c   :  { %7978 = vmatpush1.bf16.msra.mxu1 %v16169_v16  ;;  %7997 = vmatprep.mubr.bf16.mxu1 %v17132_v27  ;;  %v16235_v16 = vld [vmem:[%s23062_s3 + $0xb80] ss:$16 sps:$4 sm:$0xff]  }
 0x79d   :  { %7979 = vmatprep.subr.bf16.mxu1 %v16174_v9  ;;  %v16240_v9 = vld [vmem:[%s23062_s3 + $0xba4] ss:$16 sps:$4 sm:$0xff]  }
 0x7a0   :  { %7980 = vmatpush1.bf16.msra.mxu1 %v16172_v15  ;;  %v23980_v15 = vld [vmem:[#allocation73_spill] sm:$0xff] }
 0x7a1   :  { %8647 = vmatprep.subr.bf16.mxu1 %v16177_v22  ;;  %v16238_v22 = vld [vmem:[%s23062_s3 + $0xba0] ss:$16 sps:$4 sm:$0xff]  }
 0x7a3   :  { %7998 = vmatmul.mubr.bf16.vlgmr.msra.gmra.mrb[176].mxu1 %v20225_v63  ;;  %v16186_v63 = vld [vmem:[%s23062_s3 + $0x964] ss:$16 sps:$4 sm:$0xff]  }
 0x7a4   :  { %8648 = vmatpush1.bf16.msra.mxu1 %v16175_v12  ;;  %8007 = vmatprep.mubr.bf16.mxu1 %v17132_v27  ;;  %v16243_v12 = vld [vmem:[%s23062_s3 + $0xbc4] ss:$16 sps:$4 sm:$0xff]  }
 0x7a5   :  { %8649 = vmatprep.subr.bf16.mxu1 %v16180_v35  ;;  %v16241_v35 = vld [vmem:[%s23062_s3 + $0xbc0] ss:$16 sps:$4 sm:$0xff]  }
 0x7a8   :  { %8650 = vmatpush1.bf16.msra.mxu1 %v16178_v50  ;;  %v16246_v50 = vld [vmem:[%s23062_s3 + $0xbe4] ss:$16 sps:$4 sm:$0xff]  }
 0x7a9   :  { %8651 = vmatprep.subr.bf16.mxu1 %v16183_v14  ;;  %v23981_v14 = vld [vmem:[#allocation81_spill] sm:$0xff] }
 0x7ab   :  { %8008 = vmatmul.mubr.bf16.gmra.mrb[180].mxu1 %v20270_v17  ;;  %v16192_v17 = vld [vmem:[%s23062_s3 + $0x9a4] ss:$16 sps:$4 sm:$0xff]  }
 0x7ac   :  { %8652 = vmatpush1.bf16.msra.mxu1 %v16181_v62  ;;  %8017 = vmatprep.mubr.bf16.mxu1 %v17132_v27  ;;  %v16244_v62 = vld [vmem:[%s23062_s3 + $0xbe0] ss:$16 sps:$4 sm:$0xff]  }
 0x7ad   :  { %8653 = vmatprep.subr.bf16.mxu1 %v16186_v63  ;;  %v16249_v63 = vld [vmem:[%s23062_s3 + $0x90c] ss:$16 sps:$4 sm:$0xff]  }
 0x7b0   :  { %8654 = vmatpush1.bf16.msra.mxu1 %v16184_v28  ;;  %v16247_v28 = vld [vmem:[%s23062_s3 + $0x908] ss:$16 sps:$4 sm:$0xff]  }
 0x7b1   :  { %8655 = vmatprep.subr.bf16.mxu1 %v16189_v4  ;;  %v16252_v4 = vld [vmem:[%s23062_s3 + $0x92c] ss:$16 sps:$4 sm:$0xff]  }
 0x7b3   :  { %8018 = vmatmul.mubr.bf16.gmra.mrb[184].mxu1 %v20308_v24  ;;  %v16198_v24 = vld [vmem:[%s23062_s3 + $0x9e4] ss:$16 sps:$4 sm:$0xff]  }
 0x7b4   :  { %8656 = vmatpush1.bf16.msra.mxu1 %v16187_v49  ;;  %8027 = vmatprep.mubr.bf16.mxu1 %v17132_v27  ;;  %v16250_v49 = vld [vmem:[%s23062_s3 + $0x928] ss:$16 sps:$4 sm:$0xff]  }
 0x7b5   :  { %8657 = vmatprep.subr.bf16.mxu1 %v16192_v17  ;;  %v16255_v17 = vld [vmem:[%s23062_s3 + $0x94c] ss:$16 sps:$4 sm:$0xff]  }
 0x7b8   :  { %8658 = vmatpush1.bf16.msra.mxu1 %v16190_v51  ;;  %v16253_v51 = vld [vmem:[%s23062_s3 + $0x948] ss:$16 sps:$4 sm:$0xff]  }
 0x7b9   :  { %8659 = vmatprep.subr.bf16.mxu1 %v16195_v7  ;;  %v16258_v7 = vld [vmem:[%s23062_s3 + $0x96c] ss:$16 sps:$4 sm:$0xff]  }
 0x7bb   :  { %8028 = vmatmul.mubr.bf16.gmra.mrb[188].mxu1 %v20346_v20  ;;  %v16204_v20 = vld [vmem:[%s23062_s3 + $0xa24] ss:$16 sps:$4 sm:$0xff]  }
 0x7bc   :  { %8660 = vmatpush1.bf16.msra.mxu1 %v16193_v5  ;;  %8679 = vmatprep.mubr.bf16.mxu1 %v20375_v13  ;;  %v16256_v5 = vld [vmem:[%s23062_s3 + $0x968] ss:$16 sps:$4 sm:$0xff]  }
 0x7bd   :  { %8661 = vmatprep.subr.bf16.mxu1 %v16198_v24  ;;  %v16261_v24 = vld [vmem:[%s23062_s3 + $0x98c] ss:$16 sps:$4 sm:$0xff]  }
 0x7c0   :  { %8662 = vmatpush1.bf16.msra.mxu1 %v16196_v38  ;;  %v16259_v38 = vld [vmem:[%s23062_s3 + $0x988] ss:$16 sps:$4 sm:$0xff]  }
 0x7c1   :  { %8663 = vmatprep.subr.bf16.mxu1 %v16201_v56  ;;  %v16264_v56 = vld [vmem:[%s23062_s3 + $0x9ac] ss:$16 sps:$4 sm:$0xff]  }
 0x7c4   :  { %8664 = vmatpush1.bf16.msra.mxu1 %v16199_v57  ;;  %v16262_v57 = vld [vmem:[%s23062_s3 + $0x9a8] ss:$16 sps:$4 sm:$0xff]  }
 0x7c5   :  { %8665 = vmatprep.subr.bf16.mxu1 %v16204_v20  ;;  %v16267_v20 = vld [vmem:[%s23062_s3 + $0x9cc] ss:$16 sps:$4 sm:$0xff]  }
 0x7c8   :  { %8666 = vmatpush1.bf16.msra.mxu1 %v16202_v1  ;;  %v16265_v1 = vld [vmem:[%s23062_s3 + $0x9c8] ss:$16 sps:$4 sm:$0xff]  }
 0x7c9   :  { %8667 = vmatprep.subr.bf16.mxu1 %v16207_v19  ;;  %v16270_v19 = vld [vmem:[%s23062_s3 + $0x9ec] ss:$16 sps:$4 sm:$0xff]  }
 0x7cc   :  { %8668 = vmatpush1.bf16.msra.mxu1 %v16205_v31  ;;  %v16268_v31 = vld [vmem:[%s23062_s3 + $0x9e8] ss:$16 sps:$4 sm:$0xff]  }
 0x7cd   :  { %8669 = vmatprep.subr.bf16.mxu1 %v16210_v45  ;;  %v16273_v45 = vld [vmem:[%s23062_s3 + $0xa0c] ss:$16 sps:$4 sm:$0xff]  }
 0x7d0   :  { %8670 = vmatpush1.bf16.msra.mxu1 %v16208_v55  ;;  %v16271_v55 = vld [vmem:[%s23062_s3 + $0xa08] ss:$16 sps:$4 sm:$0xff]  }
 0x7d1   :  { %8671 = vmatprep.subr.bf16.mxu1 %v16213_v10  ;;  %v16276_v10 = vld [vmem:[%s23062_s3 + $0xa2c] ss:$16 sps:$4 sm:$0xff]  }
 0x7d4   :  { %8672 = vmatpush1.bf16.msra.mxu1 %v16211_v29  ;;  %v16279_v29 = vld [vmem:[%s23062_s3 + $0xa4c] ss:$16 sps:$4 sm:$0xff]  }
 0x7d5   :  { %8673 = vmatprep.subr.bf16.mxu1 %v16216_v6  ;;  %v16277_v6 = vld [vmem:[%s23062_s3 + $0xa48] ss:$16 sps:$4 sm:$0xff]  }
 0x7d8   :  { %8674 = vmatpush1.bf16.msra.mxu1 %v16214_v41  ;;  %v16282_v41 = vld [vmem:[%s23062_s3 + $0xa6c] ss:$16 sps:$4 sm:$0xff]  }
 0x7d9   :  { %8675 = vmatprep.subr.bf16.mxu1 %v16219_v59  ;;  %v16280_v59 = vld [vmem:[%s23062_s3 + $0xa68] ss:$16 sps:$4 sm:$0xff]  }
 0x7dc   :  { %8676 = vmatpush1.bf16.msra.mxu1 %v16217_v18  ;;  %v16285_v18 = vld [vmem:[%s23062_s3 + $0xa8c] ss:$16 sps:$4 sm:$0xff]  }
 0x7dd   :  { %8677 = vmatprep.subr.bf16.mxu1 %v16222_v47  ;;  %v16283_v47 = vld [vmem:[%s23062_s3 + $0xa88] ss:$16 sps:$4 sm:$0xff]  }
 0x7e0   :  { %8678 = vmatpush1.bf16.msra.mxu1 %v16220_v60  ;;  %v16288_v60 = vld [vmem:[%s23062_s3 + $0xaac] ss:$16 sps:$4 sm:$0xff]  }
 0x7e1   :  { %8720 = vmatprep.subr.bf16.mxu1 %v16225_v34  ;;  %v16286_v34 = vld [vmem:[%s23062_s3 + $0xaa8] ss:$16 sps:$4 sm:$0xff]  }
 0x7e3   :  { %8680 = vmatmul.mubr.bf16.vlgmr.msra.gmra.mrb[160].mxu1 %v23978_v48 }
 0x7e4   :  { %8689 = vmatprep.mubr.bf16.mxu1 %v20411_v30  ;;  %8721 = vmatpush1.bf16.msra.mxu1 %v16223_v8  ;;  %v16291_v8 = vld [vmem:[%s23062_s3 + $0xacc] ss:$16 sps:$4 sm:$0xff]  }
 0x7e5   :  { %8722 = vmatprep.subr.bf16.mxu1 %v16228_v42  ;;  %v16289_v42 = vld [vmem:[%s23062_s3 + $0xac8] ss:$16 sps:$4 sm:$0xff]  }
 0x7e8   :  { %8723 = vmatpush1.bf16.msra.mxu1 %v16226_v3  ;;  %v16294_v3 = vld [vmem:[%s23062_s3 + $0xaec] ss:$16 sps:$4 sm:$0xff]  }
 0x7e9   :  { %8724 = vmatprep.subr.bf16.mxu1 %v16231_v21  ;;  %v16292_v21 = vld [vmem:[%s23062_s3 + $0xae8] ss:$16 sps:$4 sm:$0xff]  }
 0x7eb   :  { %8690 = vmatmul.mubr.bf16.gmra.mrb[164].mxu1 %v23979_v2 }
 0x7ec   :  { %8699 = vmatprep.mubr.bf16.mxu1 %v20447_v46  ;;  %8725 = vmatpush1.bf16.msra.mxu1 %v16229_v39  ;;  %v16297_v39 = vld [vmem:[%s23062_s3 + $0xb0c] ss:$16 sps:$4 sm:$0xff]  }
 0x7ed   :  { %8726 = vmatprep.subr.bf16.mxu1 %v16234_v53  ;;  %v16295_v53 = vld [vmem:[%s23062_s3 + $0xb08] ss:$16 sps:$4 sm:$0xff]  }
 0x7f0   :  { %8727 = vmatpush1.bf16.msra.mxu1 %v16232_v25  ;;  %v16300_v25 = vld [vmem:[%s23062_s3 + $0xb2c] ss:$16 sps:$4 sm:$0xff]  }
 0x7f1   :  { %8728 = vmatprep.subr.bf16.mxu1 %v16237_v26  ;;  %v16298_v26 = vld [vmem:[%s23062_s3 + $0xb28] ss:$16 sps:$4 sm:$0xff]  }
 0x7f3   :  { %8700 = vmatmul.mubr.bf16.gmra.mrb[168].mxu1 %v23980_v15 }
 0x7f4   :  { %8709 = vmatprep.mubr.bf16.mxu1 %v20483_v32  ;;  %8729 = vmatpush1.bf16.msra.mxu1 %v16235_v16  ;;  %v16303_v16 = vld [vmem:[%s23062_s3 + $0xb4c] ss:$16 sps:$4 sm:$0xff]  }
 0x7f5   :  { %8730 = vmatprep.subr.bf16.mxu1 %v16240_v9  ;;  %v16301_v9 = vld [vmem:[%s23062_s3 + $0xb48] ss:$16 sps:$4 sm:$0xff]  }
 0x7f8   :  { %8731 = vmatpush1.bf16.msra.mxu1 %v16238_v22  ;;  %v16309_v22 = vld [vmem:[%s23062_s3 + $0xb8c] ss:$16 sps:$4 sm:$0xff]  }
 0x7f9   :  { %8732 = vmatprep.subr.bf16.mxu1 %v16243_v12  ;;  %v16307_v12 = vld [vmem:[%s23062_s3 + $0xb88] ss:$16 sps:$4 sm:$0xff]  }
 0x7fb   :  { %8710 = vmatmul.mubr.bf16.gmra.mrb[172].mxu1 %v23981_v14 }
 0x7fc   :  { %8733 = vmatpush1.bf16.msra.mxu1 %v16241_v35  ;;  %8752 = vmatprep.mubr.bf16.mxu1 %v17132_v27  ;;  %v16315_v35 = vld [vmem:[%s23062_s3 + $0xbcc] ss:$16 sps:$4 sm:$0xff]  }
 0x7fd   :  { %8734 = vmatprep.subr.bf16.mxu1 %v16246_v50  ;;  %v16313_v50 = vld [vmem:[%s23062_s3 + $0xbc8] ss:$16 sps:$4 sm:$0xff]  }
 0x800   :  { %8735 = vmatpush1.bf16.msra.mxu1 %v16244_v62  ;;  %v16318_v62 = vld [vmem:[%s23062_s3 + $0xbec] ss:$16 sps:$4 sm:$0xff]  }
 0x801   :  { %8793 = vmatprep.subr.bf16.mxu1 %v16249_v63  ;;  %v16316_v63 = vld [vmem:[%s23062_s3 + $0xbe8] ss:$16 sps:$4 sm:$0xff]  }
 0x803   :  { %8753 = vmatmul.mubr.bf16.vlgmr.msra.gmra.mrb[160].mxu1 %v20377_v61 }
 0x804   :  { %8794 = vmatpush1.bf16.msra.mxu1 %v16247_v28  ;;  %8762 = vmatprep.mubr.bf16.mxu1 %v17132_v27  ;;  %v16321_v28 = vld [vmem:[%s23062_s3 + $0xc04] ss:$16 sps:$4 sm:$0xff]  }
 0x805   :  { %8795 = vmatprep.subr.bf16.mxu1 %v16252_v4  ;;  %v16319_v4 = vld [vmem:[%s23062_s3 + $0xc00] ss:$16 sps:$4 sm:$0xff]  }
 0x808   :  { %8796 = vmatpush1.bf16.msra.mxu1 %v16250_v49  ;;  %v16322_v49 = vld [vmem:[%s23062_s3 + $0xc20] ss:$16 sps:$4 sm:$0xff]  }
 0x809   :  { %8797 = vmatprep.subr.bf16.mxu1 %v16255_v17  ;;  %v16327_v17 = vld [vmem:[%s23062_s3 + $0xc44] ss:$16 sps:$4 sm:$0xff]  }
 0x80b   :  { %8763 = vmatmul.mubr.bf16.gmra.mrb[164].mxu1 %v20420_v52 }
 0x80c   :  { %8798 = vmatpush1.bf16.msra.mxu1 %v16253_v51  ;;  %8772 = vmatprep.mubr.bf16.mxu1 %v17132_v27  ;;  %v16325_v51 = vld [vmem:[%s23062_s3 + $0xc40] ss:$16 sps:$4 sm:$0xff]  }
 0x80d   :  { %8799 = vmatprep.subr.bf16.mxu1 %v16258_v7  ;;  %v16427_v7 = vld [vmem:[%s23063_s5 + $0x220] ss:$16 sps:$4 sm:$0xff]  }
 0x810   :  { %8800 = vmatpush1.bf16.msra.mxu1 %v16256_v5  ;;  %v16429_v5 = vld [vmem:[%s23063_s5 + $0x224] ss:$16 sps:$4 sm:$0xff]  }
 0x811   :  { %8801 = vmatprep.subr.bf16.mxu1 %v16261_v24  ;;  %v16328_v24 = vld [vmem:[%s23062_s3 + $0xc60] ss:$16 sps:$4 sm:$0xff]  }
 0x813   :  { %8773 = vmatmul.mubr.bf16.gmra.mrb[168].mxu1 %v20456_v36 }
 0x814   :  { %8802 = vmatpush1.bf16.msra.mxu1 %v16259_v38  ;;  %8782 = vmatprep.mubr.bf16.mxu1 %v17132_v27  ;;  %v16333_v38 = vld [vmem:[%s23062_s3 + $0xc84] ss:$16 sps:$4 sm:$0xff]  }
 0x815   :  { %8803 = vmatprep.subr.bf16.mxu1 %v16264_v56  ;;  %v16331_v56 = vld [vmem:[%s23062_s3 + $0xc80] ss:$16 sps:$4 sm:$0xff]  }
 0x818   :  { %8804 = vmatpush1.bf16.msra.mxu1 %v16262_v57  ;;  %v16334_v57 = vld [vmem:[%s23062_s3 + $0xca0] ss:$16 sps:$4 sm:$0xff]  }
 0x819   :  { %8805 = vmatprep.subr.bf16.mxu1 %v16267_v20  ;;  %v16339_v20 = vld [vmem:[%s23062_s3 + $0xcc4] ss:$16 sps:$4 sm:$0xff]  }
 0x81b   :  { %8783 = vmatmul.mubr.bf16.gmra.mrb[172].mxu1 %v20492_v44 }
 0x81c   :  { %8806 = vmatpush1.bf16.msra.mxu1 %v16265_v1  ;;  %8825 = vmatprep.mubr.bf16.mxu1 %v20375_v13  ;;  %v16274_v13 = vld [vmem:[%s23062_s3 + $0xa28] ss:$16 sps:$4 sm:$0xff]   ;;  %v16337_v1 = vld [vmem:[%s23062_s3 + $0xcc0] ss:$16 sps:$4 sm:$0xff]  }
 0x81d   :  { %8807 = vmatprep.subr.bf16.mxu1 %v16270_v19  ;;  %v16340_v19 = vld [vmem:[%s23062_s3 + $0xce0] ss:$16 sps:$4 sm:$0xff]  }
 0x820   :  { %8808 = vmatpush1.bf16.msra.mxu1 %v16268_v31  ;;  %v16345_v31 = vld [vmem:[%s23062_s3 + $0xd04] ss:$16 sps:$4 sm:$0xff]  }
 0x821   :  { %8809 = vmatprep.subr.bf16.mxu1 %v16273_v45  ;;  %v16445_v45 = vld [vmem:[%s23063_s5 + $0x240] ss:$16 sps:$4 sm:$0xff]  }
 0x824   :  { %8810 = vmatpush1.bf16.msra.mxu1 %v16271_v55  ;;  %v16343_v55 = vld [vmem:[%s23062_s3 + $0xd00] ss:$16 sps:$4 sm:$0xff]  }
 0x825   :  { %8811 = vmatprep.subr.bf16.mxu1 %v16276_v10  ;;  %v16348_v10 = vld [vmem:[%s23062_s3 + $0xd24] ss:$16 sps:$4 sm:$0xff]  }
 0x828   :  { %8812 = vmatpush1.bf16.msra.mxu1 %v16274_v13  ;;  %v16346_v13 = vld [vmem:[%s23062_s3 + $0xd20] ss:$16 sps:$4 sm:$0xff]  }
 0x829   :  { %8813 = vmatprep.subr.bf16.mxu1 %v16279_v29  ;;  %v16351_v29 = vld [vmem:[%s23062_s3 + $0xd44] ss:$16 sps:$4 sm:$0xff]  }
 0x82c   :  { %8814 = vmatpush1.bf16.msra.mxu1 %v16277_v6  ;;  %v16349_v6 = vld [vmem:[%s23062_s3 + $0xd40] ss:$16 sps:$4 sm:$0xff]  }
 0x82d   :  { %8815 = vmatprep.subr.bf16.mxu1 %v16282_v41  ;;  %v16354_v41 = vld [vmem:[%s23062_s3 + $0xd64] ss:$16 sps:$4 sm:$0xff]  }
 0x830   :  { %8816 = vmatpush1.bf16.msra.mxu1 %v16280_v59  ;;  %v16352_v59 = vld [vmem:[%s23062_s3 + $0xd60] ss:$16 sps:$4 sm:$0xff]  }
 0x831   :  { %8817 = vmatprep.subr.bf16.mxu1 %v16285_v18  ;;  %v16357_v18 = vld [vmem:[%s23062_s3 + $0xd84] ss:$16 sps:$4 sm:$0xff]  }
 0x834   :  { %8818 = vmatpush1.bf16.msra.mxu1 %v16283_v47  ;;  %v16355_v47 = vld [vmem:[%s23062_s3 + $0xd80] ss:$16 sps:$4 sm:$0xff]  }
 0x835   :  { %8819 = vmatprep.subr.bf16.mxu1 %v16288_v60  ;;  %v16360_v60 = vld [vmem:[%s23062_s3 + $0xda4] ss:$16 sps:$4 sm:$0xff]  }
 0x838   :  { %8820 = vmatpush1.bf16.msra.mxu1 %v16286_v34  ;;  %v16463_v34 = vld [vmem:[%s23063_s5 + $0x260] ss:$16 sps:$4 sm:$0xff]  }
 0x839   :  { %8821 = vmatprep.subr.bf16.mxu1 %v16291_v8  ;;  %v16465_v8 = vld [vmem:[%s23063_s5 + $0x264] ss:$16 sps:$4 sm:$0xff]  }
 0x83c   :  { %8822 = vmatpush1.bf16.msra.mxu1 %v16289_v42  ;;  %v16358_v42 = vld [vmem:[%s23062_s3 + $0xda0] ss:$16 sps:$4 sm:$0xff]  }
 0x83d   :  { %8823 = vmatprep.subr.bf16.mxu1 %v16294_v3  ;;  %v16363_v3 = vld [vmem:[%s23062_s3 + $0xdc4] ss:$16 sps:$4 sm:$0xff]  }
 0x840   :  { %8824 = vmatpush1.bf16.msra.mxu1 %v16292_v21  ;;  %v16361_v21 = vld [vmem:[%s23062_s3 + $0xdc0] ss:$16 sps:$4 sm:$0xff]  }
 0x841   :  { %8866 = vmatprep.subr.bf16.mxu1 %v16297_v39  ;;  %v16366_v39 = vld [vmem:[%s23062_s3 + $0xde4] ss:$16 sps:$4 sm:$0xff]  }
 0x843   :  { %8826 = vmatmul.mubr.bf16.vlgmr.msra.gmra.mrb[176].mxu1 %v23978_v48  ;;  %v16304_v48 = vld [vmem:[%s23062_s3 + $0xb68] ss:$16 sps:$4 sm:$0xff]  }
 0x844   :  { %8835 = vmatprep.mubr.bf16.mxu1 %v20411_v30  ;;  %8867 = vmatpush1.bf16.msra.mxu1 %v16295_v53  ;;  %v16306_v30 = vld [vmem:[%s23062_s3 + $0xb6c] ss:$16 sps:$4 sm:$0xff]   ;;  %v16364_v53 = vld [vmem:[%s23062_s3 + $0xde0] ss:$16 sps:$4 sm:$0xff]  }
 0x845   :  { %8868 = vmatprep.subr.bf16.mxu1 %v16300_v25  ;;  %v16369_v25 = vld [vmem:[%s23062_s3 + $0xe04] ss:$16 sps:$4 sm:$0xff]  }
 0x848   :  { %8869 = vmatpush1.bf16.msra.mxu1 %v16298_v26  ;;  %v16367_v26 = vld [vmem:[%s23062_s3 + $0xe00] ss:$16 sps:$4 sm:$0xff]  }
 0x849   :  { %8870 = vmatprep.subr.bf16.mxu1 %v16303_v16  ;;  %v16372_v16 = vld [vmem:[%s23062_s3 + $0xe24] ss:$16 sps:$4 sm:$0xff]  }
 0x84b   :  { %8836 = vmatmul.mubr.bf16.gmra.mrb[180].mxu1 %v23979_v2  ;;  %v16310_v2 = vld [vmem:[%s23062_s3 + $0xba8] ss:$16 sps:$4 sm:$0xff]  }
 0x84c   :  { %8845 = vmatprep.mubr.bf16.mxu1 %v20447_v46  ;;  %8871 = vmatpush1.bf16.msra.mxu1 %v16301_v9  ;;  %v16312_v46 = vld [vmem:[%s23062_s3 + $0xbac] ss:$16 sps:$4 sm:$0xff]   ;;  %v16370_v9 = vld [vmem:[%s23062_s3 + $0xe20] ss:$16 sps:$4 sm:$0xff]  }
 0x84d   :  { %8872 = vmatprep.subr.bf16.mxu1 %v16306_v30  ;;  %v23982_v30 = vld [vmem:[#allocation171_spill] sm:$0xff] }
 0x850   :  { %8873 = vmatpush1.bf16.msra.mxu1 %v16304_v48  ;;  %v16375_v48 = vld [vmem:[%s23062_s3 + $0xe44] ss:$16 sps:$4 sm:$0xff]  }
 0x851   :  { %8874 = vmatprep.subr.bf16.mxu1 %v16309_v22  ;;  %v16475_v22 = vld [vmem:[%s23063_s5 + $0x280] ss:$16 sps:$4 sm:$0xff]  }
 0x853   :  { %8846 = vmatmul.mubr.bf16.gmra.mrb[184].mxu1 %v23980_v15  ;;  %v16409_v15 = vld [vmem:[%s23063_s5 + $0x200] ss:$16 sps:$4 sm:$0xff]  }
 0x854   :  { %8855 = vmatprep.mubr.bf16.mxu1 %v20483_v32  ;;  %8875 = vmatpush1.bf16.msra.mxu1 %v16307_v12  ;;  %v16411_v32 = vld [vmem:[%s23063_s5 + $0x204] ss:$16 sps:$4 sm:$0xff]  }
 0x855   :  { %8876 = vmatprep.subr.bf16.mxu1 %v16312_v46  ;;  %10383 = vmatprep.subr.bf16.mxu0 %v16411_v32  ;;  %v16477_v12 = vld [vmem:[%s23063_s5 + $0x284] ss:$16 sps:$4 sm:$0xff]   ;;  %v16373_v46 = vld [vmem:[%s23062_s3 + $0xe40] ss:$16 sps:$4 sm:$0xff]  }
 0x856   :  { %10384 = vmatpush1.bf16.msra.mxu0 %v16409_v15  ;;  %v16381_v15 = vld [vmem:[%s23062_s3 + $0xe84] ss:$16 sps:$4 sm:$0xff]   ;;  %v16379_v32 = vld [vmem:[%s23062_s3 + $0xe80] ss:$16 sps:$4 sm:$0xff]  }
 0x857   :  { %10385 = vmatprep.subr.bf16.mxu0 %v16429_v5  ;;  %v16483_v5 = vld [vmem:[%s23063_s5 + $0x2c4] ss:$16 sps:$4 sm:$0xff]  }
 0x858   :  { %8877 = vmatpush1.bf16.msra.mxu1 %v16310_v2  ;;  %v16378_v2 = vld [vmem:[%s23062_s3 + $0xe64] ss:$16 sps:$4 sm:$0xff]  }
 0x859   :  { %8878 = vmatprep.subr.bf16.mxu1 %v16315_v35  ;;  %v16376_v35 = vld [vmem:[%s23062_s3 + $0xe60] ss:$16 sps:$4 sm:$0xff]  }
 0x85a   :  { %10386 = vmatpush1.bf16.msra.mxu0 %v16427_v7  ;;  %v16388_v7 = vld [vmem:[%s23062_s3 + $0xee0] ss:$16 sps:$4 sm:$0xff]  }
 0x85b   :  { %8856 = vmatmul.mubr.bf16.gmra.mrb[188].mxu1 %v23981_v14  ;;  %v16324_v14 = vld [vmem:[%s23062_s3 + $0xc24] ss:$16 sps:$4 sm:$0xff]  }
 0x85c   :  { %8879 = vmatpush1.bf16.msra.mxu1 %v16313_v50  ;;  %8898 = vmatprep.mubr.bf16.mxu1 %v17132_v27  ;;  %v23983_v50 = vld [vmem:[#allocation97_spill] sm:$0xff] }
 0x85d   :  { %8880 = vmatprep.subr.bf16.mxu1 %v16318_v62  ;;  %v16384_v62 = vld [vmem:[%s23062_s3 + $0xea4] ss:$16 sps:$4 sm:$0xff]  }
 0x860   :  { %8881 = vmatpush1.bf16.msra.mxu1 %v16316_v63  ;;  %v16382_v63 = vld [vmem:[%s23062_s3 + $0xea0] ss:$16 sps:$4 sm:$0xff]  }
 0x861   :  { %9548 = vmatprep.subr.bf16.mxu1 %v16321_v28  ;;  %v23984_v28 = vld [vmem:[#allocation105_spill] sm:$0xff] }
 0x863   :  { %8899 = vmatmul.mubr.bf16.vlgmr.msra.gmra.mrb[176].mxu1 %v20377_v61  ;;  %v16330_v61 = vld [vmem:[%s23062_s3 + $0xc64] ss:$16 sps:$4 sm:$0xff]  }
 0x864   :  { %9549 = vmatpush1.bf16.msra.mxu1 %v16319_v4  ;;  %8908 = vmatprep.mubr.bf16.mxu1 %v17132_v27  ;;  %v16387_v4 = vld [vmem:[%s23062_s3 + $0xec4] ss:$16 sps:$4 sm:$0xff]  }
 0x865   :  { %9550 = vmatprep.subr.bf16.mxu1 %v16324_v14  ;;  %v16385_v14 = vld [vmem:[%s23062_s3 + $0xec0] ss:$16 sps:$4 sm:$0xff]  }
 0x868   :  { %9551 = vmatpush1.bf16.msra.mxu1 %v16322_v49  ;;  %v16390_v49 = vld [vmem:[%s23062_s3 + $0xee4] ss:$16 sps:$4 sm:$0xff]  }
 0x869   :  { %9552 = vmatprep.subr.bf16.mxu1 %v16327_v17  ;;  %v23985_v17 = vld [vmem:[#allocation108_spill] sm:$0xff] }
 0x86b   :  { %8909 = vmatmul.mubr.bf16.gmra.mrb[180].mxu1 %v20420_v52  ;;  %v16336_v52 = vld [vmem:[%s23062_s3 + $0xca4] ss:$16 sps:$4 sm:$0xff]  }
 0x86c   :  { %9553 = vmatpush1.bf16.msra.mxu1 %v16325_v51  ;;  %8918 = vmatprep.mubr.bf16.mxu1 %v17132_v27  ;;  %v16478_v51 = vld [vmem:[%s23063_s5 + $0x2a0] ss:$16 sps:$4 sm:$0xff]  }
 0x86d   :  { %9554 = vmatprep.subr.bf16.mxu1 %v16330_v61  ;;  %v16480_v61 = vld [vmem:[%s23063_s5 + $0x2a4] ss:$16 sps:$4 sm:$0xff]  }
 0x870   :  { %9555 = vmatpush1.bf16.msra.mxu1 %v16328_v24  ;;  %v16393_v24 = vld [vmem:[%s23062_s3 + $0xc0c] ss:$16 sps:$4 sm:$0xff]  }
 0x871   :  { %9556 = vmatprep.subr.bf16.mxu1 %v16333_v38  ;;  %v16481_v38 = vld [vmem:[%s23063_s5 + $0x2c0] ss:$16 sps:$4 sm:$0xff]  }
 0x873   :  { %8919 = vmatmul.mubr.bf16.gmra.mrb[184].mxu1 %v20456_v36  ;;  %v16342_v36 = vld [vmem:[%s23062_s3 + $0xce4] ss:$16 sps:$4 sm:$0xff]  }
 0x874   :  { %9557 = vmatpush1.bf16.msra.mxu1 %v16331_v56  ;;  %8928 = vmatprep.mubr.bf16.mxu1 %v17132_v27  ;;  %v16486_v56 = vld [vmem:[%s23063_s5 + $0x2e4] ss:$16 sps:$4 sm:$0xff]  }
 0x875   :  { %9558 = vmatprep.subr.bf16.mxu1 %v16336_v52  ;;  %v16391_v52 = vld [vmem:[%s23062_s3 + $0xc08] ss:$16 sps:$4 sm:$0xff]  }
 0x878   :  { %9559 = vmatpush1.bf16.msra.mxu1 %v16334_v57  ;;  %v16396_v57 = vld [vmem:[%s23062_s3 + $0xc2c] ss:$16 sps:$4 sm:$0xff]  }
 0x879   :  { %9560 = vmatprep.subr.bf16.mxu1 %v16339_v20  ;;  %v16484_v20 = vld [vmem:[%s23063_s5 + $0x2e0] ss:$16 sps:$4 sm:$0xff]  }
 0x87b   :  { %8929 = vmatmul.mubr.bf16.gmra.mrb[188].mxu1 %v20492_v44  ;;  %v16447_v44 = vld [vmem:[%s23063_s5 + $0x244] ss:$16 sps:$4 sm:$0xff]  }
 0x87c   :  { %9561 = vmatpush1.bf16.msra.mxu1 %v16337_v1  ;;  %9580 = vmatprep.mubr.bf16.mxu1 %v20519_v0  ;;  %v16489_v1 = vld [vmem:[%s23063_s5 + $0x304] ss:$16 sps:$4 sm:$0xff]  }
 0x87d   :  { %9562 = vmatprep.subr.bf16.mxu1 %v16342_v36  ;;  %10387 = vmatprep.subr.bf16.mxu0 %v16447_v44  ;;  %v16394_v36 = vld [vmem:[%s23062_s3 + $0xc28] ss:$16 sps:$4 sm:$0xff]  }
 0x87e   :  { %10388 = vmatpush1.bf16.msra.mxu0 %v16445_v45  ;;  %v16492_v45 = vld [vmem:[%s23063_s5 + $0x324] ss:$16 sps:$4 sm:$0xff]   ;;  %v16397_v44 = vld [vmem:[%s23062_s3 + $0xc48] ss:$16 sps:$4 sm:$0xff]  }
 0x87f   :  { %10389 = vmatprep.subr.bf16.mxu0 %v16465_v8  ;;  %v16420_v8 = vld [vmem:[%s23062_s3 + $0xd0c] ss:$16 sps:$4 sm:$0xff]  }
 0x880   :  { %9563 = vmatpush1.bf16.msra.mxu1 %v16340_v19  ;;  %v16399_v19 = vld [vmem:[%s23062_s3 + $0xc4c] ss:$16 sps:$4 sm:$0xff]  }
 0x881   :  { %9564 = vmatprep.subr.bf16.mxu1 %v16345_v31  ;;  %v16487_v31 = vld [vmem:[%s23063_s5 + $0x300] ss:$16 sps:$4 sm:$0xff]  }
 0x882   :  { %10390 = vmatpush1.bf16.msra.mxu0 %v16463_v34  ;;  %v16415_v34 = vld [vmem:[%s23062_s3 + $0xce8] ss:$16 sps:$4 sm:$0xff]  }
 0x883   :  { %10391 = vmatprep.subr.bf16.mxu0 %v16477_v12  ;;  %v16439_v12 = vld [vmem:[%s23062_s3 + $0xdc8] ss:$16 sps:$4 sm:$0xff]  }
 0x884   :  { %9565 = vmatpush1.bf16.msra.mxu1 %v16343_v55  ;;  %v16402_v55 = vld [vmem:[%s23062_s3 + $0xc6c] ss:$16 sps:$4 sm:$0xff]  }
 0x885   :  { %9566 = vmatprep.subr.bf16.mxu1 %v16348_v10  ;;  %v16490_v10 = vld [vmem:[%s23063_s5 + $0x320] ss:$16 sps:$4 sm:$0xff]  }
 0x886   :  { %10392 = vmatpush1.bf16.msra.mxu0 %v16475_v22  ;;  %v16441_v22 = vld [vmem:[%s23062_s3 + $0xdcc] ss:$16 sps:$4 sm:$0xff]  }
 0x887   :  { %10393 = vmatprep.subr.bf16.mxu0 %v16480_v61  ;;  %v16469_v61 = vld [vmem:[%s23062_s3 + $0xec8] ss:$16 sps:$4 sm:$0xff]  }
 0x888   :  { %9567 = vmatpush1.bf16.msra.mxu1 %v16346_v13  ;;  %v16400_v13 = vld [vmem:[%s23062_s3 + $0xc68] ss:$16 sps:$4 sm:$0xff]  }
 0x889   :  { %9568 = vmatprep.subr.bf16.mxu1 %v16351_v29  ;;  %v16405_v29 = vld [vmem:[%s23062_s3 + $0xc8c] ss:$16 sps:$4 sm:$0xff]  }
 0x88a   :  { %10394 = vmatpush1.bf16.msra.mxu0 %v16478_v51  ;;  %v16471_v51 = vld [vmem:[%s23062_s3 + $0xecc] ss:$16 sps:$4 sm:$0xff]  }
 0x88b   :  { %10395 = vmatprep.subr.bf16.mxu0 %v16483_v5  ;;  %v16495_v5 = vld [vmem:[%s23063_s5 + $0x344] ss:$16 sps:$4 sm:$0xff]  }
 0x88c   :  { %9569 = vmatpush1.bf16.msra.mxu1 %v16349_v6  ;;  %v16403_v6 = vld [vmem:[%s23062_s3 + $0xc88] ss:$16 sps:$4 sm:$0xff]  }
 0x88d   :  { %9570 = vmatprep.subr.bf16.mxu1 %v16354_v41  ;;  %v16408_v41 = vld [vmem:[%s23062_s3 + $0xcac] ss:$16 sps:$4 sm:$0xff]  }
 0x88e   :  { %10396 = vmatpush1.bf16.msra.mxu0 %v16481_v38  ;;  %v16501_v38 = vld [vmem:[%s23063_s5 + $0x384] ss:$16 sps:$4 sm:$0xff]  }
 0x88f   :  { %10397 = vmatprep.subr.bf16.mxu0 %v16486_v56  ;;  %v16499_v56 = vld [vmem:[%s23063_s5 + $0x380] ss:$16 sps:$4 sm:$0xff]  }
 0x890   :  { %9571 = vmatpush1.bf16.msra.mxu1 %v16352_v59  ;;  %v16406_v59 = vld [vmem:[%s23062_s3 + $0xca8] ss:$16 sps:$4 sm:$0xff]  }
 0x891   :  { %9572 = vmatprep.subr.bf16.mxu1 %v16357_v18  ;;  %v16414_v18 = vld [vmem:[%s23062_s3 + $0xccc] ss:$16 sps:$4 sm:$0xff]  }
 0x892   :  { %10398 = vmatpush1.bf16.msra.mxu0 %v16484_v20  ;;  %v16502_v20 = vld [vmem:[%s23063_s5 + $0x3a0] ss:$16 sps:$4 sm:$0xff]  }
 0x893   :  { %10399 = vmatprep.subr.bf16.mxu0 %v16489_v1  ;;  %v16519_v1 = vld [vmem:[%s23063_s5 + $0x3c4] ss:$16 sps:$4 sm:$0xff]  }
 0x894   :  { %9573 = vmatpush1.bf16.msra.mxu1 %v16355_v47  ;;  %v16412_v47 = vld [vmem:[%s23062_s3 + $0xcc8] ss:$16 sps:$4 sm:$0xff]  }
 0x895   :  { %9574 = vmatprep.subr.bf16.mxu1 %v16360_v60  ;;  %v16417_v60 = vld [vmem:[%s23062_s3 + $0xcec] ss:$16 sps:$4 sm:$0xff]  }
 0x896   :  { %10400 = vmatpush1.bf16.msra.mxu0 %v16487_v31  ;;  %v16517_v31 = vld [vmem:[%s23063_s5 + $0x3c0] ss:$16 sps:$4 sm:$0xff]  }
 0x897   :  { %10401 = vmatprep.subr.bf16.mxu0 %v16492_v45  ;;  %v16514_v45 = vld [vmem:[%s23063_s5 + $0x660] ss:$16 sps:$4 sm:$0xff]  }
 0x898   :  { %9575 = vmatpush1.bf16.msra.mxu1 %v16358_v42  ;;  %v16418_v42 = vld [vmem:[%s23062_s3 + $0xd08] ss:$16 sps:$4 sm:$0xff]  }
 0x899   :  { %9576 = vmatprep.subr.bf16.mxu1 %v16363_v3  ;;  %v16423_v3 = vld [vmem:[%s23062_s3 + $0xd2c] ss:$16 sps:$4 sm:$0xff]  }
 0x89a   :  { %10402 = vmatpush1.bf16.msra.mxu0 %v16490_v10  ;;  %v16523_v10 = vld [vmem:[%s23063_s5 + $0x6a0] ss:$16 sps:$4 sm:$0xff]  }
 0x89b   :  { %10403 = vmatprep.subr.bf16.mxu0 %v16495_v5 }
 0x89c   :  { %9577 = vmatpush1.bf16.msra.mxu1 %v16361_v21  ;;  %v16426_v21 = vld [vmem:[%s23062_s3 + $0xd4c] ss:$16 sps:$4 sm:$0xff]  }
 0x89d   :  { %9578 = vmatprep.subr.bf16.mxu1 %v16366_v39  ;;  %v16424_v39 = vld [vmem:[%s23062_s3 + $0xd48] ss:$16 sps:$4 sm:$0xff]  }
 0x8a0   :  { %9579 = vmatpush1.bf16.msra.mxu1 %v16364_v53  ;;  %v16432_v53 = vld [vmem:[%s23062_s3 + $0xd6c] ss:$16 sps:$4 sm:$0xff]  }
 0x8a1   :  { %9621 = vmatprep.subr.bf16.mxu1 %v16369_v25  ;;  %v16430_v25 = vld [vmem:[%s23062_s3 + $0xd68] ss:$16 sps:$4 sm:$0xff]  }
 0x8a3   :  { %9581 = vmatmul.mubr.bf16.vlgmr.msra.gmra.mrb[160].mxu1 %v23982_v30 }
 0x8a4   :  { %9590 = vmatprep.mubr.bf16.mxu1 %v20557_v11  ;;  %9622 = vmatpush1.bf16.msra.mxu1 %v16367_v26  ;;  %v16435_v26 = vld [vmem:[%s23062_s3 + $0xd8c] ss:$16 sps:$4 sm:$0xff]  }
 0x8a5   :  { %9623 = vmatprep.subr.bf16.mxu1 %v16372_v16  ;;  %v16433_v16 = vld [vmem:[%s23062_s3 + $0xd88] ss:$16 sps:$4 sm:$0xff]  }
 0x8a8   :  { %9624 = vmatpush1.bf16.msra.mxu1 %v16370_v9  ;;  %v16438_v9 = vld [vmem:[%s23062_s3 + $0xdac] ss:$16 sps:$4 sm:$0xff]  }
 0x8a9   :  { %9625 = vmatprep.subr.bf16.mxu1 %v16375_v48  ;;  %v16436_v48 = vld [vmem:[%s23062_s3 + $0xda8] ss:$16 sps:$4 sm:$0xff]  }
 0x8ab   :  { %9591 = vmatmul.mubr.bf16.gmra.mrb[164].mxu1 %v23983_v50 }
 0x8ac   :  { %9600 = vmatprep.mubr.bf16.mxu1 %v20595_v33  ;;  %9626 = vmatpush1.bf16.msra.mxu1 %v16373_v46  ;;  %v16444_v46 = vld [vmem:[%s23062_s3 + $0xdec] ss:$16 sps:$4 sm:$0xff]  }
 0x8ad   :  { %9627 = vmatprep.subr.bf16.mxu1 %v16378_v2  ;;  %v16442_v2 = vld [vmem:[%s23062_s3 + $0xde8] ss:$16 sps:$4 sm:$0xff]  }
 0x8b0   :  { %9628 = vmatpush1.bf16.msra.mxu1 %v16376_v35  ;;  %v16450_v35 = vld [vmem:[%s23062_s3 + $0xe0c] ss:$16 sps:$4 sm:$0xff]  }
 0x8b1   :  { %9629 = vmatprep.subr.bf16.mxu1 %v16381_v15  ;;  %v16448_v15 = vld [vmem:[%s23062_s3 + $0xe08] ss:$16 sps:$4 sm:$0xff]  }
 0x8b3   :  { %9601 = vmatmul.mubr.bf16.gmra.mrb[168].mxu1 %v23984_v28 }
 0x8b4   :  { %9610 = vmatprep.mubr.bf16.mxu1 %v20627_v54  ;;  %9630 = vmatpush1.bf16.msra.mxu1 %v16379_v32  ;;  %v16453_v32 = vld [vmem:[%s23062_s3 + $0xe2c] ss:$16 sps:$4 sm:$0xff]  }
 0x8b5   :  { %9631 = vmatprep.subr.bf16.mxu1 %v16384_v62  ;;  %v16451_v62 = vld [vmem:[%s23062_s3 + $0xe28] ss:$16 sps:$4 sm:$0xff]  }
 0x8b8   :  { %9632 = vmatpush1.bf16.msra.mxu1 %v16382_v63  ;;  %v16456_v63 = vld [vmem:[%s23062_s3 + $0xe4c] ss:$16 sps:$4 sm:$0xff]  }
 0x8b9   :  { %9633 = vmatprep.subr.bf16.mxu1 %v16387_v4  ;;  %v16454_v4 = vld [vmem:[%s23062_s3 + $0xe48] ss:$16 sps:$4 sm:$0xff]  }
 0x8bb   :  { %9611 = vmatmul.mubr.bf16.gmra.mrb[172].mxu1 %v23985_v17 }
 0x8bc   :  { %9634 = vmatpush1.bf16.msra.mxu1 %v16385_v14  ;;  %9653 = vmatprep.mubr.bf16.mxu1 %v17132_v27  ;;  %v16462_v14 = vld [vmem:[%s23062_s3 + $0xe8c] ss:$16 sps:$4 sm:$0xff]  }
 0x8bd   :  { %9635 = vmatprep.subr.bf16.mxu1 %v16390_v49  ;;  %v16460_v49 = vld [vmem:[%s23062_s3 + $0xe88] ss:$16 sps:$4 sm:$0xff]  }
 0x8c0   :  { %9636 = vmatpush1.bf16.msra.mxu1 %v16388_v7  ;;  %v16493_v7 = vld [vmem:[%s23063_s5 + $0x340] ss:$16 sps:$4 sm:$0xff]  }
 0x8c1   :  { %9694 = vmatprep.subr.bf16.mxu1 %v16393_v24  ;;  %10404 = vmatpush1.bf16.msra.mxu0 %v16493_v7  ;;  %v16498_v24 = vld [vmem:[%s23063_s5 + $0x364] ss:$16 sps:$4 sm:$0xff]  }
 0x8c2   :  { %10405 = vmatprep.subr.bf16.mxu0 %v16498_v24 }
 0x8c3   :  { %9654 = vmatmul.mubr.bf16.vlgmr.msra.gmra.mrb[160].mxu1 %v20521_v40 }
 0x8c4   :  { %9695 = vmatpush1.bf16.msra.mxu1 %v16391_v52  ;;  %9663 = vmatprep.mubr.bf16.mxu1 %v17132_v27  ;;  %v16504_v52 = vld [vmem:[%s23063_s5 + $0x3a4] ss:$16 sps:$4 sm:$0xff]  }
 0x8c5   :  { %9696 = vmatprep.subr.bf16.mxu1 %v16396_v57  ;;  %v16513_v57 = vld [vmem:[%s23063_s5 + $0x644] ss:$16 sps:$4 sm:$0xff]  }
 0x8c8   :  { %9697 = vmatpush1.bf16.msra.mxu1 %v16394_v36  ;;  %v16511_v36 = vld [vmem:[%s23063_s5 + $0x640] ss:$16 sps:$4 sm:$0xff]  }
 0x8c9   :  { %9698 = vmatprep.subr.bf16.mxu1 %v16399_v19  ;;  %v16516_v19 = vld [vmem:[%s23063_s5 + $0x664] ss:$16 sps:$4 sm:$0xff]  }
 0x8cb   :  { %9664 = vmatmul.mubr.bf16.gmra.mrb[164].mxu1 %v20566_v58 }
 0x8cc   :  { %9699 = vmatpush1.bf16.msra.mxu1 %v16397_v44  ;;  %9673 = vmatprep.mubr.bf16.mxu1 %v17132_v27  ;;  %v16520_v44 = vld [vmem:[%s23063_s5 + $0x680] ss:$16 sps:$4 sm:$0xff]  }
 0x8cd   :  { %9700 = vmatprep.subr.bf16.mxu1 %v16402_v55  ;;  %v16525_v55 = vld [vmem:[%s23063_s5 + $0x6a4] ss:$16 sps:$4 sm:$0xff]  }
 0x8d0   :  { %9701 = vmatpush1.bf16.msra.mxu1 %v16400_v13  ;;  %v16528_v13 = vld [vmem:[%s23063_s5 + $0x6c4] ss:$16 sps:$4 sm:$0xff]  }
 0x8d1   :  { %9702 = vmatprep.subr.bf16.mxu1 %v16405_v29  ;;  %v16526_v29 = vld [vmem:[%s23063_s5 + $0x6c0] ss:$16 sps:$4 sm:$0xff]  }
 0x8d3   :  { %9674 = vmatmul.mubr.bf16.gmra.mrb[168].mxu1 %v20604_v23 }
 0x8d4   :  { %9703 = vmatpush1.bf16.msra.mxu1 %v16403_v6  ;;  %9683 = vmatprep.mubr.bf16.mxu1 %v17132_v27  ;;  %v16531_v6 = vld [vmem:[%s23063_s5 + $0x6e4] ss:$16 sps:$4 sm:$0xff]  }
 0x8d5   :  { %9704 = vmatprep.subr.bf16.mxu1 %v16408_v41  ;;  %v16529_v41 = vld [vmem:[%s23063_s5 + $0x6e0] ss:$16 sps:$4 sm:$0xff]  }
 0x8d8   :  { %9705 = vmatpush1.bf16.msra.mxu1 %v16406_v59  ;;  %v16534_v59 = vld [vmem:[%s23063_s5 + $0x704] ss:$16 sps:$4 sm:$0xff]  }
 0x8d9   :  { %9706 = vmatprep.subr.bf16.mxu1 %v16414_v18  ;;  %v16532_v18 = vld [vmem:[%s23063_s5 + $0x700] ss:$16 sps:$4 sm:$0xff]  }
 0x8db   :  { %9684 = vmatmul.mubr.bf16.gmra.mrb[172].mxu1 %v20632_v37 }
 0x8dc   :  { %9707 = vmatpush1.bf16.msra.mxu1 %v16412_v47  ;;  %9726 = vmatprep.mubr.bf16.mxu1 %v20519_v0  ;;  %v16421_v0 = vld [vmem:[%s23062_s3 + $0xd28] ss:$16 sps:$4 sm:$0xff]   ;;  %v16540_v47 = vld [vmem:[%s23063_s5 + $0x724] ss:$16 sps:$4 sm:$0xff]  }
 0x8dd   :  { %9708 = vmatprep.subr.bf16.mxu1 %v16417_v60  ;;  %v16535_v60 = vld [vmem:[%s23063_s5 + $0x3e0] ss:$16 sps:$4 sm:$0xff]  }
 0x8e0   :  { %9709 = vmatpush1.bf16.msra.mxu1 %v16415_v34  ;;  %v16537_v34 = vld [vmem:[%s23063_s5 + $0x3e4] ss:$16 sps:$4 sm:$0xff]  }
 0x8e1   :  { %9710 = vmatprep.subr.bf16.mxu1 %v16420_v8  ;;  %v16538_v8 = vld [vmem:[%s23063_s5 + $0x720] ss:$16 sps:$4 sm:$0xff]  }
 0x8e4   :  { %9711 = vmatpush1.bf16.msra.mxu1 %v16418_v42  ;;  %v16543_v42 = vld [vmem:[%s23063_s5 + $0x744] ss:$16 sps:$4 sm:$0xff]  }
 0x8e5   :  { %9712 = vmatprep.subr.bf16.mxu1 %v16423_v3  ;;  %v16541_v3 = vld [vmem:[%s23063_s5 + $0x740] ss:$16 sps:$4 sm:$0xff]  }
 0x8e8   :  { %9713 = vmatpush1.bf16.msra.mxu1 %v16421_v0  ;;  %v16546_v0 = vld [vmem:[%s23063_s5 + $0x764] ss:$16 sps:$4 sm:$0xff]  }
 0x8e9   :  { %9714 = vmatprep.subr.bf16.mxu1 %v16426_v21  ;;  %v16544_v21 = vld [vmem:[%s23063_s5 + $0x760] ss:$16 sps:$4 sm:$0xff]  }
 0x8ec   :  { %9715 = vmatpush1.bf16.msra.mxu1 %v16424_v39  ;;  %v16549_v39 = vld [vmem:[%s23063_s5 + $0x784] ss:$16 sps:$4 sm:$0xff]  }
 0x8ed   :  { %9716 = vmatprep.subr.bf16.mxu1 %v16432_v53  ;;  %v16547_v53 = vld [vmem:[%s23063_s5 + $0x780] ss:$16 sps:$4 sm:$0xff]  }
 0x8f0   :  { %9717 = vmatpush1.bf16.msra.mxu1 %v16430_v25  ;;  %v16552_v25 = vld [vmem:[%s23063_s5 + $0x7a4] ss:$16 sps:$4 sm:$0xff]  }
 0x8f1   :  { %9718 = vmatprep.subr.bf16.mxu1 %v16435_v26  ;;  %v16550_v26 = vld [vmem:[%s23063_s5 + $0x7a0] ss:$16 sps:$4 sm:$0xff]  }
 0x8f4   :  { %9719 = vmatpush1.bf16.msra.mxu1 %v16433_v16  ;;  %v16555_v16 = vld [vmem:[%s23063_s5 + $0x20c] ss:$16 sps:$4 sm:$0xff]  }
 0x8f5   :  { %9720 = vmatprep.subr.bf16.mxu1 %v16438_v9 }
 0x8f8   :  { %9721 = vmatpush1.bf16.msra.mxu1 %v16436_v48  ;;  %v16558_v48 = vld [vmem:[%s23063_s5 + $0x7c4] ss:$16 sps:$4 sm:$0xff]  }
 0x8f9   :  { %9722 = vmatprep.subr.bf16.mxu1 %v16441_v22 }
 0x8fc   :  { %9723 = vmatpush1.bf16.msra.mxu1 %v16439_v12  ;;  %v16556_v12 = vld [vmem:[%s23063_s5 + $0x7c0] ss:$16 sps:$4 sm:$0xff]  }
 0x8fd   :  { %9724 = vmatprep.subr.bf16.mxu1 %v16444_v46 }
 0x900   :  { %9725 = vmatpush1.bf16.msra.mxu1 %v16442_v2 }
 0x901   :  { %9767 = vmatprep.subr.bf16.mxu1 %v16450_v35  ;;  %v16564_v35 = vld [vmem:[%s23063_s5 + $0x7e4] ss:$16 sps:$4 sm:$0xff]  }
 0x903   :  { %9727 = vmatmul.mubr.bf16.vlgmr.msra.gmra.mrb[176].mxu1 %v23982_v30  ;;  %v16457_v30 = vld [vmem:[%s23062_s3 + $0xe68] ss:$16 sps:$4 sm:$0xff]  }
 0x904   :  { %9736 = vmatprep.mubr.bf16.mxu1 %v20557_v11  ;;  %9768 = vmatpush1.bf16.msra.mxu1 %v16448_v15  ;;  %v16459_v11 = vld [vmem:[%s23062_s3 + $0xe6c] ss:$16 sps:$4 sm:$0xff]   ;;  %v16562_v15 = vld [vmem:[%s23063_s5 + $0x7e0] ss:$16 sps:$4 sm:$0xff]  }
 0x905   :  { %9769 = vmatprep.subr.bf16.mxu1 %v16453_v32 }
 0x908   :  { %9770 = vmatpush1.bf16.msra.mxu1 %v16451_v62 }
 0x909   :  { %9771 = vmatprep.subr.bf16.mxu1 %v16456_v63 }
 0x90b   :  { %9737 = vmatmul.mubr.bf16.gmra.mrb[180].mxu1 %v23983_v50  ;;  %v16466_v50 = vld [vmem:[%s23062_s3 + $0xea8] ss:$16 sps:$4 sm:$0xff]  }
 0x90c   :  { %9746 = vmatprep.mubr.bf16.mxu1 %v20595_v33  ;;  %9772 = vmatpush1.bf16.msra.mxu1 %v16454_v4  ;;  %v16468_v33 = vld [vmem:[%s23062_s3 + $0xeac] ss:$16 sps:$4 sm:$0xff]  }
 0x90d   :  { %9773 = vmatprep.subr.bf16.mxu1 %v16459_v11 }
 0x910   :  { %9774 = vmatpush1.bf16.msra.mxu1 %v16457_v30 }
 0x911   :  { %9775 = vmatprep.subr.bf16.mxu1 %v16462_v14 }
 0x913   :  { %9747 = vmatmul.mubr.bf16.gmra.mrb[184].mxu1 %v23984_v28  ;;  %v16472_v28 = vld [vmem:[%s23062_s3 + $0xee8] ss:$16 sps:$4 sm:$0xff]  }
 0x914   :  { %9756 = vmatprep.mubr.bf16.mxu1 %v20627_v54  ;;  %9776 = vmatpush1.bf16.msra.mxu1 %v16460_v49  ;;  %v16474_v54 = vld [vmem:[%s23062_s3 + $0xeec] ss:$16 sps:$4 sm:$0xff]  }
 0x915   :  { %9777 = vmatprep.subr.bf16.mxu1 %v16468_v33 }
 0x918   :  { %9778 = vmatpush1.bf16.msra.mxu1 %v16466_v50 }
 0x919   :  { %9779 = vmatprep.subr.bf16.mxu1 %v16471_v51 }
 0x91b   :  { %9757 = vmatmul.mubr.bf16.gmra.mrb[188].mxu1 %v23985_v17  ;;  %v16496_v17 = vld [vmem:[%s23063_s5 + $0x360] ss:$16 sps:$4 sm:$0xff]  }
 0x91c   :  { %9780 = vmatpush1.bf16.msra.mxu1 %v16469_v61  ;;  %9799 = vmatprep.mubr.bf16.mxu1 %v17132_v27 }
 0x91d   :  { %9781 = vmatprep.subr.bf16.mxu1 %v16474_v54  ;;  %10406 = vmatpush1.bf16.msra.mxu0 %v16496_v17 }
 0x91e   :  { %10407 = vmatprep.subr.bf16.mxu0 %v16501_v38 }
 0x920   :  { %9782 = vmatpush1.bf16.msra.mxu1 %v16472_v28 }
 0x921   :  { %10408 = vmatpush1.bf16.msra.mxu0 %v16499_v56 }
 0x922   :  { %10409 = vmatprep.subr.bf16.mxu0 %v16504_v52 }
 0x923   :  { %9800 = vmatmul.mubr.bf16.vlgmr.msra.gmra.mrb[176].mxu1 %v20521_v40  ;;  %v16505_v40 = vld [vmem:[%s23063_s5 + $0x600] ss:$16 sps:$4 sm:$0xff]  }
 0x924   :  { %9809 = vmatprep.mubr.bf16.mxu1 %v17132_v27 }
 0x925   :  { %10410 = vmatpush1.bf16.msra.mxu0 %v16502_v20 }
 0x926   :  { %10411 = vmatprep.subr.bf16.mxu0 %v16519_v1 }
 0x929   :  { %10412 = vmatpush1.bf16.msra.mxu0 %v16517_v31 }
 0x92a   :  { %10413 = vmatprep.subr.bf16.mxu0 %v16537_v34 }
 0x92b   :  { %9810 = vmatmul.mubr.bf16.gmra.mrb[180].mxu1 %v20566_v58  ;;  %v16507_v58 = vld [vmem:[%s23063_s5 + $0x604] ss:$16 sps:$4 sm:$0xff]  }
 0x92c   :  { %9819 = vmatprep.mubr.bf16.mxu1 %v17132_v27  ;;  %11729 = vmatprep.subr.bf16.mxu1 %v16507_v58 }
 0x92d   :  { %11730 = vmatpush1.bf16.msra.mxu1 %v16505_v40  ;;  %10414 = vmatpush1.bf16.msra.mxu0 %v16535_v60 }
 0x92e   :  { %10424 = vmatprep.subr.bf16.mxu0 %v16555_v16 }
 0x933   :  { %9820 = vmatmul.mubr.bf16.gmra.mrb[184].mxu1 %v20604_v23  ;;  %v16510_v23 = vld [vmem:[%s23063_s5 + $0x624] ss:$16 sps:$4 sm:$0xff]  }
 0x934   :  { %9829 = vmatprep.mubr.bf16.mxu1 %v17132_v27  ;;  %v16508_v27 = vld [vmem:[%s23063_s5 + $0x620] ss:$16 sps:$4 sm:$0xff]   ;;  %11731 = vmatprep.subr.bf16.mxu1 %v16510_v23 }
 0x935   :  { %11732 = vmatpush1.bf16.msra.mxu1 %v16508_v27 }
 0x936   :  { %11733 = vmatprep.subr.bf16.mxu1 %v16513_v57 }
 0x939   :  { %11734 = vmatpush1.bf16.msra.mxu1 %v16511_v36  ;;  %v9896_v36 = vld [vmem:[%s23064_s4] sm:$0x3] }
 0x93a   :  { %11735 = vmatprep.subr.bf16.mxu1 %v16516_v19 }
 0x93b   :  { %9830 = vmatmul.mubr.bf16.gmra.mrb[188].mxu1 %v20632_v37  ;;  %v16522_v37 = vld [vmem:[%s23063_s5 + $0x684] ss:$16 sps:$4 sm:$0xff]  }
 0x93d   :  { %11736 = vmatpush1.bf16.msra.mxu1 %v16514_v45  ;;  %v23986_v45 = vld [vmem:[#allocation114_spill] sm:$0xff] }
 0x93e   :  { %11737 = vmatprep.subr.bf16.mxu1 %v16522_v37  ;;  %v9901_v37 = vrot.slane %v9896_v36, %v23986_v45 }
 0x941   :  { %11738 = vmatpush1.bf16.msra.mxu1 %v16520_v44 }
 0x942   :  { %11739 = vmatprep.subr.bf16.mxu1 %v16525_v55 }
 0x945   :  { %11740 = vmatpush1.bf16.msra.mxu1 %v16523_v10  ;;  %v23987_v10 = vld [vmem:[#allocation111_spill] sm:$0xff] }
 0x946   :  { %11741 = vmatprep.subr.bf16.mxu1 %v16528_v13  ;;  %v9905_v13 = vrot.slane %v9896_v36, %v23987_v10  ;;  %v16574_v36 = vld [vmem:[%s23063_s5 + $0x2a8] ss:$16 sps:$4 sm:$0xff]  }
 0x949   :  { %11742 = vmatpush1.bf16.msra.mxu1 %v16526_v29 }
 0x94a   :  { %11743 = vmatprep.subr.bf16.mxu1 %v16531_v6 }
 0x94d   :  { %11744 = vmatpush1.bf16.msra.mxu1 %v16529_v41 }
 0x94e   :  { %11745 = vmatprep.subr.bf16.mxu1 %v16534_v59 }
 0x951   :  { %11746 = vmatpush1.bf16.msra.mxu1 %v16532_v18 }
 0x952   :  { %11747 = vmatprep.subr.bf16.mxu1 %v16540_v47 }
 0x955   :  { %11748 = vmatpush1.bf16.msra.mxu1 %v16538_v8 }
 0x956   :  { %11749 = vmatprep.subr.bf16.mxu1 %v16543_v42 }
 0x959   :  { %11750 = vmatpush1.bf16.msra.mxu1 %v16541_v3 }
 0x95a   :  { %11751 = vmatprep.subr.bf16.mxu1 %v16546_v0 }
 0x95d   :  { %11752 = vmatpush1.bf16.msra.mxu1 %v16544_v21 }
 0x95e   :  { %11753 = vmatprep.subr.bf16.mxu1 %v16549_v39 }
 0x961   :  { %11754 = vmatpush1.bf16.msra.mxu1 %v16547_v53 }
 0x962   :  { %11755 = vmatprep.subr.bf16.mxu1 %v16552_v25 }
 0x965   :  { %11756 = vmatpush1.bf16.msra.mxu1 %v16550_v26 }
 0x966   :  { %11757 = vmatprep.subr.bf16.mxu1 %v16558_v48 }
 0x969   :  { %11758 = vmatpush1.bf16.msra.mxu1 %v16556_v12 }
 0x96a   :  { %11759 = vmatprep.subr.bf16.mxu1 %v16564_v35 }
 0x96d   :  { %11760 = vmatpush1.bf16.msra.mxu1 %v16562_v15 }
 0x996   :  { %v9655_v9 = vpop.f32.mrb[160].mxu1 }
 0x997   :  { %v9657_v22 = vpop.f32.mrb[161].mxu1 }
 0x998   :  { %v9659_v46 = vpop.f32.mrb[162].mxu1 }
 0x999   :  { %v9661_v2 = vpop.f32.mrb[163].mxu1 }
 0x99e   :  { %v9665_v32 = vpop.f32.mrb[164].mxu1 }
 0x99f   :  { %v9667_v62 = vpop.f32.mrb[165].mxu1 }
 0x9a0   :  { %v22121_v63 = vpop.f32.mrb[166].mxu1 }
 0x9a1   :  { %v22123_v4 = vpop.f32.mrb[167].mxu1 }
 0x9a6   :  { %v9675_v11 = vpop.f32.mrb[168].mxu1 }
 0x9a7   :  { %v9677_v30 = vpop.f32.mrb[169].mxu1 }
 0x9a8   :  { %v9679_v14 = vpop.f32.mrb[170].mxu1 }
 0x9a9   :  { %v9681_v49 = vpop.f32.mrb[171].mxu1 }
 0x9ae   :  { %v9685_v33 = vpop.f32.mrb[172].mxu1 }
 0x9af   :  { %v9687_v50 = vpop.f32.mrb[173].mxu1 }
 0x9b0   :  { %v9689_v51 = vpop.f32.mrb[174].mxu1 }
 0x9b1   :  { %v9691_v61 = vpop.f32.mrb[175].mxu1 }
 0x9f6   :  { %v9801_v54 = vpop.f32.mrb[176].mxu1 }
 0x9f7   :  { %v9872_v28 = vmax.f32 %v9655_v9, %v9801_v54  ;;  %v9803_v7 = vpop.f32.mrb[177].mxu1 }
 0x9f8   :  { %v9873_v5 = vmax.f32 %v9657_v22, %v9803_v7  ;;  %v9805_v17 = vpop.f32.mrb[178].mxu1 }
 0x9f9   :  { %v9874_v24 = vmax.f32 %v9659_v46, %v9805_v17  ;;  %v9807_v38 = vpop.f32.mrb[179].mxu1  ;;  %v16559_v17 = vld [vmem:[%s23063_s5 + $0x228] ss:$16 sps:$4 sm:$0xff]  }
 0x9fa   :  { %v9875_v40 = vmax.f32 %v9661_v2, %v9807_v38  ;;  %v16567_v38 = vld [vmem:[%s23063_s5 + $0x24c] ss:$16 sps:$4 sm:$0xff]  }
 0x9fe   :  { %v9811_v58 = vpop.f32.mrb[180].mxu1 }
 0x9ff   :  { %v9876_v56 = vmax.f32 %v9665_v32, %v9811_v58  ;;  %v9813_v23 = vpop.f32.mrb[181].mxu1  ;;  %v16565_v58 = vld [vmem:[%s23063_s5 + $0x248] ss:$16 sps:$4 sm:$0xff]  }
 0xa00   :  { %v9877_v52 = vmax.f32 %v9667_v62, %v9813_v23  ;;  %v9815_v27 = vpop.f32.mrb[182].mxu1 }
 0xa01   :  { %v9878_v57 = vmax.f32 %v22121_v63, %v9815_v27  ;;  %v9817_v20 = vpop.f32.mrb[183].mxu1  ;;  %v16568_v27 = vld [vmem:[%s23063_s5 + $0x268] ss:$16 sps:$4 sm:$0xff]  }
 0xa02   :  { %v9879_v1 = vmax.f32 %v22123_v4, %v9817_v20  ;;  %v16571_v20 = vld [vmem:[%s23063_s5 + $0x288] ss:$16 sps:$4 sm:$0xff]  }
 0xa06   :  { %v9821_v19 = vpop.f32.mrb[184].mxu1 }
 0xa07   :  { %v9880_v31 = vmax.f32 %v9675_v11, %v9821_v19  ;;  %v9823_v44 = vpop.f32.mrb[185].mxu1  ;;  %v16579_v19 = vld [vmem:[%s23063_s5 + $0x2cc] ss:$16 sps:$4 sm:$0xff]  }
 0xa08   :  { %v9881_v55 = vmax.f32 %v9677_v30, %v9823_v44  ;;  %v9825_v29 = vpop.f32.mrb[186].mxu1  ;;  %v16580_v44 = vld [vmem:[%s23063_s5 + $0x2e8] ss:$16 sps:$4 sm:$0xff]  }
 0xa09   :  { %v9888_v6 = vmax.f32 %v9872_v28, %v9880_v31  ;;  %v9882_v41 = vmax.f32 %v9679_v14, %v9825_v29  ;;  %v9827_v59 = vpop.f32.mrb[187].mxu1  ;;  %v16577_v31 = vld [vmem:[%s23063_s5 + $0x2c8] ss:$16 sps:$4 sm:$0xff]   ;;  %v16588_v29 = vld [vmem:[%s23063_s5 + $0x32c] ss:$16 sps:$4 sm:$0xff]  }
 0xa0a   :  { %v9889_v18 = vmax.f32 %v9873_v5, %v9881_v55  ;;  %v9883_v47 = vmax.f32 %v9681_v49, %v9827_v59  ;;  %v16553_v49 = vld [vmem:[%s23063_s5 + $0x208] ss:$16 sps:$4 sm:$0xff]   ;;  %v16585_v55 = vld [vmem:[%s23063_s5 + $0x30c] ss:$16 sps:$4 sm:$0xff]  }
 0xa0b   :  { %v9908_v60 = vadd.f32 %v9901_v37, %v9888_v6  ;;  %v9890_v34 = vmax.f32 %v9874_v24, %v9882_v41  ;;  %v16586_v6 = vld [vmem:[%s23063_s5 + $0x328] ss:$16 sps:$4 sm:$0xff]   ;;  %v16591_v41 = vld [vmem:[%s23063_s5 + $0x34c] ss:$16 sps:$4 sm:$0xff]  }
 0xa0c   :  { %v9909_v8 = vadd.f32 %v9905_v13, %v9889_v18  ;;  %v9891_v42 = vmax.f32 %v9875_v40, %v9883_v47  ;;  %v16589_v59 = vld [vmem:[%s23063_s5 + $0x348] ss:$16 sps:$4 sm:$0xff]   ;;  %v16594_v18 = vld [vmem:[%s23063_s5 + $0x36c] ss:$16 sps:$4 sm:$0xff]  }
 0xa0d   :  { %v9910_v3 = vadd.f32 %v9901_v37, %v9890_v34  ;;  %v9916_v39 = vmax.f32 %v9908_v60, 0.0  ;;  %v16592_v47 = vld [vmem:[%s23063_s5 + $0x368] ss:$16 sps:$4 sm:$0xff]   ;;  %v16597_v60 = vld [vmem:[%s23063_s5 + $0x38c] ss:$16 sps:$4 sm:$0xff]  }
 0xa0e   :  { %v9911_v0 = vadd.f32 %v9905_v13, %v9891_v42  ;;  %v9831_v21 = vpop.f32.mrb[188].mxu1  ;;  %v9917_v16 = vmax.f32 %v9909_v8, 0.0  ;;  %v16595_v34 = vld [vmem:[%s23063_s5 + $0x388] ss:$16 sps:$4 sm:$0xff]   ;;  %v16600_v8 = vld [vmem:[%s23063_s5 + $0x3ac] ss:$16 sps:$4 sm:$0xff]  }
 0xa0f   :  { %v9918_v53 = vmax.f32 %v9910_v3, 0.0  ;;  %v9884_v25 = vmax.f32 %v9685_v33, %v9831_v21  ;;  %v9833_v26 = vpop.f32.mrb[189].mxu1  ;;  %v16598_v42 = vld [vmem:[%s23063_s5 + $0x3a8] ss:$16 sps:$4 sm:$0xff]   ;;  %v16603_v3 = vld [vmem:[%s23063_s5 + $0x3cc] ss:$16 sps:$4 sm:$0xff]  }
 0xa10   :  { %v9919_v9 = vmax.f32 %v9911_v0, 0.0  ;;  %v9885_v48 = vmax.f32 %v9687_v50, %v9833_v26  ;;  %v9835_v22 = vpop.f32.mrb[190].mxu1  ;;  %v16601_v0 = vld [vmem:[%s23063_s5 + $0x3c8] ss:$16 sps:$4 sm:$0xff]   ;;  %v16606_v21 = vld [vmem:[%s23063_s5 + $0x3ec] ss:$16 sps:$4 sm:$0xff]  }
 0xa11   :  { %v22132_v12 = vpack.c.bf16 %v9918_v53, %v9916_v39  ;;  %v9892_v46 = vmax.f32 %v9876_v56, %v9884_v25  ;;  %v9886_v2 = vmax.f32 %v9689_v51, %v9835_v22  ;;  %v9837_v35 = vpop.f32.mrb[191].mxu1  ;;  %v16561_v51 = vld [vmem:[%s23063_s5 + $0x22c] ss:$16 sps:$4 sm:$0xff]   ;;  %v16604_v39 = vld [vmem:[%s23063_s5 + $0x3e8] ss:$16 sps:$4 sm:$0xff]  }
 0xa12   :  { %v22134_v15 = vpack.c.bf16 %v9919_v9, %v9917_v16  ;;  %v9893_v32 = vmax.f32 %v9877_v52, %v9885_v48  ;;  %v9887_v62 = vmax.f32 %v9691_v61, %v9837_v35  ;;  %v16570_v52 = vld [vmem:[%s23063_s5 + $0x26c] ss:$16 sps:$4 sm:$0xff]   ;;  %v16609_v53 = vld [vmem:[%s23063_s5 + $0x4] ss:$16 sps:$4 sm:$0xff]   ;;  %v16607_v25 = vld [vmem:[%s23063_s5] ss:$16 sps:$4 sm:$0xff]  }
 0xa13   :  { %v9912_v63 = vadd.f32 %v9901_v37, %v9892_v46  ;;  %v9894_v4 = vmax.f32 %v9878_v57, %v9886_v2  ;;  %v10059_v33 = vrot.slane %v22132_v12, 4  ;;  %v16573_v57 = vld [vmem:[%s23063_s5 + $0x28c] ss:$16 sps:$4 sm:$0xff]   ;;  %v16612_v26 = vld [vmem:[%s23063_s5 + $0x24] ss:$16 sps:$4 sm:$0xff]  }
 0xa14   :  { %v9913_v11 = vadd.f32 %v9905_v13, %v9893_v32  ;;  %v9895_v30 = vmax.f32 %v9879_v1, %v9887_v62  ;;  %v10060_v14 = vrot.slane %v22134_v15, 4  ;;  %v16576_v1 = vld [vmem:[%s23063_s5 + $0x2ac] ss:$16 sps:$4 sm:$0xff]   ;;  %v16610_v16 = vld [vmem:[%s23063_s5 + $0x20] ss:$16 sps:$4 sm:$0xff]  }
 0xa15   :  { %v9914_v50 = vadd.f32 %v9901_v37, %v9894_v4  ;;  %v9920_v61 = vmax.f32 %v9912_v63, 0.0  ;;  %v16582_v37 = vld [vmem:[%s23063_s5 + $0x2ec] ss:$16 sps:$4 sm:$0xff]   ;;  %v16615_v9 = vld [vmem:[%s23063_s5 + $0x44] ss:$16 sps:$4 sm:$0xff]  }
 0xa16   :  { %v9915_v54 = vadd.f32 %v9905_v13, %v9895_v30  ;;  %10415 = vmatprep.mubr.bf16.mxu0 %v10060_v14  ;;  %v9921_v7 = vmax.f32 %v9913_v11, 0.0  ;;  %v16583_v13 = vld [vmem:[%s23063_s5 + $0x308] ss:$16 sps:$4 sm:$0xff]   ;;  %v16613_v48 = vld [vmem:[%s23063_s5 + $0x40] ss:$16 sps:$4 sm:$0xff]  }
 0xa17   :  { %v9922_v28 = vmax.f32 %v9914_v50, 0.0  ;;  %10416 = vmatmul.mubr.bf16.vlgmr.msra.gmra.mrb[64].mxu0 %v10059_v33  ;;  %v16618_v22 = vld [vmem:[%s23063_s5 + $0x64] ss:$16 sps:$4 sm:$0xff]   ;;  %v16616_v46 = vld [vmem:[%s23063_s5 + $0x60] ss:$16 sps:$4 sm:$0xff]  }
 0xa18   :  { %v9923_v5 = vmax.f32 %v9915_v54, 0.0  ;;  %10425 = vmatpush1.bf16.msra.mxu0 %v16553_v49  ;;  %10456 = vmatprep.mubr.bf16.mxu0 %v10060_v14  ;;  %v16621_v2 = vld [vmem:[%s23063_s5 + $0x84] ss:$16 sps:$4 sm:$0xff]   ;;  %v16619_v35 = vld [vmem:[%s23063_s5 + $0x80] ss:$16 sps:$4 sm:$0xff]  }
 0xa19   :  { %v22149_v24 = vpack.c.bf16 %v9922_v28, %v9920_v61  ;;  %10426 = vmatprep.subr.bf16.mxu0 %v16561_v51  ;;  %v16624_v32 = vld [vmem:[%s23063_s5 + $0xa4] ss:$16 sps:$4 sm:$0xff]   ;;  %v16622_v62 = vld [vmem:[%s23063_s5 + $0xa0] ss:$16 sps:$4 sm:$0xff]  }
 0xa1a   :  { %v22154_v40 = vpack.c.bf16 %v9923_v5, %v9921_v7  ;;  %v16627_v63 = vld [vmem:[%s23063_s5 + $0xc4] ss:$16 sps:$4 sm:$0xff]   ;;  %v16625_v4 = vld [vmem:[%s23063_s5 + $0xc0] ss:$16 sps:$4 sm:$0xff]  }
 0xa1b   :  { %v11405_v23 = vrot.slane %v22149_v24, 4  ;;  %v16630_v11 = vld [vmem:[%s23063_s5 + $0xe4] ss:$16 sps:$4 sm:$0xff]   ;;  %v16628_v30 = vld [vmem:[%s23063_s5 + $0xe0] ss:$16 sps:$4 sm:$0xff]  }
 0xa1c   :  { %10427 = vmatpush1.bf16.msra.mxu0 %v16559_v17  ;;  %v11406_v56 = vrot.slane %v22154_v40, 4  ;;  %v16633_v14 = vld [vmem:[%s23063_s5 + $0x104] ss:$16 sps:$4 sm:$0xff]   ;;  %v16631_v49 = vld [vmem:[%s23063_s5 + $0x100] ss:$16 sps:$4 sm:$0xff]  }
 0xa1d   :  { %10428 = vmatprep.subr.bf16.mxu0 %v16567_v38  ;;  %v16634_v50 = vld [vmem:[%s23063_s5 + $0x120] ss:$16 sps:$4 sm:$0xff]   ;;  %v16639_v51 = vld [vmem:[%s23063_s5 + $0x144] ss:$16 sps:$4 sm:$0xff]  }
 0xa1e   :  { %11761 = vmatprep.mubr.bf16.mxu1 %v11406_v56  ;;  %v16637_v54 = vld [vmem:[%s23063_s5 + $0x140] ss:$16 sps:$4 sm:$0xff]   ;;  %v16642_v61 = vld [vmem:[%s23063_s5 + $0x164] ss:$16 sps:$4 sm:$0xff]  }
 0xa1f   :  { %11762 = vmatmul.mubr.bf16.vlgmr.msra.gmra.mrb[192].mxu1 %v11405_v23  ;;  %v16640_v28 = vld [vmem:[%s23063_s5 + $0x160] ss:$16 sps:$4 sm:$0xff]   ;;  %v16645_v7 = vld [vmem:[%s23063_s5 + $0x184] ss:$16 sps:$4 sm:$0xff]  }
 0xa20   :  { %10429 = vmatpush1.bf16.msra.mxu0 %v16565_v58  ;;  %v16643_v5 = vld [vmem:[%s23063_s5 + $0x180] ss:$16 sps:$4 sm:$0xff]   ;;  %v16648_v17 = vld [vmem:[%s23063_s5 + $0x1a4] ss:$16 sps:$4 sm:$0xff]  }
 0xa21   :  { %10430 = vmatprep.subr.bf16.mxu0 %v16570_v52  ;;  %v16646_v38 = vld [vmem:[%s23063_s5 + $0x1a0] ss:$16 sps:$4 sm:$0xff]   ;;  %v16651_v58 = vld [vmem:[%s23063_s5 + $0x1c4] ss:$16 sps:$4 sm:$0xff]  }
 0xa22   :  { %v16649_v52 = vld [vmem:[%s23063_s5 + $0x1c0] ss:$16 sps:$4 sm:$0xff]  }
 0xa24   :  { %10431 = vmatpush1.bf16.msra.mxu0 %v16568_v27  ;;  %v16654_v27 = vld [vmem:[%s23063_s5 + $0x1e4] ss:$16 sps:$4 sm:$0xff]  }
 0xa25   :  { %10432 = vmatprep.subr.bf16.mxu0 %v16573_v57  ;;  %v16652_v57 = vld [vmem:[%s23063_s5 + $0x1e0] ss:$16 sps:$4 sm:$0xff]  }
 0xa28   :  { %10433 = vmatpush1.bf16.msra.mxu0 %v16571_v20  ;;  %v16657_v20 = vld [vmem:[%s23063_s5 + $0xc] ss:$16 sps:$4 sm:$0xff]  }
 0xa29   :  { %10434 = vmatprep.subr.bf16.mxu0 %v16576_v1  ;;  %v16655_v1 = vld [vmem:[%s23063_s5 + $0x8] ss:$16 sps:$4 sm:$0xff]  }
 0xa2c   :  { %10435 = vmatpush1.bf16.msra.mxu0 %v16574_v36  ;;  %v16660_v36 = vld [vmem:[%s23063_s5 + $0x2c] ss:$16 sps:$4 sm:$0xff]  }
 0xa2d   :  { %10436 = vmatprep.subr.bf16.mxu0 %v16579_v19  ;;  %v16658_v19 = vld [vmem:[%s23063_s5 + $0x28] ss:$16 sps:$4 sm:$0xff]  }
 0xa30   :  { %10437 = vmatpush1.bf16.msra.mxu0 %v16577_v31  ;;  %v16663_v31 = vld [vmem:[%s23063_s5 + $0x4c] ss:$16 sps:$4 sm:$0xff]  }
 0xa31   :  { %10438 = vmatprep.subr.bf16.mxu0 %v16582_v37  ;;  %v16661_v37 = vld [vmem:[%s23063_s5 + $0x48] ss:$16 sps:$4 sm:$0xff]  }
 0xa34   :  { %10439 = vmatpush1.bf16.msra.mxu0 %v16580_v44  ;;  %v16666_v44 = vld [vmem:[%s23063_s5 + $0x6c] ss:$16 sps:$4 sm:$0xff]  }
 0xa35   :  { %10440 = vmatprep.subr.bf16.mxu0 %v16585_v55  ;;  %v16669_v55 = vld [vmem:[%s23063_s5 + $0x8c] ss:$16 sps:$4 sm:$0xff]  }
 0xa38   :  { %10441 = vmatpush1.bf16.msra.mxu0 %v16583_v13  ;;  %v16667_v13 = vld [vmem:[%s23063_s5 + $0x88] ss:$16 sps:$4 sm:$0xff]  }
 0xa39   :  { %10442 = vmatprep.subr.bf16.mxu0 %v16588_v29  ;;  %v16672_v29 = vld [vmem:[%s23063_s5 + $0xac] ss:$16 sps:$4 sm:$0xff]  }
 0xa3c   :  { %10443 = vmatpush1.bf16.msra.mxu0 %v16586_v6  ;;  %v16670_v6 = vld [vmem:[%s23063_s5 + $0xa8] ss:$16 sps:$4 sm:$0xff]  }
 0xa3d   :  { %10444 = vmatprep.subr.bf16.mxu0 %v16591_v41  ;;  %v16675_v41 = vld [vmem:[%s23063_s5 + $0xcc] ss:$16 sps:$4 sm:$0xff]  }
 0xa40   :  { %10445 = vmatpush1.bf16.msra.mxu0 %v16589_v59  ;;  %v16673_v59 = vld [vmem:[%s23063_s5 + $0xc8] ss:$16 sps:$4 sm:$0xff]  }
 0xa41   :  { %10446 = vmatprep.subr.bf16.mxu0 %v16594_v18  ;;  %v16678_v18 = vld [vmem:[%s23063_s5 + $0xec] ss:$16 sps:$4 sm:$0xff]  }
 0xa44   :  { %10447 = vmatpush1.bf16.msra.mxu0 %v16592_v47  ;;  %v16676_v47 = vld [vmem:[%s23063_s5 + $0xe8] ss:$16 sps:$4 sm:$0xff]  }
 0xa45   :  { %10448 = vmatprep.subr.bf16.mxu0 %v16597_v60  ;;  %v16681_v60 = vld [vmem:[%s23063_s5 + $0x10c] ss:$16 sps:$4 sm:$0xff]  }
 0xa48   :  { %10449 = vmatpush1.bf16.msra.mxu0 %v16595_v34  ;;  %v16679_v34 = vld [vmem:[%s23063_s5 + $0x108] ss:$16 sps:$4 sm:$0xff]  }
 0xa49   :  { %10450 = vmatprep.subr.bf16.mxu0 %v16600_v8  ;;  %v16684_v8 = vld [vmem:[%s23063_s5 + $0x12c] ss:$16 sps:$4 sm:$0xff]  }
 0xa4c   :  { %10451 = vmatpush1.bf16.msra.mxu0 %v16598_v42  ;;  %v16682_v42 = vld [vmem:[%s23063_s5 + $0x128] ss:$16 sps:$4 sm:$0xff]  }
 0xa4d   :  { %10452 = vmatprep.subr.bf16.mxu0 %v16603_v3  ;;  %v16687_v3 = vld [vmem:[%s23063_s5 + $0x14c] ss:$16 sps:$4 sm:$0xff]  }
 0xa50   :  { %10453 = vmatpush1.bf16.msra.mxu0 %v16601_v0  ;;  %v16685_v0 = vld [vmem:[%s23063_s5 + $0x148] ss:$16 sps:$4 sm:$0xff]  }
 0xa51   :  { %10454 = vmatprep.subr.bf16.mxu0 %v16606_v21  ;;  %v16690_v21 = vld [vmem:[%s23063_s5 + $0x16c] ss:$16 sps:$4 sm:$0xff]  }
 0xa54   :  { %10455 = vmatpush1.bf16.msra.mxu0 %v16604_v39  ;;  %v16688_v39 = vld [vmem:[%s23063_s5 + $0x168] ss:$16 sps:$4 sm:$0xff]  }
 0xa55   :  { %10785 = vmatprep.subr.bf16.mxu0 %v16609_v53  ;;  %v16693_v53 = vld [vmem:[%s23063_s5 + $0x18c] ss:$16 sps:$4 sm:$0xff]  }
 0xa57   :  { %10457 = vmatmul.mubr.bf16.vlgmr.msra.gmra.mrb[68].mxu0 %v10059_v33  ;;  %v16636_v33 = vld [vmem:[%s23063_s5 + $0x124] ss:$16 sps:$4 sm:$0xff]  }
 0xa58   :  { %10786 = vmatpush1.bf16.msra.mxu0 %v16607_v25  ;;  %10817 = vmatprep.mubr.bf16.mxu0 %v22134_v15  ;;  %v16691_v25 = vld [vmem:[%s23063_s5 + $0x188] ss:$16 sps:$4 sm:$0xff]  }
 0xa59   :  { %10787 = vmatprep.subr.bf16.mxu0 %v16612_v26  ;;  %v16696_v26 = vld [vmem:[%s23063_s5 + $0x1ac] ss:$16 sps:$4 sm:$0xff]  }
 0xa5c   :  { %10788 = vmatpush1.bf16.msra.mxu0 %v16610_v16  ;;  %v16694_v16 = vld [vmem:[%s23063_s5 + $0x1a8] ss:$16 sps:$4 sm:$0xff]  }
 0xa5d   :  { %10789 = vmatprep.subr.bf16.mxu0 %v16615_v9  ;;  %v16699_v9 = vld [vmem:[%s23063_s5 + $0x1cc] ss:$16 sps:$4 sm:$0xff]  }
 0xa60   :  { %10790 = vmatpush1.bf16.msra.mxu0 %v16613_v48  ;;  %v16697_v48 = vld [vmem:[%s23063_s5 + $0x1c8] ss:$16 sps:$4 sm:$0xff]  }
 0xa61   :  { %10791 = vmatprep.subr.bf16.mxu0 %v16618_v22  ;;  %v16702_v22 = vld [vmem:[%s23063_s5 + $0x1ec] ss:$16 sps:$4 sm:$0xff]  }
 0xa64   :  { %10792 = vmatpush1.bf16.msra.mxu0 %v16616_v46  ;;  %v16700_v46 = vld [vmem:[%s23063_s5 + $0x1e8] ss:$16 sps:$4 sm:$0xff]  }
 0xa65   :  { %10793 = vmatprep.subr.bf16.mxu0 %v16621_v2  ;;  %v16705_v2 = vld [vmem:[%s23063_s5 + $0x404] ss:$16 sps:$4 sm:$0xff]  }
 0xa68   :  { %10794 = vmatpush1.bf16.msra.mxu0 %v16619_v35  ;;  %v16703_v35 = vld [vmem:[%s23063_s5 + $0x400] ss:$16 sps:$4 sm:$0xff]  }
 0xa69   :  { %10795 = vmatprep.subr.bf16.mxu0 %v16624_v32  ;;  %v16708_v32 = vld [vmem:[%s23063_s5 + $0x424] ss:$16 sps:$4 sm:$0xff]  }
 0xa6c   :  { %10796 = vmatpush1.bf16.msra.mxu0 %v16622_v62  ;;  %v16706_v62 = vld [vmem:[%s23063_s5 + $0x420] ss:$16 sps:$4 sm:$0xff]  }
 0xa6d   :  { %10797 = vmatprep.subr.bf16.mxu0 %v16627_v63  ;;  %v16711_v63 = vld [vmem:[%s23063_s5 + $0x444] ss:$16 sps:$4 sm:$0xff]  }
 0xa70   :  { %10798 = vmatpush1.bf16.msra.mxu0 %v16625_v4  ;;  %v16709_v4 = vld [vmem:[%s23063_s5 + $0x440] ss:$16 sps:$4 sm:$0xff]  }
 0xa71   :  { %10799 = vmatprep.subr.bf16.mxu0 %v16630_v11  ;;  %v16712_v11 = vld [vmem:[%s23063_s5 + $0x460] ss:$16 sps:$4 sm:$0xff]  }
 0xa74   :  { %10800 = vmatpush1.bf16.msra.mxu0 %v16628_v30  ;;  %v16717_v30 = vld [vmem:[%s23063_s5 + $0x484] ss:$16 sps:$4 sm:$0xff]  }
 0xa75   :  { %10801 = vmatprep.subr.bf16.mxu0 %v16633_v14  ;;  %v16715_v14 = vld [vmem:[%s23063_s5 + $0x480] ss:$16 sps:$4 sm:$0xff]  }
 0xa78   :  { %10802 = vmatpush1.bf16.msra.mxu0 %v16631_v49  ;;  %v16720_v49 = vld [vmem:[%s23063_s5 + $0x4a4] ss:$16 sps:$4 sm:$0xff]  }
 0xa79   :  { %10803 = vmatprep.subr.bf16.mxu0 %v16636_v33  ;;  %v16718_v33 = vld [vmem:[%s23063_s5 + $0x4a0] ss:$16 sps:$4 sm:$0xff]  }
 0xa7c   :  { %10804 = vmatpush1.bf16.msra.mxu0 %v16634_v50  ;;  %v16723_v50 = vld [vmem:[%s23063_s5 + $0x4c4] ss:$16 sps:$4 sm:$0xff]  }
 0xa7d   :  { %10805 = vmatprep.subr.bf16.mxu0 %v16639_v51 }
 0xa80   :  { %10806 = vmatpush1.bf16.msra.mxu0 %v16637_v54 }
 0xa81   :  { %10807 = vmatprep.subr.bf16.mxu0 %v16642_v61 }
 0xa84   :  { %10808 = vmatpush1.bf16.msra.mxu0 %v16640_v28  ;;  %v16721_v28 = vld [vmem:[%s23063_s5 + $0x4c0] ss:$16 sps:$4 sm:$0xff]  }
 0xa85   :  { %10809 = vmatprep.subr.bf16.mxu0 %v16645_v7 }
 0xa88   :  { %10810 = vmatpush1.bf16.msra.mxu0 %v16643_v5  ;;  %v16726_v5 = vld [vmem:[%s23063_s5 + $0x4e4] ss:$16 sps:$4 sm:$0xff]  }
 0xa89   :  { %10811 = vmatprep.subr.bf16.mxu0 %v16648_v17  ;;  %v16724_v17 = vld [vmem:[%s23063_s5 + $0x4e0] ss:$16 sps:$4 sm:$0xff]  }
 0xa8c   :  { %10812 = vmatpush1.bf16.msra.mxu0 %v16646_v38  ;;  %v16729_v38 = vld [vmem:[%s23063_s5 + $0x504] ss:$16 sps:$4 sm:$0xff]  }
 0xa8d   :  { %10813 = vmatprep.subr.bf16.mxu0 %v16651_v58 }
 0xa90   :  { %10814 = vmatpush1.bf16.msra.mxu0 %v16649_v52 }
 0xa91   :  { %10815 = vmatprep.subr.bf16.mxu0 %v16654_v27 }
 0xa94   :  { %10816 = vmatpush1.bf16.msra.mxu0 %v16652_v57  ;;  %v16727_v57 = vld [vmem:[%s23063_s5 + $0x500] ss:$16 sps:$4 sm:$0xff]  }
 0xa95   :  { %10826 = vmatprep.subr.bf16.mxu0 %v16657_v20 }
 0xa97   :  { %10818 = vmatmul.mubr.bf16.vlgmr.msra.gmra.mrb[72].mxu0 %v22132_v12 }
 0xa98   :  { %10827 = vmatpush1.bf16.msra.mxu0 %v16655_v1  ;;  %10858 = vmatprep.mubr.bf16.mxu0 %v22134_v15  ;;  %v16664_v15 = vld [vmem:[%s23063_s5 + $0x68] ss:$16 sps:$4 sm:$0xff]   ;;  %v16732_v1 = vld [vmem:[%s23063_s5 + $0x524] ss:$16 sps:$4 sm:$0xff]  }
 0xa99   :  { %10828 = vmatprep.subr.bf16.mxu0 %v16660_v36  ;;  %v16730_v36 = vld [vmem:[%s23063_s5 + $0x520] ss:$16 sps:$4 sm:$0xff]  }
 0xa9c   :  { %10829 = vmatpush1.bf16.msra.mxu0 %v16658_v19  ;;  %v16735_v19 = vld [vmem:[%s23063_s5 + $0x544] ss:$16 sps:$4 sm:$0xff]  }
 0xa9d   :  { %10830 = vmatprep.subr.bf16.mxu0 %v16663_v31  ;;  %v16733_v31 = vld [vmem:[%s23063_s5 + $0x540] ss:$16 sps:$4 sm:$0xff]  }
 0xaa0   :  { %10831 = vmatpush1.bf16.msra.mxu0 %v16661_v37  ;;  %v16738_v37 = vld [vmem:[%s23063_s5 + $0x564] ss:$16 sps:$4 sm:$0xff]  }
 0xaa1   :  { %10832 = vmatprep.subr.bf16.mxu0 %v16666_v44  ;;  %v16736_v44 = vld [vmem:[%s23063_s5 + $0x560] ss:$16 sps:$4 sm:$0xff]  }
 0xaa4   :  { %10833 = vmatpush1.bf16.msra.mxu0 %v16664_v15  ;;  %v16741_v15 = vld [vmem:[%s23063_s5 + $0x584] ss:$16 sps:$4 sm:$0xff]  }
 0xaa5   :  { %10834 = vmatprep.subr.bf16.mxu0 %v16669_v55  ;;  %v16739_v55 = vld [vmem:[%s23063_s5 + $0x580] ss:$16 sps:$4 sm:$0xff]  }
 0xaa8   :  { %10835 = vmatpush1.bf16.msra.mxu0 %v16667_v13  ;;  %v16744_v13 = vld [vmem:[%s23063_s5 + $0x5a4] ss:$16 sps:$4 sm:$0xff]  }
 0xaa9   :  { %10836 = vmatprep.subr.bf16.mxu0 %v16672_v29  ;;  %v16742_v29 = vld [vmem:[%s23063_s5 + $0x5a0] ss:$16 sps:$4 sm:$0xff]  }
 0xaac   :  { %10837 = vmatpush1.bf16.msra.mxu0 %v16670_v6  ;;  %v16747_v6 = vld [vmem:[%s23063_s5 + $0x5c4] ss:$16 sps:$4 sm:$0xff]  }
 0xaad   :  { %10838 = vmatprep.subr.bf16.mxu0 %v16675_v41  ;;  %v16745_v41 = vld [vmem:[%s23063_s5 + $0x5c0] ss:$16 sps:$4 sm:$0xff]  }
 0xab0   :  { %10839 = vmatpush1.bf16.msra.mxu0 %v16673_v59  ;;  %v16750_v59 = vld [vmem:[%s23063_s5 + $0x5e4] ss:$16 sps:$4 sm:$0xff]  }
 0xab1   :  { %10840 = vmatprep.subr.bf16.mxu0 %v16678_v18  ;;  %v16748_v18 = vld [vmem:[%s23063_s5 + $0x5e0] ss:$16 sps:$4 sm:$0xff]  }
 0xab4   :  { %10841 = vmatpush1.bf16.msra.mxu0 %v16676_v47  ;;  %v16753_v47 = vld [vmem:[%s23063_s5 + $0x40c] ss:$16 sps:$4 sm:$0xff]  }
 0xab5   :  { %10842 = vmatprep.subr.bf16.mxu0 %v16681_v60  ;;  %v16751_v60 = vld [vmem:[%s23063_s5 + $0x408] ss:$16 sps:$4 sm:$0xff]  }
 0xab8   :  { %10843 = vmatpush1.bf16.msra.mxu0 %v16679_v34  ;;  %v16756_v34 = vld [vmem:[%s23063_s5 + $0x42c] ss:$16 sps:$4 sm:$0xff]  }
 0xab9   :  { %10844 = vmatprep.subr.bf16.mxu0 %v16684_v8  ;;  %v16754_v8 = vld [vmem:[%s23063_s5 + $0x428] ss:$16 sps:$4 sm:$0xff]  }
 0xabc   :  { %10845 = vmatpush1.bf16.msra.mxu0 %v16682_v42  ;;  %v16759_v42 = vld [vmem:[%s23063_s5 + $0x44c] ss:$16 sps:$4 sm:$0xff]  }
 0xabd   :  { %10846 = vmatprep.subr.bf16.mxu0 %v16687_v3  ;;  %v16757_v3 = vld [vmem:[%s23063_s5 + $0x448] ss:$16 sps:$4 sm:$0xff]  }
 0xac0   :  { %10847 = vmatpush1.bf16.msra.mxu0 %v16685_v0  ;;  %v16762_v0 = vld [vmem:[%s23063_s5 + $0x46c] ss:$16 sps:$4 sm:$0xff]  }
 0xac1   :  { %10848 = vmatprep.subr.bf16.mxu0 %v16690_v21  ;;  %v16760_v21 = vld [vmem:[%s23063_s5 + $0x468] ss:$16 sps:$4 sm:$0xff]  }
 0xac4   :  { %10849 = vmatpush1.bf16.msra.mxu0 %v16688_v39  ;;  %v16765_v39 = vld [vmem:[%s23063_s5 + $0x48c] ss:$16 sps:$4 sm:$0xff]  }
 0xac5   :  { %10850 = vmatprep.subr.bf16.mxu0 %v16693_v53  ;;  %v16763_v53 = vld [vmem:[%s23063_s5 + $0x488] ss:$16 sps:$4 sm:$0xff]  }
 0xac8   :  { %10851 = vmatpush1.bf16.msra.mxu0 %v16691_v25  ;;  %v16768_v25 = vld [vmem:[%s23063_s5 + $0x4ac] ss:$16 sps:$4 sm:$0xff]  }
 0xac9   :  { %10852 = vmatprep.subr.bf16.mxu0 %v16696_v26  ;;  %v16766_v26 = vld [vmem:[%s23063_s5 + $0x4a8] ss:$16 sps:$4 sm:$0xff]  }
 0xacc   :  { %10853 = vmatpush1.bf16.msra.mxu0 %v16694_v16  ;;  %v16771_v16 = vld [vmem:[%s23063_s5 + $0x4cc] ss:$16 sps:$4 sm:$0xff]  }
 0xacd   :  { %10854 = vmatprep.subr.bf16.mxu0 %v16699_v9 }
 0xad0   :  { %10855 = vmatpush1.bf16.msra.mxu0 %v16697_v48 }
 0xad1   :  { %10856 = vmatprep.subr.bf16.mxu0 %v16702_v22 }
 0xad4   :  { %10857 = vmatpush1.bf16.msra.mxu0 %v16700_v46  ;;  %v16769_v46 = vld [vmem:[%s23063_s5 + $0x4c8] ss:$16 sps:$4 sm:$0xff]  }
 0xad5   :  { %11252 = vmatprep.subr.bf16.mxu0 %v16705_v2 }
 0xad7   :  { %10859 = vmatmul.mubr.bf16.vlgmr.msra.gmra.mrb[76].mxu0 %v22132_v12  ;;  %v16714_v12 = vld [vmem:[%s23063_s5 + $0x464] ss:$16 sps:$4 sm:$0xff]  }
 0xad8   :  { %11253 = vmatpush1.bf16.msra.mxu0 %v16703_v35  ;;  %11284 = vmatprep.mubr.bf16.mxu0 %v22154_v40  ;;  %v16774_v35 = vld [vmem:[%s23063_s5 + $0x4ec] ss:$16 sps:$4 sm:$0xff]  }
 0xad9   :  { %11254 = vmatprep.subr.bf16.mxu0 %v16708_v32  ;;  %v16847_v32 = vld [vmem:[%s23065_s7] ss:$8 sps:$4 sm:$0xff]  }
 0xadc   :  { %11255 = vmatpush1.bf16.msra.mxu0 %v16706_v62  ;;  %v16849_v62 = vld [vmem:[%s23065_s7 + $0x4] ss:$8 sps:$4 sm:$0xff]  }
 0xadd   :  { %11256 = vmatprep.subr.bf16.mxu0 %v16711_v63  ;;  %v16772_v63 = vld [vmem:[%s23063_s5 + $0x4e8] ss:$16 sps:$4 sm:$0xff]   ;;  %12245 = vmatprep.subr.bf16.mxu1 %v16849_v62 }
 0xade   :  { %12246 = vmatpush1.bf16.msra.mxu1 %v16847_v32  ;;  %v16816_v32 = vld [vmem:[%s23063_s5 + $0x6ac] ss:$16 sps:$4 sm:$0xff]   ;;  %v16814_v62 = vld [vmem:[%s23063_s5 + $0x6a8] ss:$16 sps:$4 sm:$0xff]  }
 0xae0   :  { %11257 = vmatpush1.bf16.msra.mxu0 %v16709_v4  ;;  %v16852_v4 = vld [vmem:[%s23065_s7 + $0x14] ss:$8 sps:$4 sm:$0xff]  }
 0xae1   :  { %11258 = vmatprep.subr.bf16.mxu0 %v16714_v12  ;;  %v16777_v12 = vld [vmem:[%s23063_s5 + $0x50c] ss:$16 sps:$4 sm:$0xff]   ;;  %12247 = vmatprep.subr.bf16.mxu1 %v16852_v4 }
 0xae2   :  { %v16888_v4 = vld [vmem:[%s23065_s7 + $0xd4] ss:$8 sps:$4 sm:$0xff]  }
 0xae4   :  { %11259 = vmatpush1.bf16.msra.mxu0 %v16712_v11  ;;  %v16850_v11 = vld [vmem:[%s23065_s7 + $0x10] ss:$8 sps:$4 sm:$0xff]  }
 0xae5   :  { %11260 = vmatprep.subr.bf16.mxu0 %v16717_v30  ;;  %v16855_v30 = vld [vmem:[%s23065_s7 + $0x24] ss:$8 sps:$4 sm:$0xff]   ;;  %12248 = vmatpush1.bf16.msra.mxu1 %v16850_v11  ;;  %v16886_v11 = vld [vmem:[%s23065_s7 + $0xd0] ss:$8 sps:$4 sm:$0xff]  }
 0xae6   :  { %12249 = vmatprep.subr.bf16.mxu1 %v16855_v30 }
 0xae8   :  { %11261 = vmatpush1.bf16.msra.mxu0 %v16715_v14  ;;  %v16775_v14 = vld [vmem:[%s23063_s5 + $0x508] ss:$16 sps:$4 sm:$0xff]  }
 0xae9   :  { %11262 = vmatprep.subr.bf16.mxu0 %v16720_v49  ;;  %v16780_v49 = vld [vmem:[%s23063_s5 + $0x52c] ss:$16 sps:$4 sm:$0xff]  }
 0xaea   :  { %v22481_v51 = vpop.f32.mrb[64].mxu0 }
 0xaeb   :  { %v22483_v54 = vpop.f32.mrb[65].mxu0 }
 0xaec   :  { %11263 = vmatpush1.bf16.msra.mxu0 %v16718_v33  ;;  %v10421_v61 = vpop.f32.mrb[66].mxu0  ;;  %v16853_v33 = vld [vmem:[%s23065_s7 + $0x20] ss:$8 sps:$4 sm:$0xff]  }
 0xaed   :  { %v10422_v7 = vpop.f32.mrb[67].mxu0  ;;  %11264 = vmatprep.subr.bf16.mxu0 %v16723_v50  ;;  %v16858_v50 = vld [vmem:[%s23065_s7 + $0x34] ss:$8 sps:$4 sm:$0xff]   ;;  %v16778_v61 = vld [vmem:[%s23063_s5 + $0x528] ss:$16 sps:$4 sm:$0xff]   ;;  %12250 = vmatpush1.bf16.msra.mxu1 %v16853_v33 }
 0xaee   :  { %v16856_v7 = vld [vmem:[%s23065_s7 + $0x30] ss:$8 sps:$4 sm:$0xff]   ;;  %12251 = vmatprep.subr.bf16.mxu1 %v16858_v50 }
 0xaef   :  { %v16817_v50 = vld [vmem:[%s23063_s5 + $0x6c8] ss:$16 sps:$4 sm:$0xff]  }
 0xaf0   :  { %11265 = vmatpush1.bf16.msra.mxu0 %v16721_v28  ;;  %v16783_v28 = vld [vmem:[%s23063_s5 + $0x54c] ss:$16 sps:$4 sm:$0xff]  }
 0xaf1   :  { %11266 = vmatprep.subr.bf16.mxu0 %v16726_v5  ;;  %v16861_v5 = vld [vmem:[%s23065_s7 + $0x44] ss:$8 sps:$4 sm:$0xff]   ;;  %12252 = vmatpush1.bf16.msra.mxu1 %v16856_v7  ;;  %v16820_v7 = vld [vmem:[%s23063_s5 + $0x6e8] ss:$16 sps:$4 sm:$0xff]  }
 0xaf2   :  { %v22497_v58 = vpop.f32.mrb[192].mxu1  ;;  %12253 = vmatprep.subr.bf16.mxu1 %v16861_v5  ;;  %v16825_v5 = vld [vmem:[%s23063_s5 + $0x70c] ss:$16 sps:$4 sm:$0xff]  }
 0xaf3   :  { %v22499_v52 = vpop.f32.mrb[193].mxu1 }
 0xaf4   :  { %11267 = vmatpush1.bf16.msra.mxu0 %v16724_v17  ;;  %v11767_v27 = vpop.f32.mrb[194].mxu1  ;;  %v16781_v17 = vld [vmem:[%s23063_s5 + $0x548] ss:$16 sps:$4 sm:$0xff]  }
 0xaf5   :  { %v11768_v20 = vpop.f32.mrb[195].mxu1  ;;  %11268 = vmatprep.subr.bf16.mxu0 %v16729_v38  ;;  %v16786_v38 = vld [vmem:[%s23063_s5 + $0x56c] ss:$16 sps:$4 sm:$0xff]   ;;  %v16784_v27 = vld [vmem:[%s23063_s5 + $0x568] ss:$16 sps:$4 sm:$0xff]  }
 0xaf6   :  { %v16789_v20 = vld [vmem:[%s23063_s5 + $0x58c] ss:$16 sps:$4 sm:$0xff]  }
 0xaf8   :  { %11269 = vmatpush1.bf16.msra.mxu0 %v16727_v57  ;;  %v16859_v57 = vld [vmem:[%s23065_s7 + $0x40] ss:$8 sps:$4 sm:$0xff]  }
 0xaf9   :  { %11270 = vmatprep.subr.bf16.mxu0 %v16732_v1  ;;  %v16864_v1 = vld [vmem:[%s23065_s7 + $0x54] ss:$8 sps:$4 sm:$0xff]   ;;  %12254 = vmatpush1.bf16.msra.mxu1 %v16859_v57 }
 0xafa   :  { %12255 = vmatprep.subr.bf16.mxu1 %v16864_v1  ;;  %v16828_v57 = vld [vmem:[%s23063_s5 + $0x72c] ss:$16 sps:$4 sm:$0xff]  }
 0xafb   :  { %v16831_v1 = vld [vmem:[%s23063_s5 + $0x74c] ss:$16 sps:$4 sm:$0xff]  }
 0xafc   :  { %11271 = vmatpush1.bf16.msra.mxu0 %v16730_v36  ;;  %v16862_v36 = vld [vmem:[%s23065_s7 + $0x50] ss:$8 sps:$4 sm:$0xff]  }
 0xafd   :  { %11272 = vmatprep.subr.bf16.mxu0 %v16735_v19  ;;  %v16867_v19 = vld [vmem:[%s23065_s7 + $0x64] ss:$8 sps:$4 sm:$0xff]   ;;  %12256 = vmatpush1.bf16.msra.mxu1 %v16862_v36  ;;  %v16829_v36 = vld [vmem:[%s23063_s5 + $0x748] ss:$16 sps:$4 sm:$0xff]  }
 0xafe   :  { %12257 = vmatprep.subr.bf16.mxu1 %v16867_v19  ;;  %v16834_v19 = vld [vmem:[%s23063_s5 + $0x76c] ss:$16 sps:$4 sm:$0xff]  }
 0xb00   :  { %11273 = vmatpush1.bf16.msra.mxu0 %v16733_v31  ;;  %v16787_v31 = vld [vmem:[%s23063_s5 + $0x588] ss:$16 sps:$4 sm:$0xff]  }
 0xb01   :  { %11274 = vmatprep.subr.bf16.mxu0 %v16738_v37  ;;  %v16792_v37 = vld [vmem:[%s23063_s5 + $0x5ac] ss:$16 sps:$4 sm:$0xff]  }
 0xb04   :  { %11275 = vmatpush1.bf16.msra.mxu0 %v16736_v44  ;;  %v16865_v44 = vld [vmem:[%s23065_s7 + $0x60] ss:$8 sps:$4 sm:$0xff]  }
 0xb05   :  { %11276 = vmatprep.subr.bf16.mxu0 %v16741_v15  ;;  %v16870_v15 = vld [vmem:[%s23065_s7 + $0x74] ss:$8 sps:$4 sm:$0xff]   ;;  %12258 = vmatpush1.bf16.msra.mxu1 %v16865_v44  ;;  %v16835_v44 = vld [vmem:[%s23063_s5 + $0x788] ss:$16 sps:$4 sm:$0xff]  }
 0xb06   :  { %12259 = vmatprep.subr.bf16.mxu1 %v16870_v15  ;;  %v16840_v15 = vld [vmem:[%s23063_s5 + $0x7ac] ss:$16 sps:$4 sm:$0xff]  }
 0xb08   :  { %11277 = vmatpush1.bf16.msra.mxu0 %v16739_v55  ;;  %v16790_v55 = vld [vmem:[%s23063_s5 + $0x5a8] ss:$16 sps:$4 sm:$0xff]  }
 0xb09   :  { %11278 = vmatprep.subr.bf16.mxu0 %v16744_v13  ;;  %v16795_v13 = vld [vmem:[%s23063_s5 + $0x5cc] ss:$16 sps:$4 sm:$0xff]  }
 0xb0c   :  { %11279 = vmatpush1.bf16.msra.mxu0 %v16742_v29  ;;  %v16868_v29 = vld [vmem:[%s23065_s7 + $0x70] ss:$8 sps:$4 sm:$0xff]  }
 0xb0d   :  { %11280 = vmatprep.subr.bf16.mxu0 %v16747_v6  ;;  %v16873_v6 = vld [vmem:[%s23065_s7 + $0x84] ss:$8 sps:$4 sm:$0xff]   ;;  %12260 = vmatpush1.bf16.msra.mxu1 %v16868_v29  ;;  %v16841_v29 = vld [vmem:[%s23063_s5 + $0x7c8] ss:$16 sps:$4 sm:$0xff]  }
 0xb0e   :  { %12261 = vmatprep.subr.bf16.mxu1 %v16873_v6  ;;  %v16846_v6 = vld [vmem:[%s23063_s5 + $0x7ec] ss:$16 sps:$4 sm:$0xff]  }
 0xb10   :  { %11281 = vmatpush1.bf16.msra.mxu0 %v16745_v41  ;;  %v16793_v41 = vld [vmem:[%s23063_s5 + $0x5c8] ss:$16 sps:$4 sm:$0xff]  }
 0xb11   :  { %11282 = vmatprep.subr.bf16.mxu0 %v16750_v59  ;;  %v16798_v59 = vld [vmem:[%s23063_s5 + $0x5ec] ss:$16 sps:$4 sm:$0xff]  }
 0xb14   :  { %11283 = vmatpush1.bf16.msra.mxu0 %v16748_v18  ;;  %v16871_v18 = vld [vmem:[%s23065_s7 + $0x80] ss:$8 sps:$4 sm:$0xff]  }
 0xb15   :  { %11293 = vmatprep.subr.bf16.mxu0 %v16753_v47  ;;  %v16876_v47 = vld [vmem:[%s23065_s7 + $0x94] ss:$8 sps:$4 sm:$0xff]   ;;  %12262 = vmatpush1.bf16.msra.mxu1 %v16871_v18 }
 0xb16   :  { %12263 = vmatprep.subr.bf16.mxu1 %v16876_v47 }
 0xb17   :  { %11285 = vmatmul.mubr.bf16.vlgmr.msra.gmra.mrb[80].mxu0 %v22149_v24 }
 0xb18   :  { %11294 = vmatpush1.bf16.msra.mxu0 %v16751_v60  ;;  %11325 = vmatprep.mubr.bf16.mxu0 %v22154_v40  ;;  %v16796_v60 = vld [vmem:[%s23063_s5 + $0x5e8] ss:$16 sps:$4 sm:$0xff]   ;;  %v16885_v40 = vld [vmem:[%s23065_s7 + $0xc4] ss:$8 sps:$4 sm:$0xff]  }
 0xb19   :  { %11295 = vmatprep.subr.bf16.mxu0 %v16756_v34  ;;  %v16801_v34 = vld [vmem:[%s23063_s5 + $0x60c] ss:$16 sps:$4 sm:$0xff]  }
 0xb1c   :  { %11296 = vmatpush1.bf16.msra.mxu0 %v16754_v8  ;;  %v16874_v8 = vld [vmem:[%s23065_s7 + $0x90] ss:$8 sps:$4 sm:$0xff]  }
 0xb1d   :  { %11297 = vmatprep.subr.bf16.mxu0 %v16759_v42  ;;  %v16879_v42 = vld [vmem:[%s23065_s7 + $0xa4] ss:$8 sps:$4 sm:$0xff]   ;;  %12264 = vmatpush1.bf16.msra.mxu1 %v16874_v8 }
 0xb1e   :  { %12265 = vmatprep.subr.bf16.mxu1 %v16879_v42  ;;  %v16897_v42 = vld [vmem:[%s23065_s7 + $0x104] ss:$8 sps:$4 sm:$0xff]  }
 0xb20   :  { %11298 = vmatpush1.bf16.msra.mxu0 %v16757_v3  ;;  %v16799_v3 = vld [vmem:[%s23063_s5 + $0x608] ss:$16 sps:$4 sm:$0xff]  }
 0xb21   :  { %11299 = vmatprep.subr.bf16.mxu0 %v16762_v0  ;;  %v16804_v0 = vld [vmem:[%s23063_s5 + $0x62c] ss:$16 sps:$4 sm:$0xff]  }
 0xb24   :  { %11300 = vmatpush1.bf16.msra.mxu0 %v16760_v21  ;;  %v16877_v21 = vld [vmem:[%s23065_s7 + $0xa0] ss:$8 sps:$4 sm:$0xff]  }
 0xb25   :  { %11301 = vmatprep.subr.bf16.mxu0 %v16765_v39  ;;  %v16882_v39 = vld [vmem:[%s23065_s7 + $0xb4] ss:$8 sps:$4 sm:$0xff]   ;;  %12266 = vmatpush1.bf16.msra.mxu1 %v16877_v21 }
 0xb26   :  { %12267 = vmatprep.subr.bf16.mxu1 %v16882_v39 }
 0xb28   :  { %11302 = vmatpush1.bf16.msra.mxu0 %v16763_v53  ;;  %v16802_v53 = vld [vmem:[%s23063_s5 + $0x628] ss:$16 sps:$4 sm:$0xff]  }
 0xb29   :  { %11303 = vmatprep.subr.bf16.mxu0 %v16768_v25  ;;  %v16807_v25 = vld [vmem:[%s23063_s5 + $0x64c] ss:$16 sps:$4 sm:$0xff]  }
 0xb2a   :  { %v22587_v9 = vpop.f32.mrb[68].mxu0 }
 0xb2b   :  { %v22589_v48 = vpop.f32.mrb[69].mxu0 }
 0xb2c   :  { %v10462_v22 = vpop.f32.mrb[70].mxu0  ;;  %11304 = vmatpush1.bf16.msra.mxu0 %v16766_v26  ;;  %v16880_v26 = vld [vmem:[%s23065_s7 + $0xb0] ss:$8 sps:$4 sm:$0xff]  }
 0xb2d   :  { %v10463_v2 = vpop.f32.mrb[71].mxu0  ;;  %11305 = vmatprep.subr.bf16.mxu0 %v16771_v16  ;;  %v16810_v16 = vld [vmem:[%s23063_s5 + $0x66c] ss:$16 sps:$4 sm:$0xff]   ;;  %12268 = vmatpush1.bf16.msra.mxu1 %v16880_v26  ;;  %v16883_v22 = vld [vmem:[%s23065_s7 + $0xc0] ss:$8 sps:$4 sm:$0xff]  }
 0xb2e   :  { %12269 = vmatprep.subr.bf16.mxu1 %v16885_v40  ;;  %v16813_v2 = vld [vmem:[%s23063_s5 + $0x68c] ss:$16 sps:$4 sm:$0xff]  }
 0xb30   :  { %11306 = vmatpush1.bf16.msra.mxu0 %v16769_v46  ;;  %v16808_v46 = vld [vmem:[%s23063_s5 + $0x668] ss:$16 sps:$4 sm:$0xff]  }
 0xb31   :  { %11307 = vmatprep.subr.bf16.mxu0 %v16774_v35  ;;  %12270 = vmatpush1.bf16.msra.mxu1 %v16883_v22  ;;  %v16811_v35 = vld [vmem:[%s23063_s5 + $0x688] ss:$16 sps:$4 sm:$0xff]  }
 0xb32   :  { %12271 = vmatprep.subr.bf16.mxu1 %v16888_v4  ;;  %v16945_v4 = vld [vmem:[%s23067_s9 + $0x48] sm:$0xff]  }
 0xb34   :  { %11308 = vmatpush1.bf16.msra.mxu0 %v16772_v63  ;;  %v16819_v63 = vld [vmem:[%s23063_s5 + $0x6cc] ss:$16 sps:$4 sm:$0xff]  }
 0xb35   :  { %11309 = vmatprep.subr.bf16.mxu0 %v16777_v12  ;;  %12272 = vmatpush1.bf16.msra.mxu1 %v16886_v11  ;;  %v16947_v11 = vld [vmem:[%s23067_s9 + $0x50] sm:$0xff]  }
 0xb38   :  { %11310 = vmatpush1.bf16.msra.mxu0 %v16775_v14 }
 0xb39   :  { %11311 = vmatprep.subr.bf16.mxu0 %v16780_v49 }
 0xb3c   :  { %11312 = vmatpush1.bf16.msra.mxu0 %v16778_v61 }
 0xb3d   :  { %11313 = vmatprep.subr.bf16.mxu0 %v16783_v28  ;;  %v16822_v28 = vld [vmem:[%s23063_s5 + $0x6ec] ss:$16 sps:$4 sm:$0xff]  }
 0xb40   :  { %11314 = vmatpush1.bf16.msra.mxu0 %v16781_v17  ;;  %v16894_v17 = vld [vmem:[%s23065_s7 + $0xf4] ss:$8 sps:$4 sm:$0xff]  }
 0xb41   :  { %11315 = vmatprep.subr.bf16.mxu0 %v16786_v38  ;;  %v16892_v38 = vld [vmem:[%s23065_s7 + $0xf0] ss:$8 sps:$4 sm:$0xff]  }
 0xb44   :  { %11316 = vmatpush1.bf16.msra.mxu0 %v16784_v27  ;;  %v16823_v27 = vld [vmem:[%s23063_s5 + $0x708] ss:$16 sps:$4 sm:$0xff]  }
 0xb45   :  { %11317 = vmatprep.subr.bf16.mxu0 %v16789_v20  ;;  %v16826_v20 = vld [vmem:[%s23063_s5 + $0x728] ss:$16 sps:$4 sm:$0xff]  }
 0xb48   :  { %11318 = vmatpush1.bf16.msra.mxu0 %v16787_v31  ;;  %v16832_v31 = vld [vmem:[%s23063_s5 + $0x768] ss:$16 sps:$4 sm:$0xff]  }
 0xb49   :  { %11319 = vmatprep.subr.bf16.mxu0 %v16792_v37  ;;  %v16837_v37 = vld [vmem:[%s23063_s5 + $0x78c] ss:$16 sps:$4 sm:$0xff]  }
 0xb4c   :  { %11320 = vmatpush1.bf16.msra.mxu0 %v16790_v55  ;;  %v16838_v55 = vld [vmem:[%s23063_s5 + $0x7a8] ss:$16 sps:$4 sm:$0xff]  }
 0xb4d   :  { %11321 = vmatprep.subr.bf16.mxu0 %v16795_v13  ;;  %v16843_v13 = vld [vmem:[%s23063_s5 + $0x7cc] ss:$16 sps:$4 sm:$0xff]  }
 0xb50   :  { %11322 = vmatpush1.bf16.msra.mxu0 %v16793_v41  ;;  %v16844_v41 = vld [vmem:[%s23063_s5 + $0x7e8] ss:$16 sps:$4 sm:$0xff]  }
 0xb51   :  { %11323 = vmatprep.subr.bf16.mxu0 %v16798_v59 }
 0xb54   :  { %11324 = vmatpush1.bf16.msra.mxu0 %v16796_v60 }
 0xb55   :  { %11770 = vmatprep.subr.bf16.mxu0 %v16801_v34 }
 0xb57   :  { %11326 = vmatmul.mubr.bf16.vlgmr.msra.gmra.mrb[84].mxu0 %v22149_v24  ;;  %v22863_v24 = vld [vmem:[%s23066_s6] sm:$0xf] }
 0xb58   :  { %11771 = vmatpush1.bf16.msra.mxu0 %v16799_v3  ;;  %11802 = vmatprep.mubr.bf16.mxu0 %v11406_v56  ;;  %v16805_v56 = vld [vmem:[%s23063_s5 + $0x648] ss:$16 sps:$4 sm:$0xff]   ;;  %v11820_v3 = vrot.slane %v22863_v24, %v23986_v45  ;;  %v11824_v21 = vrot.slane %v22863_v24, %v23987_v10 }
 0xb59   :  { %11772 = vmatprep.subr.bf16.mxu0 %v16804_v0 }
 0xb5c   :  { %11773 = vmatpush1.bf16.msra.mxu0 %v16802_v53 }
 0xb5d   :  { %11774 = vmatprep.subr.bf16.mxu0 %v16807_v25 }
 0xb60   :  { %11775 = vmatpush1.bf16.msra.mxu0 %v16805_v56 }
 0xb61   :  { %11776 = vmatprep.subr.bf16.mxu0 %v16810_v16 }
 0xb64   :  { %11777 = vmatpush1.bf16.msra.mxu0 %v16808_v46 }
 0xb65   :  { %11778 = vmatprep.subr.bf16.mxu0 %v16813_v2  ;;  %v16895_v2 = vld [vmem:[%s23065_s7 + $0x100] ss:$8 sps:$4 sm:$0xff]  }
 0xb68   :  { %11779 = vmatpush1.bf16.msra.mxu0 %v16811_v35 }
 0xb69   :  { %11780 = vmatprep.subr.bf16.mxu0 %v16816_v32  ;;  %v16900_v32 = vld [vmem:[%s23065_s7 + $0x114] ss:$8 sps:$4 sm:$0xff]  }
 0xb6a   :  { %v10819_v12 = vpop.f32.mrb[72].mxu0 }
 0xb6b   :  { %v22775_v30 = vadd.f32 %v10819_v12, %v22481_v51  ;;  %v10821_v14 = vpop.f32.mrb[73].mxu0  ;;  %v16891_v51 = vld [vmem:[%s23065_s7 + $0xe4] ss:$8 sps:$4 sm:$0xff]  }
 0xb6c   :  { %v22778_v49 = vadd.f32 %v10821_v14, %v22483_v54  ;;  %v10823_v33 = vpop.f32.mrb[74].mxu0  ;;  %11781 = vmatpush1.bf16.msra.mxu0 %v16814_v62  ;;  %v16889_v54 = vld [vmem:[%s23065_s7 + $0xe0] ss:$8 sps:$4 sm:$0xff]   ;;  %12273 = vmatprep.subr.bf16.mxu1 %v16891_v51  ;;  %v16903_v62 = vld [vmem:[%s23065_s7 + $0x124] ss:$8 sps:$4 sm:$0xff]  }
 0xb6d   :  { %v10824_v61 = vpop.f32.mrb[75].mxu0  ;;  %11782 = vmatprep.subr.bf16.mxu0 %v16819_v63  ;;  %12274 = vmatpush1.bf16.msra.mxu1 %v16889_v54  ;;  %v16944_v63 = vld [vmem:[%s23067_s9] sm:$0xff]   ;;  %v16946_v12 = vld [vmem:[%s23067_s9 + $0x8] sm:$0xff]   ;;  %v16906_v14 = vld [vmem:[%s23065_s7 + $0x134] ss:$8 sps:$4 sm:$0xff]  }
 0xb6e   :  { %12275 = vmatprep.subr.bf16.mxu1 %v16894_v17  ;;  %v16949_v33 = vld [vmem:[%s23067_s9 + $0x58] sm:$0xff]   ;;  %v16909_v61 = vld [vmem:[%s23065_s7 + $0x144] ss:$8 sps:$4 sm:$0xff]   ;;  %v16907_v51 = vld [vmem:[%s23065_s7 + $0x140] ss:$8 sps:$4 sm:$0xff]  }
 0xb6f   :  { %v16951_v54 = vld [vmem:[%s23067_s9 + $0x60] sm:$0xff]   ;;  %v16953_v17 = vld [vmem:[%s23067_s9 + $0x68] sm:$0xff]  }
 0xb70   :  { %11783 = vmatpush1.bf16.msra.mxu0 %v16817_v50  ;;  %v16904_v50 = vld [vmem:[%s23065_s7 + $0x130] ss:$8 sps:$4 sm:$0xff]  }
 0xb71   :  { %11784 = vmatprep.subr.bf16.mxu0 %v16822_v28  ;;  %12276 = vmatpush1.bf16.msra.mxu1 %v16892_v38  ;;  %v16950_v28 = vld [vmem:[%s23067_s9 + $0x18] sm:$0xff]  }
 0xb72   :  { %12286 = vmatprep.subr.bf16.mxu1 %v16897_v42  ;;  %v16910_v38 = vld [vmem:[%s23065_s7 + $0x150] ss:$8 sps:$4 sm:$0xff]  }
 0xb74   :  { %11785 = vmatpush1.bf16.msra.mxu0 %v16820_v7  ;;  %v16912_v7 = vld [vmem:[%s23065_s7 + $0x154] ss:$8 sps:$4 sm:$0xff]  }
 0xb75   :  { %11786 = vmatprep.subr.bf16.mxu0 %v16825_v5  ;;  %v16952_v5 = vld [vmem:[%s23067_s9 + $0x20] sm:$0xff]  }
 0xb78   :  { %11787 = vmatpush1.bf16.msra.mxu0 %v16823_v27  ;;  %v16915_v27 = vld [vmem:[%s23065_s7 + $0x164] ss:$8 sps:$4 sm:$0xff]  }
 0xb79   :  { %11788 = vmatprep.subr.bf16.mxu0 %v16828_v57  ;;  %v16954_v57 = vld [vmem:[%s23067_s9 + $0x28] sm:$0xff]  }
 0xb7c   :  { %11789 = vmatpush1.bf16.msra.mxu0 %v16826_v20  ;;  %v16913_v20 = vld [vmem:[%s23065_s7 + $0x160] ss:$8 sps:$4 sm:$0xff]  }
 0xb7d   :  { %11790 = vmatprep.subr.bf16.mxu0 %v16831_v1  ;;  %v16918_v1 = vld [vmem:[%s23065_s7 + $0x174] ss:$8 sps:$4 sm:$0xff]  }
 0xb80   :  { %11791 = vmatpush1.bf16.msra.mxu0 %v16829_v36  ;;  %v16916_v36 = vld [vmem:[%s23065_s7 + $0x170] ss:$8 sps:$4 sm:$0xff]  }
 0xb81   :  { %11792 = vmatprep.subr.bf16.mxu0 %v16834_v19  ;;  %v16921_v19 = vld [vmem:[%s23065_s7 + $0x184] ss:$8 sps:$4 sm:$0xff]  }
 0xb84   :  { %11793 = vmatpush1.bf16.msra.mxu0 %v16832_v31  ;;  %v16919_v31 = vld [vmem:[%s23065_s7 + $0x180] ss:$8 sps:$4 sm:$0xff]  }
 0xb85   :  { %11794 = vmatprep.subr.bf16.mxu0 %v16837_v37  ;;  %v16924_v37 = vld [vmem:[%s23065_s7 + $0x194] ss:$8 sps:$4 sm:$0xff]  }
 0xb88   :  { %11795 = vmatpush1.bf16.msra.mxu0 %v16835_v44  ;;  %v16922_v44 = vld [vmem:[%s23065_s7 + $0x190] ss:$8 sps:$4 sm:$0xff]  }
 0xb89   :  { %11796 = vmatprep.subr.bf16.mxu0 %v16840_v15  ;;  %v16927_v15 = vld [vmem:[%s23065_s7 + $0x1a4] ss:$8 sps:$4 sm:$0xff]  }
 0xb8c   :  { %11797 = vmatpush1.bf16.msra.mxu0 %v16838_v55  ;;  %v16925_v55 = vld [vmem:[%s23065_s7 + $0x1a0] ss:$8 sps:$4 sm:$0xff]  }
 0xb8d   :  { %11798 = vmatprep.subr.bf16.mxu0 %v16843_v13  ;;  %v16930_v13 = vld [vmem:[%s23065_s7 + $0x1b4] ss:$8 sps:$4 sm:$0xff]  }
 0xb90   :  { %11799 = vmatpush1.bf16.msra.mxu0 %v16841_v29  ;;  %v16928_v29 = vld [vmem:[%s23065_s7 + $0x1b0] ss:$8 sps:$4 sm:$0xff]  }
 0xb91   :  { %11800 = vmatprep.subr.bf16.mxu0 %v16846_v6  ;;  %v16933_v6 = vld [vmem:[%s23065_s7 + $0x1c4] ss:$8 sps:$4 sm:$0xff]  }
 0xb94   :  { %11801 = vmatpush1.bf16.msra.mxu0 %v16844_v41  ;;  %v16931_v41 = vld [vmem:[%s23065_s7 + $0x1c0] ss:$8 sps:$4 sm:$0xff]  }
 0xb97   :  { %11803 = vmatmul.mubr.bf16.vlgmr.msra.gmra.mrb[88].mxu0 %v11405_v23 }
 0xbaa   :  { %v10860_v59 = vpop.f32.mrb[76].mxu0 }
 0xbab   :  { %v22852_v18 = vadd.f32 %v10860_v59, %v22587_v9  ;;  %v10862_v47 = vpop.f32.mrb[77].mxu0  ;;  %v16936_v59 = vld [vmem:[%s23065_s7 + $0x1d4] ss:$8 sps:$4 sm:$0xff]  }
 0xbac   :  { %v22855_v60 = vadd.f32 %v10862_v47, %v22589_v48  ;;  %v10864_v34 = vpop.f32.mrb[78].mxu0  ;;  %v16934_v47 = vld [vmem:[%s23065_s7 + $0x1d0] ss:$8 sps:$4 sm:$0xff]  }
 0xbad   :  { %v10865_v8 = vpop.f32.mrb[79].mxu0  ;;  %v16939_v34 = vld [vmem:[%s23065_s7 + $0x1e4] ss:$8 sps:$4 sm:$0xff]  }
 0xbea   :  { %v11286_v23 = vpop.f32.mrb[80].mxu0 }
 0xbeb   :  { %v11334_v9 = vadd.f32 %v11286_v23, %v22775_v30  ;;  %v11288_v48 = vpop.f32.mrb[81].mxu0  ;;  %v16901_v30 = vld [vmem:[%s23065_s7 + $0x120] ss:$8 sps:$4 sm:$0xff]  }
 0xbec   :  { %v11335_v0 = vadd.f32 %v11288_v48, %v22778_v49  ;;  %v11290_v39 = vpop.f32.mrb[82].mxu0  ;;  %v16948_v49 = vld [vmem:[%s23067_s9 + $0x10] sm:$0xff]   ;;  %v16937_v48 = vld [vmem:[%s23065_s7 + $0x1e0] ss:$8 sps:$4 sm:$0xff]  }
 0xbed   :  { %v11811_v53 = vadd.f32 %v22497_v58, %v11334_v9  ;;  %v11291_v25 = vpop.f32.mrb[83].mxu0  ;;  %v16898_v58 = vld [vmem:[%s23065_s7 + $0x110] ss:$8 sps:$4 sm:$0xff]   ;;  %v23988_v39 = vsub.s32 2, %v23690_v43 }
 0xbee   :  { %v11812_v26 = vadd.f32 %v22499_v52, %v11335_v0  ;;  %v16943_v52 = vld [vmem:[%s23067_s9 + $0x40] sm:$0xff]  }
 0xbef   :  { %v11837_v40 = vadd.f32 %v11820_v3, %v11811_v53  ;;  %14387 = vmatprep.subr.bf16.mxu0 %v16943_v52  ;;  %v11828_v53 = vrot.slane %v22863_v24, %v23988_v39 }
 0xbf0   :  { %v11838_v56 = vadd.f32 %v11824_v21, %v11812_v26  ;;  %14388 = vmatpush3.bf16.msra.mxu0 %v16944_v63  ;;  %v16942_v21 = vld [vmem:[%s23065_s7 + $0x1f4] ss:$8 sps:$4 sm:$0xff]  }
 0xbf1   :  { %v11841_v16 = vmax.f32 %v11837_v40, 0.0  ;;  %14389 = vmatprep.subr.bf16.mxu0 %v16945_v4  ;;  %v16957_v63 = vld [vmem:[%s23067_s9 + $0x78] sm:$0xff]  }
 0xbf2   :  { %v11842_v22 = vmax.f32 %v11838_v56, 0.0  ;;  %v16958_v4 = vld [vmem:[%s23067_s9 + $0x38] sm:$0xff]  }
 0xbf3   :  { %v11845_v35 = vpack.c.bf16 %v11841_v16, %v11841_v16 }
 0xbf4   :  { %v11846_v46 = vpack.c.bf16 %v11842_v22, %v11842_v22  ;;  %14390 = vmatpush3.bf16.msra.mxu0 %v16946_v12  ;;  %v17133_v12 = vmov 0.0  }
 0xbf5   :  { %14391 = vmatprep.subr.bf16.mxu0 %v16947_v11  ;;  %v11913_v11 = vld [vmem:[%s23069_s8] sm:$0x3] }
 0xbf6   :  { %12277 = vmatprep.mubr.bf16.mxu1 %v11846_v46 }
 0xbf7   :  { %12278 = vmatmul.mubr.bf16.vlgmr.msra.gmra.mrb[196].mxu1 %v11845_v35 }
 0xbf8   :  { %12287 = vmatpush1.bf16.msra.mxu1 %v16895_v2  ;;  %14392 = vmatpush3.bf16.msra.mxu0 %v16948_v49 }
 0xbf9   :  { %12288 = vmatprep.subr.bf16.mxu1 %v16900_v32  ;;  %14393 = vmatprep.subr.bf16.mxu0 %v16949_v33 }
 0xbfc   :  { %12289 = vmatpush1.bf16.msra.mxu1 %v16898_v58  ;;  %14394 = vmatpush3.bf16.msra.mxu0 %v16950_v28 }
 0xbfd   :  { %12290 = vmatprep.subr.bf16.mxu1 %v16903_v62  ;;  %14395 = vmatprep.subr.bf16.mxu0 %v16951_v54 }
 0xc00   :  { %12291 = vmatpush1.bf16.msra.mxu1 %v16901_v30  ;;  %14396 = vmatpush3.bf16.msra.mxu0 %v16952_v5  ;;  %v11918_v30 = vrot.slane %v11913_v11, %v23986_v45  ;;  %v16960_v45 = vld [vmem:[%s23068_s11 + $0x8] sm:$0xff]  }
 0xc01   :  { %12292 = vmatprep.subr.bf16.mxu1 %v16906_v14  ;;  %14397 = vmatprep.subr.bf16.mxu0 %v16953_v17  ;;  %v11922_v14 = vrot.slane %v11913_v11, %v23987_v10  ;;  %v16959_v17 = vld [vmem:[%s23068_s11] sm:$0xff]   ;;  %v16961_v10 = vld [vmem:[%s23068_s11 + $0x10] sm:$0xff]  }
 0xc04   :  { %12293 = vmatpush1.bf16.msra.mxu1 %v16904_v50  ;;  %14398 = vmatpush3.bf16.msra.mxu0 %v16954_v57  ;;  %v16963_v57 = vld [vmem:[%s23068_s11 + $0x20] sm:$0xff]  }
 0xc05   :  { %12294 = vmatprep.subr.bf16.mxu1 %v16909_v61 }
 0xc08   :  { %12295 = vmatpush1.bf16.msra.mxu1 %v16907_v51 }
 0xc09   :  { %12296 = vmatprep.subr.bf16.mxu1 %v16912_v7 }
 0xc0c   :  { %12297 = vmatpush1.bf16.msra.mxu1 %v16910_v38 }
 0xc0d   :  { %12298 = vmatprep.subr.bf16.mxu1 %v16915_v27  ;;  %v16962_v27 = vld [vmem:[%s23068_s11 + $0x18] sm:$0xff]  }
 0xc10   :  { %12299 = vmatpush1.bf16.msra.mxu1 %v16913_v20  ;;  %v16964_v20 = vld [vmem:[%s23068_s11 + $0x28] sm:$0xff]  }
 0xc11   :  { %12300 = vmatprep.subr.bf16.mxu1 %v16918_v1  ;;  %v16965_v1 = vld [vmem:[%s23068_s11 + $0x30] sm:$0xff]  }
 0xc14   :  { %12301 = vmatpush1.bf16.msra.mxu1 %v16916_v36  ;;  %v16966_v36 = vld [vmem:[%s23068_s11 + $0x38] sm:$0xff]  }
 0xc15   :  { %12302 = vmatprep.subr.bf16.mxu1 %v16921_v19 }
 0xc18   :  { %12303 = vmatpush1.bf16.msra.mxu1 %v16919_v31  ;;  %v14361_v31 = vld [vmem:[%s23070_s10] ss:$0 sm:$0xff] }
 0xc19   :  { %12304 = vmatprep.subr.bf16.mxu1 %v16924_v37 }
 0xc1c   :  { %12305 = vmatpush1.bf16.msra.mxu1 %v16922_v44 }
 0xc1d   :  { %12306 = vmatprep.subr.bf16.mxu1 %v16927_v15 }
 0xc20   :  { %12307 = vmatpush1.bf16.msra.mxu1 %v16925_v55 }
 0xc21   :  { %12308 = vmatprep.subr.bf16.mxu1 %v16930_v13 }
 0xc24   :  { %12309 = vmatpush1.bf16.msra.mxu1 %v16928_v29 }
 0xc25   :  { %12310 = vmatprep.subr.bf16.mxu1 %v16933_v6 }
 0xc28   :  { %12311 = vmatpush1.bf16.msra.mxu1 %v16931_v41  ;;  %v14378_v41 = vld [vmem:[%s23071_s12] ss:$0 sm:$0xff] }
 0xc29   :  { %12312 = vmatprep.subr.bf16.mxu1 %v16936_v59 }
 0xc2a   :  { %v11327_v8 = vpop.f32.mrb[84].mxu0 }
 0xc2b   :  { %v11336_v42 = vadd.f32 %v11327_v8, %v22852_v18  ;;  %v11329_v23 = vpop.f32.mrb[85].mxu0  ;;  %v16940_v18 = vld [vmem:[%s23065_s7 + $0x1f0] ss:$8 sps:$4 sm:$0xff]  }
 0xc2c   :  { %v11337_v9 = vadd.f32 %v11329_v23, %v22855_v60  ;;  %v11331_v3 = vpop.f32.mrb[86].mxu0  ;;  %12313 = vmatpush1.bf16.msra.mxu1 %v16934_v47  ;;  %v11831_v60 = vsub.s32 3, %v23690_v43  ;;  %v16955_v43 = vld [vmem:[%s23067_s9 + $0x70] sm:$0xff]  }
 0xc2d   :  { %v11332_v0 = vpop.f32.mrb[87].mxu0  ;;  %12314 = vmatprep.subr.bf16.mxu1 %v16939_v34  ;;  %14399 = vmatprep.subr.bf16.mxu0 %v16955_v43 }
 0xc2e   :  { %v11832_v26 = vrot.slane %v22863_v24, %v11831_v60  ;;  %v16956_v24 = vld [vmem:[%s23067_s9 + $0x30] sm:$0xff]  }
 0xc2f   :  { %14400 = vmatpush3.bf16.msra.mxu0 %v16956_v24 }
 0xc30   :  { %12315 = vmatpush1.bf16.msra.mxu1 %v16937_v48  ;;  %14401 = vmatprep.subr.bf16.mxu0 %v16957_v63 }
 0xc31   :  { %12316 = vmatprep.subr.bf16.mxu1 %v16942_v21 }
 0xc33   :  { %14402 = vmatpush3.bf16.msra.mxu0 %v16958_v4 }
 0xc34   :  { %12317 = vmatpush1.bf16.msra.mxu1 %v16940_v18  ;;  %14418 = vmatprep.subr.bf16.mxu0 %v17133_v12 }
 0xc6a   :  { %v11804_v25 = vpop.f32.mrb[88].mxu0 }
 0xc6b   :  { %v11813_v40 = vadd.f32 %v11804_v25, %v11336_v42  ;;  %v11806_v56 = vpop.f32.mrb[89].mxu0 }
 0xc6c   :  { %v11814_v16 = vadd.f32 %v11806_v56, %v11337_v9  ;;  %v11808_v22 = vpop.f32.mrb[90].mxu0 }
 0xc6d   :  { %v11839_v46 = vadd.f32 %v11828_v53, %v11813_v40  ;;  %v11809_v2 = vpop.f32.mrb[91].mxu0 }
 0xc6e   :  { %v11840_v35 = vadd.f32 %v11832_v26, %v11814_v16 }
 0xc6f   :  { %v11843_v32 = vmax.f32 %v11839_v46, 0.0 }
 0xc70   :  { %v11844_v58 = vmax.f32 %v11840_v35, 0.0 }
 0xc71   :  { %v11847_v62 = vpack.c.bf16 %v11843_v32, %v11843_v32 }
 0xc72   :  { %v11848_v52 = vpack.c.bf16 %v11844_v58, %v11844_v58 }
 0xc74   :  { %12318 = vmatprep.mubr.bf16.mxu1 %v11848_v52 }
 0xc75   :  { %12319 = vmatmul.mubr.bf16.vlgmr.msra.gmra.mrb[196].mxu1 %v11847_v62 }
 0xd48   :  { %v12320_v49 = vpop.f32.mrb[196].mxu1 }
 0xd49   :  { %v14438_v33 = vadd.f32 %v12320_v49, %v11918_v30  ;;  %v12322_v50 = vpop.f32.mrb[197].mxu1 }
 0xd4a   :  { %v14439_v61 = vadd.f32 %v12322_v50, %v11922_v14  ;;  %v12324_v28 = vpop.f32.mrb[198].mxu1 }
 0xd4b   :  { %v12327_v51 = vmax.f32 %v14438_v33, 0.0  ;;  %v12325_v54 = vpop.f32.mrb[199].mxu1 }
 0xd4c   :  { %v12328_v7 = vmax.f32 %v14439_v61, 0.0 }
 0xd4d   :  { %v12329_v38 = vpack.c.bf16 %v12327_v51, %v12327_v51 }
 0xd4e   :  { %v12330_v5 = vpack.c.bf16 %v12328_v7, %v12328_v7 }
 0xd50   :  { %12498 = vmatprep.mubr.bf16.mxu0 %v12330_v5 }
 0xd51   :  { %12499 = vmatmul.mubr.bf16.vlgmr.msra.gmra.mrb[92].mxu0 %v12329_v38 }
 0xd52   :  { %14419 = vmatpush3.bf16.msra.mxu0 %v16959_v17  ;;  %14434 = vmatprep.mubr.msk.bf16.mxu0 %vm17134_vm0, %v17133_v12 }
 0xd53   :  { %14420 = vmatprep.subr.bf16.mxu0 %v17133_v12 }
 0xd56   :  { %14421 = vmatpush3.bf16.msra.mxu0 %v16960_v45 }
 0xd57   :  { %14422 = vmatprep.subr.bf16.mxu0 %v17133_v12 }
 0xd5a   :  { %14423 = vmatpush3.bf16.msra.mxu0 %v16961_v10 }
 0xd5b   :  { %14424 = vmatprep.subr.bf16.mxu0 %v17133_v12 }
 0xd5e   :  { %14425 = vmatpush3.bf16.msra.mxu0 %v16962_v27 }
 0xd5f   :  { %14426 = vmatprep.subr.bf16.mxu0 %v17133_v12 }
 0xd62   :  { %14427 = vmatpush3.bf16.msra.mxu0 %v16963_v57 }
 0xd63   :  { %14428 = vmatprep.subr.bf16.mxu0 %v17133_v12 }
 0xd66   :  { %14429 = vmatpush3.bf16.msra.mxu0 %v16964_v20 }
 0xd67   :  { %14430 = vmatprep.subr.bf16.mxu0 %v17133_v12 }
 0xd6a   :  { %14431 = vmatpush3.bf16.msra.mxu0 %v16965_v1 }
 0xd6b   :  { %14432 = vmatprep.subr.bf16.mxu0 %v17133_v12 }
 0xd6e   :  { %14433 = vmatpush3.bf16.msra.mxu0 %v16966_v36 }
 0xe24   :  { %v14403_v19 = vpop.f32.mrb[92].mxu0 }
 0xe25   :  { %v14404_v37 = vpop.f32.mrb[93].mxu0 }
 0xe26   :  { %v14405_v44 = vadd.f32 %v14404_v37, %v14403_v19  ;;  %v14406_v15 = vpop.f32.mrb[94].mxu0 }
 0xe27   :  { %v14407_v55 = vpop.f32.mrb[95].mxu0 }
 0xe28   :  { %v12501_v13 = vadd.f32 %v14405_v44, %v14361_v31 }
 0xe2a   :  { %v12506_v29 = vmax.f32 %v12501_v13, 0.0 }
 0xe2c   :  { %v12507_v6 = vpack.c.bf16 %v12506_v29, %v12506_v29 }
 0xe2e   :  { %14435 = vmatmul.mubr.bf16.vlgmr.msra.gmra.mrb[96].mxu0 %v12507_v6 }
 0xf01   :  { %v12613_v59 = vpop.f32.mrb[96].mxu0 }
 0xf02   :  { %v12614_v47 = vadd.f32 %v14378_v41, %v12613_v59  ;;  %v14436_v34 = vpop.f32.mrb[97].mxu0 }
 0xf03   :  { %v12616_v8 = vpop.f32.mrb[98].mxu0 }
 0xf04   :  { %12619 = vmax.xlane.f32.xlu0 %v12614_v47  ;;  %v14437_v42 = vpop.f32.mrb[99].mxu0 }
 0xf91   :  { %v12620_v23 = vpop.xlane.xlu0 %12619 }
 0xf92   :  { %v12621_v9 = vsub.f32 %v12614_v47, %v12620_v23 }
 0xf94   :  { %v12622_v3 = vmul.f32 1.442695, %v12621_v9 }
 0xf96   :  { %16967 = vpow2.f32 %v12622_v3 }
 0xfa0   :  { %v16968_v48 = vpop.eup %16967 }
 0xfa1   :  { %12624 = vadd.xlane.f32.xlu0 %v16968_v48 }
0x102e   :  { %v12625_v0 = vpop.xlane.xlu0 %12624 }
0x102f   :  { %16969 = vrcp.f32 %v12625_v0 }
0x1039   :  { %v16970_v21 = vpop.eup %16969 }
0x103a   :  { %v12627_v18 = vmul.f32 %v16970_v21, %v16968_v48 }
0x103c   :  { %12628 = vst [vmem:[%s23072_s13] sm:$0xff] %v12627_v18 }

</bundles_post_ra>
